<compile_context>
chip_gen: v7x
topology: tpu7x:2x2x1
jax: 0.10.0
libtpu: 0.0.40
codegen_flags: <defaults>
</compile_context>

<pallas_src>
import functools

import jax
import jax.numpy as jnp
from jax.experimental import pallas as pl
from jax.experimental.pallas import tpu as pltpu  # noqa: F401  (TPU backend)


# ----------------------------------------------------------------------------
# Fused Pallas kernel: full iEFL forward (all iterative steps)
# ----------------------------------------------------------------------------

def iefl_fused_kernel(
    # activations / positional
    fs0_ref, qpos_ref, mem_ref, kpos_ref,
    # exemplar-shape MHA (wq, wkv, b[3,E], wo, bo)
    wq1_ref, wkv1_ref, b1_ref, wo1_ref, bo1_ref,
    # exemplar-image MHA
    wq2_ref, wkv2_ref, b2_ref, wo2_ref, bo2_ref,
    # linear attention (wq, wk, wv, b[3,E], ln gamma/beta)
    wq_la_ref, wk_la_ref, wv_la_ref, b_la_ref, la_g_ref, la_b_ref,
    # feed-forward MLP
    mlp_w1_ref, mlp_b1_ref, mlp_w2_ref, mlp_b2_ref,
    # norm1/2/3 gamma / beta stacked as [3, E]
    norm_g_ref, norm_b_ref,
    # output: [num_steps, Mq_pad, E]
    o_ref,
    *, num_steps, num_heads, emb_dim, bs, mq_valid, ln_eps, la_eps):
    f32 = jnp.float32
    E = emb_dim
    hd = E // num_heads
    mq_pad = fs0_ref.shape[0]
    mk = mem_ref.shape[0]

    def mm(x, w):
        return jnp.dot(x, w, preferred_element_type=f32)

    def layernorm(x, g, b, eps):
        mu = jnp.mean(x, axis=-1, keepdims=True)
        xc = x - mu
        var = jnp.mean(xc * xc, axis=-1, keepdims=True)
        return xc * jax.lax.rsqrt(var + eps) * g + b

    # ---- load everything once (whole problem fits comfortably in VMEM) ----
    fs0 = fs0_ref[...]            # initial F_S; also F_exm (zero_shot clone)
    qpos = qpos_ref[...]
    mem = mem_ref[...]
    kpos = kpos_ref[...]

    wq1 = wq1_ref[...]; wkv1 = wkv1_ref[...]; b1 = b1_ref[...]
    wo1 = wo1_ref[...]; bo1 = bo1_ref[...]
    wq2 = wq2_ref[...]; wkv2 = wkv2_ref[...]; b2 = b2_ref[...]
    wo2 = wo2_ref[...]; bo2 = bo2_ref[...]
    wq_la = wq_la_ref[...]; wk_la = wk_la_ref[...]; wv_la = wv_la_ref[...]
    b_la = b_la_ref[...]; la_g = la_g_ref[...]; la_b = la_b_ref[...]
    mlp_w1 = mlp_w1_ref[...]; mlp_b1 = mlp_b1_ref[...]
    mlp_w2 = mlp_w2_ref[...]; mlp_b2 = mlp_b2_ref[...]
    ng = norm_g_ref[...]; nb = norm_b_ref[...]

    # per-head sublane slices of the output projections (replaces head concat)
    wo1_h = [wo1[h * hd:(h + 1) * hd, :] for h in range(num_heads)]
    wo2_h = [wo2[h * hd:(h + 1) * hd, :] for h in range(num_heads)]

    # ---- block-diagonal batch masks, generated in-kernel ----
    # queries of one batch element must not attend to keys of another; padded
    # query rows still attend to valid keys (finite values, sliced off later),
    # padded exemplar key columns are masked for everyone.
    r1 = jax.lax.broadcasted_iota(jnp.int32, (mq_pad, mq_pad), 0)
    c1 = jax.lax.broadcasted_iota(jnp.int32, (mq_pad, mq_pad), 1)
    bias1 = jnp.where((r1 % bs == c1 % bs) & (c1 < mq_valid),
                      0.0, -1e30).astype(f32)
    r2 = jax.lax.broadcasted_iota(jnp.int32, (mq_pad, mk), 0)
    c2 = jax.lax.broadcasted_iota(jnp.int32, (mq_pad, mk), 1)
    bias2 = jnp.where(r2 % bs == c2 % bs, 0.0, -1e30).astype(f32)

    # ---- step-invariant precompute (hoisted out of the iterative loop) ----
    # MHA1 K/V: exemplar features (= initial F_S) never change across steps.
    kv1 = mm(fs0, wkv1)                              # fused K+V projection
    k1 = kv1[:, :E] + b1[1:2, :]
    v1 = kv1[:, E:] + b1[2:3, :]
    k1t = k1.T                                       # [E, Mq_pad] lane-dense
    k1h_t = [k1t[h * hd:(h + 1) * hd, :] for h in range(num_heads)]
    v1h = [v1[:, h * hd:(h + 1) * hd] for h in range(num_heads)]

    # MHA2 K/V: `memory` never changes across steps.
    kv2 = mm(mem, wkv2)
    k2 = kv2[:, :E] + b2[1:2, :]
    v2 = kv2[:, E:] + b2[2:3, :]
    k2t = k2.T                                       # [E, Mk] lane-dense
    k2h_t = [k2t[h * hd:(h + 1) * hd, :] for h in range(num_heads)]
    v2h = [v2[:, h * hd:(h + 1) * hd] for h in range(num_heads)]

    # Linear-attention key/value path + context vector (memory-only,
    # batch-mixing, exactly as the reference's flattened call).
    k_la = mm(mem + kpos, wk_la) + b_la[1:2, :]
    v_la = mm(mem, wv_la) + b_la[2:3, :]
    k_la = k_la - jnp.max(k_la, axis=0, keepdims=True)   # softmax over tokens
    k_la = jnp.exp(k_la)
    k_la = k_la / jnp.sum(k_la, axis=0, keepdims=True)
    context = jnp.sum(k_la * v_la, axis=0, keepdims=True)  # einsum('be,be->e')

    # hoisted [rows, *] broadcasts (JAX does not CSE broadcast_in_dim; do not
    # re-emit them in every unrolled step)
    def bc(v):
        return jnp.broadcast_to(v, (mq_pad,) + v.shape[1:])

    bq1_b = bc(b1[0:1, :]); bq2_b = bc(b2[0:1, :]); bq_la_b = bc(b_la[0:1, :])
    bo1_b = bc(bo1); bo2_b = bc(bo2)
    la_g_b = bc(la_g); la_b_b = bc(la_b)
    mlp_b1_b = bc(mlp_b1); mlp_b2_b = bc(mlp_b2)
    n1g_b = bc(ng[0:1, :]); n1b_b = bc(nb[0:1, :])
    n2g_b = bc(ng[1:2, :]); n2b_b = bc(nb[1:2, :])
    n3g_b = bc(ng[2:3, :]); n3b_b = bc(nb[2:3, :])
    ctx_b = bc(context)

    hd_scale = hd ** (-0.5)
    la_scale = E ** (-0.5)

    def mha(q_in, wq, bq_b, kht, vh, wo_h, bo_b, bias):
        q = mm(q_in, wq) + bq_b
        out = bo_b                               # fold out-proj bias into acc
        for h in range(num_heads):
            s = mm(q[:, h * hd:(h + 1) * hd] * hd_scale, kht[h]) + bias
            s = s - jnp.max(s, axis=-1, keepdims=True)
            p = jnp.exp(s)
            p = p / jnp.sum(p, axis=-1, keepdims=True)
            out = out + mm(mm(p, vh[h]), wo_h[h])
        return out

    # ---- iterative steps (statically unrolled; num_steps is small) ----
    # TODO(synk): switch to lax.fori_loop (fs as carry, dynamic o_ref store)
    #             if num_iterative_steps grows beyond ~3 to bound live ranges.
    fs = fs0
    for step in range(num_steps):
        # (1) exemplar-shape attention, post-norm
        a1 = mha(fs + qpos, wq1, bq1_b, k1h_t, v1h, wo1_h, bo1_b, bias1)
        f_prime = layernorm(fs + a1, n1g_b, n1b_b, ln_eps)
        # (2) exemplar-image attention, post-norm
        a2 = mha(f_prime, wq2, bq2_b, k2h_t, v2h, wo2_h, bo2_b, bias2)
        f_hat_mhca = layernorm(f_prime + a2, n2g_b, n2b_b, ln_eps)
        # (3) linear attention: only the query path depends on the step
        q_la = (mm(f_hat_mhca + qpos, wq_la) + bq_la_b) * la_scale
        q_la = q_la - jnp.max(q_la, axis=-1, keepdims=True)
        q_la = jnp.exp(q_la)
        q_la = q_la / jnp.sum(q_la, axis=-1, keepdims=True)
        f_hat = layernorm(q_la * ctx_b, la_g_b, la_b_b, la_eps)
        # (4) feed-forward + norm (dropout = identity in eval mode)
        h1 = jnp.maximum(mm(f_hat, mlp_w1) + mlp_b1_b, 0.0)
        ff = mm(h1, mlp_w2) + mlp_b2_b
        fs = layernorm(f_hat + ff, n3g_b, n3b_b, ln_eps)

        o_ref[step] = f_hat


# ----------------------------------------------------------------------------
# Positional encodings (glue, plain JAX — matches PositionalEncodingsFixed)
# ----------------------------------------------------------------------------

def positional_encodings_fixed(bs, h, w, emb_dim, temperature=10000.0):
    half = emb_dim // 2
    t = jnp.arange(half, dtype=jnp.float32)
    temp = temperature ** (2.0 * jnp.floor(t / 2.0) / half)

    y_embed = jnp.broadcast_to(
        jnp.arange(1, h + 1, dtype=jnp.float32)[None, :, None], (bs, h, w))
    x_embed = jnp.broadcast_to(
        jnp.arange(1, w + 1, dtype=jnp.float32)[None, None, :], (bs, h, w))

    def enc1d(e):
        e = e[..., None] / temp                               # [bs,h,w,half]
        s = jnp.sin(e[..., 0::2])
        c = jnp.cos(e[..., 1::2])
        return jnp.stack([s, c], axis=-1).reshape(bs, h, w, half)

    enc = jnp.concatenate([enc1d(y_embed), enc1d(x_embed)], axis=3)
    return enc.transpose(0, 3, 1, 2)                          # [bs, emb, h, w]


# ----------------------------------------------------------------------------
# iEFLModule forward (zero_shot=True, norm_first=False, norm=True, eval mode)
# ----------------------------------------------------------------------------

def iefl_forward(params, f_e, pos_emb, bboxes, *, num_steps, num_objects,
                 kernel_dim, num_heads, emb_dim, layer_norm_eps):
    del bboxes  # unused in zero_shot mode (roi_align branch never taken)
    bs, e, h, w = f_e.shape
    s_len = num_objects * kernel_dim * kernel_dim
    mq = s_len * bs
    mq_pad = -(-mq // 8) * 8          # sublane-aligned query row count
    mk = h * w * bs

    # shape_emb: Parameter [no, kd^2, E] -> expand(bs) -> flatten(1,2) -> [S,bs,E]
    shape_emb = jnp.broadcast_to(
        params["shape_mapping"][None],
        (bs, num_objects, kernel_dim * kernel_dim, e)).reshape(bs, s_len, e)
    shape_emb = shape_emb.transpose(1, 0, 2)                  # [S, bs, E]

    qpe = positional_encodings_fixed(bs, kernel_dim, kernel_dim, e)
    query_pos_emb = jnp.tile(
        qpe.reshape(bs, e, kernel_dim * kernel_dim).transpose(2, 0, 1),
        (num_objects, 1, 1))                                  # [S, bs, E]

    memory = f_e.reshape(bs, e, h * w).transpose(2, 0, 1)     # [HW, bs, E]

    # flatten to token-major rows (row = s*bs + b), same ordering as
    # tensor.reshape(-1, E) on a [L, B, E] tensor in the reference; then pad
    # the query-side rows to a sublane multiple (masked / sliced off later).
    pad = ((0, mq_pad - mq), (0, 0))
    fs0 = jnp.pad(shape_emb.reshape(mq, e), pad)
    qpos = jnp.pad(query_pos_emb.reshape(mq, e), pad)
    mem = memory.reshape(mk, e)
    kpos = pos_emb.reshape(mk, e)

    # pre-transpose all weights to [in, out]; stack per-projection biases on
    # the sublane axis as [3, E] (q / k / v rows).
    def mha_args(p):
        w_t = p["in_w"].T                                     # [E, 3E]
        return (w_t[:, :e],                                   # wq   [E, E]
                w_t[:, e:],                                   # wkv  [E, 2E]
                p["in_b"].reshape(3, e),                      # b    [3, E]
                p["out_w"].T,                                 # wo   [E, E]
                p["out_b"].reshape(1, e))                     # bo   [1, E]

    la = params["la"]
    la_args = (la["wq"].T, la["wk"].T, la["wv"].T,
               jnp.stack([la["bq"], la["bk"], la["bv"]]),     # [3, E]
               la["ln_g"].reshape(1, e), la["ln_b"].reshape(1, e))

    norm_g = jnp.stack([params["norm1_g"], params["norm2_g"], params["norm3_g"]])
    norm_b = jnp.stack([params["norm1_b"], params["norm2_b"], params["norm3_b"]])

    kernel = functools.partial(
        iefl_fused_kernel,
        num_steps=num_steps, num_heads=num_heads, emb_dim=e,
        bs=bs, mq_valid=mq, ln_eps=layer_norm_eps,
        la_eps=1e-5)  # LinearAttention's LayerNorm uses the PyTorch default eps

    protos = pl.pallas_call(
        kernel,
        out_shape=jax.ShapeDtypeStruct((num_steps, mq_pad, e), jnp.float32),
    )(fs0, qpos, mem, kpos,
      *mha_args(params["mha1"]), *mha_args(params["mha2"]),
      *la_args,
      params["mlp_w1"].T, params["mlp_b1"].reshape(1, -1),
      params["mlp_w2"].T, params["mlp_b2"].reshape(1, -1),
      norm_g, norm_b)

    # drop padded rows, then [steps, S, bs, E]
    return protos[:, :mq].reshape(num_steps, s_len, bs, e)


# ----------------------------------------------------------------------------
# Deterministic parameter construction
# ----------------------------------------------------------------------------

def make_params(key, emb_dim, num_objects, kernel_dim, mlp_factor):
    ks = jax.random.split(key, 16)
    e = emb_dim
    hid = mlp_factor * e

    def nrm(k, shape, std=0.02):
        return std * jax.random.normal(k, shape, jnp.float32)

    def mha_params(k):
        k1, k2 = jax.random.split(k)
        return {
            "in_w": nrm(k1, (3 * e, e)),
            "in_b": jnp.zeros((3 * e,), jnp.float32),
            "out_w": nrm(k2, (e, e)),
            "out_b": jnp.zeros((e,), jnp.float32),
        }

    return {
        # zero_shot shape_mapping parameter: nn.init.normal_ (std=1)
        "shape_mapping": jax.random.normal(
            ks[0], (num_objects, kernel_dim * kernel_dim, e), jnp.float32),
        "mha1": mha_params(ks[1]),
        "mha2": mha_params(ks[2]),
        "la": {
            "wq": nrm(ks[3], (e, e)), "bq": jnp.zeros((e,), jnp.float32),
            "wk": nrm(ks[4], (e, e)), "bk": jnp.zeros((e,), jnp.float32),
            "wv": nrm(ks[5], (e, e)), "bv": jnp.zeros((e,), jnp.float32),
            "ln_g": jnp.ones((e,), jnp.float32),
            "ln_b": jnp.zeros((e,), jnp.float32),
        },
        "mlp_w1": nrm(ks[6], (hid, e)), "mlp_b1": jnp.zeros((hid,), jnp.float32),
        "mlp_w2": nrm(ks[7], (e, hid)), "mlp_b2": jnp.zeros((e,), jnp.float32),
        "norm1_g": jnp.ones((e,), jnp.float32), "norm1_b": jnp.zeros((e,), jnp.float32),
        "norm2_g": jnp.ones((e,), jnp.float32), "norm2_b": jnp.zeros((e,), jnp.float32),
        "norm3_g": jnp.ones((e,), jnp.float32), "norm3_b": jnp.zeros((e,), jnp.float32),
    }


# ----------------------------------------------------------------------------
# Main
# ----------------------------------------------------------------------------

if __name__ == "__main__":
    # module config (small, consistent with the reference forward)
    num_iterative_steps = 2
    emb_dim = 32
    kernel_dim = 3
    num_objects = 3
    num_heads = 2
    mlp_factor = 2
    layer_norm_eps = 1e-5
    bs, H, W = 2, 8, 8

    root = jax.random.PRNGKey(0)
    k_in, k_pos, k_box, k_par = jax.random.split(root, 4)

    f_e = jax.random.normal(k_in, (bs, emb_dim, H, W), jnp.float32)        # NCHW
    pos_emb = jax.random.normal(k_pos, (H * W, bs, emb_dim), jnp.float32)
    bboxes = jax.random.uniform(k_box, (bs, num_objects, 4), jnp.float32)  # unused

    params = make_params(k_par, emb_dim, num_objects, kernel_dim, mlp_factor)

    fwd = jax.jit(functools.partial(
        iefl_forward,
        num_steps=num_iterative_steps,
        num_objects=num_objects,
        kernel_dim=kernel_dim,
        num_heads=num_heads,
        emb_dim=emb_dim,
        layer_norm_eps=layer_norm_eps,
    ))

    out = fwd(params, f_e, pos_emb, bboxes)
    jax.block_until_ready(out)

    expected = (num_iterative_steps, num_objects * kernel_dim * kernel_dim, bs, emb_dim)
    assert out.shape == expected, (out.shape, expected)
    assert bool(jnp.all(jnp.isfinite(out)))
    print("KERNEL_OK")
</pallas_src>

<mosaic_0001>
module attributes {stable_mosaic.version = 11 : i64} {
  func.func @iefl_fused_kernel(%arg0: memref<56x32xf32, #tpu.memory_space<vmem>>, %arg1: memref<56x32xf32, #tpu.memory_space<vmem>>, %arg2: memref<128x32xf32, #tpu.memory_space<vmem>>, %arg3: memref<128x32xf32, #tpu.memory_space<vmem>>, %arg4: memref<32x32xf32, #tpu.memory_space<vmem>>, %arg5: memref<32x64xf32, #tpu.memory_space<vmem>>, %arg6: memref<3x32xf32, #tpu.memory_space<vmem>>, %arg7: memref<32x32xf32, #tpu.memory_space<vmem>>, %arg8: memref<1x32xf32, #tpu.memory_space<vmem>>, %arg9: memref<32x32xf32, #tpu.memory_space<vmem>>, %arg10: memref<32x64xf32, #tpu.memory_space<vmem>>, %arg11: memref<3x32xf32, #tpu.memory_space<vmem>>, %arg12: memref<32x32xf32, #tpu.memory_space<vmem>>, %arg13: memref<1x32xf32, #tpu.memory_space<vmem>>, %arg14: memref<32x32xf32, #tpu.memory_space<vmem>>, %arg15: memref<32x32xf32, #tpu.memory_space<vmem>>, %arg16: memref<32x32xf32, #tpu.memory_space<vmem>>, %arg17: memref<3x32xf32, #tpu.memory_space<vmem>>, %arg18: memref<1x32xf32, #tpu.memory_space<vmem>>, %arg19: memref<1x32xf32, #tpu.memory_space<vmem>>, %arg20: memref<32x64xf32, #tpu.memory_space<vmem>>, %arg21: memref<1x64xf32, #tpu.memory_space<vmem>>, %arg22: memref<64x32xf32, #tpu.memory_space<vmem>>, %arg23: memref<1x32xf32, #tpu.memory_space<vmem>>, %arg24: memref<3x32xf32, #tpu.memory_space<vmem>>, %arg25: memref<3x32xf32, #tpu.memory_space<vmem>>, %arg26: memref<2x56x32xf32, #tpu.memory_space<vmem>>) attributes {dimension_semantics = [], scalar_prefetch = 0 : i64, scratch_operands = 0 : i64, tpu.core_type = #tpu.core_type<tc>} {
    %c0 = arith.constant 0 : index
    %c0_0 = arith.constant 0 : index
    %0 = vector.load %arg0[%c0, %c0_0] : memref<56x32xf32, #tpu.memory_space<vmem>>, vector<56x32xf32>
    %c0_1 = arith.constant 0 : index
    %c0_2 = arith.constant 0 : index
    %1 = vector.load %arg1[%c0_1, %c0_2] : memref<56x32xf32, #tpu.memory_space<vmem>>, vector<56x32xf32>
    %c0_3 = arith.constant 0 : index
    %c0_4 = arith.constant 0 : index
    %2 = vector.load %arg2[%c0_3, %c0_4] : memref<128x32xf32, #tpu.memory_space<vmem>>, vector<128x32xf32>
    %c0_5 = arith.constant 0 : index
    %c0_6 = arith.constant 0 : index
    %3 = vector.load %arg3[%c0_5, %c0_6] : memref<128x32xf32, #tpu.memory_space<vmem>>, vector<128x32xf32>
    %c0_7 = arith.constant 0 : index
    %c0_8 = arith.constant 0 : index
    %4 = vector.load %arg4[%c0_7, %c0_8] : memref<32x32xf32, #tpu.memory_space<vmem>>, vector<32x32xf32>
    %c0_9 = arith.constant 0 : index
    %c0_10 = arith.constant 0 : index
    %5 = vector.load %arg5[%c0_9, %c0_10] : memref<32x64xf32, #tpu.memory_space<vmem>>, vector<32x64xf32>
    %c0_11 = arith.constant 0 : index
    %c0_12 = arith.constant 0 : index
    %6 = vector.load %arg6[%c0_11, %c0_12] : memref<3x32xf32, #tpu.memory_space<vmem>>, vector<3x32xf32>
    %c0_13 = arith.constant 0 : index
    %c0_14 = arith.constant 0 : index
    %7 = vector.load %arg7[%c0_13, %c0_14] : memref<32x32xf32, #tpu.memory_space<vmem>>, vector<32x32xf32>
    %c0_15 = arith.constant 0 : index
    %c0_16 = arith.constant 0 : index
    %8 = vector.load %arg8[%c0_15, %c0_16] : memref<1x32xf32, #tpu.memory_space<vmem>>, vector<1x32xf32>
    %c0_17 = arith.constant 0 : index
    %c0_18 = arith.constant 0 : index
    %9 = vector.load %arg9[%c0_17, %c0_18] : memref<32x32xf32, #tpu.memory_space<vmem>>, vector<32x32xf32>
    %c0_19 = arith.constant 0 : index
    %c0_20 = arith.constant 0 : index
    %10 = vector.load %arg10[%c0_19, %c0_20] : memref<32x64xf32, #tpu.memory_space<vmem>>, vector<32x64xf32>
    %c0_21 = arith.constant 0 : index
    %c0_22 = arith.constant 0 : index
    %11 = vector.load %arg11[%c0_21, %c0_22] : memref<3x32xf32, #tpu.memory_space<vmem>>, vector<3x32xf32>
    %c0_23 = arith.constant 0 : index
    %c0_24 = arith.constant 0 : index
    %12 = vector.load %arg12[%c0_23, %c0_24] : memref<32x32xf32, #tpu.memory_space<vmem>>, vector<32x32xf32>
    %c0_25 = arith.constant 0 : index
    %c0_26 = arith.constant 0 : index
    %13 = vector.load %arg13[%c0_25, %c0_26] : memref<1x32xf32, #tpu.memory_space<vmem>>, vector<1x32xf32>
    %c0_27 = arith.constant 0 : index
    %c0_28 = arith.constant 0 : index
    %14 = vector.load %arg14[%c0_27, %c0_28] : memref<32x32xf32, #tpu.memory_space<vmem>>, vector<32x32xf32>
    %c0_29 = arith.constant 0 : index
    %c0_30 = arith.constant 0 : index
    %15 = vector.load %arg15[%c0_29, %c0_30] : memref<32x32xf32, #tpu.memory_space<vmem>>, vector<32x32xf32>
    %c0_31 = arith.constant 0 : index
    %c0_32 = arith.constant 0 : index
    %16 = vector.load %arg16[%c0_31, %c0_32] : memref<32x32xf32, #tpu.memory_space<vmem>>, vector<32x32xf32>
    %c0_33 = arith.constant 0 : index
    %c0_34 = arith.constant 0 : index
    %17 = vector.load %arg17[%c0_33, %c0_34] : memref<3x32xf32, #tpu.memory_space<vmem>>, vector<3x32xf32>
    %c0_35 = arith.constant 0 : index
    %c0_36 = arith.constant 0 : index
    %18 = vector.load %arg18[%c0_35, %c0_36] : memref<1x32xf32, #tpu.memory_space<vmem>>, vector<1x32xf32>
    %c0_37 = arith.constant 0 : index
    %c0_38 = arith.constant 0 : index
    %19 = vector.load %arg19[%c0_37, %c0_38] : memref<1x32xf32, #tpu.memory_space<vmem>>, vector<1x32xf32>
    %c0_39 = arith.constant 0 : index
    %c0_40 = arith.constant 0 : index
    %20 = vector.load %arg20[%c0_39, %c0_40] : memref<32x64xf32, #tpu.memory_space<vmem>>, vector<32x64xf32>
    %c0_41 = arith.constant 0 : index
    %c0_42 = arith.constant 0 : index
    %21 = vector.load %arg21[%c0_41, %c0_42] : memref<1x64xf32, #tpu.memory_space<vmem>>, vector<1x64xf32>
    %c0_43 = arith.constant 0 : index
    %c0_44 = arith.constant 0 : index
    %22 = vector.load %arg22[%c0_43, %c0_44] : memref<64x32xf32, #tpu.memory_space<vmem>>, vector<64x32xf32>
    %c0_45 = arith.constant 0 : index
    %c0_46 = arith.constant 0 : index
    %23 = vector.load %arg23[%c0_45, %c0_46] : memref<1x32xf32, #tpu.memory_space<vmem>>, vector<1x32xf32>
    %c0_47 = arith.constant 0 : index
    %c0_48 = arith.constant 0 : index
    %24 = vector.load %arg24[%c0_47, %c0_48] : memref<3x32xf32, #tpu.memory_space<vmem>>, vector<3x32xf32>
    %c0_49 = arith.constant 0 : index
    %c0_50 = arith.constant 0 : index
    %25 = vector.load %arg25[%c0_49, %c0_50] : memref<3x32xf32, #tpu.memory_space<vmem>>, vector<3x32xf32>
    %26 = vector.extract_strided_slice %7 {offsets = [0, 0], sizes = [16, 32], strides = [1, 1]} : vector<32x32xf32> to vector<16x32xf32>
    %27 = vector.extract_strided_slice %7 {offsets = [16, 0], sizes = [16, 32], strides = [1, 1]} : vector<32x32xf32> to vector<16x32xf32>
    %28 = vector.extract_strided_slice %12 {offsets = [0, 0], sizes = [16, 32], strides = [1, 1]} : vector<32x32xf32> to vector<16x32xf32>
    %29 = vector.extract_strided_slice %12 {offsets = [16, 0], sizes = [16, 32], strides = [1, 1]} : vector<32x32xf32> to vector<16x32xf32>
    %30 = tpu.iota {dimensions = array<i32: 0>} : vector<56x56xi32>
    %31 = tpu.iota {dimensions = array<i32: 1>} : vector<56x56xi32>
    %c2_i32 = arith.constant 2 : i32
    %c0_i32 = arith.constant 0 : i32
    %32 = arith.cmpi eq, %c2_i32, %c0_i32 : i32
    %c1_i32 = arith.constant 1 : i32
    %33 = arith.select %32, %c1_i32, %c2_i32 : i32
    %34 = vector.broadcast %33 : i32 to vector<56x56xi32>
    %35 = arith.remsi %30, %34 : vector<56x56xi32>
    %c0_i32_51 = arith.constant 0 : i32
    %36 = vector.broadcast %c0_i32_51 : i32 to vector<56x56xi32>
    %37 = arith.cmpi ne, %35, %36 : vector<56x56xi32>
    %c0_i32_52 = arith.constant 0 : i32
    %38 = vector.broadcast %c0_i32_52 : i32 to vector<56x56xi32>
    %39 = arith.cmpi slt, %35, %38 : vector<56x56xi32>
    %c0_i32_53 = arith.constant 0 : i32
    %40 = arith.cmpi slt, %33, %c0_i32_53 : i32
    %41 = vector.broadcast %40 : i1 to vector<56x56xi1>
    %42 = vector.broadcast %41 : vector<56x56xi1> to vector<56x56xi1>
    %43 = arith.xori %39, %42 : vector<56x56xi1>
    %44 = arith.andi %43, %37 : vector<56x56xi1>
    %45 = vector.broadcast %33 : i32 to vector<56x56xi32>
    %46 = arith.addi %35, %45 : vector<56x56xi32>
    %47 = arith.select %44, %46, %35 : vector<56x56xi1>, vector<56x56xi32>
    %c2_i32_54 = arith.constant 2 : i32
    %c0_i32_55 = arith.constant 0 : i32
    %48 = arith.cmpi eq, %c2_i32_54, %c0_i32_55 : i32
    %c1_i32_56 = arith.constant 1 : i32
    %49 = arith.select %48, %c1_i32_56, %c2_i32_54 : i32
    %50 = vector.broadcast %49 : i32 to vector<56x56xi32>
    %51 = arith.remsi %31, %50 : vector<56x56xi32>
    %c0_i32_57 = arith.constant 0 : i32
    %52 = vector.broadcast %c0_i32_57 : i32 to vector<56x56xi32>
    %53 = arith.cmpi ne, %51, %52 : vector<56x56xi32>
    %c0_i32_58 = arith.constant 0 : i32
    %54 = vector.broadcast %c0_i32_58 : i32 to vector<56x56xi32>
    %55 = arith.cmpi slt, %51, %54 : vector<56x56xi32>
    %c0_i32_59 = arith.constant 0 : i32
    %56 = arith.cmpi slt, %49, %c0_i32_59 : i32
    %57 = vector.broadcast %56 : i1 to vector<56x56xi1>
    %58 = vector.broadcast %57 : vector<56x56xi1> to vector<56x56xi1>
    %59 = arith.xori %55, %58 : vector<56x56xi1>
    %60 = arith.andi %59, %53 : vector<56x56xi1>
    %61 = vector.broadcast %49 : i32 to vector<56x56xi32>
    %62 = arith.addi %51, %61 : vector<56x56xi32>
    %63 = arith.select %60, %62, %51 : vector<56x56xi1>, vector<56x56xi32>
    %64 = arith.cmpi eq, %47, %63 : vector<56x56xi32>
    %c54_i32 = arith.constant 54 : i32
    %65 = vector.broadcast %c54_i32 : i32 to vector<56x56xi32>
    %66 = arith.cmpi slt, %31, %65 : vector<56x56xi32>
    %67 = arith.andi %64, %66 : vector<56x56xi1>
    %cst = arith.constant 0.000000e+00 : f32
    %cst_60 = arith.constant -1.000000e+30 : f32
    %68 = vector.broadcast %cst : f32 to vector<56x56xf32>
    %69 = vector.broadcast %cst_60 : f32 to vector<56x56xf32>
    %70 = arith.select %67, %68, %69 : vector<56x56xi1>, vector<56x56xf32>
    %71 = tpu.iota {dimensions = array<i32: 0>} : vector<56x128xi32>
    %72 = tpu.iota {dimensions = array<i32: 1>} : vector<56x128xi32>
    %c2_i32_61 = arith.constant 2 : i32
    %c0_i32_62 = arith.constant 0 : i32
    %73 = arith.cmpi eq, %c2_i32_61, %c0_i32_62 : i32
    %c1_i32_63 = arith.constant 1 : i32
    %74 = arith.select %73, %c1_i32_63, %c2_i32_61 : i32
    %75 = vector.broadcast %74 : i32 to vector<56x128xi32>
    %76 = arith.remsi %71, %75 : vector<56x128xi32>
    %c0_i32_64 = arith.constant 0 : i32
    %77 = vector.broadcast %c0_i32_64 : i32 to vector<56x128xi32>
    %78 = arith.cmpi ne, %76, %77 : vector<56x128xi32>
    %c0_i32_65 = arith.constant 0 : i32
    %79 = vector.broadcast %c0_i32_65 : i32 to vector<56x128xi32>
    %80 = arith.cmpi slt, %76, %79 : vector<56x128xi32>
    %c0_i32_66 = arith.constant 0 : i32
    %81 = arith.cmpi slt, %74, %c0_i32_66 : i32
    %82 = vector.broadcast %81 : i1 to vector<56x128xi1>
    %83 = vector.broadcast %82 : vector<56x128xi1> to vector<56x128xi1>
    %84 = arith.xori %80, %83 : vector<56x128xi1>
    %85 = arith.andi %84, %78 : vector<56x128xi1>
    %86 = vector.broadcast %74 : i32 to vector<56x128xi32>
    %87 = arith.addi %76, %86 : vector<56x128xi32>
    %88 = arith.select %85, %87, %76 : vector<56x128xi1>, vector<56x128xi32>
    %c2_i32_67 = arith.constant 2 : i32
    %c0_i32_68 = arith.constant 0 : i32
    %89 = arith.cmpi eq, %c2_i32_67, %c0_i32_68 : i32
    %c1_i32_69 = arith.constant 1 : i32
    %90 = arith.select %89, %c1_i32_69, %c2_i32_67 : i32
    %91 = vector.broadcast %90 : i32 to vector<56x128xi32>
    %92 = arith.remsi %72, %91 : vector<56x128xi32>
    %c0_i32_70 = arith.constant 0 : i32
    %93 = vector.broadcast %c0_i32_70 : i32 to vector<56x128xi32>
    %94 = arith.cmpi ne, %92, %93 : vector<56x128xi32>
    %c0_i32_71 = arith.constant 0 : i32
    %95 = vector.broadcast %c0_i32_71 : i32 to vector<56x128xi32>
    %96 = arith.cmpi slt, %92, %95 : vector<56x128xi32>
    %c0_i32_72 = arith.constant 0 : i32
    %97 = arith.cmpi slt, %90, %c0_i32_72 : i32
    %98 = vector.broadcast %97 : i1 to vector<56x128xi1>
    %99 = vector.broadcast %98 : vector<56x128xi1> to vector<56x128xi1>
    %100 = arith.xori %96, %99 : vector<56x128xi1>
    %101 = arith.andi %100, %94 : vector<56x128xi1>
    %102 = vector.broadcast %90 : i32 to vector<56x128xi32>
    %103 = arith.addi %92, %102 : vector<56x128xi32>
    %104 = arith.select %101, %103, %92 : vector<56x128xi1>, vector<56x128xi32>
    %105 = arith.cmpi eq, %88, %104 : vector<56x128xi32>
    %cst_73 = arith.constant 0.000000e+00 : f32
    %cst_74 = arith.constant -1.000000e+30 : f32
    %106 = vector.broadcast %cst_73 : f32 to vector<56x128xf32>
    %107 = vector.broadcast %cst_74 : f32 to vector<56x128xf32>
    %108 = arith.select %105, %106, %107 : vector<56x128xi1>, vector<56x128xf32>
    %cst_75 = arith.constant dense<0.000000e+00> : vector<56x64xf32>
    %109 = tpu.matmul %0, %5, %cst_75 {dimension_numbers = #tpu.dot_dimension_numbers<[1], [0], [0], [1], [0, 0, 1, 1], [], []>} : vector<56x32xf32>, vector<32x64xf32>, vector<56x64xf32> -> vector<56x64xf32>
    %110 = vector.extract_strided_slice %109 {offsets = [0, 0], sizes = [56, 32], strides = [1, 1]} : vector<56x64xf32> to vector<56x32xf32>
    %111 = vector.extract_strided_slice %6 {offsets = [1, 0], sizes = [1, 32], strides = [1, 1]} : vector<3x32xf32> to vector<1x32xf32>
    %112 = vector.broadcast %111 : vector<1x32xf32> to vector<56x32xf32>
    %113 = arith.addf %110, %112 : vector<56x32xf32>
    %114 = vector.extract_strided_slice %109 {offsets = [0, 32], sizes = [56, 32], strides = [1, 1]} : vector<56x64xf32> to vector<56x32xf32>
    %115 = vector.extract_strided_slice %6 {offsets = [2, 0], sizes = [1, 32], strides = [1, 1]} : vector<3x32xf32> to vector<1x32xf32>
    %116 = vector.broadcast %115 : vector<1x32xf32> to vector<56x32xf32>
    %117 = arith.addf %114, %116 : vector<56x32xf32>
    %118 = tpu.transpose %113, [1, 0] : vector<56x32xf32> -> vector<32x56xf32>
    %119 = vector.extract_strided_slice %118 {offsets = [0, 0], sizes = [16, 56], strides = [1, 1]} : vector<32x56xf32> to vector<16x56xf32>
    %120 = vector.extract_strided_slice %118 {offsets = [16, 0], sizes = [16, 56], strides = [1, 1]} : vector<32x56xf32> to vector<16x56xf32>
    %121 = vector.extract_strided_slice %117 {offsets = [0, 0], sizes = [56, 16], strides = [1, 1]} : vector<56x32xf32> to vector<56x16xf32>
    %122 = vector.extract_strided_slice %117 {offsets = [0, 16], sizes = [56, 16], strides = [1, 1]} : vector<56x32xf32> to vector<56x16xf32>
    %cst_76 = arith.constant dense<0.000000e+00> : vector<128x64xf32>
    %123 = tpu.matmul %2, %10, %cst_76 {dimension_numbers = #tpu.dot_dimension_numbers<[1], [0], [0], [1], [0, 0, 1, 1], [], []>} : vector<128x32xf32>, vector<32x64xf32>, vector<128x64xf32> -> vector<128x64xf32>
    %124 = vector.extract_strided_slice %123 {offsets = [0, 0], sizes = [128, 32], strides = [1, 1]} : vector<128x64xf32> to vector<128x32xf32>
    %125 = vector.extract_strided_slice %11 {offsets = [1, 0], sizes = [1, 32], strides = [1, 1]} : vector<3x32xf32> to vector<1x32xf32>
    %126 = vector.broadcast %125 : vector<1x32xf32> to vector<128x32xf32>
    %127 = arith.addf %124, %126 : vector<128x32xf32>
    %128 = vector.extract_strided_slice %123 {offsets = [0, 32], sizes = [128, 32], strides = [1, 1]} : vector<128x64xf32> to vector<128x32xf32>
    %129 = vector.extract_strided_slice %11 {offsets = [2, 0], sizes = [1, 32], strides = [1, 1]} : vector<3x32xf32> to vector<1x32xf32>
    %130 = vector.broadcast %129 : vector<1x32xf32> to vector<128x32xf32>
    %131 = arith.addf %128, %130 : vector<128x32xf32>
    %132 = tpu.transpose %127, [1, 0] : vector<128x32xf32> -> vector<32x128xf32>
    %133 = vector.extract_strided_slice %132 {offsets = [0, 0], sizes = [16, 128], strides = [1, 1]} : vector<32x128xf32> to vector<16x128xf32>
    %134 = vector.extract_strided_slice %132 {offsets = [16, 0], sizes = [16, 128], strides = [1, 1]} : vector<32x128xf32> to vector<16x128xf32>
    %135 = vector.extract_strided_slice %131 {offsets = [0, 0], sizes = [128, 16], strides = [1, 1]} : vector<128x32xf32> to vector<128x16xf32>
    %136 = vector.extract_strided_slice %131 {offsets = [0, 16], sizes = [128, 16], strides = [1, 1]} : vector<128x32xf32> to vector<128x16xf32>
    %137 = arith.addf %2, %3 : vector<128x32xf32>
    %cst_77 = arith.constant dense<0.000000e+00> : vector<128x32xf32>
    %138 = tpu.matmul %137, %15, %cst_77 {dimension_numbers = #tpu.dot_dimension_numbers<[1], [0], [0], [1], [0, 0, 1, 1], [], []>} : vector<128x32xf32>, vector<32x32xf32>, vector<128x32xf32> -> vector<128x32xf32>
    %139 = vector.extract_strided_slice %17 {offsets = [1, 0], sizes = [1, 32], strides = [1, 1]} : vector<3x32xf32> to vector<1x32xf32>
    %140 = vector.broadcast %139 : vector<1x32xf32> to vector<128x32xf32>
    %141 = arith.addf %138, %140 : vector<128x32xf32>
    %cst_78 = arith.constant dense<0.000000e+00> : vector<128x32xf32>
    %142 = tpu.matmul %2, %16, %cst_78 {dimension_numbers = #tpu.dot_dimension_numbers<[1], [0], [0], [1], [0, 0, 1, 1], [], []>} : vector<128x32xf32>, vector<32x32xf32>, vector<128x32xf32> -> vector<128x32xf32>
    %143 = vector.extract_strided_slice %17 {offsets = [2, 0], sizes = [1, 32], strides = [1, 1]} : vector<3x32xf32> to vector<1x32xf32>
    %144 = vector.broadcast %143 : vector<1x32xf32> to vector<128x32xf32>
    %145 = arith.addf %142, %144 : vector<128x32xf32>
    %cst_79 = arith.constant dense<0xFF800000> : vector<32xf32>
    %146 = vector.multi_reduction <maximumf>, %141, %cst_79 [0] : vector<128x32xf32> to vector<32xf32>
    %147 = vector.shape_cast %146 : vector<32xf32> to vector<1x32xf32>
    %148 = vector.broadcast %147 : vector<1x32xf32> to vector<128x32xf32>
    %149 = arith.subf %141, %148 : vector<128x32xf32>
    %150 = math.exp %149 : vector<128x32xf32>
    %cst_80 = arith.constant dense<0.000000e+00> : vector<32xf32>
    %151 = vector.multi_reduction <add>, %150, %cst_80 [0] : vector<128x32xf32> to vector<32xf32>
    %152 = vector.shape_cast %151 : vector<32xf32> to vector<1x32xf32>
    %153 = vector.broadcast %152 : vector<1x32xf32> to vector<128x32xf32>
    %154 = arith.divf %150, %153 : vector<128x32xf32>
    %155 = arith.mulf %154, %145 : vector<128x32xf32>
    %cst_81 = arith.constant dense<0.000000e+00> : vector<32xf32>
    %156 = vector.multi_reduction <add>, %155, %cst_81 [0] : vector<128x32xf32> to vector<32xf32>
    %157 = vector.shape_cast %156 : vector<32xf32> to vector<1x32xf32>
    %158 = vector.extract_strided_slice %6 {offsets = [0, 0], sizes = [1, 32], strides = [1, 1]} : vector<3x32xf32> to vector<1x32xf32>
    %159 = vector.shape_cast %158 : vector<1x32xf32> to vector<1x32xf32>
    %160 = vector.broadcast %159 : vector<1x32xf32> to vector<56x32xf32>
    %161 = vector.extract_strided_slice %11 {offsets = [0, 0], sizes = [1, 32], strides = [1, 1]} : vector<3x32xf32> to vector<1x32xf32>
    %162 = vector.shape_cast %161 : vector<1x32xf32> to vector<1x32xf32>
    %163 = vector.broadcast %162 : vector<1x32xf32> to vector<56x32xf32>
    %164 = vector.extract_strided_slice %17 {offsets = [0, 0], sizes = [1, 32], strides = [1, 1]} : vector<3x32xf32> to vector<1x32xf32>
    %165 = vector.shape_cast %164 : vector<1x32xf32> to vector<1x32xf32>
    %166 = vector.broadcast %165 : vector<1x32xf32> to vector<56x32xf32>
    %167 = vector.shape_cast %8 : vector<1x32xf32> to vector<1x32xf32>
    %168 = vector.broadcast %167 : vector<1x32xf32> to vector<56x32xf32>
    %169 = vector.shape_cast %13 : vector<1x32xf32> to vector<1x32xf32>
    %170 = vector.broadcast %169 : vector<1x32xf32> to vector<56x32xf32>
    %171 = vector.shape_cast %18 : vector<1x32xf32> to vector<1x32xf32>
    %172 = vector.broadcast %171 : vector<1x32xf32> to vector<56x32xf32>
    %173 = vector.shape_cast %19 : vector<1x32xf32> to vector<1x32xf32>
    %174 = vector.broadcast %173 : vector<1x32xf32> to vector<56x32xf32>
    %175 = vector.shape_cast %21 : vector<1x64xf32> to vector<1x64xf32>
    %176 = vector.broadcast %175 : vector<1x64xf32> to vector<56x64xf32>
    %177 = vector.shape_cast %23 : vector<1x32xf32> to vector<1x32xf32>
    %178 = vector.broadcast %177 : vector<1x32xf32> to vector<56x32xf32>
    %179 = vector.extract_strided_slice %24 {offsets = [0, 0], sizes = [1, 32], strides = [1, 1]} : vector<3x32xf32> to vector<1x32xf32>
    %180 = vector.shape_cast %179 : vector<1x32xf32> to vector<1x32xf32>
    %181 = vector.broadcast %180 : vector<1x32xf32> to vector<56x32xf32>
    %182 = vector.extract_strided_slice %25 {offsets = [0, 0], sizes = [1, 32], strides = [1, 1]} : vector<3x32xf32> to vector<1x32xf32>
    %183 = vector.shape_cast %182 : vector<1x32xf32> to vector<1x32xf32>
    %184 = vector.broadcast %183 : vector<1x32xf32> to vector<56x32xf32>
    %185 = vector.extract_strided_slice %24 {offsets = [1, 0], sizes = [1, 32], strides = [1, 1]} : vector<3x32xf32> to vector<1x32xf32>
    %186 = vector.shape_cast %185 : vector<1x32xf32> to vector<1x32xf32>
    %187 = vector.broadcast %186 : vector<1x32xf32> to vector<56x32xf32>
    %188 = vector.extract_strided_slice %25 {offsets = [1, 0], sizes = [1, 32], strides = [1, 1]} : vector<3x32xf32> to vector<1x32xf32>
    %189 = vector.shape_cast %188 : vector<1x32xf32> to vector<1x32xf32>
    %190 = vector.broadcast %189 : vector<1x32xf32> to vector<56x32xf32>
    %191 = vector.extract_strided_slice %24 {offsets = [2, 0], sizes = [1, 32], strides = [1, 1]} : vector<3x32xf32> to vector<1x32xf32>
    %192 = vector.shape_cast %191 : vector<1x32xf32> to vector<1x32xf32>
    %193 = vector.broadcast %192 : vector<1x32xf32> to vector<56x32xf32>
    %194 = vector.extract_strided_slice %25 {offsets = [2, 0], sizes = [1, 32], strides = [1, 1]} : vector<3x32xf32> to vector<1x32xf32>
    %195 = vector.shape_cast %194 : vector<1x32xf32> to vector<1x32xf32>
    %196 = vector.broadcast %195 : vector<1x32xf32> to vector<56x32xf32>
    %197 = vector.shape_cast %157 : vector<1x32xf32> to vector<1x32xf32>
    %198 = vector.broadcast %197 : vector<1x32xf32> to vector<56x32xf32>
    %199 = arith.addf %0, %1 : vector<56x32xf32>
    %cst_82 = arith.constant dense<0.000000e+00> : vector<56x32xf32>
    %200 = tpu.matmul %199, %4, %cst_82 {dimension_numbers = #tpu.dot_dimension_numbers<[1], [0], [0], [1], [0, 0, 1, 1], [], []>} : vector<56x32xf32>, vector<32x32xf32>, vector<56x32xf32> -> vector<56x32xf32>
    %201 = arith.addf %200, %160 : vector<56x32xf32>
    %202 = vector.extract_strided_slice %201 {offsets = [0, 0], sizes = [56, 16], strides = [1, 1]} : vector<56x32xf32> to vector<56x16xf32>
    %cst_83 = arith.constant 2.500000e-01 : f32
    %203 = vector.broadcast %cst_83 : f32 to vector<56x16xf32>
    %204 = arith.mulf %202, %203 : vector<56x16xf32>
    %cst_84 = arith.constant dense<0.000000e+00> : vector<56x56xf32>
    %205 = tpu.matmul %204, %119, %cst_84 {dimension_numbers = #tpu.dot_dimension_numbers<[1], [0], [0], [1], [0, 0, 1, 1], [], []>} : vector<56x16xf32>, vector<16x56xf32>, vector<56x56xf32> -> vector<56x56xf32>
    %206 = arith.addf %205, %70 : vector<56x56xf32>
    %cst_85 = arith.constant dense<0xFF800000> : vector<56xf32>
    %207 = vector.multi_reduction <maximumf>, %206, %cst_85 [1] : vector<56x56xf32> to vector<56xf32>
    %208 = vector.shape_cast %207 : vector<56xf32> to vector<56x1xf32>
    %209 = vector.broadcast %208 : vector<56x1xf32> to vector<56x56xf32>
    %210 = arith.subf %206, %209 : vector<56x56xf32>
    %211 = math.exp %210 : vector<56x56xf32>
    %cst_86 = arith.constant dense<0.000000e+00> : vector<56xf32>
    %212 = vector.multi_reduction <add>, %211, %cst_86 [1] : vector<56x56xf32> to vector<56xf32>
    %213 = vector.shape_cast %212 : vector<56xf32> to vector<56x1xf32>
    %214 = vector.broadcast %213 : vector<56x1xf32> to vector<56x56xf32>
    %215 = arith.divf %211, %214 : vector<56x56xf32>
    %cst_87 = arith.constant dense<0.000000e+00> : vector<56x16xf32>
    %216 = tpu.matmul %215, %121, %cst_87 {dimension_numbers = #tpu.dot_dimension_numbers<[1], [0], [0], [1], [0, 0, 1, 1], [], []>} : vector<56x56xf32>, vector<56x16xf32>, vector<56x16xf32> -> vector<56x16xf32>
    %cst_88 = arith.constant dense<0.000000e+00> : vector<56x32xf32>
    %217 = tpu.matmul %216, %26, %cst_88 {dimension_numbers = #tpu.dot_dimension_numbers<[1], [0], [0], [1], [0, 0, 1, 1], [], []>} : vector<56x16xf32>, vector<16x32xf32>, vector<56x32xf32> -> vector<56x32xf32>
    %218 = arith.addf %168, %217 : vector<56x32xf32>
    %219 = vector.extract_strided_slice %201 {offsets = [0, 16], sizes = [56, 16], strides = [1, 1]} : vector<56x32xf32> to vector<56x16xf32>
    %cst_89 = arith.constant 2.500000e-01 : f32
    %220 = vector.broadcast %cst_89 : f32 to vector<56x16xf32>
    %221 = arith.mulf %219, %220 : vector<56x16xf32>
    %cst_90 = arith.constant dense<0.000000e+00> : vector<56x56xf32>
    %222 = tpu.matmul %221, %120, %cst_90 {dimension_numbers = #tpu.dot_dimension_numbers<[1], [0], [0], [1], [0, 0, 1, 1], [], []>} : vector<56x16xf32>, vector<16x56xf32>, vector<56x56xf32> -> vector<56x56xf32>
    %223 = arith.addf %222, %70 : vector<56x56xf32>
    %cst_91 = arith.constant dense<0xFF800000> : vector<56xf32>
    %224 = vector.multi_reduction <maximumf>, %223, %cst_91 [1] : vector<56x56xf32> to vector<56xf32>
    %225 = vector.shape_cast %224 : vector<56xf32> to vector<56x1xf32>
    %226 = vector.broadcast %225 : vector<56x1xf32> to vector<56x56xf32>
    %227 = arith.subf %223, %226 : vector<56x56xf32>
    %228 = math.exp %227 : vector<56x56xf32>
    %cst_92 = arith.constant dense<0.000000e+00> : vector<56xf32>
    %229 = vector.multi_reduction <add>, %228, %cst_92 [1] : vector<56x56xf32> to vector<56xf32>
    %230 = vector.shape_cast %229 : vector<56xf32> to vector<56x1xf32>
    %231 = vector.broadcast %230 : vector<56x1xf32> to vector<56x56xf32>
    %232 = arith.divf %228, %231 : vector<56x56xf32>
    %cst_93 = arith.constant dense<0.000000e+00> : vector<56x16xf32>
    %233 = tpu.matmul %232, %122, %cst_93 {dimension_numbers = #tpu.dot_dimension_numbers<[1], [0], [0], [1], [0, 0, 1, 1], [], []>} : vector<56x56xf32>, vector<56x16xf32>, vector<56x16xf32> -> vector<56x16xf32>
    %cst_94 = arith.constant dense<0.000000e+00> : vector<56x32xf32>
    %234 = tpu.matmul %233, %27, %cst_94 {dimension_numbers = #tpu.dot_dimension_numbers<[1], [0], [0], [1], [0, 0, 1, 1], [], []>} : vector<56x16xf32>, vector<16x32xf32>, vector<56x32xf32> -> vector<56x32xf32>
    %235 = arith.addf %218, %234 : vector<56x32xf32>
    %236 = arith.addf %0, %235 : vector<56x32xf32>
    %cst_95 = arith.constant dense<0.000000e+00> : vector<56xf32>
    %237 = vector.multi_reduction <add>, %236, %cst_95 [1] : vector<56x32xf32> to vector<56xf32>
    %238 = vector.shape_cast %237 : vector<56xf32> to vector<56x1xf32>
    %cst_96 = arith.constant 3.200000e+01 : f32
    %239 = vector.broadcast %cst_96 : f32 to vector<56x1xf32>
    %240 = arith.divf %238, %239 : vector<56x1xf32>
    %241 = vector.broadcast %240 : vector<56x1xf32> to vector<56x32xf32>
    %242 = arith.subf %236, %241 : vector<56x32xf32>
    %243 = arith.mulf %242, %242 : vector<56x32xf32>
    %cst_97 = arith.constant dense<0.000000e+00> : vector<56xf32>
    %244 = vector.multi_reduction <add>, %243, %cst_97 [1] : vector<56x32xf32> to vector<56xf32>
    %245 = vector.shape_cast %244 : vector<56xf32> to vector<56x1xf32>
    %cst_98 = arith.constant 3.200000e+01 : f32
    %246 = vector.broadcast %cst_98 : f32 to vector<56x1xf32>
    %247 = arith.divf %245, %246 : vector<56x1xf32>
    %cst_99 = arith.constant 9.99999974E-6 : f32
    %248 = vector.broadcast %cst_99 : f32 to vector<56x1xf32>
    %249 = arith.addf %247, %248 : vector<56x1xf32>
    %250 = math.rsqrt %249 : vector<56x1xf32>
    %251 = vector.broadcast %250 : vector<56x1xf32> to vector<56x32xf32>
    %252 = arith.mulf %242, %251 : vector<56x32xf32>
    %253 = arith.mulf %252, %181 : vector<56x32xf32>
    %254 = arith.addf %253, %184 : vector<56x32xf32>
    %cst_100 = arith.constant dense<0.000000e+00> : vector<56x32xf32>
    %255 = tpu.matmul %254, %9, %cst_100 {dimension_numbers = #tpu.dot_dimension_numbers<[1], [0], [0], [1], [0, 0, 1, 1], [], []>} : vector<56x32xf32>, vector<32x32xf32>, vector<56x32xf32> -> vector<56x32xf32>
    %256 = arith.addf %255, %163 : vector<56x32xf32>
    %257 = vector.extract_strided_slice %256 {offsets = [0, 0], sizes = [56, 16], strides = [1, 1]} : vector<56x32xf32> to vector<56x16xf32>
    %cst_101 = arith.constant 2.500000e-01 : f32
    %258 = vector.broadcast %cst_101 : f32 to vector<56x16xf32>
    %259 = arith.mulf %257, %258 : vector<56x16xf32>
    %cst_102 = arith.constant dense<0.000000e+00> : vector<56x128xf32>
    %260 = tpu.matmul %259, %133, %cst_102 {dimension_numbers = #tpu.dot_dimension_numbers<[1], [0], [0], [1], [0, 0, 1, 1], [], []>} : vector<56x16xf32>, vector<16x128xf32>, vector<56x128xf32> -> vector<56x128xf32>
    %261 = arith.addf %260, %108 : vector<56x128xf32>
    %cst_103 = arith.constant dense<0xFF800000> : vector<56xf32>
    %262 = vector.multi_reduction <maximumf>, %261, %cst_103 [1] : vector<56x128xf32> to vector<56xf32>
    %263 = vector.shape_cast %262 : vector<56xf32> to vector<56x1xf32>
    %264 = vector.broadcast %263 : vector<56x1xf32> to vector<56x128xf32>
    %265 = arith.subf %261, %264 : vector<56x128xf32>
    %266 = math.exp %265 : vector<56x128xf32>
    %cst_104 = arith.constant dense<0.000000e+00> : vector<56xf32>
    %267 = vector.multi_reduction <add>, %266, %cst_104 [1] : vector<56x128xf32> to vector<56xf32>
    %268 = vector.shape_cast %267 : vector<56xf32> to vector<56x1xf32>
    %269 = vector.broadcast %268 : vector<56x1xf32> to vector<56x128xf32>
    %270 = arith.divf %266, %269 : vector<56x128xf32>
    %cst_105 = arith.constant dense<0.000000e+00> : vector<56x16xf32>
    %271 = tpu.matmul %270, %135, %cst_105 {dimension_numbers = #tpu.dot_dimension_numbers<[1], [0], [0], [1], [0, 0, 1, 1], [], []>} : vector<56x128xf32>, vector<128x16xf32>, vector<56x16xf32> -> vector<56x16xf32>
    %cst_106 = arith.constant dense<0.000000e+00> : vector<56x32xf32>
    %272 = tpu.matmul %271, %28, %cst_106 {dimension_numbers = #tpu.dot_dimension_numbers<[1], [0], [0], [1], [0, 0, 1, 1], [], []>} : vector<56x16xf32>, vector<16x32xf32>, vector<56x32xf32> -> vector<56x32xf32>
    %273 = arith.addf %170, %272 : vector<56x32xf32>
    %274 = vector.extract_strided_slice %256 {offsets = [0, 16], sizes = [56, 16], strides = [1, 1]} : vector<56x32xf32> to vector<56x16xf32>
    %cst_107 = arith.constant 2.500000e-01 : f32
    %275 = vector.broadcast %cst_107 : f32 to vector<56x16xf32>
    %276 = arith.mulf %274, %275 : vector<56x16xf32>
    %cst_108 = arith.constant dense<0.000000e+00> : vector<56x128xf32>
    %277 = tpu.matmul %276, %134, %cst_108 {dimension_numbers = #tpu.dot_dimension_numbers<[1], [0], [0], [1], [0, 0, 1, 1], [], []>} : vector<56x16xf32>, vector<16x128xf32>, vector<56x128xf32> -> vector<56x128xf32>
    %278 = arith.addf %277, %108 : vector<56x128xf32>
    %cst_109 = arith.constant dense<0xFF800000> : vector<56xf32>
    %279 = vector.multi_reduction <maximumf>, %278, %cst_109 [1] : vector<56x128xf32> to vector<56xf32>
    %280 = vector.shape_cast %279 : vector<56xf32> to vector<56x1xf32>
    %281 = vector.broadcast %280 : vector<56x1xf32> to vector<56x128xf32>
    %282 = arith.subf %278, %281 : vector<56x128xf32>
    %283 = math.exp %282 : vector<56x128xf32>
    %cst_110 = arith.constant dense<0.000000e+00> : vector<56xf32>
    %284 = vector.multi_reduction <add>, %283, %cst_110 [1] : vector<56x128xf32> to vector<56xf32>
    %285 = vector.shape_cast %284 : vector<56xf32> to vector<56x1xf32>
    %286 = vector.broadcast %285 : vector<56x1xf32> to vector<56x128xf32>
    %287 = arith.divf %283, %286 : vector<56x128xf32>
    %cst_111 = arith.constant dense<0.000000e+00> : vector<56x16xf32>
    %288 = tpu.matmul %287, %136, %cst_111 {dimension_numbers = #tpu.dot_dimension_numbers<[1], [0], [0], [1], [0, 0, 1, 1], [], []>} : vector<56x128xf32>, vector<128x16xf32>, vector<56x16xf32> -> vector<56x16xf32>
    %cst_112 = arith.constant dense<0.000000e+00> : vector<56x32xf32>
    %289 = tpu.matmul %288, %29, %cst_112 {dimension_numbers = #tpu.dot_dimension_numbers<[1], [0], [0], [1], [0, 0, 1, 1], [], []>} : vector<56x16xf32>, vector<16x32xf32>, vector<56x32xf32> -> vector<56x32xf32>
    %290 = arith.addf %273, %289 : vector<56x32xf32>
    %291 = arith.addf %254, %290 : vector<56x32xf32>
    %cst_113 = arith.constant dense<0.000000e+00> : vector<56xf32>
    %292 = vector.multi_reduction <add>, %291, %cst_113 [1] : vector<56x32xf32> to vector<56xf32>
    %293 = vector.shape_cast %292 : vector<56xf32> to vector<56x1xf32>
    %cst_114 = arith.constant 3.200000e+01 : f32
    %294 = vector.broadcast %cst_114 : f32 to vector<56x1xf32>
    %295 = arith.divf %293, %294 : vector<56x1xf32>
    %296 = vector.broadcast %295 : vector<56x1xf32> to vector<56x32xf32>
    %297 = arith.subf %291, %296 : vector<56x32xf32>
    %298 = arith.mulf %297, %297 : vector<56x32xf32>
    %cst_115 = arith.constant dense<0.000000e+00> : vector<56xf32>
    %299 = vector.multi_reduction <add>, %298, %cst_115 [1] : vector<56x32xf32> to vector<56xf32>
    %300 = vector.shape_cast %299 : vector<56xf32> to vector<56x1xf32>
    %cst_116 = arith.constant 3.200000e+01 : f32
    %301 = vector.broadcast %cst_116 : f32 to vector<56x1xf32>
    %302 = arith.divf %300, %301 : vector<56x1xf32>
    %cst_117 = arith.constant 9.99999974E-6 : f32
    %303 = vector.broadcast %cst_117 : f32 to vector<56x1xf32>
    %304 = arith.addf %302, %303 : vector<56x1xf32>
    %305 = math.rsqrt %304 : vector<56x1xf32>
    %306 = vector.broadcast %305 : vector<56x1xf32> to vector<56x32xf32>
    %307 = arith.mulf %297, %306 : vector<56x32xf32>
    %308 = arith.mulf %307, %187 : vector<56x32xf32>
    %309 = arith.addf %308, %190 : vector<56x32xf32>
    %310 = arith.addf %309, %1 : vector<56x32xf32>
    %cst_118 = arith.constant dense<0.000000e+00> : vector<56x32xf32>
    %311 = tpu.matmul %310, %14, %cst_118 {dimension_numbers = #tpu.dot_dimension_numbers<[1], [0], [0], [1], [0, 0, 1, 1], [], []>} : vector<56x32xf32>, vector<32x32xf32>, vector<56x32xf32> -> vector<56x32xf32>
    %312 = arith.addf %311, %166 : vector<56x32xf32>
    %cst_119 = arith.constant 0.176776692 : f32
    %313 = vector.broadcast %cst_119 : f32 to vector<56x32xf32>
    %314 = arith.mulf %312, %313 : vector<56x32xf32>
    %cst_120 = arith.constant dense<0xFF800000> : vector<56xf32>
    %315 = vector.multi_reduction <maximumf>, %314, %cst_120 [1] : vector<56x32xf32> to vector<56xf32>
    %316 = vector.shape_cast %315 : vector<56xf32> to vector<56x1xf32>
    %317 = vector.broadcast %316 : vector<56x1xf32> to vector<56x32xf32>
    %318 = arith.subf %314, %317 : vector<56x32xf32>
    %319 = math.exp %318 : vector<56x32xf32>
    %cst_121 = arith.constant dense<0.000000e+00> : vector<56xf32>
    %320 = vector.multi_reduction <add>, %319, %cst_121 [1] : vector<56x32xf32> to vector<56xf32>
    %321 = vector.shape_cast %320 : vector<56xf32> to vector<56x1xf32>
    %322 = vector.broadcast %321 : vector<56x1xf32> to vector<56x32xf32>
    %323 = arith.divf %319, %322 : vector<56x32xf32>
    %324 = arith.mulf %323, %198 : vector<56x32xf32>
    %cst_122 = arith.constant dense<0.000000e+00> : vector<56xf32>
    %325 = vector.multi_reduction <add>, %324, %cst_122 [1] : vector<56x32xf32> to vector<56xf32>
    %326 = vector.shape_cast %325 : vector<56xf32> to vector<56x1xf32>
    %cst_123 = arith.constant 3.200000e+01 : f32
    %327 = vector.broadcast %cst_123 : f32 to vector<56x1xf32>
    %328 = arith.divf %326, %327 : vector<56x1xf32>
    %329 = vector.broadcast %328 : vector<56x1xf32> to vector<56x32xf32>
    %330 = arith.subf %324, %329 : vector<56x32xf32>
    %331 = arith.mulf %330, %330 : vector<56x32xf32>
    %cst_124 = arith.constant dense<0.000000e+00> : vector<56xf32>
    %332 = vector.multi_reduction <add>, %331, %cst_124 [1] : vector<56x32xf32> to vector<56xf32>
    %333 = vector.shape_cast %332 : vector<56xf32> to vector<56x1xf32>
    %cst_125 = arith.constant 3.200000e+01 : f32
    %334 = vector.broadcast %cst_125 : f32 to vector<56x1xf32>
    %335 = arith.divf %333, %334 : vector<56x1xf32>
    %cst_126 = arith.constant 9.99999974E-6 : f32
    %336 = vector.broadcast %cst_126 : f32 to vector<56x1xf32>
    %337 = arith.addf %335, %336 : vector<56x1xf32>
    %338 = math.rsqrt %337 : vector<56x1xf32>
    %339 = vector.broadcast %338 : vector<56x1xf32> to vector<56x32xf32>
    %340 = arith.mulf %330, %339 : vector<56x32xf32>
    %341 = arith.mulf %340, %172 : vector<56x32xf32>
    %342 = arith.addf %341, %174 : vector<56x32xf32>
    %cst_127 = arith.constant dense<0.000000e+00> : vector<56x64xf32>
    %343 = tpu.matmul %342, %20, %cst_127 {dimension_numbers = #tpu.dot_dimension_numbers<[1], [0], [0], [1], [0, 0, 1, 1], [], []>} : vector<56x32xf32>, vector<32x64xf32>, vector<56x64xf32> -> vector<56x64xf32>
    %344 = arith.addf %343, %176 : vector<56x64xf32>
    %cst_128 = arith.constant 0.000000e+00 : f32
    %345 = vector.broadcast %cst_128 : f32 to vector<56x64xf32>
    %346 = arith.maximumf %344, %345 : vector<56x64xf32>
    %cst_129 = arith.constant dense<0.000000e+00> : vector<56x32xf32>
    %347 = tpu.matmul %346, %22, %cst_129 {dimension_numbers = #tpu.dot_dimension_numbers<[1], [0], [0], [1], [0, 0, 1, 1], [], []>} : vector<56x64xf32>, vector<64x32xf32>, vector<56x32xf32> -> vector<56x32xf32>
    %348 = arith.addf %347, %178 : vector<56x32xf32>
    %349 = arith.addf %342, %348 : vector<56x32xf32>
    %cst_130 = arith.constant dense<0.000000e+00> : vector<56xf32>
    %350 = vector.multi_reduction <add>, %349, %cst_130 [1] : vector<56x32xf32> to vector<56xf32>
    %351 = vector.shape_cast %350 : vector<56xf32> to vector<56x1xf32>
    %cst_131 = arith.constant 3.200000e+01 : f32
    %352 = vector.broadcast %cst_131 : f32 to vector<56x1xf32>
    %353 = arith.divf %351, %352 : vector<56x1xf32>
    %354 = vector.broadcast %353 : vector<56x1xf32> to vector<56x32xf32>
    %355 = arith.subf %349, %354 : vector<56x32xf32>
    %356 = arith.mulf %355, %355 : vector<56x32xf32>
    %cst_132 = arith.constant dense<0.000000e+00> : vector<56xf32>
    %357 = vector.multi_reduction <add>, %356, %cst_132 [1] : vector<56x32xf32> to vector<56xf32>
    %358 = vector.shape_cast %357 : vector<56xf32> to vector<56x1xf32>
    %cst_133 = arith.constant 3.200000e+01 : f32
    %359 = vector.broadcast %cst_133 : f32 to vector<56x1xf32>
    %360 = arith.divf %358, %359 : vector<56x1xf32>
    %cst_134 = arith.constant 9.99999974E-6 : f32
    %361 = vector.broadcast %cst_134 : f32 to vector<56x1xf32>
    %362 = arith.addf %360, %361 : vector<56x1xf32>
    %363 = math.rsqrt %362 : vector<56x1xf32>
    %364 = vector.broadcast %363 : vector<56x1xf32> to vector<56x32xf32>
    %365 = arith.mulf %355, %364 : vector<56x32xf32>
    %366 = arith.mulf %365, %193 : vector<56x32xf32>
    %367 = arith.addf %366, %196 : vector<56x32xf32>
    %c0_135 = arith.constant 0 : index
    %c0_136 = arith.constant 0 : index
    %c0_137 = arith.constant 0 : index
    %368 = vector.load %arg26[%c0_135, %c0_136, %c0_137] : memref<2x56x32xf32, #tpu.memory_space<vmem>>, vector<1x56x32xf32>
    %369 = vector.shape_cast %368 : vector<1x56x32xf32> to vector<56x32xf32>
    %370 = vector.shape_cast %342 : vector<56x32xf32> to vector<1x56x32xf32>
    tpu.vector_store %arg26[%c0_135, %c0_136, %c0_137], %370 {strides = array<i32>} : memref<2x56x32xf32, #tpu.memory_space<vmem>>, vector<1x56x32xf32>,
    %371 = arith.addf %367, %1 : vector<56x32xf32>
    %cst_138 = arith.constant dense<0.000000e+00> : vector<56x32xf32>
    %372 = tpu.matmul %371, %4, %cst_138 {dimension_numbers = #tpu.dot_dimension_numbers<[1], [0], [0], [1], [0, 0, 1, 1], [], []>} : vector<56x32xf32>, vector<32x32xf32>, vector<56x32xf32> -> vector<56x32xf32>
    %373 = arith.addf %372, %160 : vector<56x32xf32>
    %374 = vector.extract_strided_slice %373 {offsets = [0, 0], sizes = [56, 16], strides = [1, 1]} : vector<56x32xf32> to vector<56x16xf32>
    %cst_139 = arith.constant 2.500000e-01 : f32
    %375 = vector.broadcast %cst_139 : f32 to vector<56x16xf32>
    %376 = arith.mulf %374, %375 : vector<56x16xf32>
    %cst_140 = arith.constant dense<0.000000e+00> : vector<56x56xf32>
    %377 = tpu.matmul %376, %119, %cst_140 {dimension_numbers = #tpu.dot_dimension_numbers<[1], [0], [0], [1], [0, 0, 1, 1], [], []>} : vector<56x16xf32>, vector<16x56xf32>, vector<56x56xf32> -> vector<56x56xf32>
    %378 = arith.addf %377, %70 : vector<56x56xf32>
    %cst_141 = arith.constant dense<0xFF800000> : vector<56xf32>
    %379 = vector.multi_reduction <maximumf>, %378, %cst_141 [1] : vector<56x56xf32> to vector<56xf32>
    %380 = vector.shape_cast %379 : vector<56xf32> to vector<56x1xf32>
    %381 = vector.broadcast %380 : vector<56x1xf32> to vector<56x56xf32>
    %382 = arith.subf %378, %381 : vector<56x56xf32>
    %383 = math.exp %382 : vector<56x56xf32>
    %cst_142 = arith.constant dense<0.000000e+00> : vector<56xf32>
    %384 = vector.multi_reduction <add>, %383, %cst_142 [1] : vector<56x56xf32> to vector<56xf32>
    %385 = vector.shape_cast %384 : vector<56xf32> to vector<56x1xf32>
    %386 = vector.broadcast %385 : vector<56x1xf32> to vector<56x56xf32>
    %387 = arith.divf %383, %386 : vector<56x56xf32>
    %cst_143 = arith.constant dense<0.000000e+00> : vector<56x16xf32>
    %388 = tpu.matmul %387, %121, %cst_143 {dimension_numbers = #tpu.dot_dimension_numbers<[1], [0], [0], [1], [0, 0, 1, 1], [], []>} : vector<56x56xf32>, vector<56x16xf32>, vector<56x16xf32> -> vector<56x16xf32>
    %cst_144 = arith.constant dense<0.000000e+00> : vector<56x32xf32>
    %389 = tpu.matmul %388, %26, %cst_144 {dimension_numbers = #tpu.dot_dimension_numbers<[1], [0], [0], [1], [0, 0, 1, 1], [], []>} : vector<56x16xf32>, vector<16x32xf32>, vector<56x32xf32> -> vector<56x32xf32>
    %390 = arith.addf %168, %389 : vector<56x32xf32>
    %391 = vector.extract_strided_slice %373 {offsets = [0, 16], sizes = [56, 16], strides = [1, 1]} : vector<56x32xf32> to vector<56x16xf32>
    %cst_145 = arith.constant 2.500000e-01 : f32
    %392 = vector.broadcast %cst_145 : f32 to vector<56x16xf32>
    %393 = arith.mulf %391, %392 : vector<56x16xf32>
    %cst_146 = arith.constant dense<0.000000e+00> : vector<56x56xf32>
    %394 = tpu.matmul %393, %120, %cst_146 {dimension_numbers = #tpu.dot_dimension_numbers<[1], [0], [0], [1], [0, 0, 1, 1], [], []>} : vector<56x16xf32>, vector<16x56xf32>, vector<56x56xf32> -> vector<56x56xf32>
    %395 = arith.addf %394, %70 : vector<56x56xf32>
    %cst_147 = arith.constant dense<0xFF800000> : vector<56xf32>
    %396 = vector.multi_reduction <maximumf>, %395, %cst_147 [1] : vector<56x56xf32> to vector<56xf32>
    %397 = vector.shape_cast %396 : vector<56xf32> to vector<56x1xf32>
    %398 = vector.broadcast %397 : vector<56x1xf32> to vector<56x56xf32>
    %399 = arith.subf %395, %398 : vector<56x56xf32>
    %400 = math.exp %399 : vector<56x56xf32>
    %cst_148 = arith.constant dense<0.000000e+00> : vector<56xf32>
    %401 = vector.multi_reduction <add>, %400, %cst_148 [1] : vector<56x56xf32> to vector<56xf32>
    %402 = vector.shape_cast %401 : vector<56xf32> to vector<56x1xf32>
    %403 = vector.broadcast %402 : vector<56x1xf32> to vector<56x56xf32>
    %404 = arith.divf %400, %403 : vector<56x56xf32>
    %cst_149 = arith.constant dense<0.000000e+00> : vector<56x16xf32>
    %405 = tpu.matmul %404, %122, %cst_149 {dimension_numbers = #tpu.dot_dimension_numbers<[1], [0], [0], [1], [0, 0, 1, 1], [], []>} : vector<56x56xf32>, vector<56x16xf32>, vector<56x16xf32> -> vector<56x16xf32>
    %cst_150 = arith.constant dense<0.000000e+00> : vector<56x32xf32>
    %406 = tpu.matmul %405, %27, %cst_150 {dimension_numbers = #tpu.dot_dimension_numbers<[1], [0], [0], [1], [0, 0, 1, 1], [], []>} : vector<56x16xf32>, vector<16x32xf32>, vector<56x32xf32> -> vector<56x32xf32>
    %407 = arith.addf %390, %406 : vector<56x32xf32>
    %408 = arith.addf %367, %407 : vector<56x32xf32>
    %cst_151 = arith.constant dense<0.000000e+00> : vector<56xf32>
    %409 = vector.multi_reduction <add>, %408, %cst_151 [1] : vector<56x32xf32> to vector<56xf32>
    %410 = vector.shape_cast %409 : vector<56xf32> to vector<56x1xf32>
    %cst_152 = arith.constant 3.200000e+01 : f32
    %411 = vector.broadcast %cst_152 : f32 to vector<56x1xf32>
    %412 = arith.divf %410, %411 : vector<56x1xf32>
    %413 = vector.broadcast %412 : vector<56x1xf32> to vector<56x32xf32>
    %414 = arith.subf %408, %413 : vector<56x32xf32>
    %415 = arith.mulf %414, %414 : vector<56x32xf32>
    %cst_153 = arith.constant dense<0.000000e+00> : vector<56xf32>
    %416 = vector.multi_reduction <add>, %415, %cst_153 [1] : vector<56x32xf32> to vector<56xf32>
    %417 = vector.shape_cast %416 : vector<56xf32> to vector<56x1xf32>
    %cst_154 = arith.constant 3.200000e+01 : f32
    %418 = vector.broadcast %cst_154 : f32 to vector<56x1xf32>
    %419 = arith.divf %417, %418 : vector<56x1xf32>
    %cst_155 = arith.constant 9.99999974E-6 : f32
    %420 = vector.broadcast %cst_155 : f32 to vector<56x1xf32>
    %421 = arith.addf %419, %420 : vector<56x1xf32>
    %422 = math.rsqrt %421 : vector<56x1xf32>
    %423 = vector.broadcast %422 : vector<56x1xf32> to vector<56x32xf32>
    %424 = arith.mulf %414, %423 : vector<56x32xf32>
    %425 = arith.mulf %424, %181 : vector<56x32xf32>
    %426 = arith.addf %425, %184 : vector<56x32xf32>
    %cst_156 = arith.constant dense<0.000000e+00> : vector<56x32xf32>
    %427 = tpu.matmul %426, %9, %cst_156 {dimension_numbers = #tpu.dot_dimension_numbers<[1], [0], [0], [1], [0, 0, 1, 1], [], []>} : vector<56x32xf32>, vector<32x32xf32>, vector<56x32xf32> -> vector<56x32xf32>
    %428 = arith.addf %427, %163 : vector<56x32xf32>
    %429 = vector.extract_strided_slice %428 {offsets = [0, 0], sizes = [56, 16], strides = [1, 1]} : vector<56x32xf32> to vector<56x16xf32>
    %cst_157 = arith.constant 2.500000e-01 : f32
    %430 = vector.broadcast %cst_157 : f32 to vector<56x16xf32>
    %431 = arith.mulf %429, %430 : vector<56x16xf32>
    %cst_158 = arith.constant dense<0.000000e+00> : vector<56x128xf32>
    %432 = tpu.matmul %431, %133, %cst_158 {dimension_numbers = #tpu.dot_dimension_numbers<[1], [0], [0], [1], [0, 0, 1, 1], [], []>} : vector<56x16xf32>, vector<16x128xf32>, vector<56x128xf32> -> vector<56x128xf32>
    %433 = arith.addf %432, %108 : vector<56x128xf32>
    %cst_159 = arith.constant dense<0xFF800000> : vector<56xf32>
    %434 = vector.multi_reduction <maximumf>, %433, %cst_159 [1] : vector<56x128xf32> to vector<56xf32>
    %435 = vector.shape_cast %434 : vector<56xf32> to vector<56x1xf32>
    %436 = vector.broadcast %435 : vector<56x1xf32> to vector<56x128xf32>
    %437 = arith.subf %433, %436 : vector<56x128xf32>
    %438 = math.exp %437 : vector<56x128xf32>
    %cst_160 = arith.constant dense<0.000000e+00> : vector<56xf32>
    %439 = vector.multi_reduction <add>, %438, %cst_160 [1] : vector<56x128xf32> to vector<56xf32>
    %440 = vector.shape_cast %439 : vector<56xf32> to vector<56x1xf32>
    %441 = vector.broadcast %440 : vector<56x1xf32> to vector<56x128xf32>
    %442 = arith.divf %438, %441 : vector<56x128xf32>
    %cst_161 = arith.constant dense<0.000000e+00> : vector<56x16xf32>
    %443 = tpu.matmul %442, %135, %cst_161 {dimension_numbers = #tpu.dot_dimension_numbers<[1], [0], [0], [1], [0, 0, 1, 1], [], []>} : vector<56x128xf32>, vector<128x16xf32>, vector<56x16xf32> -> vector<56x16xf32>
    %cst_162 = arith.constant dense<0.000000e+00> : vector<56x32xf32>
    %444 = tpu.matmul %443, %28, %cst_162 {dimension_numbers = #tpu.dot_dimension_numbers<[1], [0], [0], [1], [0, 0, 1, 1], [], []>} : vector<56x16xf32>, vector<16x32xf32>, vector<56x32xf32> -> vector<56x32xf32>
    %445 = arith.addf %170, %444 : vector<56x32xf32>
    %446 = vector.extract_strided_slice %428 {offsets = [0, 16], sizes = [56, 16], strides = [1, 1]} : vector<56x32xf32> to vector<56x16xf32>
    %cst_163 = arith.constant 2.500000e-01 : f32
    %447 = vector.broadcast %cst_163 : f32 to vector<56x16xf32>
    %448 = arith.mulf %446, %447 : vector<56x16xf32>
    %cst_164 = arith.constant dense<0.000000e+00> : vector<56x128xf32>
    %449 = tpu.matmul %448, %134, %cst_164 {dimension_numbers = #tpu.dot_dimension_numbers<[1], [0], [0], [1], [0, 0, 1, 1], [], []>} : vector<56x16xf32>, vector<16x128xf32>, vector<56x128xf32> -> vector<56x128xf32>
    %450 = arith.addf %449, %108 : vector<56x128xf32>
    %cst_165 = arith.constant dense<0xFF800000> : vector<56xf32>
    %451 = vector.multi_reduction <maximumf>, %450, %cst_165 [1] : vector<56x128xf32> to vector<56xf32>
    %452 = vector.shape_cast %451 : vector<56xf32> to vector<56x1xf32>
    %453 = vector.broadcast %452 : vector<56x1xf32> to vector<56x128xf32>
    %454 = arith.subf %450, %453 : vector<56x128xf32>
    %455 = math.exp %454 : vector<56x128xf32>
    %cst_166 = arith.constant dense<0.000000e+00> : vector<56xf32>
    %456 = vector.multi_reduction <add>, %455, %cst_166 [1] : vector<56x128xf32> to vector<56xf32>
    %457 = vector.shape_cast %456 : vector<56xf32> to vector<56x1xf32>
    %458 = vector.broadcast %457 : vector<56x1xf32> to vector<56x128xf32>
    %459 = arith.divf %455, %458 : vector<56x128xf32>
    %cst_167 = arith.constant dense<0.000000e+00> : vector<56x16xf32>
    %460 = tpu.matmul %459, %136, %cst_167 {dimension_numbers = #tpu.dot_dimension_numbers<[1], [0], [0], [1], [0, 0, 1, 1], [], []>} : vector<56x128xf32>, vector<128x16xf32>, vector<56x16xf32> -> vector<56x16xf32>
    %cst_168 = arith.constant dense<0.000000e+00> : vector<56x32xf32>
    %461 = tpu.matmul %460, %29, %cst_168 {dimension_numbers = #tpu.dot_dimension_numbers<[1], [0], [0], [1], [0, 0, 1, 1], [], []>} : vector<56x16xf32>, vector<16x32xf32>, vector<56x32xf32> -> vector<56x32xf32>
    %462 = arith.addf %445, %461 : vector<56x32xf32>
    %463 = arith.addf %426, %462 : vector<56x32xf32>
    %cst_169 = arith.constant dense<0.000000e+00> : vector<56xf32>
    %464 = vector.multi_reduction <add>, %463, %cst_169 [1] : vector<56x32xf32> to vector<56xf32>
    %465 = vector.shape_cast %464 : vector<56xf32> to vector<56x1xf32>
    %cst_170 = arith.constant 3.200000e+01 : f32
    %466 = vector.broadcast %cst_170 : f32 to vector<56x1xf32>
    %467 = arith.divf %465, %466 : vector<56x1xf32>
    %468 = vector.broadcast %467 : vector<56x1xf32> to vector<56x32xf32>
    %469 = arith.subf %463, %468 : vector<56x32xf32>
    %470 = arith.mulf %469, %469 : vector<56x32xf32>
    %cst_171 = arith.constant dense<0.000000e+00> : vector<56xf32>
    %471 = vector.multi_reduction <add>, %470, %cst_171 [1] : vector<56x32xf32> to vector<56xf32>
    %472 = vector.shape_cast %471 : vector<56xf32> to vector<56x1xf32>
    %cst_172 = arith.constant 3.200000e+01 : f32
    %473 = vector.broadcast %cst_172 : f32 to vector<56x1xf32>
    %474 = arith.divf %472, %473 : vector<56x1xf32>
    %cst_173 = arith.constant 9.99999974E-6 : f32
    %475 = vector.broadcast %cst_173 : f32 to vector<56x1xf32>
    %476 = arith.addf %474, %475 : vector<56x1xf32>
    %477 = math.rsqrt %476 : vector<56x1xf32>
    %478 = vector.broadcast %477 : vector<56x1xf32> to vector<56x32xf32>
    %479 = arith.mulf %469, %478 : vector<56x32xf32>
    %480 = arith.mulf %479, %187 : vector<56x32xf32>
    %481 = arith.addf %480, %190 : vector<56x32xf32>
    %482 = arith.addf %481, %1 : vector<56x32xf32>
    %cst_174 = arith.constant dense<0.000000e+00> : vector<56x32xf32>
    %483 = tpu.matmul %482, %14, %cst_174 {dimension_numbers = #tpu.dot_dimension_numbers<[1], [0], [0], [1], [0, 0, 1, 1], [], []>} : vector<56x32xf32>, vector<32x32xf32>, vector<56x32xf32> -> vector<56x32xf32>
    %484 = arith.addf %483, %166 : vector<56x32xf32>
    %cst_175 = arith.constant 0.176776692 : f32
    %485 = vector.broadcast %cst_175 : f32 to vector<56x32xf32>
    %486 = arith.mulf %484, %485 : vector<56x32xf32>
    %cst_176 = arith.constant dense<0xFF800000> : vector<56xf32>
    %487 = vector.multi_reduction <maximumf>, %486, %cst_176 [1] : vector<56x32xf32> to vector<56xf32>
    %488 = vector.shape_cast %487 : vector<56xf32> to vector<56x1xf32>
    %489 = vector.broadcast %488 : vector<56x1xf32> to vector<56x32xf32>
    %490 = arith.subf %486, %489 : vector<56x32xf32>
    %491 = math.exp %490 : vector<56x32xf32>
    %cst_177 = arith.constant dense<0.000000e+00> : vector<56xf32>
    %492 = vector.multi_reduction <add>, %491, %cst_177 [1] : vector<56x32xf32> to vector<56xf32>
    %493 = vector.shape_cast %492 : vector<56xf32> to vector<56x1xf32>
    %494 = vector.broadcast %493 : vector<56x1xf32> to vector<56x32xf32>
    %495 = arith.divf %491, %494 : vector<56x32xf32>
    %496 = arith.mulf %495, %198 : vector<56x32xf32>
    %cst_178 = arith.constant dense<0.000000e+00> : vector<56xf32>
    %497 = vector.multi_reduction <add>, %496, %cst_178 [1] : vector<56x32xf32> to vector<56xf32>
    %498 = vector.shape_cast %497 : vector<56xf32> to vector<56x1xf32>
    %cst_179 = arith.constant 3.200000e+01 : f32
    %499 = vector.broadcast %cst_179 : f32 to vector<56x1xf32>
    %500 = arith.divf %498, %499 : vector<56x1xf32>
    %501 = vector.broadcast %500 : vector<56x1xf32> to vector<56x32xf32>
    %502 = arith.subf %496, %501 : vector<56x32xf32>
    %503 = arith.mulf %502, %502 : vector<56x32xf32>
    %cst_180 = arith.constant dense<0.000000e+00> : vector<56xf32>
    %504 = vector.multi_reduction <add>, %503, %cst_180 [1] : vector<56x32xf32> to vector<56xf32>
    %505 = vector.shape_cast %504 : vector<56xf32> to vector<56x1xf32>
    %cst_181 = arith.constant 3.200000e+01 : f32
    %506 = vector.broadcast %cst_181 : f32 to vector<56x1xf32>
    %507 = arith.divf %505, %506 : vector<56x1xf32>
    %cst_182 = arith.constant 9.99999974E-6 : f32
    %508 = vector.broadcast %cst_182 : f32 to vector<56x1xf32>
    %509 = arith.addf %507, %508 : vector<56x1xf32>
    %510 = math.rsqrt %509 : vector<56x1xf32>
    %511 = vector.broadcast %510 : vector<56x1xf32> to vector<56x32xf32>
    %512 = arith.mulf %502, %511 : vector<56x32xf32>
    %513 = arith.mulf %512, %172 : vector<56x32xf32>
    %514 = arith.addf %513, %174 : vector<56x32xf32>
    %c1 = arith.constant 1 : index
    %c0_183 = arith.constant 0 : index
    %c0_184 = arith.constant 0 : index
    %515 = vector.load %arg26[%c1, %c0_183, %c0_184] : memref<2x56x32xf32, #tpu.memory_space<vmem>>, vector<1x56x32xf32>
    %516 = vector.shape_cast %515 : vector<1x56x32xf32> to vector<56x32xf32>
    %517 = vector.shape_cast %514 : vector<56x32xf32> to vector<1x56x32xf32>
    tpu.vector_store %arg26[%c1, %c0_183, %c0_184], %517 {strides = array<i32>} : memref<2x56x32xf32, #tpu.memory_space<vmem>>, vector<1x56x32xf32>,
    return
  }
}

</mosaic_0001>

<bundles_post_ra>
// kernel: tile.9
= control target key start
LH: loop header
LB: loop body
LE: loop exit
PB: predicated region body
PF: predicated region fallthrough
CT: control target
= control target key end

     0   :  { %vm136_vm0 = vcmask 261120   ;;  %s544_s0 = inlined_call_operand.vmem [shape: f32[3,9,1,2,32], index: 0, kind: input, shape index: {}]   ;;  %s545_s1 = inlined_call_operand.vmem [shape: f32[54,32], index: 1, kind: output, shape index: {}]  }
   0x1   :  { %v293_v0 = vld [vmem:[%s544_s0 + $0x34] sm:$0x3]  ;;  %v294_v1 = vld [vmem:[%s544_s0 + $0x32] sm:$0x3]  ;;  %v295_v2 = vld [vmem:[%s544_s0 + $0x30] sm:$0x3] }
   0x2   :  { %8 = vst [vmem:[#allocation0 + $0xd0] sm:$0x3] %v293_v0  ;;  %13 = vst [vmem:[#allocation0 + $0xc8] sm:$0x3] %v294_v1  ;;  %v296_v3 = vld [vmem:[%s544_s0 + $0x2e] sm:$0x3] }
   0x3   :  { %18 = vst [vmem:[#allocation0 + $0xc0] sm:$0x3] %v295_v2  ;;  %v297_v4 = vld [vmem:[%s544_s0 + $0x2c] sm:$0x3]  ;;  %v298_v5 = vld [vmem:[%s544_s0 + $0x2a] sm:$0x3] }
   0x4   :  { %23 = vst [vmem:[#allocation0 + $0xb8] sm:$0x3] %v296_v3  ;;  %28 = vst [vmem:[#allocation0 + $0xb0] sm:$0x3] %v297_v4  ;;  %v299_v6 = vld [vmem:[%s544_s0 + $0x28] sm:$0x3] }
   0x5   :  { %33 = vst [vmem:[#allocation0 + $0xa8] sm:$0x3] %v298_v5  ;;  %v300_v7 = vld [vmem:[%s544_s0 + $0x26] sm:$0x3]  ;;  %v301_v8 = vld [vmem:[%s544_s0 + $0x24] sm:$0x3] }
   0x6   :  { %38 = vst [vmem:[#allocation0 + $0xa0] sm:$0x3] %v299_v6  ;;  %43 = vst [vmem:[#allocation0 + $0x98] sm:$0x3] %v300_v7  ;;  %v302_v9 = vld [vmem:[%s544_s0 + $0x22] sm:$0x3] }
   0x7   :  { %48 = vst [vmem:[#allocation0 + $0x90] sm:$0x3] %v301_v8  ;;  %v303_v10 = vld [vmem:[%s544_s0 + $0x20] sm:$0x3]  ;;  %v304_v11 = vld [vmem:[%s544_s0 + $0x1e] sm:$0x3] }
   0x8   :  { %53 = vst [vmem:[#allocation0 + $0x88] sm:$0x3] %v302_v9  ;;  %58 = vst [vmem:[#allocation0 + $0x80] sm:$0x3] %v303_v10  ;;  %v305_v12 = vld [vmem:[%s544_s0 + $0x1c] sm:$0x3] }
   0x9   :  { %63 = vst [vmem:[#allocation0 + $0x78] sm:$0x3] %v304_v11  ;;  %v306_v13 = vld [vmem:[%s544_s0 + $0x1a] sm:$0x3]  ;;  %v307_v14 = vld [vmem:[%s544_s0 + $0x18] sm:$0x3] }
   0xa   :  { %68 = vst [vmem:[#allocation0 + $0x70] sm:$0x3] %v305_v12  ;;  %73 = vst [vmem:[#allocation0 + $0x68] sm:$0x3] %v306_v13  ;;  %v308_v15 = vld [vmem:[%s544_s0 + $0x16] sm:$0x3] }
   0xb   :  { %78 = vst [vmem:[#allocation0 + $0x60] sm:$0x3] %v307_v14  ;;  %v309_v16 = vld [vmem:[%s544_s0 + $0x14] sm:$0x3]  ;;  %v310_v17 = vld [vmem:[%s544_s0 + $0x12] sm:$0x3] }
   0xc   :  { %83 = vst [vmem:[#allocation0 + $0x58] sm:$0x3] %v308_v15  ;;  %88 = vst [vmem:[#allocation0 + $0x50] sm:$0x3] %v309_v16  ;;  %v311_v18 = vld [vmem:[%s544_s0 + $0x10] sm:$0x3] }
   0xd   :  { %93 = vst [vmem:[#allocation0 + $0x48] sm:$0x3] %v310_v17  ;;  %v312_v19 = vld [vmem:[%s544_s0 + $0xe] sm:$0x3]  ;;  %v313_v20 = vld [vmem:[%s544_s0 + $0xc] sm:$0x3] }
   0xe   :  { %98 = vst [vmem:[#allocation0 + $0x40] sm:$0x3] %v311_v18  ;;  %103 = vst [vmem:[#allocation0 + $0x38] sm:$0x3] %v312_v19  ;;  %v314_v21 = vld [vmem:[%s544_s0 + $0xa] sm:$0x3] }
   0xf   :  { %108 = vst [vmem:[#allocation0 + $0x30] sm:$0x3] %v313_v20  ;;  %v315_v22 = vld [vmem:[%s544_s0 + $0x8] sm:$0x3]  ;;  %v316_v23 = vld [vmem:[%s544_s0 + $0x6] sm:$0x3] }
  0x10   :  { %113 = vst [vmem:[#allocation0 + $0x28] sm:$0x3] %v314_v21  ;;  %118 = vst [vmem:[#allocation0 + $0x20] sm:$0x3] %v315_v22  ;;  %v317_v24 = vld [vmem:[%s544_s0 + $0x4] sm:$0x3] }
  0x11   :  { %123 = vst [vmem:[#allocation0 + $0x18] sm:$0x3] %v316_v23  ;;  %v318_v25 = vld [vmem:[%s544_s0 + $0x2] sm:$0x3]  ;;  %v133_v26 = vld [vmem:[%s544_s0] sm:$0x3] }
  0x12   :  { %128 = vst [vmem:[#allocation0 + $0x10] sm:$0x3] %v317_v24  ;;  %132 = vst [vmem:[#allocation0 + $0x8] sm:$0x3] %v318_v25  ;;  %v239_v27 = vld [vmem:[#allocation0 + $0xa8] sm:$0x3]  }
  0x13   :  { %134 = vst [vmem:[#allocation0] sm:$0x3] %v133_v26  ;;  %v244_v28 = vld [vmem:[#allocation0 + $0xb0] sm:$0x3]   ;;  %v229_v30 = vld [vmem:[#allocation0 + $0x98] sm:$0x3]  }
  0x14   :  { %v224_v29 = vld [vmem:[#allocation0 + $0x90] sm:$0x3]   ;;  %v234_v31 = vld [vmem:[#allocation0 + $0xa0] sm:$0x3]   ;;  %339 = vst.msk [vmem:[%s545_s1 + $0x2a] sm:$0x3] %vm136_vm0, %v239_v27  }
  0x15   :  { %340 = vst.msk [vmem:[%s545_s1 + $0x2c] sm:$0x3] %vm136_vm0, %v244_v28   ;;  %v209_v32 = vld [vmem:[#allocation0 + $0x78] sm:$0x3]   ;;  %v214_v33 = vld [vmem:[#allocation0 + $0x80] sm:$0x3]  }
  0x16   :  { %v219_v34 = vld [vmem:[#allocation0 + $0x88] sm:$0x3]   ;;  %336 = vst.msk [vmem:[%s545_s1 + $0x24] sm:$0x3] %vm136_vm0, %v224_v29   ;;  %337 = vst.msk [vmem:[%s545_s1 + $0x26] sm:$0x3] %vm136_vm0, %v229_v30  }
  0x17   :  { %338 = vst.msk [vmem:[%s545_s1 + $0x28] sm:$0x3] %vm136_vm0, %v234_v31   ;;  %v194_v35 = vld [vmem:[#allocation0 + $0x60] sm:$0x3]   ;;  %v199_v36 = vld [vmem:[#allocation0 + $0x68] sm:$0x3]  }
  0x18   :  { %v204_v37 = vld [vmem:[#allocation0 + $0x70] sm:$0x3]   ;;  %333 = vst.msk [vmem:[%s545_s1 + $0x1e] sm:$0x3] %vm136_vm0, %v209_v32   ;;  %334 = vst.msk [vmem:[%s545_s1 + $0x20] sm:$0x3] %vm136_vm0, %v214_v33  }
  0x19   :  { %335 = vst.msk [vmem:[%s545_s1 + $0x22] sm:$0x3] %vm136_vm0, %v219_v34   ;;  %v179_v38 = vld [vmem:[#allocation0 + $0x48] sm:$0x3]   ;;  %v184_v39 = vld [vmem:[#allocation0 + $0x50] sm:$0x3]  }
  0x1a   :  { %v189_v40 = vld [vmem:[#allocation0 + $0x58] sm:$0x3]   ;;  %330 = vst.msk [vmem:[%s545_s1 + $0x18] sm:$0x3] %vm136_vm0, %v194_v35   ;;  %331 = vst.msk [vmem:[%s545_s1 + $0x1a] sm:$0x3] %vm136_vm0, %v199_v36  }
  0x1b   :  { %332 = vst.msk [vmem:[%s545_s1 + $0x1c] sm:$0x3] %vm136_vm0, %v204_v37   ;;  %v164_v41 = vld [vmem:[#allocation0 + $0x30] sm:$0x3]   ;;  %v169_v42 = vld [vmem:[#allocation0 + $0x38] sm:$0x3]  }
  0x1c   :  { %v174_v43 = vld [vmem:[#allocation0 + $0x40] sm:$0x3]   ;;  %327 = vst.msk [vmem:[%s545_s1 + $0x12] sm:$0x3] %vm136_vm0, %v179_v38   ;;  %328 = vst.msk [vmem:[%s545_s1 + $0x14] sm:$0x3] %vm136_vm0, %v184_v39  }
  0x1d   :  { %329 = vst.msk [vmem:[%s545_s1 + $0x16] sm:$0x3] %vm136_vm0, %v189_v40   ;;  %v149_v44 = vld [vmem:[#allocation0 + $0x18] sm:$0x3]   ;;  %v154_v45 = vld [vmem:[#allocation0 + $0x20] sm:$0x3]  }
  0x1e   :  { %v159_v46 = vld [vmem:[#allocation0 + $0x28] sm:$0x3]   ;;  %324 = vst.msk [vmem:[%s545_s1 + $0xc] sm:$0x3] %vm136_vm0, %v164_v41   ;;  %325 = vst.msk [vmem:[%s545_s1 + $0xe] sm:$0x3] %vm136_vm0, %v169_v42  }
  0x1f   :  { %326 = vst.msk [vmem:[%s545_s1 + $0x10] sm:$0x3] %vm136_vm0, %v174_v43   ;;  %v135_v47 = vld [vmem:[#allocation0] sm:$0x3]   ;;  %v139_v48 = vld [vmem:[#allocation0 + $0x8] sm:$0x3]  }
  0x20   :  { %v144_v49 = vld [vmem:[#allocation0 + $0x10] sm:$0x3]   ;;  %321 = vst.msk [vmem:[%s545_s1 + $0x6] sm:$0x3] %vm136_vm0, %v149_v44   ;;  %322 = vst.msk [vmem:[%s545_s1 + $0x8] sm:$0x3] %vm136_vm0, %v154_v45  }
  0x21   :  { %323 = vst.msk [vmem:[%s545_s1 + $0xa] sm:$0x3] %vm136_vm0, %v159_v46   ;;  %137 = vst.msk [vmem:[%s545_s1] sm:$0x3] %vm136_vm0, %v135_v47   ;;  %v249_v50 = vld [vmem:[#allocation0 + $0xb8] sm:$0x3]  }
  0x22   :  { %319 = vst.msk [vmem:[%s545_s1 + $0x2] sm:$0x3] %vm136_vm0, %v139_v48   ;;  %320 = vst.msk [vmem:[%s545_s1 + $0x4] sm:$0x3] %vm136_vm0, %v144_v49   ;;  %v254_v51 = vld [vmem:[#allocation0 + $0xc0] sm:$0x3]  }
  0x23   :  { %v259_v52 = vld [vmem:[#allocation0 + $0xc8] sm:$0x3]   ;;  %341 = vst.msk [vmem:[%s545_s1 + $0x2e] sm:$0x3] %vm136_vm0, %v249_v50   ;;  %342 = vst.msk [vmem:[%s545_s1 + $0x30] sm:$0x3] %vm136_vm0, %v254_v51  }
  0x24   :  { %343 = vst.msk [vmem:[%s545_s1 + $0x32] sm:$0x3] %vm136_vm0, %v259_v52   ;;  %v264_v53 = vld [vmem:[#allocation0 + $0xd0] sm:$0x3]  }
  0x25   :  { %344 = vst.msk [vmem:[%s545_s1 + $0x34] sm:$0x3] %vm136_vm0, %v264_v53  }

// kernel: iefl_forward.1
= control target key start
LH: loop header
LB: loop body
LE: loop exit
PB: predicated region body
PF: predicated region fallthrough
CT: control target
= control target key end

     0   :  { %v13095_v0 = vmov 0.0|0.0   ;;  %vm9697_vm0 = vmmov 0   ;;  %v13093_v4 = vmov 0.0   ;;  %vm323_vm1 = vcmask 261120   ;;  %s9699_s29 = smov 32   ;;  %s13055_s5 = inlined_call_operand.vmem [shape: f32[32,64], index: 5, kind: input, shape index: {}]   ;;  %s13056_s15 = inlined_call_operand.vmem [shape: f32[32,32], index: 15, kind: input, shape index: {}]   ;;  %s13057_s0 = inlined_call_operand.vmem [shape: f32[56,32], index: 0, kind: input, shape index: {}]   ;;  %s13058_s2 = inlined_call_operand.vmem [shape: f32[128,32], index: 2, kind: input, shape index: {}]   ;;  %s13059_s10 = inlined_call_operand.vmem [shape: f32[32,64], index: 10, kind: input, shape index: {}]   ;;  %s13060_s16 = inlined_call_operand.vmem [shape: f32[32,32], index: 16, kind: input, shape index: {}]   ;;  %s13061_s3 = inlined_call_operand.vmem [shape: f32[128,32], index: 3, kind: input, shape index: {}]   ;;  %s13062_s4 = inlined_call_operand.vmem [shape: f32[32,32], index: 4, kind: input, shape index: {}]   ;;  %s13063_s1 = inlined_call_operand.vmem [shape: f32[56,32], index: 1, kind: input, shape index: {}]   ;;  %s13064_s6 = inlined_call_operand.vmem [shape: f32[3,32], index: 6, kind: input, shape index: {}]   ;;  %s13065_s17 = inlined_call_operand.vmem [shape: f32[3,32], index: 17, kind: input, shape index: {}]   ;;  %s13066_s7 = inlined_call_operand.vmem [shape: f32[32,32], index: 7, kind: input, shape index: {}]   ;;  %s13067_s8 = inlined_call_operand.vmem [shape: f32[1,32], index: 8, kind: input, shape index: {}]   ;;  %s13068_s9 = inlined_call_operand.vmem [shape: f32[32,32], index: 9, kind: input, shape index: {}]   ;;  %s13069_s11 = inlined_call_operand.vmem [shape: f32[3,32], index: 11, kind: input, shape index: {}]   ;;  %s13070_s24 = inlined_call_operand.vmem [shape: f32[3,32], index: 24, kind: input, shape index: {}]   ;;  %s13071_s25 = inlined_call_operand.vmem [shape: f32[3,32], index: 25, kind: input, shape index: {}]   ;;  %s13072_s12 = inlined_call_operand.vmem [shape: f32[32,32], index: 12, kind: input, shape index: {}]   ;;  %s13073_s13 = inlined_call_operand.vmem [shape: f32[1,32], index: 13, kind: input, shape index: {}]   ;;  %s13074_s14 = inlined_call_operand.vmem [shape: f32[32,32], index: 14, kind: input, shape index: {}]   ;;  %s13075_s20 = inlined_call_operand.vmem [shape: f32[32,64], index: 20, kind: input, shape index: {}]   ;;  %s13076_s22 = inlined_call_operand.vmem [shape: f32[64,32], index: 22, kind: input, shape index: {}]   ;;  %s13077_s18 = inlined_call_operand.vmem [shape: f32[1,32], index: 18, kind: input, shape index: {}]   ;;  %s13078_s19 = inlined_call_operand.vmem [shape: f32[1,32], index: 19, kind: input, shape index: {}]   ;;  %s13079_s26 = inlined_call_operand.vmem [shape: f32[2,56,32], index: 26, kind: output, shape index: {}]   ;;  %s13080_s21 = inlined_call_operand.vmem [shape: f32[1,64], index: 21, kind: input, shape index: {}]   ;;  %s13081_s23 = inlined_call_operand.vmem [shape: f32[1,32], index: 23, kind: input, shape index: {}]  }
   0x1   :  { %13171 = sst [smem:[#allocation38_spill]] %s13055_s5  ;;  %8865 = vmatprep.subr.bf16.mxu0 %v13095_v0  ;;  %7756 = vmatprep.mubr.msk.f32.mxu0 %vm9697_vm0, %v13093_v4  ;;  %vm1533_vm2 = vcmask 130048   ;;  %vm1655_vm8 = vcmask 457728  }
   0x2   :  { %13172 = sst [smem:[#allocation39_spill]] %s13056_s15  ;;  %s13182_s15 = sld [smem:[#allocation38_spill]] }
   0x3   :  { %13173 = sst [smem:[#allocation40_spill]] %s13057_s0  ;;  %s9700_s0 = smov 96  }
   0x4   :  { %13174 = sst [smem:[#allocation41_spill]] %s13058_s2  ;;  %s13184_s28 = sld [smem:[#allocation40_spill]] }
   0x5   :  { %13175 = sst [smem:[#allocation42_spill]] %s13059_s10 }
   0x6   :  { %13176 = sst [smem:[#allocation43_spill]] %s13060_s16  ;;  %s13183_s16 = sld [smem:[#allocation39_spill]] }
   0x7   :  { %13177 = sst [smem:[#allocation44_spill]] %s13061_s3  ;;  %s13187_s3 = sld [smem:[#allocation43_spill]] }
   0x8   :  { %13178 = sst [smem:[#allocation45_spill]] %s13062_s4  ;;  %v133_v1 = vld [vmem:[%s13182_s15] sm:$0xff]  ;;  %v134_v2 = vld [vmem:[%s13182_s15 + $0x8] sm:$0xff]  ;;  %v135_v3 = vld [vmem:[%s13182_s15 + $0x10] sm:$0xff]  ;;  %s13186_s4 = sld [smem:[#allocation42_spill]] }
   0x9   :  { %13179 = sst [smem:[#allocation46_spill]] %s13063_s1  ;;  %v8866_v5 = vpack.c.bf16 %v134_v2, %v133_v1  ;;  %v136_v6 = vld [vmem:[%s13182_s15 + $0x18] sm:$0xff]  ;;  %s13188_s2 = sld [smem:[#allocation44_spill]] }
   0xa   :  { %13180 = sst [smem:[#allocation47_spill]] %s13064_s6  ;;  %v8869_v7 = vpack.c.bf16 %v136_v6, %v135_v3  ;;  %v9867_v12 = vld [vmem:[%s13184_s28] sm:$0xff]  ;;  %s13185_s6 = sld [smem:[#allocation41_spill]]  ;;  %v9886_v16 = vld [vmem:[%s13184_s28 + $0x8] sm:$0xff]  ;;  %v9895_v17 = vld [vmem:[%s13184_s28 + $0x10] sm:$0xff] }
   0xb   :  { %13181 = sst [smem:[#allocation48_spill]] %s13065_s17  ;;  %8867 = vmatpush3.bf16.msra.mxu0 %v8866_v5  ;;  %v9914_v21 = vld [vmem:[%s13184_s28 + $0x18] sm:$0xff]  ;;  %v9932_v27 = vld [vmem:[%s13184_s28 + $0x20] sm:$0xff]  ;;  %v9947_v31 = vld [vmem:[%s13184_s28 + $0x28] sm:$0xff]  ;;  %s13192_s27 = sld [smem:[#allocation46_spill]] }
   0xc   :  { %8868 = vmatprep.subr.bf16.mxu0 %v13095_v0  ;;  %v161_v8 = vld [vmem:[%s13183_s16] sm:$0xff]  ;;  %v162_v9 = vld [vmem:[%s13183_s16 + $0x8] sm:$0xff]  ;;  %v163_v11 = vld [vmem:[%s13183_s16 + $0x10] sm:$0xff]  ;;  %s13194_s15 = sld [smem:[#allocation47_spill]]  ;;  %s13201_s10 = sld [smem:[#allocation48_spill]] }
   0xd   :  { %v8879_v10 = vpack.c.bf16 %v162_v9, %v161_v8  ;;  %v164_v13 = vld [vmem:[%s13183_s16 + $0x18] sm:$0xff]  ;;  %v165_v25 = vld [vmem:[%s13187_s3] sm:$0xff]  ;;  %v166_v26 = vld [vmem:[%s13187_s3 + $0x8] sm:$0xff]  ;;  %s9703_s17 = smov 80  }
   0xe   :  { %v8883_v15 = vpack.c.bf16 %v164_v13, %v163_v11  ;;  %v147_v18 = vld [vmem:[%s13186_s4] sm:$0xff]  ;;  %v148_v19 = vld [vmem:[%s13186_s4 + $0x8] sm:$0xff]  ;;  %v149_v20 = vld [vmem:[%s13186_s4 + $0x10] sm:$0xff]  ;;  %v8887_v28 = vpack.c.bf16 %v166_v26, %v165_v25 }
   0xf   :  { %8870 = vmatpush3.bf16.msra.mxu0 %v8869_v7  ;;  %v8871_v22 = vpack.c.bf16 %v148_v19, %v147_v18  ;;  %v150_v23 = vld [vmem:[%s13186_s4 + $0x18] sm:$0xff]  ;;  %v167_v29 = vld [vmem:[%s13187_s3 + $0x10] sm:$0xff]  ;;  %v113_v32 = vld [vmem:[%s13188_s2] sm:$0xff] }
  0x10   :  { %v9875_v14 = vld [vmem:[%s13185_s6] sm:$0xff]  ;;  %8880 = vmatprep.subr.bf16.mxu0 %v8879_v10  ;;  %v8875_v24 = vpack.c.bf16 %v150_v23, %v149_v20  ;;  %v168_v30 = vld [vmem:[%s13187_s3 + $0x18] sm:$0xff]  ;;  %v9955_v33 = vld [vmem:[%s13185_s6 + $0x8] sm:$0xff]  ;;  %s13189_s3 = sld [smem:[#allocation45_spill]] }
  0x11   :  { %7785 = vmatprep.mubr.msk.f32.mxu1 %vm323_vm1, %v9875_v14  ;;  %8872 = vmatprep.subr.bf16.mxu1 %v8871_v22  ;;  %v8891_v34 = vpack.c.bf16 %v168_v30, %v167_v29  ;;  %v9960_v35 = vld [vmem:[%s13185_s6 + $0x10] sm:$0xff]  ;;  %v772_v37 = vadd.f32 %v113_v32, %v9875_v14  ;;  %v114_v38 = vld [vmem:[%s13188_s2 + $0x8] sm:$0xff]  ;;  %v9985_v40 = vld [vmem:[%s13185_s6 + $0x18] sm:$0xff] }
  0x12   :  { %7757 = vmatmul.mubr.msk.f32.vlgmr.msra.gmra.mrb[0].mxu0 %vm323_vm1, %v9867_v12  ;;  %8874 = vmatpush3.bf16.msra.mxu1 %v8871_v22  ;;  %v9973_v36 = vld [vmem:[%s13184_s28 + $0x30] sm:$0xff]  ;;  %v9996_v43 = vld [vmem:[%s13185_s6 + $0x20] sm:$0xff]  ;;  %v773_v44 = vadd.f32 %v114_v38, %v9955_v33  ;;  %v116_v46 = vld [vmem:[%s13188_s2 + $0x18] sm:$0xff] }
  0x13   :  { %7759 = vmatprep.mubr.msk.f32.mxu0 %vm9697_vm0, %v13093_v4  ;;  %8882 = vmatpush3.bf16.msra.mxu0 %v8879_v10  ;;  %v115_v39 = vld [vmem:[%s13188_s2 + $0x10] sm:$0xff]  ;;  %v117_v47 = vld [vmem:[%s13188_s2 + $0x20] sm:$0xff]  ;;  %v10018_v49 = vld [vmem:[%s13185_s6 + $0x28] sm:$0xff]  ;;  %v775_v53 = vadd.f32 %v116_v46, %v9985_v40 }
  0x14   :  { %8884 = vmatprep.subr.bf16.mxu0 %v8883_v15  ;;  %8876 = vmatprep.subr.bf16.mxu1 %v8875_v24  ;;  %v774_v45 = vadd.f32 %v115_v39, %v9960_v35  ;;  %v10030_v52 = vld [vmem:[%s13185_s6 + $0x30] sm:$0xff]  ;;  %v776_v54 = vadd.f32 %v117_v47, %v9996_v43  ;;  %v118_v55 = vld [vmem:[%s13188_s2 + $0x28] sm:$0xff]  ;;  %v10052_v58 = vld [vmem:[%s13185_s6 + $0x38] sm:$0xff] }
  0x15   :  { %v119_v57 = vld [vmem:[%s13188_s2 + $0x30] sm:$0xff]  ;;  %v10058_v59 = vld [vmem:[%s13185_s6 + $0x40] sm:$0xff]  ;;  %v777_v60 = vadd.f32 %v118_v55, %v10018_v49  ;;  %v120_v62 = vld [vmem:[%s13188_s2 + $0x38] sm:$0xff] }
  0x16   :  { %7760 = vmatmul.mubr.msk.f32.gmra.mrb[2].mxu0 %vm323_vm1, %v9886_v16  ;;  %8878 = vmatpush3.bf16.msra.mxu1 %v8875_v24  ;;  %v129_v41 = vld [vmem:[%s13189_s3] sm:$0xff]  ;;  %v130_v42 = vld [vmem:[%s13189_s3 + $0x8] sm:$0xff]  ;;  %v131_v50 = vld [vmem:[%s13189_s3 + $0x10] sm:$0xff]  ;;  %v778_v61 = vadd.f32 %v119_v57, %v10030_v52  ;;  %v779_v3 = vadd.f32 %v120_v62, %v10052_v58 }
  0x17   :  { %7762 = vmatprep.mubr.msk.f32.mxu0 %vm9697_vm0, %v13093_v4  ;;  %8886 = vmatpush3.bf16.msra.mxu0 %v8883_v15  ;;  %v10013_v48 = vpack.c.bf16 %v130_v42, %v129_v41  ;;  %v132_v51 = vld [vmem:[%s13189_s3 + $0x18] sm:$0xff]  ;;  %v121_v63 = vld [vmem:[%s13188_s2 + $0x40] sm:$0xff]  ;;  %v10078_v1 = vld [vmem:[%s13185_s6 + $0x48] sm:$0xff]  ;;  %s9702_s3 = smov 112  }
  0x18   :  { %8895 = vmatprep.subr.bf16.mxu0 %v13095_v0  ;;  %8888 = vmatprep.subr.bf16.mxu1 %v8887_v28  ;;  %v10044_v56 = vpack.c.bf16 %v132_v51, %v131_v50  ;;  %v10084_v2 = vld [vmem:[%s13185_s6 + $0x50] sm:$0xff]  ;;  %v780_v5 = vadd.f32 %v121_v63, %v10058_v59  ;;  %v122_v6 = vld [vmem:[%s13188_s2 + $0x48] sm:$0xff]  ;;  %v108_v8 = vld [vmem:[%s13185_s6 + $0x58] sm:$0xff] }
  0x19   :  { %7786 = vmatmul.mubr.msk.f32.vlgmr.msra.gmra.mrb[0].mxu1 %vm323_vm1, %v9955_v33  ;;  %13190 = vst [vmem:[#allocation2_spill] sm:$0xff] %v10013_v48  ;;  %v123_v7 = vld [vmem:[%s13188_s2 + $0x50] sm:$0xff]  ;;  %v109_v9 = vld [vmem:[%s13185_s6 + $0x60] sm:$0xff]  ;;  %v781_v10 = vadd.f32 %v122_v6, %v10078_v1  ;;  %v124_v13 = vld [vmem:[%s13188_s2 + $0x58] sm:$0xff] }
  0x1a   :  { %7763 = vmatmul.mubr.msk.f32.gmra.mrb[4].mxu0 %vm323_vm1, %v9895_v17  ;;  %7788 = vmatprep.mubr.msk.f32.mxu1 %vm323_vm1, %v9960_v35  ;;  %13191 = vst [vmem:[#allocation3_spill] sm:$0xff] %v10044_v56  ;;  %v782_v11 = vadd.f32 %v123_v7, %v10084_v2  ;;  %v125_v15 = vld [vmem:[%s13188_s2 + $0x60] sm:$0xff]  ;;  %v110_v18 = vld [vmem:[%s13185_s6 + $0x68] sm:$0xff]  ;;  %v111_v19 = vld [vmem:[%s13185_s6 + $0x70] sm:$0xff]  ;;  %v783_v20 = vadd.f32 %v124_v13, %v108_v8 }
  0x1b   :  { %7765 = vmatprep.mubr.msk.f32.mxu0 %vm9697_vm0, %v13093_v4  ;;  %8890 = vmatpush3.bf16.msra.mxu1 %v8887_v28  ;;  %v784_v22 = vadd.f32 %v125_v15, %v109_v9  ;;  %v126_v23 = vld [vmem:[%s13188_s2 + $0x68] sm:$0xff]  ;;  %v127_v24 = vld [vmem:[%s13188_s2 + $0x70] sm:$0xff]  ;;  %v112_v25 = vld [vmem:[%s13185_s6 + $0x78] sm:$0xff] }
  0x1c   :  { %8892 = vmatprep.subr.bf16.mxu1 %v8891_v34  ;;  %v785_v26 = vadd.f32 %v126_v23, %v110_v18  ;;  %v786_v28 = vadd.f32 %v127_v24, %v111_v19  ;;  %v128_v29 = vld [vmem:[%s13188_s2 + $0x78] sm:$0xff] }
  0x1d   :  { %7789 = vmatmul.mubr.msk.f32.gmra.mrb[2].mxu1 %vm323_vm1, %v9985_v40  ;;  %v787_v30 = vadd.f32 %v128_v29, %v112_v25 }
  0x1e   :  { %7766 = vmatmul.mubr.msk.f32.gmra.mrb[6].mxu0 %vm323_vm1, %v9914_v21  ;;  %7791 = vmatprep.mubr.msk.f32.mxu1 %vm323_vm1, %v9996_v43 }
  0x1f   :  { %7768 = vmatprep.mubr.msk.f32.mxu0 %vm9697_vm0, %v13093_v4  ;;  %8894 = vmatpush3.bf16.msra.mxu1 %v8891_v34 }
  0x20   :  { %8901 = vmatprep.subr.bf16.mxu1 %v13095_v0 }
  0x21   :  { %7792 = vmatmul.mubr.msk.f32.gmra.mrb[4].mxu1 %vm323_vm1, %v10018_v49 }
  0x22   :  { %7769 = vmatmul.mubr.msk.f32.gmra.mrb[8].mxu0 %vm323_vm1, %v9932_v27  ;;  %7794 = vmatprep.mubr.msk.f32.mxu1 %vm323_vm1, %v10030_v52 }
  0x23   :  { %7771 = vmatprep.mubr.msk.f32.mxu0 %vm9697_vm0, %v13093_v4 }
  0x25   :  { %7795 = vmatmul.mubr.msk.f32.gmra.mrb[6].mxu1 %vm323_vm1, %v10052_v58 }
  0x26   :  { %7772 = vmatmul.mubr.msk.f32.gmra.mrb[10].mxu0 %vm323_vm1, %v9947_v31  ;;  %7797 = vmatprep.mubr.msk.f32.mxu1 %vm323_vm1, %v10058_v59 }
  0x27   :  { %7774 = vmatprep.mubr.msk.f32.mxu0 %vm9697_vm0, %v13093_v4 }
  0x29   :  { %7798 = vmatmul.mubr.msk.f32.gmra.mrb[8].mxu1 %vm323_vm1, %v10078_v1 }
  0x2a   :  { %7775 = vmatmul.mubr.msk.f32.gmra.mrb[12].mxu0 %vm323_vm1, %v9973_v36  ;;  %7800 = vmatprep.mubr.msk.f32.mxu1 %vm323_vm1, %v10084_v2 }
  0x2b   :  { %7817 = vmatprep.mubr.msk.f32.mxu0 %vm323_vm1, %v772_v37 }
  0x2d   :  { %7801 = vmatmul.mubr.msk.f32.gmra.mrb[10].mxu1 %vm323_vm1, %v108_v8 }
  0x2e   :  { %7818 = vmatmul.mubr.msk.f32.vlgmr.msra.gmra.mrb[14].mxu0 %vm323_vm1, %v773_v44  ;;  %7803 = vmatprep.mubr.msk.f32.mxu1 %vm323_vm1, %v109_v9 }
  0x2f   :  { %7820 = vmatprep.mubr.msk.f32.mxu0 %vm323_vm1, %v774_v45  ;;  %8897 = vmatpush3.bf16.msra.mxu0 %v10013_v48 }
  0x30   :  { %8898 = vmatprep.subr.bf16.mxu0 %v13095_v0 }
  0x31   :  { %7804 = vmatmul.mubr.msk.f32.gmra.mrb[12].mxu1 %vm323_vm1, %v110_v18 }
  0x32   :  { %7821 = vmatmul.mubr.msk.f32.gmra.mrb[16].mxu0 %vm323_vm1, %v775_v53  ;;  %7806 = vmatprep.mubr.msk.f32.mxu1 %vm323_vm1, %v111_v19 }
  0x33   :  { %7823 = vmatprep.mubr.msk.f32.mxu0 %vm323_vm1, %v776_v54  ;;  %8900 = vmatpush3.bf16.msra.mxu0 %v10044_v56 }
  0x34   :  { %8904 = vmatprep.subr.bf16.mxu0 %v13095_v0 }
  0x35   :  { %7807 = vmatmul.mubr.msk.f32.gmra.mrb[14].mxu1 %vm323_vm1, %v112_v25 }
  0x36   :  { %7824 = vmatmul.mubr.msk.f32.gmra.mrb[18].mxu0 %vm323_vm1, %v777_v60  ;;  %7849 = vmatprep.mubr.msk.f32.mxu1 %vm323_vm1, %v9875_v14  ;;  %v90_v14 = vld [vmem:[%s13192_s27] sm:$0xff] }
  0x37   :  { %7826 = vmatprep.mubr.msk.f32.mxu0 %vm323_vm1, %v778_v61  ;;  %v1398_v32 = vadd.f32 %v90_v14, %v9867_v12  ;;  %v92_v12 = vld [vmem:[%s13192_s27 + $0x10] sm:$0xff] }
  0x39   :  { %7850 = vmatmul.mubr.msk.f32.vlgmr.msra.gmra.mrb[16].mxu1 %vm323_vm1, %v9955_v33  ;;  %v91_v33 = vld [vmem:[%s13192_s27 + $0x8] sm:$0xff] }
  0x3a   :  { %7827 = vmatmul.mubr.msk.f32.gmra.mrb[20].mxu0 %vm323_vm1, %v779_v3  ;;  %7852 = vmatprep.mubr.msk.f32.mxu1 %vm323_vm1, %v9960_v35  ;;  %v1399_v34 = vadd.f32 %v91_v33, %v9886_v16  ;;  %v1400_v35 = vadd.f32 %v92_v12, %v9895_v17  ;;  %v93_v16 = vld [vmem:[%s13192_s27 + $0x18] sm:$0xff]  ;;  %v94_v17 = vld [vmem:[%s13192_s27 + $0x20] sm:$0xff] }
  0x3b   :  { %7829 = vmatprep.mubr.msk.f32.mxu0 %vm323_vm1, %v780_v5  ;;  %v1401_v37 = vadd.f32 %v93_v16, %v9914_v21  ;;  %v1402_v38 = vadd.f32 %v94_v17, %v9932_v27  ;;  %v95_v21 = vld [vmem:[%s13192_s27 + $0x28] sm:$0xff]  ;;  %v96_v27 = vld [vmem:[%s13192_s27 + $0x30] sm:$0xff] }
  0x3c   :  { %v1403_v39 = vadd.f32 %v95_v21, %v9947_v31  ;;  %v13092_v31 = vlaneseq }
  0x3d   :  { %7853 = vmatmul.mubr.msk.f32.gmra.mrb[18].mxu1 %vm323_vm1, %v9985_v40  ;;  %v1404_v40 = vadd.f32 %v96_v27, %v9973_v36  ;;  %v10235_v36 = vld [vmem:[%s13194_s15] sm:$0x7] }
  0x3e   :  { %7830 = vmatmul.mubr.msk.f32.gmra.mrb[22].mxu0 %vm323_vm1, %v781_v10  ;;  %7855 = vmatprep.mubr.msk.f32.mxu1 %vm323_vm1, %v9996_v43  ;;  %v10227_v41 = vshrl.u32 %v13092_v31, 7 }
  0x3f   :  { %7832 = vmatprep.mubr.msk.f32.mxu0 %vm323_vm1, %v782_v11 }
  0x40   :  { %v10230_v42 = vsub.s32 1, %v10227_v41  ;;  %v10392_v0 = vsub.s32 2, %v10227_v41 }
  0x41   :  { %7856 = vmatmul.mubr.msk.f32.gmra.mrb[20].mxu1 %vm323_vm1, %v10018_v49 }
  0x42   :  { %7833 = vmatmul.mubr.msk.f32.gmra.mrb[24].mxu0 %vm323_vm1, %v783_v20  ;;  %7858 = vmatprep.mubr.msk.f32.mxu1 %vm323_vm1, %v10030_v52  ;;  %13193 = vst [vmem:[#allocation4_spill] sm:$0xff] %v10230_v42  ;;  %v448_v43 = vrot.slane %v10235_v36, %v10230_v42 }
  0x43   :  { %7835 = vmatprep.mubr.msk.f32.mxu0 %vm323_vm1, %v784_v22 }
  0x45   :  { %7859 = vmatmul.mubr.msk.f32.gmra.mrb[22].mxu1 %vm323_vm1, %v10052_v58 }
  0x46   :  { %7836 = vmatmul.mubr.msk.f32.gmra.mrb[26].mxu0 %vm323_vm1, %v785_v26  ;;  %7861 = vmatprep.mubr.msk.f32.mxu1 %vm323_vm1, %v10058_v59 }
  0x47   :  { %7838 = vmatprep.mubr.msk.f32.mxu0 %vm323_vm1, %v786_v28 }
  0x49   :  { %7862 = vmatmul.mubr.msk.f32.gmra.mrb[24].mxu1 %vm323_vm1, %v10078_v1 }
  0x4a   :  { %7839 = vmatmul.mubr.msk.f32.gmra.mrb[28].mxu0 %vm323_vm1, %v787_v30  ;;  %7864 = vmatprep.mubr.msk.f32.mxu1 %vm323_vm1, %v10084_v2 }
  0x4b   :  { %7881 = vmatprep.mubr.msk.f32.mxu0 %vm9697_vm0, %v13093_v4 }
  0x4d   :  { %7865 = vmatmul.mubr.msk.f32.gmra.mrb[26].mxu1 %vm323_vm1, %v108_v8 }
  0x4e   :  { %7882 = vmatmul.mubr.msk.f32.vlgmr.msra.gmra.mrb[30].mxu0 %vm323_vm1, %v1398_v32  ;;  %7867 = vmatprep.mubr.msk.f32.mxu1 %vm323_vm1, %v109_v9  ;;  %v10271_v9 = vld [vmem:[%s13201_s10] sm:$0x7] }
  0x4f   :  { %7884 = vmatprep.mubr.msk.f32.mxu0 %vm9697_vm0, %v13093_v4  ;;  %v10279_v15 = vrot.slane %v10271_v9, %v10230_v42 }
  0x51   :  { %7868 = vmatmul.mubr.msk.f32.gmra.mrb[28].mxu1 %vm323_vm1, %v110_v18 }
  0x52   :  { %7885 = vmatmul.mubr.msk.f32.gmra.mrb[32].mxu0 %vm323_vm1, %v1399_v34  ;;  %7870 = vmatprep.mubr.msk.f32.mxu1 %vm323_vm1, %v111_v19 }
  0x53   :  { %7887 = vmatprep.mubr.msk.f32.mxu0 %vm9697_vm0, %v13093_v4 }
  0x55   :  { %7871 = vmatmul.mubr.msk.f32.gmra.mrb[30].mxu1 %vm323_vm1, %v112_v25 }
  0x56   :  { %7888 = vmatmul.mubr.msk.f32.gmra.mrb[34].mxu0 %vm323_vm1, %v1400_v35  ;;  %7906 = vmatprep.mubr.msk.f32.mxu1 %vm9697_vm0, %v13093_v4 }
  0x57   :  { %7890 = vmatprep.mubr.msk.f32.mxu0 %vm9697_vm0, %v13093_v4 }
  0x5a   :  { %7891 = vmatmul.mubr.msk.f32.gmra.mrb[36].mxu0 %vm323_vm1, %v1401_v37 }
  0x5b   :  { %7893 = vmatprep.mubr.msk.f32.mxu0 %vm9697_vm0, %v13093_v4 }
  0x5e   :  { %7894 = vmatmul.mubr.msk.f32.gmra.mrb[38].mxu0 %vm323_vm1, %v1402_v38 }
  0x5f   :  { %7896 = vmatprep.mubr.msk.f32.mxu0 %vm9697_vm0, %v13093_v4 }
  0x62   :  { %7897 = vmatmul.mubr.msk.f32.gmra.mrb[40].mxu0 %vm323_vm1, %v1403_v39 }
  0x63   :  { %7899 = vmatprep.mubr.msk.f32.mxu0 %vm9697_vm0, %v13093_v4 }
  0x66   :  { %7900 = vmatmul.mubr.msk.f32.gmra.mrb[42].mxu0 %vm323_vm1, %v1404_v40 }
  0x67   :  { %7941 = vmatprep.mubr.msk.f32.mxu0 %vm9697_vm0, %v13093_v4 }
  0xe5   :  { %v10239_v44 = vpop.f32.mrb[0].mxu0 }
  0xe6   :  { %v7758_v45 = vpop.f32.mrb[1].mxu0  ;;  %v449_v46 = vadd.f32 %v448_v43, %v10239_v44 }
  0xe8   :  { %471 = vxpose.xlu0.b32.start [1/7] (short) (narrow) %v449_v46, 32 }
  0xe9   :  { %v10242_v47 = vpop.f32.mrb[2].mxu0 }
  0xea   :  { %v7761_v49 = vpop.f32.mrb[3].mxu0  ;;  %v450_v50 = vadd.f32 %v448_v43, %v10242_v47 }
  0xec   :  { %472 = vxpose.xlu0.b32.cont [2/7] (short) (narrow) %v450_v50, 32  ;;  %v10254_v61 = vpop.f32.mrb[0].mxu1 }
  0xed   :  { %v10245_v51 = vpop.f32.mrb[4].mxu0  ;;  %13195 = vst [vmem:[#allocation5_spill] sm:$0xff] %v10254_v61  ;;  %v10258_v63 = vpop.f32.mrb[1].mxu1 }
  0xee   :  { %v7764_v52 = vpop.f32.mrb[5].mxu0  ;;  %v451_v53 = vadd.f32 %v448_v43, %v10245_v51  ;;  %13197 = vst [vmem:[#allocation7_spill] sm:$0xff] %v10258_v63 }
  0xf0   :  { %473 = vxpose.xlu0.b32.cont [3/7] (short) (narrow) %v451_v53, 32  ;;  %v10261_v3 = vpop.f32.mrb[2].mxu1 }
  0xf1   :  { %v10248_v54 = vpop.f32.mrb[6].mxu0  ;;  %13198 = vst [vmem:[#allocation8_spill] sm:$0xff] %v10261_v3  ;;  %v10265_v6 = vpop.f32.mrb[3].mxu1 }
  0xf2   :  { %v7767_v55 = vpop.f32.mrb[7].mxu0  ;;  %v452_v57 = vadd.f32 %v448_v43, %v10248_v54  ;;  %13200 = vst [vmem:[#allocation10_spill] sm:$0xff] %v10265_v6 }
  0xf4   :  { %474 = vxpose.xlu0.b32.cont [4/7] (short) (narrow) %v452_v57, 32  ;;  %v10273_v10 = vpop.f32.mrb[4].mxu1 }
  0xf5   :  { %v10251_v58 = vpop.f32.mrb[8].mxu0  ;;  %13202 = vst [vmem:[#allocation11_spill] sm:$0xff] %v10273_v10  ;;  %v10275_v13 = vpop.f32.mrb[5].mxu1 }
  0xf6   :  { %v7770_v59 = vpop.f32.mrb[9].mxu0  ;;  %v453_v60 = vadd.f32 %v448_v43, %v10251_v58  ;;  %13203 = vst [vmem:[#allocation12_spill] sm:$0xff] %v10275_v13 }
  0xf8   :  { %475 = vxpose.xlu0.b32.cont [5/7] (short) (narrow) %v453_v60, 32  ;;  %v10281_v19 = vpop.f32.mrb[6].mxu1 }
  0xf9   :  { %v10256_v62 = vpop.f32.mrb[10].mxu0  ;;  %13204 = vst [vmem:[#allocation13_spill] sm:$0xff] %v10281_v19  ;;  %v10283_v22 = vpop.f32.mrb[7].mxu1 }
  0xfa   :  { %13196 = vst [vmem:[#allocation6_spill] sm:$0xff] %v10256_v62  ;;  %v7773_v1 = vpop.f32.mrb[11].mxu0  ;;  %v454_v2 = vadd.f32 %v448_v43, %v10256_v62  ;;  %13205 = vst [vmem:[#allocation14_spill] sm:$0xff] %v10283_v22 }
  0xfc   :  { %476 = vxpose.xlu0.b32.cont [6/7] (short) (narrow) %v454_v2, 32  ;;  %v10291_v26 = vpop.f32.mrb[8].mxu1 }
  0xfd   :  { %v10263_v5 = vpop.f32.mrb[12].mxu0  ;;  %13206 = vst [vmem:[#allocation15_spill] sm:$0xff] %v10291_v26  ;;  %v10293_v29 = vpop.f32.mrb[9].mxu1 }
  0xfe   :  { %13199 = vst [vmem:[#allocation9_spill] sm:$0xff] %v10263_v5  ;;  %v7776_v7 = vpop.f32.mrb[13].mxu0  ;;  %v455_v8 = vadd.f32 %v448_v43, %v10263_v5  ;;  %13207 = vst [vmem:[#allocation16_spill] sm:$0xff] %v10293_v29 }
 0x100   :  { %477 = vxpose.xlu0.b32.end [7/7] (short) (narrow) %v455_v8, 32  ;;  %v10313_v37 = vpop.f32.mrb[10].mxu1 }
 0x101   :  { %v7819_v11 = vpop.f32.mrb[14].mxu0  ;;  %13208 = vst [vmem:[#allocation17_spill] sm:$0xff] %v10313_v37  ;;  %v10317_v39 = vpop.f32.mrb[11].mxu1 }
 0x102   :  { %v906_v18 = vpop.f32.mrb[15].mxu0  ;;  %v10286_v23 = vadd.f32 %v7819_v11, %v10279_v15  ;;  %13209 = vst [vmem:[#allocation18_spill] sm:$0xff] %v10317_v39 }
 0x103   :  { %v10289_v25 = vadd.f32 %v906_v18, %v10279_v15 }
 0x104   :  { %v1135_v30 = vsel %vm323_vm1, %v10286_v23, -inf  ;;  %v10331_v52 = vpop.f32.mrb[12].mxu1 }
 0x105   :  { %v7822_v20 = vpop.f32.mrb[16].mxu0  ;;  %v1134_v34 = vsel %vm323_vm1, %v10289_v25, -inf  ;;  %13210 = vst [vmem:[#allocation19_spill] sm:$0xff] %v10331_v52  ;;  %v10335_v59 = vpop.f32.mrb[13].mxu1 }
 0x106   :  { %v916_v24 = vpop.f32.mrb[17].mxu0  ;;  %v10298_v14 = vadd.f32 %v7822_v20, %v10279_v15  ;;  %13211 = vst [vmem:[#allocation20_spill] sm:$0xff] %v10335_v59 }
 0x107   :  { %v10306_v12 = vadd.f32 %v916_v24, %v10279_v15 }
 0x108   :  { %v1137_v27 = vsel %vm323_vm1, %v10298_v14, -inf  ;;  %v10345_v11 = vpop.f32.mrb[14].mxu1 }
 0x109   :  { %v7825_v28 = vpop.f32.mrb[18].mxu0  ;;  %v1136_v46 = vsel %vm323_vm1, %v10306_v12, -inf  ;;  %13212 = vst [vmem:[#allocation21_spill] sm:$0xff] %v10345_v11 }
 0x10a   :  { %v10301_v32 = vadd.f32 %v7825_v28, %v10279_v15  ;;  %v926_v33 = vpop.f32.mrb[19].mxu0  ;;  %v10349_v28 = vpop.f32.mrb[15].mxu1 }
 0x10b   :  { %v10309_v35 = vadd.f32 %v926_v33, %v10279_v15  ;;  %13213 = vst [vmem:[#allocation22_spill] sm:$0xff] %v10349_v28 }
 0x10c   :  { %v1140_v16 = vsel %vm323_vm1, %v10301_v32, -inf }
 0x10d   :  { %v1141_v17 = vmax.f32 %v1135_v30, %v1140_v16  ;;  %v1138_v38 = vsel %vm323_vm1, %v10309_v35, -inf  ;;  %v7828_v21 = vpop.f32.mrb[20].mxu0 }
 0x10e   :  { %v1139_v40 = vmax.f32 %v1134_v34, %v1138_v38  ;;  %v10322_v43 = vadd.f32 %v7828_v21, %v10279_v15  ;;  %v936_v45 = vpop.f32.mrb[21].mxu0  ;;  %v10359_v21 = vpop.f32.mrb[16].mxu1 }
 0x10f   :  { %v10327_v49 = vadd.f32 %v936_v45, %v10279_v15 }
 0x110   :  { %v1144_v50 = vsel %vm323_vm1, %v10322_v43, -inf }
 0x111   :  { %v1145_v53 = vmax.f32 %v1137_v27, %v1144_v50  ;;  %v1142_v55 = vsel %vm323_vm1, %v10327_v49, -inf  ;;  %v7831_v57 = vpop.f32.mrb[22].mxu0 }
 0x112   :  { %v1143_v60 = vmax.f32 %v1136_v46, %v1142_v55  ;;  %v10338_v1 = vadd.f32 %v7831_v57, %v10279_v15  ;;  %v946_v2 = vpop.f32.mrb[23].mxu0  ;;  %v10363_v46 = vpop.f32.mrb[17].mxu1 }
 0x113   :  { %v10341_v7 = vadd.f32 %v946_v2, %v10279_v15 }
 0x114   :  { %v1148_v8 = vsel %vm323_vm1, %v10338_v1, -inf }
 0x115   :  { %v1149_v18 = vmax.f32 %v1141_v17, %v1148_v8  ;;  %v1146_v20 = vsel %vm323_vm1, %v10341_v7, -inf  ;;  %v7834_v24 = vpop.f32.mrb[24].mxu0  ;;  %v10373_v8 = vpop.f32.mrb[18].mxu1 }
 0x116   :  { %v1147_v30 = vmax.f32 %v1139_v40, %v1146_v20  ;;  %v10352_v33 = vadd.f32 %v7834_v24, %v10279_v15  ;;  %v956_v34 = vpop.f32.mrb[25].mxu0 }
 0x117   :  { %v10355_v16 = vadd.f32 %v956_v34, %v10279_v15  ;;  %v10377_v34 = vpop.f32.mrb[19].mxu1 }
 0x118   :  { %v1152_v38 = vsel %vm323_vm1, %v10352_v33, -inf  ;;  %v10387_v4 = vpop.f32.mrb[20].mxu1 }
 0x119   :  { %v1153_v17 = vmax.f32 %v1145_v53, %v1152_v38  ;;  %v1150_v27 = vsel %vm323_vm1, %v10355_v16, -inf  ;;  %v7837_v45 = vpop.f32.mrb[26].mxu0 }
 0x11a   :  { %v1151_v40 = vmax.f32 %v1143_v60, %v1150_v27  ;;  %v10366_v50 = vadd.f32 %v7837_v45, %v10279_v15  ;;  %v966_v55 = vpop.f32.mrb[27].mxu0 }
 0x11b   :  { %v10369_v57 = vadd.f32 %v966_v55, %v10279_v15 }
 0x11c   :  { %v1156_v2 = vsel %vm323_vm1, %v10366_v50, -inf }
 0x11d   :  { %v1157_v53 = vmax.f32 %v1149_v18, %v1156_v2  ;;  %v1154_v20 = vsel %vm323_vm1, %v10369_v57, -inf  ;;  %v7840_v24 = vpop.f32.mrb[28].mxu0 }
 0x11e   :  { %v1155_v60 = vmax.f32 %v1147_v30, %v1154_v20  ;;  %v10380_v38 = vadd.f32 %v7840_v24, %v10279_v15  ;;  %v976_v27 = vpop.f32.mrb[29].mxu0  ;;  %v10396_v20 = vpop.f32.mrb[21].mxu1 }
 0x11f   :  { %v10383_v45 = vadd.f32 %v976_v27, %v10279_v15 }
 0x120   :  { %v1162_v55 = vmax.f32 %v1155_v60, %v1157_v53  ;;  %v1160_v31 = vsel %vm323_vm1, %v10380_v38, -inf  ;;  %v10398_v53 = vpop.f32.mrb[22].mxu1  ;;  %v459_v60 = vrot.slane %v10235_v36, %v10392_v0 }
 0x121   :  { %v1161_v18 = vmax.f32 %v1153_v17, %v1160_v31  ;;  %v1158_v2 = vsel %vm323_vm1, %v10383_v45, -inf  ;;  %v10394_v30 = vpop.f32.mrb[30].mxu0  ;;  %v10404_v31 = vpop.f32.mrb[23].mxu1 }
 0x122   :  { %v1159_v24 = vmax.f32 %v1151_v40, %v1158_v2  ;;  %v7883_v15 = vpop.f32.mrb[31].mxu0  ;;  %v10406_v28 = vpop.f32.mrb[24].mxu1 }
 0x124   :  { %v1163_v27 = vmax.f32 %v1159_v24, %v1161_v18  ;;  %v10411_v18 = vpop.f32.mrb[25].mxu1 }
 0x125   :  { %v10402_v56 = vpop.f32.mrb[32].mxu0  ;;  %v10413_v52 = vpop.f32.mrb[26].mxu1 }
 0x126   :  { %v1164_v17 = vmax.f32 %v1162_v55, %v1163_v27  ;;  %v7886_v48 = vpop.f32.mrb[33].mxu0  ;;  %v10417_v37 = vpop.f32.mrb[27].mxu1 }
 0x127   :  { %v10419_v39 = vpop.f32.mrb[28].mxu1 }
 0x128   :  { %v1165_v11 = vrot.slane %v1164_v17, 4 }
 0x129   :  { %461 = vrot.lane.b32.xlu0 %v459_v60, %s9699_s29  ;;  %v10409_v40 = vpop.f32.mrb[34].mxu0  ;;  %v10423_v60 = vpop.f32.mrb[29].mxu1 }
 0x12a   :  { %v1166_v2 = vmax.f32 %v1164_v17, %v1165_v11  ;;  %v7889_v24 = vpop.f32.mrb[35].mxu0 }
 0x12c   :  { %v1167_v15 = vrot.slane %v1166_v2, 2 }
 0x12d   :  { %v10415_v59 = vpop.f32.mrb[36].mxu0 }
 0x12e   :  { %v1168_v48 = vmax.f32 %v1166_v2, %v1167_v15  ;;  %v7892_v55 = vpop.f32.mrb[37].mxu0 }
 0x12f   :  { %v10435_v55 = vpop.f32.mrb[30].mxu1 }
 0x130   :  { %v1169_v27 = vrot.slane %v1168_v48, 1 }
 0x131   :  { %v10421_v26 = vpop.f32.mrb[38].mxu0 }
 0x132   :  { %v10425_v29 = vmax.f32 %v1168_v48, %v1169_v27  ;;  %v7895_v11 = vpop.f32.mrb[39].mxu0 }
 0x134   :  { %v1171_v17 = vsub.f32 %v10289_v25, %v10425_v29  ;;  %v1172_v24 = vsub.f32 %v10286_v23, %v10425_v29  ;;  %v1173_v2 = vsub.f32 %v10306_v12, %v10425_v29  ;;  %v1174_v15 = vsub.f32 %v10298_v14, %v10425_v29  ;;  %v10447_v12 = vpop.f32.mrb[31].mxu1 }
 0x135   :  { %v1175_v19 = vsub.f32 %v10309_v35, %v10425_v29  ;;  %v1176_v48 = vsub.f32 %v10301_v32, %v10425_v29  ;;  %v1177_v25 = vsub.f32 %v10327_v49, %v10425_v29  ;;  %v1178_v23 = vsub.f32 %v10322_v43, %v10425_v29  ;;  %v10445_v27 = vpop.f32.mrb[40].mxu0 }
 0x136   :  { %v1179_v14 = vsub.f32 %v10341_v7, %v10425_v29  ;;  %v1180_v11 = vsub.f32 %v10338_v1, %v10425_v29  ;;  %v1181_v35 = vsub.f32 %v10355_v16, %v10425_v29  ;;  %v1182_v32 = vsub.f32 %v10352_v33, %v10425_v29  ;;  %v7898_v49 = vpop.f32.mrb[41].mxu0 }
 0x137   :  { %v1183_v43 = vsub.f32 %v10369_v57, %v10425_v29  ;;  %v1184_v22 = vsub.f32 %v10366_v50, %v10425_v29  ;;  %v1185_v10 = vsub.f32 %v10383_v45, %v10425_v29  ;;  %v1186_v7 = vsub.f32 %v10380_v38, %v10425_v29 }
 0x138   :  { %v1187_v1 = vmul.f32 1.442695, %v1171_v17  ;;  %v1189_v13 = vmul.f32 1.442695, %v1172_v24  ;;  %v1191_v3 = vmul.f32 1.442695, %v1173_v2 }
 0x139   :  { %v1193_v16 = vmul.f32 1.442695, %v1174_v15  ;;  %v1195_v6 = vmul.f32 1.442695, %v1175_v19  ;;  %v1197_v33 = vmul.f32 1.442695, %v1176_v48 }
 0x13a   :  { %9247 = vpow2.f32 %v1187_v1  ;;  %v1199_v57 = vmul.f32 1.442695, %v1177_v25  ;;  %v10465_v49 = vpop.f32.mrb[42].mxu0  ;;  %v1201_v45 = vmul.f32 1.442695, %v1178_v23 }
 0x13b   :  { %9249 = vpow2.f32 %v1189_v13  ;;  %v7901_v50 = vpop.f32.mrb[43].mxu0  ;;  %v1203_v61 = vmul.f32 1.442695, %v1179_v14  ;;  %v1205_v29 = vmul.f32 1.442695, %v1180_v11 }
 0x13c   :  { %9251 = vpow2.f32 %v1191_v3  ;;  %v1207_v13 = vmul.f32 1.442695, %v1181_v35  ;;  %v1209_v2 = vmul.f32 1.442695, %v1182_v32  ;;  %v1211_v14 = vmul.f32 1.442695, %v1183_v43 }
 0x13d   :  { %9253 = vpow2.f32 %v1193_v16  ;;  %v1213_v32 = vmul.f32 1.442695, %v1184_v22  ;;  %v1215_v50 = vmul.f32 1.442695, %v1185_v10 }
 0x13e   :  { %9255 = vpow2.f32 %v1195_v6 }
 0x13f   :  { %9257 = vpow2.f32 %v1197_v33 }
 0x140   :  { %9259 = vpow2.f32 %v1199_v57 }
 0x141   :  { %9261 = vpow2.f32 %v1201_v45 }
 0x142   :  { %9263 = vpow2.f32 %v1203_v61 }
 0x143   :  { %9265 = vpow2.f32 %v1205_v29 }
 0x144   :  { %v10467_v38 = vpop.eup %9247  ;;  %9267 = vpow2.f32 %v1207_v13  ;;  %v1217_v13 = vmul.f32 1.442695, %v1186_v7 }
 0x145   :  { %v10469_v17 = vpop.eup %9249  ;;  %v1219_v3 = vsel %vm323_vm1, %v10467_v38, 0.0  ;;  %9269 = vpow2.f32 %v1209_v2 }
 0x146   :  { %v10473_v19 = vpop.eup %9251  ;;  %v1220_v6 = vsel %vm323_vm1, %v10469_v17, 0.0  ;;  %9271 = vpow2.f32 %v1211_v14 }
 0x147   :  { %v10477_v24 = vpop.eup %9253  ;;  %v1221_v15 = vadd.f32 %v1220_v6, %v1219_v3  ;;  %v1222_v48 = vsel %vm323_vm1, %v10473_v19, 0.0  ;;  %9273 = vpow2.f32 %v1213_v32 }
 0x148   :  { %v10481_v25 = vpop.eup %9255  ;;  %v1224_v61 = vsel %vm323_vm1, %v10477_v24, 0.0  ;;  %9275 = vpow2.f32 %v1215_v50 }
 0x149   :  { %v10485_v23 = vpop.eup %9257  ;;  %v1223_v11 = vadd.f32 %v1222_v48, %v1221_v15  ;;  %v1226_v35 = vsel %vm323_vm1, %v10481_v25, 0.0  ;;  %9277 = vpow2.f32 %v1217_v13 }
 0x14a   :  { %v10489_v1 = vpop.eup %9259  ;;  %v1228_v33 = vsel %vm323_vm1, %v10485_v23, 0.0 }
 0x14b   :  { %v1225_v16 = vadd.f32 %v1224_v61, %v1223_v11  ;;  %v10493_v57 = vpop.eup %9261  ;;  %v1230_v43 = vsel %vm323_vm1, %v10489_v1, 0.0 }
 0x14c   :  { %v10497_v29 = vpop.eup %9263  ;;  %v1232_v22 = vsel %vm323_vm1, %v10493_v57, 0.0 }
 0x14d   :  { %v1227_v45 = vadd.f32 %v1226_v35, %v1225_v16  ;;  %v10501_v6 = vpop.eup %9265  ;;  %v1234_v15 = vsel %vm323_vm1, %v10497_v29, 0.0 }
 0x14e   :  { %v10505_v10 = vpop.eup %9267  ;;  %v1236_v61 = vsel %vm323_vm1, %v10501_v6, 0.0 }
 0x14f   :  { %v1229_v3 = vadd.f32 %v1228_v33, %v1227_v45  ;;  %v10509_v14 = vpop.eup %9269  ;;  %v1238_v11 = vsel %vm323_vm1, %v10505_v10, 0.0 }
 0x150   :  { %v10513_v35 = vpop.eup %9271  ;;  %v1240_v16 = vsel %vm323_vm1, %v10509_v14, 0.0 }
 0x151   :  { %v1231_v2 = vadd.f32 %v1230_v43, %v1229_v3  ;;  %v10517_v33 = vpop.eup %9273  ;;  %v1242_v45 = vsel %vm323_vm1, %v10513_v35, 0.0 }
 0x152   :  { %v10521_v43 = vpop.eup %9275  ;;  %v1244_v3 = vsel %vm323_vm1, %v10517_v33, 0.0 }
 0x153   :  { %v1233_v48 = vadd.f32 %v1232_v22, %v1231_v2  ;;  %v10525_v22 = vpop.eup %9277 }
 0x155   :  { %v1235_v7 = vadd.f32 %v1234_v15, %v1233_v48  ;;  %v1246_v15 = vsel %vm323_vm1, %v10521_v43, 0.0 }
 0x157   :  { %v1237_v32 = vadd.f32 %v1236_v61, %v1235_v7  ;;  %v1248_v61 = vsel %vm323_vm1, %v10525_v22, 0.0 }
 0x159   :  { %v1239_v50 = vadd.f32 %v1238_v11, %v1237_v32  ;;  %v10532_v11 = vsub.s32 0, %v10227_v41 }
 0x15b   :  { %v1241_v13 = vadd.f32 %v1240_v16, %v1239_v50  ;;  %13214 = vst [vmem:[#allocation23_spill] sm:$0xff] %v10532_v11  ;;  %v10536_v16 = vrot.slane %v10235_v36, %v10532_v11  ;;  %v13216_v36 = vmov 0.0|0.0  }
 0x15d   :  { %v1243_v2 = vadd.f32 %v1242_v45, %v1241_v13  ;;  %v1493_v13 = vadd.f32 %v10394_v30, %v10536_v16  ;;  %v13217_v30 = vmov 0.0  }
 0x15f   :  { %v1245_v48 = vadd.f32 %v1244_v3, %v1243_v2 }
 0x161   :  { %v1247_v7 = vadd.f32 %v1246_v15, %v1245_v48  ;;  %v10542_v15 = vmul.f32 0.25, %v1493_v13  ;;  %v1498_v48 = vadd.f32 %v10402_v56, %v10536_v16  ;;  %v10558_v56 = vrot.slane %v10271_v9, %v10392_v0 }
 0x163   :  { %v1249_v32 = vadd.f32 %v1248_v61, %v1247_v7  ;;  %v1508_v7 = vadd.f32 %v10415_v59, %v10536_v16  ;;  %v1056_v9 = vadd.f32 %v10363_v46, %v10558_v56  ;;  %v1081_v59 = vadd.f32 %v10387_v4, %v10558_v56 }
 0x164   :  { %v1076_v13 = vadd.f32 %v10396_v20, %v10558_v56  ;;  %v1101_v46 = vadd.f32 %v10406_v28, %v10558_v56  ;;  %v1096_v4 = vadd.f32 %v10411_v18, %v10558_v56  ;;  %v1518_v28 = vadd.f32 %v10445_v27, %v10536_v16 }
 0x165   :  { %v1250_v63 = vrot.slane %v1249_v32, 4 }
 0x167   :  { %v1251_v50 = vadd.f32 %v1250_v63, %v1249_v32  ;;  %v10548_v63 = vmul.f32 0.25, %v1498_v48  ;;  %v1061_v32 = vadd.f32 %v10359_v21, %v10558_v56  ;;  %v1086_v21 = vadd.f32 %v10404_v31, %v10558_v56 }
 0x168   :  { %v487_v42 = vpop.trf.xlu0  ;;  %v1121_v31 = vadd.f32 %v10419_v39, %v10558_v56 }
 0x169   :  { %v1252_v45 = vrot.slane %v1251_v50, 2 }
 0x16b   :  { %v1253_v3 = vadd.f32 %v1252_v45, %v1251_v50  ;;  %v1071_v50 = vadd.f32 %v10373_v8, %v10558_v56  ;;  %v1066_v45 = vadd.f32 %v10377_v34, %v10558_v56  ;;  %v1111_v8 = vadd.f32 %v10413_v52, %v10558_v56 }
 0x16c   :  { %v488_v2 = vpop.trf.xlu0 }
 0x16d   :  { %v1254_v5 = vrot.slane %v1253_v3, 1  ;;  %v10540_v62 = vpack.c.bf16 %v488_v2, %v487_v42  ;;  %v1503_v42 = vadd.f32 %v10409_v40, %v10536_v16  ;;  %v1513_v40 = vadd.f32 %v10421_v26, %v10536_v16 }
 0x16e   :  { %v1091_v26 = vadd.f32 %v10398_v53, %v10558_v56  ;;  %v1106_v53 = vadd.f32 %v10417_v37, %v10558_v56 }
 0x16f   :  { %13215 = vst [vmem:[#allocation24_spill] sm:$0xff] %v10540_v62  ;;  %v1255_v61 = vadd.f32 %v1254_v5, %v1253_v3  ;;  %8903 = vmatpush3.bf16.msra.mxu1 %v10540_v62  ;;  %v10560_v5 = vmul.f32 0.25, %v1503_v42  ;;  %v10586_v3 = vmul.f32 0.25, %v1508_v7  ;;  %v10596_v20 = vmul.f32 0.25, %v1513_v40 }
 0x170   :  { %8913 = vmatprep.subr.bf16.mxu1 %v13216_v36 }
 0x171   :  { %9279 = vrcp.f32 %v1255_v61 }
 0x172   :  { %7907 = vmatmul.mubr.msk.f32.vlgmr.msra.gmra.mrb[32].mxu1 %vm1533_vm2, %v10542_v15 }
 0x173   :  { %7909 = vmatprep.mubr.msk.f32.mxu1 %vm9697_vm0, %v13217_v30 }
 0x176   :  { %7910 = vmatmul.mubr.msk.f32.gmra.mrb[34].mxu1 %vm1533_vm2, %v10548_v63 }
 0x177   :  { %7912 = vmatprep.mubr.msk.f32.mxu1 %vm9697_vm0, %v13217_v30 }
 0x17a   :  { %7913 = vmatmul.mubr.msk.f32.gmra.mrb[36].mxu1 %vm1533_vm2, %v10560_v5 }
 0x17b   :  { %v9280_v34 = vpop.eup %9279  ;;  %7915 = vmatprep.mubr.msk.f32.mxu1 %vm9697_vm0, %v13217_v30 }
 0x17c   :  { %v1258_v18 = vmul.f32 %v9280_v34, %v10469_v17  ;;  %v1257_v2 = vmul.f32 %v9280_v34, %v10467_v38  ;;  %v1260_v52 = vmul.f32 %v9280_v34, %v10477_v24  ;;  %v1259_v48 = vmul.f32 %v9280_v34, %v10473_v19 }
 0x17d   :  { %v1262_v61 = vmul.f32 %v9280_v34, %v10485_v23  ;;  %v1261_v42 = vmul.f32 %v9280_v34, %v10481_v25  ;;  %v1264_v37 = vmul.f32 %v9280_v34, %v10493_v57  ;;  %v1263_v7 = vmul.f32 %v9280_v34, %v10489_v1 }
 0x17e   :  { %v1274_v39 = vmul.f32 %v1258_v18, %v1061_v32  ;;  %v1273_v40 = vmul.f32 %v1257_v2, %v1056_v9  ;;  %v1276_v62 = vmul.f32 %v1260_v52, %v1071_v50  ;;  %v1275_v27 = vmul.f32 %v1259_v48, %v1066_v45  ;;  %7916 = vmatmul.mubr.msk.f32.gmra.mrb[38].mxu1 %vm1533_vm2, %v10586_v3 }
 0x17f   :  { %v1278_v38 = vmul.f32 %v1262_v61, %v1081_v59  ;;  %v1277_v17 = vmul.f32 %v1261_v42, %v1076_v13  ;;  %v1280_v24 = vmul.f32 %v1264_v37, %v1091_v26  ;;  %v1279_v11 = vmul.f32 %v1263_v7, %v1086_v21  ;;  %7918 = vmatprep.mubr.msk.f32.mxu1 %vm9697_vm0, %v13217_v30  ;;  %v10659_v7 = vpop.trf.xlu0 }
 0x180   :  { %v1290_v19 = vsel %vm323_vm1, %v1274_v39, 0.0  ;;  %v1289_v25 = vsel %vm323_vm1, %v1273_v40, 0.0  ;;  %v1116_v23 = vadd.f32 %v10423_v60, %v10558_v56  ;;  %v1131_v1 = vadd.f32 %v10435_v55, %v10558_v56 }
 0x181   :  { %v1291_v57 = vadd.f32 %v1290_v19, %v1289_v25  ;;  %v1294_v32 = vsel %vm323_vm1, %v1276_v62, 0.0  ;;  %v10625_v9 = vmul.f32 0.25, %v1518_v28  ;;  %v1523_v50 = vadd.f32 %v10465_v49, %v10536_v16 }
 0x182   :  { %v1292_v45 = vsel %vm323_vm1, %v1275_v27, 0.0  ;;  %v1266_v59 = vmul.f32 %v9280_v34, %v10501_v6  ;;  %v1265_v13 = vmul.f32 %v9280_v34, %v10497_v29  ;;  %v1268_v26 = vmul.f32 %v9280_v34, %v10509_v14  ;;  %7919 = vmatmul.mubr.msk.f32.gmra.mrb[40].mxu1 %vm1533_vm2, %v10596_v20 }
 0x183   :  { %v1293_v60 = vadd.f32 %v1292_v45, %v1291_v57  ;;  %v1267_v55 = vmul.f32 %v9280_v34, %v10505_v10  ;;  %v1270_v62 = vmul.f32 %v9280_v34, %v10517_v33  ;;  %v1269_v21 = vmul.f32 %v9280_v34, %v10513_v35  ;;  %7921 = vmatprep.mubr.msk.f32.mxu1 %vm9697_vm0, %v13217_v30 }
 0x184   :  { %v1282_v49 = vmul.f32 %v1266_v59, %v1101_v46  ;;  %v1281_v28 = vmul.f32 %v1265_v13, %v1096_v4  ;;  %v1284_v6 = vmul.f32 %v1268_v26, %v1111_v8  ;;  %v1272_v29 = vmul.f32 %v9280_v34, %v10525_v22 }
 0x185   :  { %v1295_v18 = vadd.f32 %v1294_v32, %v1293_v60  ;;  %v1283_v14 = vmul.f32 %v1267_v55, %v1106_v53  ;;  %v1286_v2 = vmul.f32 %v1270_v62, %v1121_v31  ;;  %v1285_v52 = vmul.f32 %v1269_v21, %v1116_v23  ;;  %v13218_v55 = vld [vmem:[#allocation6_spill] sm:$0xff] }
 0x186   :  { %v1296_v48 = vsel %vm323_vm1, %v1277_v17, 0.0  ;;  %v1288_v61 = vmul.f32 %v1272_v29, %v1131_v1  ;;  %v1126_v10 = vadd.f32 %v10447_v12, %v10558_v56  ;;  %v10644_v33 = vmul.f32 0.25, %v1523_v50  ;;  %7922 = vmatmul.mubr.msk.f32.gmra.mrb[42].mxu1 %vm1533_vm2, %v10625_v9 }
 0x187   :  { %v1297_v35 = vadd.f32 %v1296_v48, %v1295_v18  ;;  %7924 = vmatprep.mubr.msk.f32.mxu1 %vm9697_vm0, %v13217_v30  ;;  %v1298_v22 = vsel %vm323_vm1, %v1278_v38, 0.0  ;;  %v1271_v46 = vmul.f32 %v9280_v34, %v10521_v43  ;;  %v1300_v8 = vsel %vm323_vm1, %v1279_v11, 0.0  ;;  %v10664_v38 = vpop.trf.xlu0 }
 0x188   :  { %v1302_v56 = vsel %vm323_vm1, %v1280_v24, 0.0  ;;  %v1304_v42 = vsel %vm323_vm1, %v1281_v28, 0.0  ;;  %v1306_v43 = vsel %vm323_vm1, %v1282_v49, 0.0  ;;  %v1308_v11 = vsel %vm323_vm1, %v1283_v14, 0.0 }
 0x189   :  { %v1299_v4 = vadd.f32 %v1298_v22, %v1297_v35  ;;  %v1287_v53 = vmul.f32 %v1271_v46, %v1126_v10  ;;  %v1310_v40 = vsel %vm323_vm1, %v1284_v6, 0.0  ;;  %v1312_v17 = vsel %vm323_vm1, %v1285_v52, 0.0 }
 0x18a   :  { %7925 = vmatmul.mubr.msk.f32.gmra.mrb[44].mxu1 %vm1533_vm2, %v10644_v33  ;;  %v1314_v19 = vsel %vm323_vm1, %v1286_v2, 0.0  ;;  %v1318_v1 = vsel %vm323_vm1, %v1288_v61, 0.0  ;;  %v191_v18 = vadd.s32 16, %v10227_v41  ;;  %v192_v52 = vadd.s32 24, %v10227_v41 }
 0x18b   :  { %v1301_v12 = vadd.f32 %v1300_v8, %v1299_v4  ;;  %7966 = vmatprep.mubr.msk.f32.mxu1 %vm9697_vm0, %v13217_v30  ;;  %v1316_v23 = vsel %vm323_vm1, %v1287_v53, 0.0  ;;  %v13122_v48 = vmov -1e+30   ;;  %v193_v46 = vadd.s32 32, %v10227_v41 }
 0x18c   :  { %v216_v2 = vand.u32 1, %v191_v18  ;;  %v223_v22 = vand.u32 1, %v192_v52 }
 0x18d   :  { %v1303_v31 = vadd.f32 %v1302_v56, %v1301_v12 }
 0x18f   :  { %v1305_v37 = vadd.f32 %v1304_v42, %v1303_v31  ;;  %v230_v42 = vand.u32 1, %v193_v46 }
 0x191   :  { %v1307_v34 = vadd.f32 %v1306_v43, %v1305_v37  ;;  %v194_v37 = vadd.s32 40, %v10227_v41 }
 0x193   :  { %v1309_v39 = vadd.f32 %v1308_v11, %v1307_v34 }
 0x195   :  { %v1311_v27 = vadd.f32 %v1310_v40, %v1309_v39 }
 0x197   :  { %v1313_v24 = vadd.f32 %v1312_v17, %v1311_v27  ;;  %v237_v17 = vand.u32 1, %v194_v37 }
 0x199   :  { %v1315_v25 = vadd.f32 %v1314_v19, %v1313_v24  ;;  %v195_v24 = vadd.s32 48, %v10227_v41 }
 0x19b   :  { %v1317_v57 = vadd.f32 %v1316_v23, %v1315_v25  ;;  %v10670_v32 = vpop.permute.xlu0 %461 }
 0x19c   :  { %v466_v50 = vadd.f32 %v10670_v32, %v10245_v51  ;;  %v467_v45 = vadd.f32 %v10670_v32, %v10248_v54  ;;  %v464_v59 = vadd.f32 %v10670_v32, %v10239_v44  ;;  %v465_v13 = vadd.f32 %v10670_v32, %v10242_v47 }
 0x19d   :  { %v10680_v26 = vadd.f32 %v1318_v1, %v1317_v57  ;;  %v468_v60 = vadd.f32 %v10670_v32, %v10251_v58  ;;  %v469_v62 = vadd.f32 %v10670_v32, %v13218_v55  ;;  %v13219_v44 = vlaneseq }
 0x19e   :  { %v10686_v21 = vpack.i.bf16 %v467_v45, %v466_v50  ;;  %v10688_v51 = vpack.i.bf16 %v465_v13, %v464_v59  ;;  %v202_v54 = vand.u32 1, %v10227_v41  ;;  %v190_v58 = vadd.s32 8, %v10227_v41 }
 0x19f   :  { %v10690_v49 = vpack.i.bf16 %v469_v62, %v468_v60  ;;  %v197_v47 = vand.u32 127, %v13219_v44  ;;  %v244_v45 = vand.u32 1, %v195_v24 }
 0x1a0   :  { %9143 = vrot.lane.b32.xlu0 %v10686_v21, %s9700_s0  ;;  %v209_v29 = vand.u32 1, %v190_v58 }
 0x1a1   :  { %v286_v28 = vand.u32 1, %v197_v47  ;;  %vm301_vm4 = vcmp.lt.s32.totalorder %v197_v47, 54 }
 0x1a3   :  { %vm10697_vm3 = vcmp.eq.s32.totalorder %v202_v54, %v286_v28  ;;  %vm10705_vm6 = vcmp.eq.s32.totalorder %v209_v29, %v286_v28  ;;  %vm10716_vm9 = vcmp.eq.s32.totalorder %v216_v2, %v286_v28  ;;  %vm10729_vm11 = vcmp.eq.s32.totalorder %v223_v22, %v286_v28 }
 0x1a4   :  { %vm302_vm5 = vmand %vm10697_vm3, %vm301_vm4  ;;  %vm10742_vm13 = vcmp.eq.s32.totalorder %v230_v42, %v286_v28  ;;  %vm10755_vm15 = vcmp.eq.s32.totalorder %v237_v17, %v286_v28 }
 0x1a5   :  { %v10711_v61 = vsel %vm302_vm5, 0.0, %v13122_v48  ;;  %vm303_vm7 = vmand %vm10705_vm6, %vm301_vm4 }
 0x1a6   :  { %13224 = vst [vmem:[#allocation6_spill] sm:$0xff] %v10711_v61  ;;  %v10723_v53 = vsel %vm303_vm7, 0.0, %v13122_v48  ;;  %vm304_vm10 = vmand %vm10716_vm9, %vm301_vm4  ;;  %vm10767_vm7 = vcmp.eq.s32.totalorder %v244_v45, %v286_v28 }
 0x1a7   :  { %13227 = vst [vmem:[#allocation25_spill] sm:$0xff] %v10723_v53  ;;  %v10736_v11 = vsel %vm304_vm10, 0.0, %v13122_v48  ;;  %vm305_vm12 = vmand %vm10729_vm11, %vm301_vm4 }
 0x1a8   :  { %13230 = vst [vmem:[#allocation26_spill] sm:$0xff] %v10736_v11  ;;  %v10749_v23 = vsel %vm305_vm12, 0.0, %v13122_v48  ;;  %vm306_vm14 = vmand %vm10742_vm13, %vm301_vm4 }
 0x1a9   :  { %13233 = vst [vmem:[#allocation27_spill] sm:$0xff] %v10749_v23  ;;  %v10761_v13 = vsel %vm306_vm14, 0.0, %v13122_v48  ;;  %vm307_vm5 = vmand %vm10755_vm15, %vm301_vm4 }
 0x1aa   :  { %13236 = vst [vmem:[#allocation28_spill] sm:$0xff] %v10761_v13  ;;  %v10773_v58 = vsel %vm307_vm5, 0.0, %v13122_v48  ;;  %vm308_vm10 = vmand %vm10767_vm7, %vm301_vm4 }
 0x1ab   :  { %13239 = vst [vmem:[#allocation29_spill] sm:$0xff] %v10773_v58  ;;  %v10781_v52 = vsel %vm308_vm10, 0.0, %v13122_v48  ;;  %v13265_v48 = vld [vmem:[#allocation22_spill] sm:$0xff] }
 0x1ac   :  { %13240 = vst [vmem:[#allocation30_spill] sm:$0xff] %v10781_v52 }
 0x245   :  { %v1621_v10 = vpop.f32.mrb[32].mxu1 }
 0x246   :  { %v1622_v4 = vadd.f32 %v1621_v10, %v10711_v61  ;;  %v7908_v8 = vpop.f32.mrb[33].mxu1 }
 0x248   :  { %v1656_v12 = vsel %vm1655_vm8, %v1622_v4, -inf }
 0x249   :  { %1657 = vmax.xlane.f32.xlu1 %v1656_v12  ;;  %v1626_v56 = vpop.f32.mrb[34].mxu1 }
 0x24a   :  { %v1627_v43 = vadd.f32 %v1626_v56, %v10723_v53  ;;  %v7911_v34 = vpop.f32.mrb[35].mxu1 }
 0x24c   :  { %v1659_v39 = vsel %vm1655_vm8, %v1627_v43, -inf }
 0x24d   :  { %1660 = vmax.xlane.f32.xlu1 %v1659_v39  ;;  %v1631_v40 = vpop.f32.mrb[36].mxu1 }
 0x24e   :  { %v1632_v19 = vadd.f32 %v1631_v40, %v10736_v11  ;;  %v7914_v25 = vpop.f32.mrb[37].mxu1 }
 0x250   :  { %v1662_v1 = vsel %vm1655_vm8, %v1632_v19, -inf }
 0x251   :  { %1663 = vmax.xlane.f32.xlu1 %v1662_v1  ;;  %v1636_v57 = vpop.f32.mrb[38].mxu1 }
 0x252   :  { %v1637_v41 = vadd.f32 %v1636_v57, %v10749_v23  ;;  %v7917_v59 = vpop.f32.mrb[39].mxu1 }
 0x254   :  { %v1665_v60 = vsel %vm1655_vm8, %v1637_v41, -inf }
 0x255   :  { %1666 = vmax.xlane.f32.xlu1 %v1665_v60  ;;  %v1641_v55 = vpop.f32.mrb[40].mxu1 }
 0x256   :  { %v1642_v44 = vadd.f32 %v1641_v55, %v10761_v13  ;;  %v7920_v54 = vpop.f32.mrb[41].mxu1 }
 0x258   :  { %v1668_v29 = vsel %vm1655_vm8, %v1642_v44, -inf }
 0x259   :  { %1669 = vmax.xlane.f32.xlu1 %v1668_v29  ;;  %v1646_v18 = vpop.f32.mrb[42].mxu1 }
 0x25a   :  { %v1647_v2 = vadd.f32 %v1646_v18, %v10773_v58  ;;  %v7923_v28 = vpop.f32.mrb[43].mxu1 }
 0x25c   :  { %v1671_v10 = vsel %vm1655_vm8, %v1647_v2, -inf }
 0x25d   :  { %1672 = vmax.xlane.f32.xlu1 %v1671_v10  ;;  %v1651_v22 = vpop.f32.mrb[44].mxu1 }
 0x25e   :  { %v1652_v46 = vadd.f32 %v1651_v22, %v10781_v52  ;;  %v7926_v8 = vpop.f32.mrb[45].mxu1 }
 0x260   :  { %v1674_v47 = vsel %vm1655_vm8, %v1652_v46, -inf }
 0x261   :  { %1675 = vmax.xlane.f32.xlu1 %v1674_v47  ;;  %v9144_v47 = vpop.permute.xlu0 %9143 }
 0x272   :  { %9138 = vrot.lane.b32.xlu1 %v10688_v51, %s9700_s0 }
 0x2d6   :  { %v1658_v12 = vpop.xlane.xlu1 %1657 }
 0x2d7   :  { %v1677_v56 = vsub.f32 %v1622_v4, %v1658_v12 }
 0x2d9   :  { %v1684_v42 = vmul.f32 1.442695, %v1677_v56 }
 0x2da   :  { %v1661_v37 = vpop.xlane.xlu1 %1660 }
 0x2db   :  { %9281 = vpow2.f32 %v1684_v42  ;;  %v1678_v34 = vsub.f32 %v1627_v43, %v1661_v37 }
 0x2dd   :  { %v1686_v39 = vmul.f32 1.442695, %v1678_v34  ;;  %v9146_v34 = vunpack.i.h.bf16 %v9144_v47 }
 0x2de   :  { %v1664_v40 = vpop.xlane.xlu1 %1663 }
 0x2df   :  { %9283 = vpow2.f32 %v1686_v39  ;;  %v1679_v17 = vsub.f32 %v1632_v19, %v1664_v40  ;;  %v9145_v39 = vunpack.i.l.bf16 %v9144_v47  ;;  %v10865_v47 = vpack.c.bf16 %v10664_v38, %v10659_v7 }
 0x2e1   :  { %v1688_v24 = vmul.f32 1.442695, %v1679_v17 }
 0x2e2   :  { %v1667_v25 = vpop.xlane.xlu1 %1666 }
 0x2e3   :  { %9285 = vpow2.f32 %v1688_v24  ;;  %v1680_v1 = vsub.f32 %v1637_v41, %v1667_v25  ;;  %v10814_v24 = vpack.c.bf16 %v9146_v34, %v9145_v39 }
 0x2e5   :  { %v10788_v57 = vpop.eup %9281  ;;  %v1690_v45 = vmul.f32 1.442695, %v1680_v1 }
 0x2e6   :  { %v1670_v59 = vpop.xlane.xlu1 %1669  ;;  %v1698_v60 = vsel %vm1655_vm8, %v10788_v57, 0.0 }
 0x2e7   :  { %9287 = vpow2.f32 %v1690_v45  ;;  %v1681_v4 = vsub.f32 %v1642_v44, %v1670_v59  ;;  %1699 = vadd.xlane.f32.xlu1 %v1698_v60  ;;  %v13241_v59 = vld [vmem:[#allocation9_spill] sm:$0xff] }
 0x2e8   :  { %v10832_v60 = vadd.f32 %v10670_v32, %v13241_v59  ;;  %13242 = vst [vmem:[#allocation9_spill] sm:$0xff] %v10865_v47 }
 0x2e9   :  { %v10792_v55 = vpop.eup %9283  ;;  %v1692_v43 = vmul.f32 1.442695, %v1681_v4 }
 0x2ea   :  { %v1673_v54 = vpop.xlane.xlu1 %1672  ;;  %v1701_v19 = vsel %vm1655_vm8, %v10792_v55, 0.0 }
 0x2eb   :  { %9289 = vpow2.f32 %v1692_v43  ;;  %v1682_v29 = vsub.f32 %v1647_v2, %v1673_v54  ;;  %1702 = vadd.xlane.f32.xlu1 %v1701_v19 }
 0x2ed   :  { %v10796_v41 = vpop.eup %9285  ;;  %v1694_v18 = vmul.f32 1.442695, %v1682_v29 }
 0x2ee   :  { %v1676_v28 = vpop.xlane.xlu1 %1675  ;;  %v1704_v10 = vsel %vm1655_vm8, %v10796_v41, 0.0 }
 0x2ef   :  { %9291 = vpow2.f32 %v1694_v18  ;;  %v1683_v44 = vsub.f32 %v1652_v46, %v1676_v28  ;;  %1705 = vadd.xlane.f32.xlu1 %v1704_v10 }
 0x2f1   :  { %v10800_v22 = vpop.eup %9287  ;;  %v1696_v8 = vmul.f32 1.442695, %v1683_v44 }
 0x2f2   :  { %v9139_v12 = vpop.permute.xlu1 %9138  ;;  %v1707_v56 = vsel %vm1655_vm8, %v10800_v22, 0.0 }
 0x2f3   :  { %9293 = vpow2.f32 %v1696_v8  ;;  %v9141_v2 = vunpack.i.h.bf16 %v9139_v12  ;;  %v9140_v42 = vunpack.i.l.bf16 %v9139_v12  ;;  %1708 = vadd.xlane.f32.xlu1 %v1707_v56 }
 0x2f5   :  { %v10804_v37 = vpop.eup %9289  ;;  %v10806_v40 = vpack.c.bf16 %v9141_v2, %v9140_v42 }
 0x2f6   :  { %v1710_v46 = vsel %vm1655_vm8, %v10804_v37, 0.0 }
 0x2f7   :  { %1711 = vadd.xlane.f32.xlu1 %v1710_v46  ;;  %8906 = vmatpush3.bf16.msra.mxu0 %v10806_v40 }
 0x2f8   :  { %8907 = vmatprep.subr.bf16.mxu0 %v13216_v36 }
 0x2f9   :  { %v10812_v17 = vpop.eup %9291 }
 0x2fa   :  { %v1713_v25 = vsel %vm1655_vm8, %v10812_v17, 0.0 }
 0x2fb   :  { %1714 = vadd.xlane.f32.xlu0 %v1713_v25  ;;  %8909 = vmatpush3.bf16.msra.mxu0 %v10814_v24 }
 0x2fc   :  { %8910 = vmatprep.subr.bf16.mxu0 %v13216_v36 }
 0x2fd   :  { %v10820_v1 = vpop.eup %9293 }
 0x2fe   :  { %v1716_v45 = vsel %vm1655_vm8, %v10820_v1, 0.0 }
 0x2ff   :  { %1717 = vadd.xlane.f32.xlu0 %v1716_v45 }
 0x308   :  { %9148 = vrot.lane.b32.xlu1 %v10690_v49, %s9700_s0 }
 0x30c   :  { %2010 = vrot.lane.b32.xlu1 %v10542_v15, %s9702_s3  ;;  %v138_v15 = vld [vmem:[%s13066_s7] sm:$0xff] }
 0x310   :  { %2012 = vrot.lane.b32.xlu1 %v10548_v63, %s9702_s3  ;;  %v139_v63 = vld [vmem:[%s13066_s7 + $0x8] sm:$0xff] }
 0x314   :  { %2014 = vrot.lane.b32.xlu1 %v10560_v5, %s9702_s3  ;;  %v10852_v5 = vpack.c.bf16 %v139_v63, %v138_v15 }
 0x315   :  { %1752 = vrot.lane.b32.xlu0 %v10832_v60, %s9700_s0 }
 0x316   :  { %8915 = vmatpush3.bf16.msra.mxu1 %v10852_v5 }
 0x317   :  { %8919 = vmatprep.subr.bf16.mxu1 %v13216_v36 }
 0x318   :  { %2016 = vrot.lane.b32.xlu1 %v10586_v3, %s9702_s3 }
 0x319   :  { %2018 = vrot.lane.b32.xlu0 %v10596_v20, %s9702_s3 }
 0x31c   :  { %2020 = vrot.lane.b32.xlu1 %v10625_v9, %s9702_s3 }
 0x31d   :  { %2022 = vrot.lane.b32.xlu0 %v10644_v33, %s9702_s3 }
 0x374   :  { %v1700_v3 = vpop.xlane.xlu1 %1699 }
 0x375   :  { %9295 = vrcp.f32 %v1700_v3 }
 0x378   :  { %v1703_v20 = vpop.xlane.xlu1 %1702 }
 0x379   :  { %9297 = vrcp.f32 %v1703_v20 }
 0x37c   :  { %v1706_v9 = vpop.xlane.xlu1 %1705 }
 0x37d   :  { %9299 = vrcp.f32 %v1706_v9 }
 0x37f   :  { %v9296_v28 = vpop.eup %9295 }
 0x380   :  { %v1709_v32 = vpop.xlane.xlu1 %1708  ;;  %v1720_v10 = vmul.f32 %v9296_v28, %v10788_v57 }
 0x381   :  { %9301 = vrcp.f32 %v1709_v32 }
 0x383   :  { %v9298_v8 = vpop.eup %9297 }
 0x384   :  { %v1712_v33 = vpop.xlane.xlu1 %1711  ;;  %v1722_v57 = vmul.f32 %v9298_v8, %v10792_v55 }
 0x385   :  { %9303 = vrcp.f32 %v1712_v33 }
 0x387   :  { %v9300_v12 = vpop.eup %9299 }
 0x388   :  { %v1715_v4 = vpop.xlane.xlu0 %1714  ;;  %v9149_v43 = vpop.permute.xlu1 %9148  ;;  %v1724_v7 = vmul.f32 %v9300_v12, %v10796_v41 }
 0x389   :  { %v9151_v54 = vunpack.i.h.bf16 %v9149_v43  ;;  %v9150_v19 = vunpack.i.l.bf16 %v9149_v43  ;;  %9305 = vrcp.f32 %v1715_v4 }
 0x38b   :  { %v10856_v29 = vpack.c.bf16 %v9151_v54, %v9150_v19  ;;  %v9302_v38 = vpop.eup %9301 }
 0x38c   :  { %v1718_v18 = vpop.xlane.xlu0 %1717  ;;  %v1726_v55 = vmul.f32 %v9302_v38, %v10800_v22  ;;  %v2011_v22 = vpop.permute.xlu1 %2010 }
 0x38d   :  { %8912 = vmatpush3.bf16.msra.mxu0 %v10856_v29  ;;  %9307 = vrcp.f32 %v1718_v18 }
 0x38e   :  { %7939 = vmatprep.subr.mxu0 %v13217_v30 }
 0x38f   :  { %v9304_v56 = vpop.eup %9303 }
 0x390   :  { %v10861_v44 = vpop.permute.xlu0 %1752  ;;  %v1728_v2 = vmul.f32 %v9304_v56, %v10804_v37  ;;  %v2013_v37 = vpop.permute.xlu1 %2012 }
 0x391   :  { %7940 = vmatpush3.msra.mxu0 %v10861_v44 }
 0x392   :  { %7942 = vmatmul.mubr.msk.f32.vlgmr.msra.gmra.mrb[44].mxu0 %vm1655_vm8, %v1720_v10  ;;  %8916 = vmatprep.subr.bf16.mxu0 %v13216_v36 }
 0x393   :  { %8918 = vmatpush3.bf16.msra.mxu0 %v10865_v47  ;;  %7944 = vmatprep.mubr.msk.f32.mxu0 %vm9697_vm0, %v13217_v30  ;;  %v9306_v42 = vpop.eup %9305 }
 0x394   :  { %8928 = vmatprep.subr.bf16.mxu0 %v13216_v36  ;;  %v1730_v41 = vmul.f32 %v9306_v42, %v10812_v17  ;;  %v2015_v46 = vpop.permute.xlu1 %2014  ;;  %v2019_v25 = vpop.permute.xlu0 %2018 }
 0x396   :  { %7945 = vmatmul.mubr.msk.f32.gmra.mrb[46].mxu0 %vm1655_vm8, %v1722_v57 }
 0x397   :  { %7947 = vmatprep.mubr.msk.f32.mxu0 %vm9697_vm0, %v13217_v30  ;;  %v9308_v34 = vpop.eup %9307 }
 0x398   :  { %v1732_v39 = vmul.f32 %v9308_v34, %v10820_v1  ;;  %v2017_v17 = vpop.permute.xlu1 %2016  ;;  %v2023_v45 = vpop.permute.xlu0 %2022 }
 0x39a   :  { %7948 = vmatmul.mubr.msk.f32.gmra.mrb[48].mxu0 %vm1655_vm8, %v1724_v7 }
 0x39b   :  { %7950 = vmatprep.mubr.msk.f32.mxu0 %vm9697_vm0, %v13217_v30 }
 0x39c   :  { %v2021_v1 = vpop.permute.xlu1 %2020 }
 0x39e   :  { %7951 = vmatmul.mubr.msk.f32.gmra.mrb[50].mxu0 %vm1655_vm8, %v1726_v55 }
 0x39f   :  { %7953 = vmatprep.mubr.msk.f32.mxu0 %vm9697_vm0, %v13217_v30 }
 0x3a2   :  { %7954 = vmatmul.mubr.msk.f32.gmra.mrb[52].mxu0 %vm1655_vm8, %v1728_v2 }
 0x3a3   :  { %7956 = vmatprep.mubr.msk.f32.mxu0 %vm9697_vm0, %v13217_v30 }
 0x3a6   :  { %7957 = vmatmul.mubr.msk.f32.gmra.mrb[54].mxu0 %vm1655_vm8, %v1730_v41 }
 0x3a7   :  { %7959 = vmatprep.mubr.msk.f32.mxu0 %vm9697_vm0, %v13217_v30 }
 0x3aa   :  { %7960 = vmatmul.mubr.msk.f32.gmra.mrb[56].mxu0 %vm1655_vm8, %v1732_v39 }
 0x3ab   :  { %7991 = vmatprep.mubr.msk.f32.mxu0 %vm9697_vm0, %v13217_v30 }
 0x3ae   :  { %7992 = vmatmul.mubr.msk.f32.vlgmr.msra.gmra.mrb[58].mxu0 %vm1533_vm2, %v2011_v22 }
 0x3af   :  { %7994 = vmatprep.mubr.msk.f32.mxu0 %vm9697_vm0, %v13217_v30 }
 0x3b2   :  { %7995 = vmatmul.mubr.msk.f32.gmra.mrb[60].mxu0 %vm1533_vm2, %v2013_v37 }
 0x3b3   :  { %7997 = vmatprep.mubr.msk.f32.mxu0 %vm9697_vm0, %v13217_v30 }
 0x3b6   :  { %7998 = vmatmul.mubr.msk.f32.gmra.mrb[62].mxu0 %vm1533_vm2, %v2015_v46 }
 0x3b7   :  { %8000 = vmatprep.mubr.msk.f32.mxu0 %vm9697_vm0, %v13217_v30 }
 0x3ba   :  { %8001 = vmatmul.mubr.msk.f32.gmra.mrb[64].mxu0 %vm1533_vm2, %v2017_v17 }
 0x3bb   :  { %8003 = vmatprep.mubr.msk.f32.mxu0 %vm9697_vm0, %v13217_v30 }
 0x3be   :  { %8004 = vmatmul.mubr.msk.f32.gmra.mrb[66].mxu0 %vm1533_vm2, %v2019_v25 }
 0x3bf   :  { %8006 = vmatprep.mubr.msk.f32.mxu0 %vm9697_vm0, %v13217_v30 }
 0x3c2   :  { %8007 = vmatmul.mubr.msk.f32.gmra.mrb[68].mxu0 %vm1533_vm2, %v2021_v1 }
 0x3c3   :  { %8009 = vmatprep.mubr.msk.f32.mxu0 %vm9697_vm0, %v13217_v30 }
 0x3c6   :  { %8010 = vmatmul.mubr.msk.f32.gmra.mrb[70].mxu0 %vm1533_vm2, %v2023_v45 }
 0x3c7   :  { %8051 = vmatprep.mubr.msk.f32.mxu0 %vm9697_vm0, %v13217_v30 }
 0x465   :  { %v1848_v59 = vpop.f32.mrb[44].mxu0 }
 0x466   :  { %v7943_v15 = vpop.f32.mrb[45].mxu0  ;;  %7967 = vmatmul.mubr.msk.f32.vlgmr.msra.gmra.mrb[46].mxu1 %vm1533_vm2, %v1848_v59 }
 0x467   :  { %7969 = vmatprep.mubr.msk.f32.mxu1 %vm9697_vm0, %v13217_v30 }
 0x469   :  { %v1853_v63 = vpop.f32.mrb[46].mxu0 }
 0x46a   :  { %v7946_v3 = vpop.f32.mrb[47].mxu0  ;;  %7970 = vmatmul.mubr.msk.f32.gmra.mrb[48].mxu1 %vm1533_vm2, %v1853_v63 }
 0x46b   :  { %7972 = vmatprep.mubr.msk.f32.mxu1 %vm9697_vm0, %v13217_v30 }
 0x46d   :  { %v1858_v20 = vpop.f32.mrb[48].mxu0 }
 0x46e   :  { %v7949_v9 = vpop.f32.mrb[49].mxu0  ;;  %7973 = vmatmul.mubr.msk.f32.gmra.mrb[50].mxu1 %vm1533_vm2, %v1858_v20 }
 0x46f   :  { %7975 = vmatprep.mubr.msk.f32.mxu1 %vm9697_vm0, %v13217_v30 }
 0x471   :  { %v1863_v32 = vpop.f32.mrb[50].mxu0 }
 0x472   :  { %v7952_v33 = vpop.f32.mrb[51].mxu0  ;;  %7976 = vmatmul.mubr.msk.f32.gmra.mrb[52].mxu1 %vm1533_vm2, %v1863_v32 }
 0x473   :  { %7978 = vmatprep.mubr.msk.f32.mxu1 %vm9697_vm0, %v13217_v30 }
 0x475   :  { %v1868_v4 = vpop.f32.mrb[52].mxu0 }
 0x476   :  { %v7955_v43 = vpop.f32.mrb[53].mxu0  ;;  %7979 = vmatmul.mubr.msk.f32.gmra.mrb[54].mxu1 %vm1533_vm2, %v1868_v4 }
 0x477   :  { %7981 = vmatprep.mubr.msk.f32.mxu1 %vm9697_vm0, %v13217_v30 }
 0x479   :  { %v1873_v54 = vpop.f32.mrb[54].mxu0 }
 0x47a   :  { %v7958_v19 = vpop.f32.mrb[55].mxu0  ;;  %7982 = vmatmul.mubr.msk.f32.gmra.mrb[56].mxu1 %vm1533_vm2, %v1873_v54 }
 0x47b   :  { %7984 = vmatprep.mubr.msk.f32.mxu1 %vm9697_vm0, %v13217_v30 }
 0x47d   :  { %v1878_v18 = vpop.f32.mrb[56].mxu0 }
 0x47e   :  { %v7961_v28 = vpop.f32.mrb[57].mxu0  ;;  %7985 = vmatmul.mubr.msk.f32.gmra.mrb[58].mxu1 %vm1533_vm2, %v1878_v18 }
 0x47f   :  { %8026 = vmatprep.mubr.msk.f32.mxu1 %vm9697_vm0, %v13217_v30 }
 0x481   :  { %v2104_v10 = vpop.f32.mrb[58].mxu0 }
 0x482   :  { %v2105_v8 = vadd.f32 %v2104_v10, %v10711_v61  ;;  %v7993_v57 = vpop.f32.mrb[59].mxu0 }
 0x484   :  { %v2138_v12 = vsel %vm1655_vm8, %v2105_v8, -inf }
 0x485   :  { %2139 = vmax.xlane.f32.xlu1 %v2138_v12  ;;  %v2109_v7 = vpop.f32.mrb[60].mxu0 }
 0x486   :  { %v2110_v38 = vadd.f32 %v2109_v7, %v10723_v53  ;;  %v7996_v55 = vpop.f32.mrb[61].mxu0 }
 0x488   :  { %v2141_v56 = vsel %vm1655_vm8, %v2110_v38, -inf }
 0x489   :  { %2142 = vmax.xlane.f32.xlu0 %v2141_v56  ;;  %v2114_v2 = vpop.f32.mrb[62].mxu0 }
 0x48a   :  { %v2115_v42 = vadd.f32 %v2114_v2, %v10736_v11  ;;  %v7999_v41 = vpop.f32.mrb[63].mxu0 }
 0x48c   :  { %v2144_v34 = vsel %vm1655_vm8, %v2115_v42, -inf }
 0x48d   :  { %2145 = vmax.xlane.f32.xlu0 %v2144_v34  ;;  %v2119_v22 = vpop.f32.mrb[64].mxu0 }
 0x48e   :  { %v2120_v39 = vadd.f32 %v2119_v22, %v10749_v23  ;;  %v8002_v37 = vpop.f32.mrb[65].mxu0 }
 0x490   :  { %v2147_v46 = vsel %vm1655_vm8, %v2120_v39, -inf }
 0x491   :  { %2148 = vmax.xlane.f32.xlu1 %v2147_v46  ;;  %v2124_v17 = vpop.f32.mrb[66].mxu0 }
 0x492   :  { %v2125_v25 = vadd.f32 %v2124_v17, %v10761_v13  ;;  %v8005_v1 = vpop.f32.mrb[67].mxu0 }
 0x494   :  { %v2150_v45 = vsel %vm1655_vm8, %v2125_v25, -inf }
 0x495   :  { %2151 = vmax.xlane.f32.xlu0 %v2150_v45  ;;  %v2129_v59 = vpop.f32.mrb[68].mxu0 }
 0x496   :  { %v2130_v15 = vadd.f32 %v2129_v59, %v10773_v58  ;;  %v8008_v63 = vpop.f32.mrb[69].mxu0 }
 0x498   :  { %v2153_v3 = vsel %vm1655_vm8, %v2130_v15, -inf }
 0x499   :  { %2154 = vmax.xlane.f32.xlu1 %v2153_v3  ;;  %v2134_v20 = vpop.f32.mrb[70].mxu0 }
 0x49a   :  { %v10953_v9 = vadd.f32 %v2134_v20, %v10781_v52  ;;  %v8011_v32 = vpop.f32.mrb[71].mxu0 }
 0x49c   :  { %v2156_v33 = vsel %vm1655_vm8, %v10953_v9, -inf }
 0x49d   :  { %2157 = vmax.xlane.f32.xlu0 %v2156_v33 }
 0x4aa   :  { %9153 = vrot.lane.b32.xlu1 %v10688_v51, %s9703_s17 }
 0x4b3   :  { %9158 = vrot.lane.b32.xlu0 %v10686_v21, %s9703_s17 }
 0x512   :  { %v2140_v4 = vpop.xlane.xlu1 %2139 }
 0x513   :  { %v2159_v43 = vsub.f32 %v2105_v8, %v2140_v4 }
 0x515   :  { %v2166_v54 = vmul.f32 1.442695, %v2159_v43 }
 0x516   :  { %v2143_v19 = vpop.xlane.xlu0 %2142 }
 0x517   :  { %9309 = vpow2.f32 %v2166_v54  ;;  %v2160_v18 = vsub.f32 %v2110_v38, %v2143_v19 }
 0x519   :  { %v2168_v28 = vmul.f32 1.442695, %v2160_v18 }
 0x51a   :  { %v2146_v10 = vpop.xlane.xlu0 %2145 }
 0x51b   :  { %9311 = vpow2.f32 %v2168_v28  ;;  %v2161_v57 = vsub.f32 %v2115_v42, %v2146_v10 }
 0x51d   :  { %v2170_v12 = vmul.f32 1.442695, %v2161_v57 }
 0x51e   :  { %v2149_v7 = vpop.xlane.xlu1 %2148 }
 0x51f   :  { %9313 = vpow2.f32 %v2170_v12  ;;  %v2162_v55 = vsub.f32 %v2120_v39, %v2149_v7 }
 0x521   :  { %v10961_v56 = vpop.eup %9309  ;;  %v2172_v51 = vmul.f32 1.442695, %v2162_v55 }
 0x522   :  { %v2152_v2 = vpop.xlane.xlu0 %2151  ;;  %v2180_v21 = vsel %vm1655_vm8, %v10961_v56, 0.0 }
 0x523   :  { %9315 = vpow2.f32 %v2172_v51  ;;  %v2163_v8 = vsub.f32 %v2125_v25, %v2152_v2  ;;  %2181 = vadd.xlane.f32.xlu1 %v2180_v21 }
 0x525   :  { %v10965_v41 = vpop.eup %9311  ;;  %v2174_v38 = vmul.f32 1.442695, %v2163_v8 }
 0x526   :  { %v2155_v34 = vpop.xlane.xlu1 %2154  ;;  %v2183_v42 = vsel %vm1655_vm8, %v10965_v41, 0.0 }
 0x527   :  { %9317 = vpow2.f32 %v2174_v38  ;;  %v2164_v22 = vsub.f32 %v2130_v15, %v2155_v34  ;;  %2184 = vadd.xlane.f32.xlu0 %v2183_v42 }
 0x529   :  { %v10969_v39 = vpop.eup %9313  ;;  %v2176_v37 = vmul.f32 1.442695, %v2164_v22 }
 0x52a   :  { %v9154_v46 = vpop.permute.xlu1 %9153  ;;  %v2158_v17 = vpop.xlane.xlu0 %2157  ;;  %v2186_v1 = vsel %vm1655_vm8, %v10969_v39, 0.0 }
 0x52b   :  { %9319 = vpow2.f32 %v2176_v37  ;;  %v9156_v25 = vunpack.i.h.bf16 %v9154_v46  ;;  %v9155_v45 = vunpack.i.l.bf16 %v9154_v46  ;;  %2187 = vadd.xlane.f32.xlu1 %v2186_v1  ;;  %v2165_v42 = vsub.f32 %v10953_v9, %v2158_v17 }
 0x52d   :  { %v10973_v59 = vpop.eup %9315  ;;  %v10975_v63 = vpack.c.bf16 %v9156_v25, %v9155_v45  ;;  %v2178_v37 = vmul.f32 1.442695, %v2165_v42 }
 0x52e   :  { %v9159_v3 = vpop.permute.xlu0 %9158  ;;  %v2189_v15 = vsel %vm1655_vm8, %v10973_v59, 0.0 }
 0x52f   :  { %13243 = vst [vmem:[#allocation31_spill] sm:$0xff] %v10975_v63  ;;  %v9161_v20 = vunpack.i.h.bf16 %v9159_v3  ;;  %v9160_v32 = vunpack.i.l.bf16 %v9159_v3  ;;  %8921 = vmatpush3.bf16.msra.mxu1 %v10975_v63  ;;  %2190 = vadd.xlane.f32.xlu0 %v2189_v15  ;;  %9321 = vpow2.f32 %v2178_v37 }
 0x530   :  { %8922 = vmatprep.subr.bf16.mxu1 %v13216_v36 }
 0x531   :  { %v10981_v33 = vpop.eup %9317  ;;  %v10983_v4 = vpack.c.bf16 %v9161_v20, %v9160_v32 }
 0x532   :  { %v2192_v43 = vsel %vm1655_vm8, %v10981_v33, 0.0 }
 0x533   :  { %13244 = vst [vmem:[#allocation32_spill] sm:$0xff] %v10983_v4  ;;  %2193 = vadd.xlane.f32.xlu0 %v2192_v43  ;;  %8924 = vmatpush3.bf16.msra.mxu1 %v10983_v4 }
 0x534   :  { %8925 = vmatprep.subr.bf16.mxu1 %v13216_v36 }
 0x535   :  { %v10989_v54 = vpop.eup %9319 }
 0x536   :  { %v2195_v19 = vsel %vm1655_vm8, %v10989_v54, 0.0 }
 0x537   :  { %2196 = vadd.xlane.f32.xlu1 %v2195_v19 }
 0x539   :  { %v10993_v18 = vpop.f32.mrb[46].mxu1  ;;  %v9322_v46 = vpop.eup %9321 }
 0x53a   :  { %v7968_v28 = vpop.f32.mrb[47].mxu1  ;;  %v2198_v1 = vsel %vm1655_vm8, %v9322_v46, 0.0 }
 0x53d   :  { %v10995_v10 = vpop.f32.mrb[48].mxu1 }
 0x53e   :  { %v7971_v57 = vpop.f32.mrb[49].mxu1 }
 0x541   :  { %v10997_v12 = vpop.f32.mrb[50].mxu1 }
 0x542   :  { %v7974_v7 = vpop.f32.mrb[51].mxu1 }
 0x545   :  { %v10999_v55 = vpop.f32.mrb[52].mxu1 }
 0x546   :  { %v7977_v51 = vpop.f32.mrb[53].mxu1 }
 0x548   :  { %2227 = vrot.lane.b32.xlu1 %v10832_v60, %s9703_s17  ;;  %v140_v60 = vld [vmem:[%s13066_s7 + $0x10] sm:$0xff] }
 0x549   :  { %v11003_v2 = vpop.f32.mrb[54].mxu1  ;;  %9163 = vrot.lane.b32.xlu0 %v10690_v49, %s9703_s17  ;;  %v141_v49 = vld [vmem:[%s13066_s7 + $0x18] sm:$0xff] }
 0x54a   :  { %v7980_v21 = vpop.f32.mrb[55].mxu1  ;;  %v11019_v25 = vpack.c.bf16 %v141_v49, %v140_v60 }
 0x54c   :  { %13245 = vst [vmem:[#allocation33_spill] sm:$0xff] %v11019_v25  ;;  %8930 = vmatpush3.bf16.msra.mxu0 %v11019_v25 }
 0x54d   :  { %v11007_v8 = vpop.f32.mrb[56].mxu1  ;;  %8937 = vmatprep.subr.bf16.mxu0 %v13216_v36 }
 0x54e   :  { %v7983_v38 = vpop.f32.mrb[57].mxu1 }
 0x551   :  { %v11009_v34 = vpop.f32.mrb[58].mxu1 }
 0x552   :  { %v7986_v22 = vpop.f32.mrb[59].mxu1 }
 0x568   :  { %2199 = vadd.xlane.f32.xlu0 %v2198_v1 }
 0x5b0   :  { %v2182_v17 = vpop.xlane.xlu1 %2181 }
 0x5b1   :  { %9323 = vrcp.f32 %v2182_v17 }
 0x5b4   :  { %v2185_v9 = vpop.xlane.xlu0 %2184 }
 0x5b5   :  { %9325 = vrcp.f32 %v2185_v9 }
 0x5b8   :  { %v2188_v15 = vpop.xlane.xlu1 %2187 }
 0x5b9   :  { %9327 = vrcp.f32 %v2188_v15 }
 0x5bb   :  { %v9324_v57 = vpop.eup %9323 }
 0x5bc   :  { %v2191_v45 = vpop.xlane.xlu0 %2190  ;;  %v2202_v7 = vmul.f32 %v9324_v57, %v10961_v56 }
 0x5bd   :  { %9329 = vrcp.f32 %v2191_v45 }
 0x5bf   :  { %v9326_v21 = vpop.eup %9325 }
 0x5c0   :  { %v2194_v3 = vpop.xlane.xlu0 %2193  ;;  %v2204_v38 = vmul.f32 %v9326_v21, %v10965_v41 }
 0x5c1   :  { %9331 = vrcp.f32 %v2194_v3 }
 0x5c3   :  { %v9328_v42 = vpop.eup %9327 }
 0x5c4   :  { %v9164_v20 = vpop.permute.xlu0 %9163  ;;  %v2197_v19 = vpop.xlane.xlu1 %2196  ;;  %v2206_v56 = vmul.f32 %v9328_v42, %v10969_v39 }
 0x5c5   :  { %v9166_v32 = vunpack.i.h.bf16 %v9164_v20  ;;  %v9165_v43 = vunpack.i.l.bf16 %v9164_v20  ;;  %9333 = vrcp.f32 %v2197_v19 }
 0x5c7   :  { %v11023_v28 = vpack.c.bf16 %v9166_v32, %v9165_v43  ;;  %v9330_v22 = vpop.eup %9329 }
 0x5c8   :  { %v11028_v51 = vpop.permute.xlu1 %2227  ;;  %v2208_v37 = vmul.f32 %v9330_v22, %v10973_v59 }
 0x5c9   :  { %13246 = vst [vmem:[#allocation34_spill] sm:$0xff] %v11023_v28  ;;  %8927 = vmatpush3.bf16.msra.mxu1 %v11023_v28  ;;  %13247 = vst [vmem:[#allocation35_spill] sm:$0xff] %v11028_v51 }
 0x5ca   :  { %8024 = vmatprep.subr.mxu1 %v13217_v30 }
 0x5cb   :  { %v9332_v1 = vpop.eup %9331 }
 0x5cc   :  { %v2210_v41 = vmul.f32 %v9332_v1, %v10981_v33 }
 0x5cd   :  { %8025 = vmatpush3.msra.mxu1 %v11028_v51 }
 0x5ce   :  { %8027 = vmatmul.mubr.msk.f32.vlgmr.msra.gmra.mrb[60].mxu1 %vm1655_vm8, %v2202_v7  ;;  %8931 = vmatprep.subr.bf16.mxu1 %v13216_v36 }
 0x5cf   :  { %8029 = vmatprep.mubr.msk.f32.mxu1 %vm9697_vm0, %v13217_v30  ;;  %v9334_v60 = vpop.eup %9333 }
 0x5d0   :  { %v2212_v39 = vmul.f32 %v9334_v60, %v10989_v54 }
 0x5d2   :  { %8030 = vmatmul.mubr.msk.f32.gmra.mrb[62].mxu1 %vm1655_vm8, %v2204_v38  ;;  %v7084_v38 = vld [vmem:[%s13067_s8] ss:$0 sm:$0xff] }
 0x5d3   :  { %8032 = vmatprep.mubr.msk.f32.mxu1 %vm9697_vm0, %v13217_v30  ;;  %v2003_v42 = vadd.f32 %v7084_v38, %v10993_v18  ;;  %v2004_v1 = vadd.f32 %v7084_v38, %v10995_v10  ;;  %v9660_v18 = vld [vmem:[%s13184_s28 + $0x8] sm:$0xff] }
 0x5d6   :  { %8033 = vmatmul.mubr.msk.f32.gmra.mrb[64].mxu1 %vm1655_vm8, %v2206_v56 }
 0x5d7   :  { %8035 = vmatprep.mubr.msk.f32.mxu1 %vm9697_vm0, %v13217_v30 }
 0x5da   :  { %8036 = vmatmul.mubr.msk.f32.gmra.mrb[66].mxu1 %vm1655_vm8, %v2208_v37 }
 0x5db   :  { %8038 = vmatprep.mubr.msk.f32.mxu1 %vm9697_vm0, %v13217_v30 }
 0x5de   :  { %8039 = vmatmul.mubr.msk.f32.gmra.mrb[68].mxu1 %vm1655_vm8, %v2210_v41  ;;  %v9659_v41 = vld [vmem:[%s13184_s28] sm:$0xff] }
 0x5df   :  { %8041 = vmatprep.mubr.msk.f32.mxu1 %vm9697_vm0, %v13217_v30 }
 0x5e2   :  { %8042 = vmatmul.mubr.msk.f32.gmra.mrb[70].mxu1 %vm1655_vm8, %v2212_v39 }
 0x5e3   :  { %8044 = vmatprep.mubr.msk.f32.mxu1 %vm9697_vm0, %v13217_v30 }
 0x5f5   :  { %v2200_v59 = vpop.xlane.xlu0 %2199 }
 0x5f6   :  { %9335 = vrcp.f32 %v2200_v59 }
 0x600   :  { %v9336_v49 = vpop.eup %9335 }
 0x601   :  { %v2214_v9 = vmul.f32 %v9336_v49, %v9322_v46 }
 0x603   :  { %8045 = vmatmul.mubr.msk.f32.gmra.mrb[72].mxu1 %vm1655_vm8, %v2214_v9 }
 0x604   :  { %8080 = vmatprep.mubr.msk.f32.mxu1 %vm9697_vm0, %v13217_v30 }
 0x6a1   :  { %v2323_v33 = vpop.f32.mrb[60].mxu1 }
 0x6a2   :  { %v8028_v17 = vpop.f32.mrb[61].mxu1  ;;  %8052 = vmatmul.mubr.msk.f32.vlgmr.msra.gmra.mrb[72].mxu0 %vm1533_vm2, %v2323_v33  ;;  %v2005_v33 = vadd.f32 %v7084_v38, %v10997_v12 }
 0x6a3   :  { %8054 = vmatprep.mubr.msk.f32.mxu0 %vm9697_vm0, %v13217_v30 }
 0x6a5   :  { %v2328_v54 = vpop.f32.mrb[62].mxu1 }
 0x6a6   :  { %v8031_v45 = vpop.f32.mrb[63].mxu1  ;;  %8055 = vmatmul.mubr.msk.f32.gmra.mrb[74].mxu0 %vm1533_vm2, %v2328_v54 }
 0x6a7   :  { %8057 = vmatprep.mubr.msk.f32.mxu0 %vm9697_vm0, %v13217_v30 }
 0x6a9   :  { %v2333_v46 = vpop.f32.mrb[64].mxu1 }
 0x6aa   :  { %v8034_v3 = vpop.f32.mrb[65].mxu1  ;;  %8058 = vmatmul.mubr.msk.f32.gmra.mrb[76].mxu0 %vm1533_vm2, %v2333_v46 }
 0x6ab   :  { %8060 = vmatprep.mubr.msk.f32.mxu0 %vm9697_vm0, %v13217_v30  ;;  %v2006_v3 = vadd.f32 %v7084_v38, %v10999_v55 }
 0x6ad   :  { %v2338_v15 = vpop.f32.mrb[66].mxu1 }
 0x6ae   :  { %v8037_v20 = vpop.f32.mrb[67].mxu1  ;;  %8061 = vmatmul.mubr.msk.f32.gmra.mrb[78].mxu0 %vm1533_vm2, %v2338_v15  ;;  %v9661_v15 = vld [vmem:[%s13184_s28 + $0x10] sm:$0xff] }
 0x6af   :  { %8063 = vmatprep.mubr.msk.f32.mxu0 %vm9697_vm0, %v13217_v30 }
 0x6b1   :  { %v2343_v32 = vpop.f32.mrb[68].mxu1 }
 0x6b2   :  { %v8040_v43 = vpop.f32.mrb[69].mxu1  ;;  %8064 = vmatmul.mubr.msk.f32.gmra.mrb[80].mxu0 %vm1533_vm2, %v2343_v32 }
 0x6b3   :  { %8066 = vmatprep.mubr.msk.f32.mxu0 %vm9697_vm0, %v13217_v30 }
 0x6b5   :  { %v2348_v19 = vpop.f32.mrb[70].mxu1 }
 0x6b6   :  { %v8043_v57 = vpop.f32.mrb[71].mxu1  ;;  %8067 = vmatmul.mubr.msk.f32.gmra.mrb[82].mxu0 %vm1533_vm2, %v2348_v19 }
 0x6b7   :  { %8069 = vmatprep.mubr.msk.f32.mxu0 %vm9697_vm0, %v13217_v30  ;;  %v2007_v57 = vadd.f32 %v7084_v38, %v11003_v2 }
 0x6d6   :  { %v2353_v7 = vpop.f32.mrb[72].mxu1 }
 0x6d7   :  { %v8046_v21 = vpop.f32.mrb[73].mxu1  ;;  %8070 = vmatmul.mubr.msk.f32.gmra.mrb[84].mxu0 %vm1533_vm2, %v2353_v7  ;;  %v9662_v7 = vld [vmem:[%s13184_s28 + $0x18] sm:$0xff] }
 0x6d8   :  { %8105 = vmatprep.mubr.msk.f32.mxu0 %vm9697_vm0, %v13217_v30 }
 0x775   :  { %v2444_v56 = vpop.f32.mrb[72].mxu0 }
 0x776   :  { %v2478_v22 = vadd.f32 %v2444_v56, %v2003_v42  ;;  %v8053_v37 = vpop.f32.mrb[73].mxu0 }
 0x777   :  { %v2008_v37 = vadd.f32 %v7084_v38, %v11007_v8  ;;  %v2009_v8 = vadd.f32 %v7084_v38, %v11009_v34 }
 0x778   :  { %v2485_v60 = vadd.f32 %v9659_v41, %v2478_v22 }
 0x779   :  { %v2449_v39 = vpop.f32.mrb[74].mxu0 }
 0x77a   :  { %v2479_v59 = vadd.f32 %v2449_v39, %v2004_v1  ;;  %v8056_v49 = vpop.f32.mrb[75].mxu0  ;;  %v2492_v9 = vsel %vm323_vm1, %v2485_v60, 0.0  ;;  %v9663_v1 = vld [vmem:[%s13184_s28 + $0x20] sm:$0xff] }
 0x77b   :  { %2493 = vadd.xlane.f32.xlu0 %v2492_v9  ;;  %v9664_v9 = vld [vmem:[%s13184_s28 + $0x28] sm:$0xff] }
 0x77c   :  { %v2486_v17 = vadd.f32 %v9660_v18, %v2479_v59 }
 0x77d   :  { %v2454_v54 = vpop.f32.mrb[76].mxu0 }
 0x77e   :  { %v2480_v10 = vadd.f32 %v2454_v54, %v2005_v33  ;;  %v8059_v45 = vpop.f32.mrb[77].mxu0  ;;  %v2495_v46 = vsel %vm323_vm1, %v2486_v17, 0.0 }
 0x77f   :  { %2496 = vadd.xlane.f32.xlu0 %v2495_v46  ;;  %v9665_v46 = vld [vmem:[%s13184_s28 + $0x30] sm:$0xff] }
 0x780   :  { %v2487_v20 = vadd.f32 %v9661_v15, %v2480_v10 }
 0x781   :  { %v2459_v32 = vpop.f32.mrb[78].mxu0 }
 0x782   :  { %v2481_v12 = vadd.f32 %v2459_v32, %v2006_v3  ;;  %v8062_v43 = vpop.f32.mrb[79].mxu0  ;;  %v2498_v19 = vsel %vm323_vm1, %v2487_v20, 0.0 }
 0x783   :  { %2499 = vadd.xlane.f32.xlu1 %v2498_v19 }
 0x784   :  { %v2488_v21 = vadd.f32 %v9662_v7, %v2481_v12 }
 0x785   :  { %v2464_v42 = vpop.f32.mrb[80].mxu0 }
 0x786   :  { %v2482_v55 = vadd.f32 %v2464_v42, %v2007_v57  ;;  %v8065_v56 = vpop.f32.mrb[81].mxu0  ;;  %v2501_v22 = vsel %vm323_vm1, %v2488_v21, 0.0 }
 0x787   :  { %2502 = vadd.xlane.f32.xlu0 %v2501_v22 }
 0x788   :  { %v2489_v41 = vadd.f32 %v9663_v1, %v2482_v55 }
 0x789   :  { %v2469_v39 = vpop.f32.mrb[82].mxu0 }
 0x78a   :  { %v2483_v2 = vadd.f32 %v2469_v39, %v2008_v37  ;;  %v8068_v59 = vpop.f32.mrb[83].mxu0  ;;  %v2504_v49 = vsel %vm323_vm1, %v2489_v41, 0.0 }
 0x78b   :  { %2505 = vadd.xlane.f32.xlu0 %v2504_v49 }
 0x78c   :  { %v2490_v33 = vadd.f32 %v9664_v9, %v2483_v2 }
 0x78e   :  { %v2507_v18 = vsel %vm323_vm1, %v2490_v33, 0.0 }
 0x78f   :  { %2508 = vadd.xlane.f32.xlu0 %v2507_v18 }
 0x7aa   :  { %v2474_v54 = vpop.f32.mrb[84].mxu0 }
 0x7ab   :  { %v2484_v10 = vadd.f32 %v2474_v54, %v2009_v8  ;;  %v8071_v45 = vpop.f32.mrb[85].mxu0 }
 0x7ad   :  { %v2491_v3 = vadd.f32 %v9665_v46, %v2484_v10 }
 0x7af   :  { %v2510_v15 = vsel %vm323_vm1, %v2491_v3, 0.0 }
 0x7b0   :  { %2511 = vadd.xlane.f32.xlu0 %v2510_v15 }
 0x808   :  { %v2494_v32 = vpop.xlane.xlu0 %2493 }
 0x809   :  { %v2514_v12 = vmul.f32 0.03125, %v2494_v32  ;;  %v144_v32 = vld [vmem:[%s13068_s9 + $0x8] sm:$0xff] }
 0x80b   :  { %v11117_v43 = vsub.f32 %v2485_v60, %v2514_v12 }
 0x80c   :  { %v2497_v19 = vpop.xlane.xlu0 %2496 }
 0x80d   :  { %v2515_v57 = vmul.f32 0.03125, %v2497_v19  ;;  %v2528_v34 = vmul.f32 %v11117_v43, %v11117_v43  ;;  %v146_v19 = vld [vmem:[%s13068_s9 + $0x18] sm:$0xff] }
 0x80f   :  { %v11121_v38 = vsub.f32 %v2486_v17, %v2515_v57  ;;  %v2535_v7 = vsel %vm323_vm1, %v2528_v34, 0.0 }
 0x810   :  { %v2500_v42 = vpop.xlane.xlu1 %2499  ;;  %2536 = vadd.xlane.f32.xlu0 %v2535_v7 }
 0x811   :  { %v2516_v55 = vmul.f32 0.03125, %v2500_v42  ;;  %v2529_v56 = vmul.f32 %v11121_v38, %v11121_v38 }
 0x813   :  { %v11126_v22 = vsub.f32 %v2487_v20, %v2516_v55  ;;  %v2538_v60 = vsel %vm323_vm1, %v2529_v56, 0.0 }
 0x814   :  { %v2503_v37 = vpop.xlane.xlu0 %2502  ;;  %2539 = vadd.xlane.f32.xlu0 %v2538_v60  ;;  %v11175_v60 = vld [vmem:[%s13069_s11] sm:$0x7] }
 0x815   :  { %v2517_v1 = vmul.f32 0.03125, %v2503_v37  ;;  %v2530_v39 = vmul.f32 %v11126_v22, %v11126_v22  ;;  %v13250_v37 = vld [vmem:[#allocation4_spill] sm:$0xff] }
 0x817   :  { %v11131_v17 = vsub.f32 %v2488_v21, %v2517_v1  ;;  %v2541_v2 = vsel %vm323_vm1, %v2530_v39, 0.0  ;;  %v699_v1 = vrot.slane %v11175_v60, %v13250_v37  ;;  %v13251_v39 = vld [vmem:[#allocation7_spill] sm:$0xff] }
 0x818   :  { %v2506_v59 = vpop.xlane.xlu0 %2505  ;;  %2542 = vadd.xlane.f32.xlu0 %v2541_v2 }
 0x819   :  { %v2518_v49 = vmul.f32 0.03125, %v2506_v59  ;;  %v2531_v9 = vmul.f32 %v11131_v17, %v11131_v17  ;;  %v700_v2 = vadd.f32 %v699_v1, %v13251_v39  ;;  %v13252_v59 = vld [vmem:[#allocation5_spill] sm:$0xff] }
 0x81b   :  { %v11136_v20 = vsub.f32 %v2489_v41, %v2518_v49  ;;  %v2544_v18 = vsel %vm323_vm1, %v2531_v9, 0.0  ;;  %v143_v41 = vld [vmem:[%s13068_s9] sm:$0xff]  ;;  %v701_v49 = vadd.f32 %v13252_v59, %v699_v1 }
 0x81c   :  { %v2509_v8 = vpop.xlane.xlu0 %2508  ;;  %2545 = vadd.xlane.f32.xlu0 %v2544_v18  ;;  %v11153_v12 = vpack.c.bf16 %v144_v32, %v143_v41  ;;  %v13253_v9 = vld [vmem:[#allocation10_spill] sm:$0xff] }
 0x81d   :  { %v2519_v54 = vmul.f32 0.03125, %v2509_v8  ;;  %v2532_v10 = vmul.f32 %v11136_v20, %v11136_v20  ;;  %v702_v18 = vadd.f32 %v699_v1, %v13253_v9  ;;  %v13254_v8 = vld [vmem:[#allocation8_spill] sm:$0xff]  ;;  %v13257_v41 = vld [vmem:[#allocation14_spill] sm:$0xff] }
 0x81e   :  { %13248 = vst [vmem:[#allocation36_spill] sm:$0xff] %v11153_v12  ;;  %8933 = vmatpush3.bf16.msra.mxu1 %v11153_v12  ;;  %v706_v32 = vadd.f32 %v699_v1, %v13257_v41 }
 0x81f   :  { %v11141_v21 = vsub.f32 %v2490_v33, %v2519_v54  ;;  %v2547_v45 = vsel %vm323_vm1, %v2532_v10, 0.0  ;;  %v145_v33 = vld [vmem:[%s13068_s9 + $0x10] sm:$0xff]  ;;  %8934 = vmatprep.subr.bf16.mxu1 %v13216_v36  ;;  %v703_v54 = vadd.f32 %v13254_v8, %v699_v1 }
 0x820   :  { %2548 = vadd.xlane.f32.xlu0 %v2547_v45  ;;  %v11162_v57 = vpack.c.bf16 %v146_v19, %v145_v33  ;;  %v13255_v10 = vld [vmem:[#allocation12_spill] sm:$0xff]  ;;  %v13258_v33 = vld [vmem:[#allocation13_spill] sm:$0xff] }
 0x821   :  { %v2533_v46 = vmul.f32 %v11141_v21, %v11141_v21  ;;  %v704_v45 = vadd.f32 %v699_v1, %v13255_v10  ;;  %v707_v19 = vadd.f32 %v13258_v33, %v699_v1 }
 0x822   :  { %13249 = vst [vmem:[#allocation37_spill] sm:$0xff] %v11162_v57  ;;  %8936 = vmatpush3.bf16.msra.mxu1 %v11162_v57  ;;  %v13266_v57 = vld [vmem:[#allocation21_spill] sm:$0xff] }
 0x823   :  { %v2550_v15 = vsel %vm323_vm1, %v2533_v46, 0.0  ;;  %8940 = vmatprep.subr.bf16.mxu1 %v13216_v36  ;;  %v13256_v46 = vld [vmem:[#allocation11_spill] sm:$0xff] }
 0x824   :  { %2551 = vadd.xlane.f32.xlu1 %v2550_v15  ;;  %v705_v15 = vadd.f32 %v13256_v46, %v699_v1 }
 0x83d   :  { %v2512_v34 = vpop.xlane.xlu0 %2511 }
 0x83e   :  { %v2520_v7 = vmul.f32 0.03125, %v2512_v34  ;;  %v13259_v34 = vld [vmem:[#allocation16_spill] sm:$0xff] }
 0x840   :  { %v11167_v42 = vsub.f32 %v2491_v3, %v2520_v7  ;;  %v719_v3 = vrot.slane %v11175_v60, %v10392_v0  ;;  %v708_v7 = vadd.f32 %v699_v1, %v13259_v34 }
 0x842   :  { %v2534_v55 = vmul.f32 %v11167_v42, %v11167_v42 }
 0x844   :  { %v2553_v56 = vsel %vm323_vm1, %v2534_v55, 0.0  ;;  %v13260_v55 = vld [vmem:[#allocation15_spill] sm:$0xff] }
 0x845   :  { %2554 = vadd.xlane.f32.xlu0 %v2553_v56  ;;  %v709_v56 = vadd.f32 %v13260_v55, %v699_v1 }
 0x857   :  { %740 = vxpose.xlu1.b32.start [1/16] (narrow) %v700_v2, 32  ;;  %v13261_v2 = vld [vmem:[#allocation18_spill] sm:$0xff] }
 0x85b   :  { %741 = vxpose.xlu1.b32.cont [2/16] (narrow) %v701_v49, 32  ;;  %721 = vrot.lane.b32.xlu0 %v719_v3, %s9699_s29  ;;  %v710_v3 = vadd.f32 %v699_v1, %v13261_v2  ;;  %v13262_v49 = vld [vmem:[#allocation17_spill] sm:$0xff] }
 0x85f   :  { %742 = vxpose.xlu1.b32.cont [3/16] (narrow) %v702_v18, 32  ;;  %v711_v18 = vadd.f32 %v13262_v49, %v699_v1 }
 0x863   :  { %743 = vxpose.xlu1.b32.cont [4/16] (narrow) %v703_v54, 32  ;;  %v13263_v54 = vld [vmem:[#allocation20_spill] sm:$0xff] }
 0x867   :  { %744 = vxpose.xlu1.b32.cont [5/16] (narrow) %v704_v45, 32  ;;  %v712_v45 = vadd.f32 %v699_v1, %v13263_v54 }
 0x86b   :  { %745 = vxpose.xlu1.b32.cont [6/16] (narrow) %v705_v15, 32  ;;  %v13264_v15 = vld [vmem:[#allocation19_spill] sm:$0xff] }
 0x86f   :  { %746 = vxpose.xlu1.b32.cont [7/16] (narrow) %v706_v32, 32  ;;  %v713_v32 = vadd.f32 %v13264_v15, %v699_v1 }
 0x873   :  { %747 = vxpose.xlu1.b32.cont [8/16] (narrow) %v707_v19, 32  ;;  %v714_v19 = vadd.f32 %v699_v1, %v13265_v48 }
 0x877   :  { %748 = vxpose.xlu1.b32.cont [9/16] (narrow) %v708_v7, 32  ;;  %v715_v7 = vadd.f32 %v13266_v57, %v699_v1  ;;  %v187_v1 = vld [vmem:[%s13071_s25] sm:$0x7] }
 0x87b   :  { %749 = vxpose.xlu1.b32.cont [10/16] (narrow) %v709_v56, 32 }
 0x87f   :  { %750 = vxpose.xlu1.b32.cont [11/16] (narrow) %v710_v3, 32 }
 0x883   :  { %751 = vxpose.xlu1.b32.cont [12/16] (narrow) %v711_v18, 32 }
 0x887   :  { %752 = vxpose.xlu1.b32.cont [13/16] (narrow) %v712_v45, 32  ;;  %v186_v45 = vld [vmem:[%s13070_s24] sm:$0x7] }
 0x88b   :  { %753 = vxpose.xlu1.b32.cont [14/16] (narrow) %v713_v32, 32 }
 0x88f   :  { %754 = vxpose.xlu1.b32.cont [15/16] (narrow) %v714_v19, 32  ;;  %v13267_v19 = vld [vmem:[#allocation23_spill] sm:$0xff] }
 0x893   :  { %755 = vxpose.xlu1.b32.end [16/16] (narrow) %v715_v7, 32  ;;  %v11205_v7 = vrot.slane %v186_v45, %v13267_v19 }
 0x895   :  { %13268 = vst [vmem:[#allocation4_spill] sm:$0xff] %v11205_v7 }
 0x89d   :  { %v2537_v12 = vpop.xlane.xlu0 %2536 }
 0x89e   :  { %v2556_v56 = vmul.f32 0.03125, %v2537_v12 }
 0x8a0   :  { %v2563_v51 = vadd.f32 1e-05, %v2556_v56 }
 0x8a1   :  { %v2540_v28 = vpop.xlane.xlu0 %2539 }
 0x8a2   :  { %9337 = vrsqrt.f32 %v2563_v51  ;;  %v2557_v3 = vmul.f32 0.03125, %v2540_v28 }
 0x8a4   :  { %v2564_v4 = vadd.f32 1e-05, %v2557_v3 }
 0x8a5   :  { %v2543_v18 = vpop.xlane.xlu0 %2542 }
 0x8a6   :  { %9339 = vrsqrt.f32 %v2564_v4  ;;  %v2558_v63 = vmul.f32 0.03125, %v2543_v18  ;;  %v11208_v4 = vrot.slane %v187_v1, %v13267_v19 }
 0x8a8   :  { %v2565_v32 = vadd.f32 1e-05, %v2558_v63  ;;  %13269 = vst [vmem:[#allocation7_spill] sm:$0xff] %v11208_v4 }
 0x8a9   :  { %v2546_v25 = vpop.xlane.xlu0 %2545 }
 0x8aa   :  { %9341 = vrsqrt.f32 %v2565_v32  ;;  %v2559_v12 = vmul.f32 0.03125, %v2546_v25 }
 0x8ac   :  { %v9338_v28 = vpop.eup %9337  ;;  %v2566_v51 = vadd.f32 1e-05, %v2559_v12 }
 0x8ad   :  { %v2577_v56 = vmul.f32 %v9338_v28, %v11117_v43  ;;  %v2549_v3 = vpop.xlane.xlu0 %2548 }
 0x8ae   :  { %9343 = vrsqrt.f32 %v2566_v51  ;;  %v2560_v63 = vmul.f32 0.03125, %v2549_v3 }
 0x8af   :  { %v2584_v18 = vmul.f32 %v2577_v56, %v11205_v7 }
 0x8b0   :  { %v9340_v47 = vpop.eup %9339  ;;  %v2567_v52 = vadd.f32 1e-05, %v2560_v63 }
 0x8b1   :  { %v2552_v58 = vpop.xlane.xlu1 %2551  ;;  %v11213_v25 = vadd.f32 %v2584_v18, %v11208_v4  ;;  %v2578_v45 = vmul.f32 %v9340_v47, %v11121_v38 }
 0x8b2   :  { %9345 = vrsqrt.f32 %v2567_v52  ;;  %v2561_v32 = vmul.f32 0.03125, %v2552_v58 }
 0x8b3   :  { %8081 = vmatmul.mubr.msk.f32.vlgmr.msra.gmra.mrb[74].mxu1 %vm323_vm1, %v11213_v25  ;;  %v2585_v43 = vmul.f32 %v2578_v45, %v11205_v7 }
 0x8b4   :  { %v9342_v1 = vpop.eup %9341  ;;  %v2568_v12 = vadd.f32 1e-05, %v2561_v32  ;;  %8083 = vmatprep.mubr.msk.f32.mxu1 %vm9697_vm0, %v13217_v30 }
 0x8b5   :  { %v11222_v28 = vadd.f32 %v2585_v43, %v11208_v4  ;;  %v2579_v51 = vmul.f32 %v9342_v1, %v11126_v22 }
 0x8b6   :  { %9347 = vrsqrt.f32 %v2568_v12 }
 0x8b7   :  { %8084 = vmatmul.mubr.msk.f32.gmra.mrb[76].mxu1 %vm323_vm1, %v11222_v28  ;;  %v2586_v58 = vmul.f32 %v2579_v51, %v11205_v7 }
 0x8b8   :  { %v9344_v52 = vpop.eup %9343  ;;  %8086 = vmatprep.mubr.msk.f32.mxu1 %vm9697_vm0, %v13217_v30 }
 0x8b9   :  { %v11231_v47 = vadd.f32 %v2586_v58, %v11208_v4  ;;  %v2580_v38 = vmul.f32 %v9344_v52, %v11131_v17 }
 0x8bb   :  { %8087 = vmatmul.mubr.msk.f32.gmra.mrb[78].mxu1 %vm323_vm1, %v11231_v47  ;;  %v2587_v22 = vmul.f32 %v2580_v38, %v11205_v7 }
 0x8bc   :  { %v9346_v56 = vpop.eup %9345  ;;  %8089 = vmatprep.mubr.msk.f32.mxu1 %vm9697_vm0, %v13217_v30 }
 0x8bd   :  { %v11240_v3 = vadd.f32 %v2587_v22, %v11208_v4  ;;  %v2581_v63 = vmul.f32 %v9346_v56, %v11136_v20 }
 0x8bf   :  { %8090 = vmatmul.mubr.msk.f32.gmra.mrb[80].mxu1 %vm323_vm1, %v11240_v3  ;;  %v2588_v18 = vmul.f32 %v2581_v63, %v11205_v7 }
 0x8c0   :  { %v9348_v17 = vpop.eup %9347  ;;  %8092 = vmatprep.mubr.msk.f32.mxu1 %vm9697_vm0, %v13217_v30 }
 0x8c1   :  { %v11249_v45 = vadd.f32 %v2588_v18, %v11208_v4  ;;  %v2582_v32 = vmul.f32 %v9348_v17, %v11141_v21 }
 0x8c3   :  { %8093 = vmatmul.mubr.msk.f32.gmra.mrb[82].mxu1 %vm323_vm1, %v11249_v45  ;;  %v2589_v43 = vmul.f32 %v2582_v32, %v11205_v7 }
 0x8c4   :  { %8095 = vmatprep.mubr.msk.f32.mxu1 %vm9697_vm0, %v13217_v30 }
 0x8c5   :  { %v11258_v20 = vadd.f32 %v2589_v43, %v11208_v4 }
 0x8c7   :  { %8096 = vmatmul.mubr.msk.f32.gmra.mrb[84].mxu1 %vm323_vm1, %v11258_v20 }
 0x8c8   :  { %8098 = vmatprep.mubr.msk.f32.mxu1 %vm9697_vm0, %v13217_v30 }
 0x8d2   :  { %v2555_v1 = vpop.xlane.xlu0 %2554 }
 0x8d3   :  { %v2562_v12 = vmul.f32 0.03125, %v2555_v1 }
 0x8d5   :  { %v2569_v21 = vadd.f32 1e-05, %v2562_v12 }
 0x8d6   :  { %v722_v51 = vpop.permute.xlu0 %721 }
 0x8d7   :  { %9349 = vrsqrt.f32 %v2569_v21  ;;  %v728_v58 = vadd.f32 %v722_v51, %v13255_v10  ;;  %v729_v52 = vadd.f32 %v13256_v46, %v722_v51  ;;  %v724_v38 = vadd.f32 %v722_v51, %v13251_v39  ;;  %v756_v22 = vpop.trf.xlu1 }
 0x8d8   :  { %v725_v56 = vadd.f32 %v13252_v59, %v722_v51  ;;  %v734_v63 = vadd.f32 %v722_v51, %v13261_v2  ;;  %v735_v18 = vadd.f32 %v13262_v49, %v722_v51  ;;  %v726_v17 = vadd.f32 %v722_v51, %v13253_v9 }
 0x8d9   :  { %v11271_v32 = vpack.i.bf16 %v729_v52, %v728_v58  ;;  %v727_v43 = vadd.f32 %v13254_v8, %v722_v51  ;;  %v730_v1 = vadd.f32 %v722_v51, %v13257_v41  ;;  %v731_v10 = vadd.f32 %v13258_v33, %v722_v51 }
 0x8da   :  { %v11276_v46 = vpack.i.bf16 %v725_v56, %v724_v38  ;;  %v11278_v39 = vpack.i.bf16 %v735_v18, %v734_v63  ;;  %v732_v59 = vadd.f32 %v722_v51, %v13259_v34  ;;  %v733_v2 = vadd.f32 %v13260_v55, %v722_v51 }
 0x8db   :  { %9178 = vrot.lane.b32.xlu1 %v11271_v32, %s9700_s0  ;;  %v11284_v9 = vpack.i.bf16 %v727_v43, %v726_v17  ;;  %v11286_v49 = vpack.i.bf16 %v731_v10, %v730_v1  ;;  %v757_v8 = vpop.trf.xlu1  ;;  %v738_v41 = vadd.f32 %v722_v51, %v13265_v48  ;;  %v739_v33 = vadd.f32 %v13266_v57, %v722_v51 }
 0x8dc   :  { %9168 = vrot.lane.b32.xlu0 %v11276_v46, %s9700_s0  ;;  %v11292_v12 = vpack.c.bf16 %v757_v8, %v756_v22  ;;  %v11294_v34 = vpack.i.bf16 %v733_v2, %v732_v59  ;;  %v736_v55 = vadd.f32 %v722_v51, %v13263_v54  ;;  %v737_v21 = vadd.f32 %v13264_v15, %v722_v51 }
 0x8dd   :  { %v11298_v58 = vpack.i.bf16 %v739_v33, %v738_v41 }
 0x8de   :  { %13270 = vst [vmem:[#allocation5_spill] sm:$0xff] %v11292_v12  ;;  %8939 = vmatpush3.bf16.msra.mxu0 %v11292_v12  ;;  %v11301_v52 = vpack.i.bf16 %v737_v21, %v736_v55 }
 0x8df   :  { %9193 = vrot.lane.b32.xlu1 %v11278_v39, %s9700_s0  ;;  %8964 = vmatprep.subr.bf16.mxu0 %v13216_v36  ;;  %v11319_v51 = vpop.trf.xlu1 }
 0x8e0   :  { %9173 = vrot.lane.b32.xlu0 %v11284_v9, %s9700_s0 }
 0x8e1   :  { %v9350_v48 = vpop.eup %9349 }
 0x8e2   :  { %v2583_v57 = vmul.f32 %v9350_v48, %v11167_v42  ;;  %v11341_v48 = vrot.slane %v11175_v60, %v13267_v19 }
 0x8e3   :  { %v11321_v38 = vpop.trf.xlu1 }
 0x8e4   :  { %9183 = vrot.lane.b32.xlu0 %v11286_v49, %s9700_s0  ;;  %v2590_v54 = vmul.f32 %v2583_v57, %v11205_v7  ;;  %13275 = vst [vmem:[#allocation14_spill] sm:$0xff] %v11341_v48 }
 0x8e6   :  { %v11313_v15 = vadd.f32 %v2590_v54, %v11208_v4 }
 0x8e8   :  { %8099 = vmatmul.mubr.msk.f32.gmra.mrb[86].mxu1 %vm323_vm1, %v11313_v15 }
 0x8e9   :  { %8158 = vmatprep.mubr.msk.f32.mxu1 %vm9697_vm0, %v13217_v30 }
 0x94d   :  { %v9179_v18 = vpop.permute.xlu1 %9178 }
 0x94e   :  { %v9169_v22 = vpop.permute.xlu0 %9168  ;;  %v9181_v10 = vunpack.i.h.bf16 %v9179_v18  ;;  %v9180_v59 = vunpack.i.l.bf16 %v9179_v18 }
 0x94f   :  { %v9171_v42 = vunpack.i.h.bf16 %v9169_v22  ;;  %v9170_v56 = vunpack.i.l.bf16 %v9169_v22 }
 0x950   :  { %v11331_v41 = vpack.c.bf16 %v9181_v10, %v9180_v59 }
 0x951   :  { %v11323_v63 = vpack.c.bf16 %v9171_v42, %v9170_v56 }
 0x952   :  { %v9174_v17 = vpop.permute.xlu0 %9173  ;;  %13273 = vst [vmem:[#allocation12_spill] sm:$0xff] %v11331_v41 }
 0x953   :  { %13271 = vst [vmem:[#allocation10_spill] sm:$0xff] %v11323_v63  ;;  %v9176_v43 = vunpack.i.h.bf16 %v9174_v17  ;;  %v9175_v1 = vunpack.i.l.bf16 %v9174_v17  ;;  %8942 = vmatpush3.bf16.msra.mxu1 %v11323_v63 }
 0x954   :  { %8943 = vmatprep.subr.bf16.mxu1 %v13216_v36 }
 0x955   :  { %v11327_v2 = vpack.c.bf16 %v9176_v43, %v9175_v1 }
 0x956   :  { %v9184_v8 = vpop.permute.xlu0 %9183 }
 0x957   :  { %13272 = vst [vmem:[#allocation8_spill] sm:$0xff] %v11327_v2  ;;  %8945 = vmatpush3.bf16.msra.mxu1 %v11327_v2  ;;  %v9186_v33 = vunpack.i.h.bf16 %v9184_v8  ;;  %v9185_v55 = vunpack.i.l.bf16 %v9184_v8 }
 0x958   :  { %8946 = vmatprep.subr.bf16.mxu1 %v13216_v36 }
 0x959   :  { %v11335_v21 = vpack.c.bf16 %v9186_v33, %v9185_v55 }
 0x95b   :  { %8948 = vmatpush3.bf16.msra.mxu1 %v11331_v41  ;;  %13274 = vst [vmem:[#allocation11_spill] sm:$0xff] %v11335_v21 }
 0x95c   :  { %8949 = vmatprep.subr.bf16.mxu1 %v13216_v36 }
 0x95f   :  { %8951 = vmatpush3.bf16.msra.mxu1 %v11335_v21 }
 0x960   :  { %8952 = vmatprep.subr.bf16.mxu1 %v13216_v36 }
 0x986   :  { %v2685_v57 = vpop.f32.mrb[74].mxu1 }
 0x987   :  { %v2686_v54 = vadd.f32 %v2685_v57, %v11341_v48  ;;  %v8082_v22 = vpop.f32.mrb[75].mxu1 }
 0x989   :  { %v11344_v42 = vmul.f32 0.25, %v2686_v54 }
 0x98a   :  { %v2690_v56 = vpop.f32.mrb[76].mxu1 }
 0x98b   :  { %v2691_v18 = vadd.f32 %v2690_v56, %v11341_v48  ;;  %v8085_v17 = vpop.f32.mrb[77].mxu1  ;;  %8106 = vmatmul.mubr.msk.f32.vlgmr.msra.gmra.mrb[86].mxu0 %vm1533_vm2, %v11344_v42 }
 0x98c   :  { %8108 = vmatprep.mubr.msk.f32.mxu0 %vm9697_vm0, %v13217_v30 }
 0x98d   :  { %v11351_v43 = vmul.f32 0.25, %v2691_v18 }
 0x98e   :  { %v2695_v60 = vpop.f32.mrb[78].mxu1 }
 0x98f   :  { %v2696_v1 = vadd.f32 %v2695_v60, %v11341_v48  ;;  %v8088_v10 = vpop.f32.mrb[79].mxu1  ;;  %8109 = vmatmul.mubr.msk.f32.gmra.mrb[88].mxu0 %vm1533_vm2, %v11351_v43 }
 0x990   :  { %8111 = vmatprep.mubr.msk.f32.mxu0 %vm9697_vm0, %v13217_v30 }
 0x991   :  { %v11358_v59 = vmul.f32 0.25, %v2696_v1 }
 0x992   :  { %v2700_v8 = vpop.f32.mrb[80].mxu1 }
 0x993   :  { %v2701_v33 = vadd.f32 %v2700_v8, %v11341_v48  ;;  %v8091_v55 = vpop.f32.mrb[81].mxu1  ;;  %8112 = vmatmul.mubr.msk.f32.gmra.mrb[90].mxu0 %vm1533_vm2, %v11358_v59 }
 0x994   :  { %8114 = vmatprep.mubr.msk.f32.mxu0 %vm9697_vm0, %v13217_v30 }
 0x995   :  { %v11365_v57 = vmul.f32 0.25, %v2701_v33 }
 0x996   :  { %v2705_v54 = vpop.f32.mrb[82].mxu1 }
 0x997   :  { %v2706_v22 = vadd.f32 %v2705_v54, %v11341_v48  ;;  %v8094_v56 = vpop.f32.mrb[83].mxu1  ;;  %8115 = vmatmul.mubr.msk.f32.gmra.mrb[92].mxu0 %vm1533_vm2, %v11365_v57 }
 0x998   :  { %8117 = vmatprep.mubr.msk.f32.mxu0 %vm9697_vm0, %v13217_v30 }
 0x999   :  { %v11372_v18 = vmul.f32 0.25, %v2706_v22  ;;  %v13276_v22 = vmov -1e+30  }
 0x99a   :  { %v2710_v17 = vpop.f32.mrb[84].mxu1  ;;  %v11395_v56 = vsel %vm10697_vm3, 0.0, %v13276_v22  ;;  %v11407_v6 = vsel %vm10716_vm9, 0.0, %v13276_v22  ;;  %v11413_v14 = vsel %vm10729_vm11, 0.0, %v13276_v22  ;;  %v11419_v35 = vsel %vm10742_vm13, 0.0, %v13276_v22 }
 0x99b   :  { %v2711_v60 = vadd.f32 %v2710_v17, %v11341_v48  ;;  %v8097_v1 = vpop.f32.mrb[85].mxu1  ;;  %8118 = vmatmul.mubr.msk.f32.gmra.mrb[94].mxu0 %vm1533_vm2, %v11372_v18  ;;  %v11425_v31 = vsel %vm10755_vm15, 0.0, %v13276_v22  ;;  %v11431_v27 = vsel %vm10767_vm7, 0.0, %v13276_v22  ;;  %vm4233_vm3 = vcmask 523264  }
 0x99c   :  { %8120 = vmatprep.mubr.msk.f32.mxu0 %vm9697_vm0, %v13217_v30 }
 0x99d   :  { %v11379_v10 = vmul.f32 0.25, %v2711_v60 }
 0x99f   :  { %8121 = vmatmul.mubr.msk.f32.gmra.mrb[96].mxu0 %vm1533_vm2, %v11379_v10 }
 0x9a0   :  { %8123 = vmatprep.mubr.msk.f32.mxu0 %vm9697_vm0, %v13217_v30 }
 0x9bb   :  { %v2715_v8 = vpop.f32.mrb[86].mxu1 }
 0x9bc   :  { %v2716_v33 = vadd.f32 %v2715_v8, %v11341_v48  ;;  %v8100_v55 = vpop.f32.mrb[87].mxu1  ;;  %v11401_v8 = vsel %vm10705_vm6, 0.0, %v13276_v22 }
 0x9be   :  { %v11386_v54 = vmul.f32 0.25, %v2716_v33 }
 0x9c0   :  { %8124 = vmatmul.mubr.msk.f32.gmra.mrb[98].mxu0 %vm1533_vm2, %v11386_v54 }
 0x9c1   :  { %8183 = vmatprep.mubr.msk.f32.mxu0 %vm9697_vm0, %v13217_v30 }
 0xa5e   :  { %v2813_v17 = vpop.f32.mrb[86].mxu0 }
 0xa5f   :  { %v2814_v60 = vadd.f32 %v2813_v17, %v11395_v56  ;;  %v8107_v1 = vpop.f32.mrb[87].mxu0 }
 0xa61   :  { %2847 = vmax.xlane.f32.xlu0 %v2814_v60 }
 0xa62   :  { %v2818_v33 = vpop.f32.mrb[88].mxu0 }
 0xa63   :  { %v2819_v55 = vadd.f32 %v2818_v33, %v11401_v8  ;;  %v8110_v48 = vpop.f32.mrb[89].mxu0 }
 0xa65   :  { %2849 = vmax.xlane.f32.xlu0 %v2819_v55 }
 0xa66   :  { %v2823_v21 = vpop.f32.mrb[90].mxu0 }
 0xa67   :  { %v2824_v17 = vadd.f32 %v2823_v21, %v11407_v6  ;;  %v8113_v1 = vpop.f32.mrb[91].mxu0 }
 0xa69   :  { %2851 = vmax.xlane.f32.xlu0 %v2824_v17 }
 0xa6a   :  { %v2828_v41 = vpop.f32.mrb[92].mxu0 }
 0xa6b   :  { %v2829_v33 = vadd.f32 %v2828_v41, %v11413_v14  ;;  %v8116_v48 = vpop.f32.mrb[93].mxu0 }
 0xa6d   :  { %2853 = vmax.xlane.f32.xlu0 %v2829_v33 }
 0xa6e   :  { %v2833_v2 = vpop.f32.mrb[94].mxu0 }
 0xa6f   :  { %v2834_v21 = vadd.f32 %v2833_v2, %v11419_v35  ;;  %v8119_v1 = vpop.f32.mrb[95].mxu0 }
 0xa71   :  { %2855 = vmax.xlane.f32.xlu0 %v2834_v21 }
 0xa72   :  { %v2838_v63 = vpop.f32.mrb[96].mxu0 }
 0xa73   :  { %v2839_v41 = vadd.f32 %v2838_v63, %v11425_v31  ;;  %v8122_v48 = vpop.f32.mrb[97].mxu0 }
 0xa75   :  { %2857 = vmax.xlane.f32.xlu0 %v2839_v41 }
 0xa93   :  { %v2843_v4 = vpop.f32.mrb[98].mxu0 }
 0xa94   :  { %v2844_v2 = vadd.f32 %v2843_v4, %v11431_v27  ;;  %v8125_v1 = vpop.f32.mrb[99].mxu0 }
 0xa96   :  { %2859 = vmax.xlane.f32.xlu0 %v2844_v2 }
 0xaac   :  { %9188 = vrot.lane.b32.xlu0 %v11294_v34, %s9700_s0 }
 0xaee   :  { %v2848_v50 = vpop.xlane.xlu0 %2847 }
 0xaef   :  { %v2861_v7 = vsub.f32 %v2814_v60, %v2848_v50 }
 0xaf1   :  { %v2868_v12 = vmul.f32 1.442695, %v2861_v7 }
 0xaf2   :  { %v2850_v13 = vpop.xlane.xlu0 %2849 }
 0xaf3   :  { %9351 = vpow2.f32 %v2868_v12  ;;  %v2862_v63 = vsub.f32 %v2819_v55, %v2850_v13  ;;  %v9194_v55 = vpop.permute.xlu1 %9193 }
 0xaf4   :  { %v9196_v50 = vunpack.i.h.bf16 %v9194_v55 }
 0xaf5   :  { %v2870_v48 = vmul.f32 1.442695, %v2862_v63  ;;  %v9195_v63 = vunpack.i.l.bf16 %v9194_v55 }
 0xaf6   :  { %v2852_v23 = vpop.xlane.xlu0 %2851 }
 0xaf7   :  { %9353 = vpow2.f32 %v2870_v48  ;;  %v2863_v62 = vsub.f32 %v2824_v17, %v2852_v23 }
 0xaf9   :  { %v2872_v22 = vmul.f32 1.442695, %v2863_v62 }
 0xafa   :  { %v2854_v11 = vpop.xlane.xlu0 %2853 }
 0xafb   :  { %9355 = vpow2.f32 %v2872_v22  ;;  %v2864_v53 = vsub.f32 %v2829_v33, %v2854_v11  ;;  %v11459_v22 = vpack.c.bf16 %v9196_v50, %v9195_v63 }
 0xafd   :  { %v11436_v4 = vpop.eup %9351  ;;  %v2874_v1 = vmul.f32 1.442695, %v2864_v53 }
 0xafe   :  { %v2856_v61 = vpop.xlane.xlu0 %2855  ;;  %2882 = vadd.xlane.f32.xlu0 %v11436_v4 }
 0xaff   :  { %9357 = vpow2.f32 %v2874_v1  ;;  %v2865_v60 = vsub.f32 %v2834_v21, %v2856_v61 }
 0xb01   :  { %v11439_v7 = vpop.eup %9353  ;;  %v2876_v12 = vmul.f32 1.442695, %v2865_v60 }
 0xb02   :  { %2884 = vadd.xlane.f32.xlu0 %v11439_v7  ;;  %v2858_v11 = vpop.xlane.xlu0 %2857 }
 0xb03   :  { %9359 = vpow2.f32 %v2876_v12  ;;  %v2866_v62 = vsub.f32 %v2839_v41, %v2858_v11 }
 0xb05   :  { %v11442_v13 = vpop.eup %9355  ;;  %v2878_v1 = vmul.f32 1.442695, %v2866_v62 }
 0xb06   :  { %2886 = vadd.xlane.f32.xlu1 %v11442_v13 }
 0xb07   :  { %9361 = vpow2.f32 %v2878_v1  ;;  %v11510_v1 = vpack.c.bf16 %v11321_v38, %v11319_v51 }
 0xb09   :  { %v11445_v23 = vpop.eup %9357 }
 0xb0a   :  { %2888 = vadd.xlane.f32.xlu0 %v11445_v23 }
 0xb0d   :  { %v11448_v53 = vpop.eup %9359 }
 0xb0e   :  { %2890 = vadd.xlane.f32.xlu1 %v11448_v53 }
 0xb1f   :  { %9203 = vrot.lane.b32.xlu1 %v11298_v58, %s9700_s0 }
 0xb20   :  { %9198 = vrot.lane.b32.xlu0 %v11301_v52, %s9700_s0 }
 0xb23   :  { %v2860_v61 = vpop.xlane.xlu0 %2859 }
 0xb24   :  { %v2867_v60 = vsub.f32 %v2844_v2, %v2860_v61 }
 0xb26   :  { %v2880_v12 = vmul.f32 1.442695, %v2867_v60 }
 0xb27   :  { %v9189_v17 = vpop.permute.xlu0 %9188 }
 0xb28   :  { %v9191_v33 = vunpack.i.h.bf16 %v9189_v17  ;;  %v9190_v21 = vunpack.i.l.bf16 %v9189_v17  ;;  %9363 = vpow2.f32 %v2880_v12  ;;  %v11463_v17 = vpop.eup %9361 }
 0xb2a   :  { %v11455_v48 = vpack.c.bf16 %v9191_v33, %v9190_v21 }
 0xb2c   :  { %8954 = vmatpush3.bf16.msra.mxu1 %v11455_v48 }
 0xb2d   :  { %8955 = vmatprep.subr.bf16.mxu1 %v13216_v36 }
 0xb30   :  { %8957 = vmatpush3.bf16.msra.mxu1 %v11459_v22 }
 0xb31   :  { %8958 = vmatprep.subr.bf16.mxu1 %v13216_v36 }
 0xb32   :  { %v11466_v41 = vpop.eup %9363 }
 0xb3f   :  { %2892 = vadd.xlane.f32.xlu0 %v11463_v17 }
 0xb43   :  { %2894 = vadd.xlane.f32.xlu1 %v11466_v41 }
 0xb54   :  { %3210 = vrot.lane.b32.xlu1 %v11372_v18, %s9702_s3 }
 0xb55   :  { %3202 = vrot.lane.b32.xlu0 %v11344_v42, %s9702_s3  ;;  %v153_v42 = vld [vmem:[%s13072_s12 + $0x8] sm:$0xff] }
 0xb58   :  { %9213 = vrot.lane.b32.xlu1 %v11284_v9, %s9703_s17  ;;  %v152_v9 = vld [vmem:[%s13072_s12] sm:$0xff] }
 0xb59   :  { %3204 = vrot.lane.b32.xlu0 %v11351_v43, %s9702_s3  ;;  %v11495_v43 = vpack.c.bf16 %v153_v42, %v152_v9 }
 0xb5b   :  { %8966 = vmatpush3.bf16.msra.mxu0 %v11495_v43 }
 0xb5c   :  { %8970 = vmatprep.subr.bf16.mxu0 %v13216_v36 }
 0xb5d   :  { %3206 = vrot.lane.b32.xlu0 %v11358_v59, %s9702_s3 }
 0xb61   :  { %3208 = vrot.lane.b32.xlu0 %v11365_v57, %s9702_s3 }
 0xb65   :  { %3212 = vrot.lane.b32.xlu0 %v11379_v10, %s9702_s3 }
 0xb69   :  { %3214 = vrot.lane.b32.xlu0 %v11386_v54, %s9702_s3 }
 0xb6d   :  { %9208 = vrot.lane.b32.xlu0 %v11276_v46, %s9703_s17 }
 0xb71   :  { %9218 = vrot.lane.b32.xlu0 %v11271_v32, %s9703_s17 }
 0xb8b   :  { %v2883_v59 = vpop.xlane.xlu0 %2882 }
 0xb8c   :  { %9365 = vrcp.f32 %v2883_v59 }
 0xb8f   :  { %v2885_v57 = vpop.xlane.xlu0 %2884 }
 0xb90   :  { %9367 = vrcp.f32 %v2885_v57 }
 0xb93   :  { %v2887_v46 = vpop.xlane.xlu1 %2886 }
 0xb94   :  { %9369 = vrcp.f32 %v2887_v46 }
 0xb96   :  { %v9366_v21 = vpop.eup %9365 }
 0xb97   :  { %v2889_v18 = vpop.xlane.xlu0 %2888  ;;  %v2897_v63 = vmul.f32 %v9366_v21, %v11436_v4 }
 0xb98   :  { %9371 = vrcp.f32 %v2889_v18 }
 0xb9a   :  { %v9368_v62 = vpop.eup %9367 }
 0xb9b   :  { %v2891_v32 = vpop.xlane.xlu1 %2890  ;;  %v9199_v10 = vpop.permute.xlu0 %9198  ;;  %v2899_v60 = vmul.f32 %v9368_v62, %v11439_v7 }
 0xb9c   :  { %v9201_v54 = vunpack.i.h.bf16 %v9199_v10  ;;  %v9200_v2 = vunpack.i.l.bf16 %v9199_v10  ;;  %9373 = vrcp.f32 %v2891_v32 }
 0xb9e   :  { %v11499_v11 = vpack.c.bf16 %v9201_v54, %v9200_v2  ;;  %v9370_v12 = vpop.eup %9369 }
 0xb9f   :  { %v9204_v61 = vpop.permute.xlu1 %9203  ;;  %v2901_v4 = vmul.f32 %v9370_v12, %v11442_v13 }
 0xba0   :  { %v9206_v55 = vunpack.i.h.bf16 %v9204_v61  ;;  %v9205_v33 = vunpack.i.l.bf16 %v9204_v61  ;;  %8960 = vmatpush3.bf16.msra.mxu1 %v11499_v11 }
 0xba1   :  { %8961 = vmatprep.subr.bf16.mxu1 %v13216_v36 }
 0xba2   :  { %v11503_v50 = vpack.c.bf16 %v9206_v55, %v9205_v33  ;;  %v9372_v51 = vpop.eup %9371 }
 0xba3   :  { %v2903_v38 = vmul.f32 %v9372_v51, %v11445_v23 }
 0xba4   :  { %8963 = vmatpush3.bf16.msra.mxu1 %v11503_v50 }
 0xba5   :  { %8967 = vmatprep.subr.bf16.mxu1 %v13216_v36 }
 0xba6   :  { %v9374_v9 = vpop.eup %9373 }
 0xba7   :  { %8159 = vmatmul.mubr.f32.vlgmr.msra.gmra.mrb[88].mxu1 %v2897_v63  ;;  %v2905_v7 = vmul.f32 %v9374_v9, %v11448_v53 }
 0xba8   :  { %8161 = vmatprep.mubr.msk.f32.mxu1 %vm9697_vm0, %v13217_v30  ;;  %8969 = vmatpush3.bf16.msra.mxu1 %v11510_v1 }
 0xba9   :  { %8994 = vmatprep.subr.bf16.mxu1 %v13216_v36 }
 0xbab   :  { %8162 = vmatmul.mubr.f32.gmra.mrb[90].mxu1 %v2899_v60 }
 0xbac   :  { %8164 = vmatprep.mubr.msk.f32.mxu1 %vm9697_vm0, %v13217_v30 }
 0xbaf   :  { %8165 = vmatmul.mubr.f32.gmra.mrb[92].mxu1 %v2901_v4 }
 0xbb0   :  { %8167 = vmatprep.mubr.msk.f32.mxu1 %vm9697_vm0, %v13217_v30 }
 0xbb3   :  { %8168 = vmatmul.mubr.f32.gmra.mrb[94].mxu1 %v2903_v38 }
 0xbb4   :  { %8170 = vmatprep.mubr.msk.f32.mxu1 %vm9697_vm0, %v13217_v30 }
 0xbb7   :  { %8171 = vmatmul.mubr.f32.gmra.mrb[96].mxu1 %v2905_v7 }
 0xbb8   :  { %8173 = vmatprep.mubr.msk.f32.mxu1 %vm9697_vm0, %v13217_v30 }
 0xbcc   :  { %v2893_v42 = vpop.xlane.xlu0 %2892 }
 0xbcd   :  { %9375 = vrcp.f32 %v2893_v42 }
 0xbd0   :  { %v2895_v13 = vpop.xlane.xlu1 %2894  ;;  %v3203_v46 = vpop.permute.xlu0 %3202 }
 0xbd1   :  { %9377 = vrcp.f32 %v2895_v13 }
 0xbd4   :  { %v3205_v53 = vpop.permute.xlu0 %3204  ;;  %v3211_v32 = vpop.permute.xlu1 %3210 }
 0xbd7   :  { %v9376_v59 = vpop.eup %9375 }
 0xbd8   :  { %v2907_v57 = vmul.f32 %v9376_v59, %v11463_v17  ;;  %v3207_v17 = vpop.permute.xlu0 %3206  ;;  %v9214_v33 = vpop.permute.xlu1 %9213 }
 0xbd9   :  { %v9216_v21 = vunpack.i.h.bf16 %v9214_v33  ;;  %v9215_v63 = vunpack.i.l.bf16 %v9214_v33 }
 0xbda   :  { %8174 = vmatmul.mubr.f32.gmra.mrb[98].mxu1 %v2907_v57 }
 0xbdb   :  { %v9378_v23 = vpop.eup %9377  ;;  %8176 = vmatprep.mubr.msk.f32.mxu1 %vm9697_vm0, %v13217_v30  ;;  %v11562_v51 = vpack.c.bf16 %v9216_v21, %v9215_v63 }
 0xbdc   :  { %v2909_v18 = vmul.f32 %v9378_v23, %v11466_v41  ;;  %v3209_v41 = vpop.permute.xlu0 %3208 }
 0xbde   :  { %8177 = vmatmul.mubr.f32.gmra.mrb[100].mxu1 %v2909_v18 }
 0xbdf   :  { %8208 = vmatprep.mubr.msk.f32.mxu1 %vm9697_vm0, %v13217_v30 }
 0xbe0   :  { %v3213_v10 = vpop.permute.xlu0 %3212 }
 0xbe2   :  { %8209 = vmatmul.mubr.msk.f32.vlgmr.msra.gmra.mrb[102].mxu1 %vm1533_vm2, %v3203_v46 }
 0xbe3   :  { %8211 = vmatprep.mubr.msk.f32.mxu1 %vm9697_vm0, %v13217_v30 }
 0xbe4   :  { %v3215_v54 = vpop.permute.xlu0 %3214 }
 0xbe6   :  { %8212 = vmatmul.mubr.msk.f32.gmra.mrb[104].mxu1 %vm1533_vm2, %v3205_v53 }
 0xbe7   :  { %8214 = vmatprep.mubr.msk.f32.mxu1 %vm9697_vm0, %v13217_v30 }
 0xbe8   :  { %v9209_v2 = vpop.permute.xlu0 %9208 }
 0xbe9   :  { %v9211_v61 = vunpack.i.h.bf16 %v9209_v2  ;;  %v9210_v55 = vunpack.i.l.bf16 %v9209_v2 }
 0xbea   :  { %8215 = vmatmul.mubr.msk.f32.gmra.mrb[106].mxu1 %vm1533_vm2, %v3207_v17 }
 0xbeb   :  { %8217 = vmatprep.mubr.msk.f32.mxu1 %vm9697_vm0, %v13217_v30  ;;  %v11555_v62 = vpack.c.bf16 %v9211_v61, %v9210_v55 }
 0xbec   :  { %v9219_v12 = vpop.permute.xlu0 %9218 }
 0xbed   :  { %v9221_v38 = vunpack.i.h.bf16 %v9219_v12  ;;  %v9220_v9 = vunpack.i.l.bf16 %v9219_v12 }
 0xbee   :  { %8218 = vmatmul.mubr.msk.f32.gmra.mrb[108].mxu1 %vm1533_vm2, %v3209_v41 }
 0xbef   :  { %8220 = vmatprep.mubr.msk.f32.mxu1 %vm9697_vm0, %v13217_v30  ;;  %v11569_v13 = vpack.c.bf16 %v9221_v38, %v9220_v9 }
 0xbf1   :  { %13277 = vst [vmem:[#allocation13_spill] sm:$0xff] %v11569_v13 }
 0xbf2   :  { %8221 = vmatmul.mubr.msk.f32.gmra.mrb[110].mxu1 %vm1533_vm2, %v3211_v32 }
 0xbf3   :  { %8223 = vmatprep.mubr.msk.f32.mxu1 %vm9697_vm0, %v13217_v30 }
 0xbf6   :  { %8224 = vmatmul.mubr.msk.f32.gmra.mrb[112].mxu1 %vm1533_vm2, %v3213_v10 }
 0xbf7   :  { %8226 = vmatprep.mubr.msk.f32.mxu1 %vm9697_vm0, %v13217_v30 }
 0xbfa   :  { %8227 = vmatmul.mubr.msk.f32.gmra.mrb[114].mxu1 %vm1533_vm2, %v3215_v54 }
 0xbfb   :  { %8286 = vmatprep.mubr.msk.f32.mxu1 %vm9697_vm0, %v13217_v30 }
 0xc7a   :  { %v3040_v60 = vpop.f32.mrb[88].mxu1 }
 0xc7b   :  { %v8160_v4 = vpop.f32.mrb[89].mxu1  ;;  %8184 = vmatmul.mubr.msk.f32.vlgmr.msra.gmra.mrb[100].mxu0 %vm1533_vm2, %v3040_v60 }
 0xc7c   :  { %8972 = vmatpush3.bf16.msra.mxu0 %v11555_v62  ;;  %8186 = vmatprep.mubr.msk.f32.mxu0 %vm9697_vm0, %v13217_v30 }
 0xc7d   :  { %8973 = vmatprep.subr.bf16.mxu0 %v13216_v36 }
 0xc7e   :  { %v3045_v7 = vpop.f32.mrb[90].mxu1 }
 0xc7f   :  { %v8163_v42 = vpop.f32.mrb[91].mxu1  ;;  %8187 = vmatmul.mubr.msk.f32.gmra.mrb[102].mxu0 %vm1533_vm2, %v3045_v7 }
 0xc80   :  { %8975 = vmatpush3.bf16.msra.mxu0 %v11562_v51  ;;  %8189 = vmatprep.mubr.msk.f32.mxu0 %vm9697_vm0, %v13217_v30 }
 0xc81   :  { %8976 = vmatprep.subr.bf16.mxu0 %v13216_v36 }
 0xc82   :  { %v3050_v59 = vpop.f32.mrb[92].mxu1 }
 0xc83   :  { %v8166_v57 = vpop.f32.mrb[93].mxu1  ;;  %8190 = vmatmul.mubr.msk.f32.gmra.mrb[104].mxu0 %vm1533_vm2, %v3050_v59 }
 0xc84   :  { %8978 = vmatpush3.bf16.msra.mxu0 %v11569_v13  ;;  %8192 = vmatprep.mubr.msk.f32.mxu0 %vm9697_vm0, %v13217_v30 }
 0xc85   :  { %8979 = vmatprep.subr.bf16.mxu0 %v13216_v36 }
 0xc86   :  { %v3055_v23 = vpop.f32.mrb[94].mxu1 }
 0xc87   :  { %v8169_v46 = vpop.f32.mrb[95].mxu1  ;;  %8193 = vmatmul.mubr.msk.f32.gmra.mrb[106].mxu0 %vm1533_vm2, %v3055_v23 }
 0xc88   :  { %8195 = vmatprep.mubr.msk.f32.mxu0 %vm9697_vm0, %v13217_v30 }
 0xc8a   :  { %v3060_v18 = vpop.f32.mrb[96].mxu1 }
 0xc8b   :  { %v8172_v53 = vpop.f32.mrb[97].mxu1  ;;  %8196 = vmatmul.mubr.msk.f32.gmra.mrb[108].mxu0 %vm1533_vm2, %v3060_v18 }
 0xc8c   :  { %8198 = vmatprep.mubr.msk.f32.mxu0 %vm9697_vm0, %v13217_v30 }
 0xcad   :  { %v3065_v17 = vpop.f32.mrb[98].mxu1 }
 0xcae   :  { %v8175_v41 = vpop.f32.mrb[99].mxu1  ;;  %8199 = vmatmul.mubr.msk.f32.gmra.mrb[110].mxu0 %vm1533_vm2, %v3065_v17 }
 0xcaf   :  { %8201 = vmatprep.mubr.msk.f32.mxu0 %vm9697_vm0, %v13217_v30 }
 0xcb1   :  { %v3070_v32 = vpop.f32.mrb[100].mxu1 }
 0xcb2   :  { %v8178_v10 = vpop.f32.mrb[101].mxu1  ;;  %8202 = vmatmul.mubr.msk.f32.gmra.mrb[112].mxu0 %vm1533_vm2, %v3070_v32 }
 0xcb3   :  { %8261 = vmatprep.mubr.msk.f32.mxu0 %vm9697_vm0, %v13217_v30 }
 0xcb5   :  { %v3296_v54 = vpop.f32.mrb[102].mxu1 }
 0xcb6   :  { %v3297_v2 = vadd.f32 %v3296_v54, %v11395_v56  ;;  %v8210_v61 = vpop.f32.mrb[103].mxu1 }
 0xcb8   :  { %3330 = vmax.xlane.f32.xlu0 %v3297_v2 }
 0xcb9   :  { %v3301_v55 = vpop.f32.mrb[104].mxu1 }
 0xcba   :  { %v3302_v33 = vadd.f32 %v3301_v55, %v11401_v8  ;;  %v8213_v21 = vpop.f32.mrb[105].mxu1 }
 0xcbc   :  { %3332 = vmax.xlane.f32.xlu1 %v3302_v33 }
 0xcbd   :  { %v3306_v63 = vpop.f32.mrb[106].mxu1 }
 0xcbe   :  { %v3307_v60 = vadd.f32 %v3306_v63, %v11407_v6  ;;  %v8216_v12 = vpop.f32.mrb[107].mxu1 }
 0xcc0   :  { %3334 = vmax.xlane.f32.xlu0 %v3307_v60 }
 0xcc1   :  { %v3311_v4 = vpop.f32.mrb[108].mxu1 }
 0xcc2   :  { %v3312_v38 = vadd.f32 %v3311_v4, %v11413_v14  ;;  %v8219_v9 = vpop.f32.mrb[109].mxu1 }
 0xcc4   :  { %3336 = vmax.xlane.f32.xlu0 %v3312_v38 }
 0xcc5   :  { %v3316_v7 = vpop.f32.mrb[110].mxu1 }
 0xcc6   :  { %v3317_v42 = vadd.f32 %v3316_v7, %v11419_v35  ;;  %v8222_v59 = vpop.f32.mrb[111].mxu1 }
 0xcc8   :  { %3338 = vmax.xlane.f32.xlu0 %v3317_v42 }
 0xcc9   :  { %v3321_v57 = vpop.f32.mrb[112].mxu1 }
 0xcca   :  { %v3322_v23 = vadd.f32 %v3321_v57, %v11425_v31  ;;  %v8225_v46 = vpop.f32.mrb[113].mxu1 }
 0xccc   :  { %3340 = vmax.xlane.f32.xlu0 %v3322_v23 }
 0xccd   :  { %v3326_v18 = vpop.f32.mrb[114].mxu1 }
 0xcce   :  { %v11595_v53 = vadd.f32 %v3326_v18, %v11431_v27  ;;  %v8228_v17 = vpop.f32.mrb[115].mxu1 }
 0xcd0   :  { %3342 = vmax.xlane.f32.xlu1 %v11595_v53 }
 0xce1   :  { %9223 = vrot.lane.b32.xlu1 %v11286_v49, %s9703_s17 }
 0xce2   :  { %9228 = vrot.lane.b32.xlu0 %v11294_v34, %s9703_s17 }
 0xce6   :  { %9233 = vrot.lane.b32.xlu0 %v11278_v39, %s9703_s17 }
 0xd45   :  { %v3331_v41 = vpop.xlane.xlu0 %3330 }
 0xd46   :  { %v3344_v32 = vsub.f32 %v3297_v2, %v3331_v41 }
 0xd48   :  { %v3351_v10 = vmul.f32 1.442695, %v3344_v32 }
 0xd49   :  { %v3333_v54 = vpop.xlane.xlu1 %3332 }
 0xd4a   :  { %9379 = vpow2.f32 %v3351_v10  ;;  %v3345_v61 = vsub.f32 %v3302_v33, %v3333_v54 }
 0xd4c   :  { %v3353_v55 = vmul.f32 1.442695, %v3345_v61 }
 0xd4d   :  { %v3335_v21 = vpop.xlane.xlu0 %3334 }
 0xd4e   :  { %9381 = vpow2.f32 %v3353_v55  ;;  %v3346_v63 = vsub.f32 %v3307_v60, %v3335_v21  ;;  %v11604_v12 = vpop.f32.mrb[100].mxu0 }
 0xd4f   :  { %v8185_v4 = vpop.f32.mrb[101].mxu0 }
 0xd50   :  { %v3355_v49 = vmul.f32 1.442695, %v3346_v63 }
 0xd51   :  { %v3337_v9 = vpop.xlane.xlu0 %3336 }
 0xd52   :  { %9383 = vpow2.f32 %v3355_v49  ;;  %v3347_v34 = vsub.f32 %v3312_v38, %v3337_v9  ;;  %v11606_v7 = vpop.f32.mrb[102].mxu0 }
 0xd53   :  { %v8188_v39 = vpop.f32.mrb[103].mxu0 }
 0xd54   :  { %v11608_v59 = vpop.eup %9379  ;;  %v3357_v2 = vmul.f32 1.442695, %v3347_v34 }
 0xd55   :  { %v3339_v57 = vpop.xlane.xlu0 %3338  ;;  %3365 = vadd.xlane.f32.xlu1 %v11608_v59 }
 0xd56   :  { %9385 = vpow2.f32 %v3357_v2  ;;  %v3348_v33 = vsub.f32 %v3317_v42, %v3339_v57  ;;  %v11611_v46 = vpop.f32.mrb[104].mxu0 }
 0xd57   :  { %v8191_v60 = vpop.f32.mrb[105].mxu0 }
 0xd58   :  { %v11613_v18 = vpop.eup %9381  ;;  %v3359_v17 = vmul.f32 1.442695, %v3348_v33 }
 0xd59   :  { %3367 = vadd.xlane.f32.xlu0 %v11613_v18  ;;  %v3341_v38 = vpop.xlane.xlu0 %3340 }
 0xd5a   :  { %9387 = vpow2.f32 %v3359_v17  ;;  %v3349_v41 = vsub.f32 %v3322_v23, %v3341_v38  ;;  %v11616_v32 = vpop.f32.mrb[106].mxu0 }
 0xd5b   :  { %v8194_v10 = vpop.f32.mrb[107].mxu0 }
 0xd5c   :  { %v11618_v54 = vpop.eup %9383  ;;  %v3361_v61 = vmul.f32 1.442695, %v3349_v41 }
 0xd5d   :  { %3369 = vadd.xlane.f32.xlu0 %v11618_v54  ;;  %v3343_v42 = vpop.xlane.xlu1 %3342  ;;  %v9229_v4 = vpop.permute.xlu0 %9228 }
 0xd5e   :  { %9389 = vpow2.f32 %v3361_v61  ;;  %v11621_v55 = vpop.f32.mrb[108].mxu0  ;;  %v9231_v39 = vunpack.i.h.bf16 %v9229_v4  ;;  %v9230_v2 = vunpack.i.l.bf16 %v9229_v4  ;;  %v3350_v4 = vsub.f32 %v11595_v53, %v3343_v42 }
 0xd5f   :  { %v8197_v21 = vpop.f32.mrb[109].mxu0 }
 0xd60   :  { %v11623_v63 = vpop.eup %9385  ;;  %v11635_v17 = vpack.c.bf16 %v9231_v39, %v9230_v2  ;;  %v154_v2 = vld [vmem:[%s13072_s12 + $0x10] sm:$0xff] }
 0xd61   :  { %3371 = vadd.xlane.f32.xlu1 %v11623_v63  ;;  %v9224_v49 = vpop.permute.xlu1 %9223  ;;  %v9234_v33 = vpop.permute.xlu0 %9233 }
 0xd62   :  { %v9226_v23 = vunpack.i.h.bf16 %v9224_v49  ;;  %v9225_v9 = vunpack.i.l.bf16 %v9224_v49  ;;  %13279 = vst [vmem:[#allocation15_spill] sm:$0xff] %v11635_v17  ;;  %v9236_v38 = vunpack.i.h.bf16 %v9234_v33  ;;  %v9235_v41 = vunpack.i.l.bf16 %v9234_v33 }
 0xd64   :  { %v11626_v34 = vpop.eup %9387  ;;  %v11628_v57 = vpack.c.bf16 %v9226_v23, %v9225_v9  ;;  %v11640_v10 = vpack.c.bf16 %v9236_v38, %v9235_v41  ;;  %v3363_v9 = vmul.f32 1.442695, %v3350_v4 }
 0xd65   :  { %3373 = vadd.xlane.f32.xlu0 %v11626_v34 }
 0xd66   :  { %13278 = vst [vmem:[#allocation16_spill] sm:$0xff] %v11628_v57  ;;  %8981 = vmatpush3.bf16.msra.mxu0 %v11628_v57  ;;  %13280 = vst [vmem:[#allocation18_spill] sm:$0xff] %v11640_v10  ;;  %9391 = vpow2.f32 %v3363_v9 }
 0xd67   :  { %8982 = vmatprep.subr.bf16.mxu0 %v13216_v36 }
 0xd68   :  { %v11632_v60 = vpop.eup %9389 }
 0xd69   :  { %3375 = vadd.xlane.f32.xlu0 %v11632_v60 }
 0xd6a   :  { %8984 = vmatpush3.bf16.msra.mxu0 %v11635_v17 }
 0xd6b   :  { %8985 = vmatprep.subr.bf16.mxu0 %v13216_v36 }
 0xd6e   :  { %8987 = vmatpush3.bf16.msra.mxu0 %v11640_v10 }
 0xd6f   :  { %8988 = vmatprep.subr.bf16.mxu0 %v13216_v36 }
 0xd70   :  { %v9392_v39 = vpop.eup %9391 }
 0xd72   :  { %9238 = vrot.lane.b32.xlu1 %v11301_v52, %s9703_s17 }
 0xd7f   :  { %9243 = vrot.lane.b32.xlu0 %v11298_v58, %s9703_s17  ;;  %v155_v58 = vld [vmem:[%s13072_s12 + $0x18] sm:$0xff] }
 0xd80   :  { %v11659_v52 = vpack.c.bf16 %v155_v58, %v154_v2 }
 0xd81   :  { %v11648_v61 = vpop.f32.mrb[110].mxu0 }
 0xd82   :  { %v8200_v21 = vpop.f32.mrb[111].mxu0  ;;  %8996 = vmatpush3.bf16.msra.mxu1 %v11659_v52 }
 0xd83   :  { %9003 = vmatprep.subr.bf16.mxu1 %v13216_v36 }
 0xd85   :  { %v11651_v49 = vpop.f32.mrb[112].mxu0 }
 0xd86   :  { %v8203_v23 = vpop.f32.mrb[113].mxu0 }
 0xd96   :  { %3377 = vadd.xlane.f32.xlu1 %v9392_v39 }
 0xde2   :  { %v3366_v42 = vpop.xlane.xlu1 %3365 }
 0xde3   :  { %9393 = vrcp.f32 %v3366_v42 }
 0xde6   :  { %v3368_v53 = vpop.xlane.xlu0 %3367 }
 0xde7   :  { %9395 = vrcp.f32 %v3368_v53 }
 0xdea   :  { %v3370_v33 = vpop.xlane.xlu0 %3369 }
 0xdeb   :  { %9397 = vrcp.f32 %v3370_v33 }
 0xded   :  { %v9394_v57 = vpop.eup %9393 }
 0xdee   :  { %v3372_v38 = vpop.xlane.xlu1 %3371  ;;  %v3380_v42 = vmul.f32 %v9394_v57, %v11608_v59 }
 0xdef   :  { %9399 = vrcp.f32 %v3372_v38 }
 0xdf2   :  { %v3374_v41 = vpop.xlane.xlu0 %3373  ;;  %v9239_v21 = vpop.permute.xlu1 %9238 }
 0xdf3   :  { %v9241_v4 = vunpack.i.h.bf16 %v9239_v21  ;;  %v9240_v23 = vunpack.i.l.bf16 %v9239_v21  ;;  %v9396_v21 = vpop.eup %9395  ;;  %9401 = vrcp.f32 %v3374_v41 }
 0xdf4   :  { %v3382_v53 = vmul.f32 %v9396_v21, %v11613_v18 }
 0xdf5   :  { %v11663_v9 = vpack.c.bf16 %v9241_v4, %v9240_v23  ;;  %v9398_v33 = vpop.eup %9397 }
 0xdf6   :  { %v3376_v10 = vpop.xlane.xlu0 %3375 }
 0xdf7   :  { %8990 = vmatpush3.bf16.msra.mxu0 %v11663_v9  ;;  %9403 = vrcp.f32 %v3376_v10 }
 0xdf8   :  { %8991 = vmatprep.subr.bf16.mxu0 %v13216_v36 }
 0xdf9   :  { %v9400_v38 = vpop.eup %9399 }
 0xdfa   :  { %v9244_v2 = vpop.permute.xlu0 %9243  ;;  %v3386_v59 = vmul.f32 %v9400_v38, %v11623_v63 }
 0xdfb   :  { %v9246_v58 = vunpack.i.h.bf16 %v9244_v2  ;;  %v9245_v17 = vunpack.i.l.bf16 %v9244_v2 }
 0xdfd   :  { %v11667_v13 = vpack.c.bf16 %v9246_v58, %v9245_v17  ;;  %v3384_v17 = vmul.f32 %v9398_v33, %v11618_v54  ;;  %v9402_v57 = vpop.eup %9401 }
 0xdfe   :  { %v3388_v18 = vmul.f32 %v9402_v57, %v11626_v34 }
 0xdff   :  { %8993 = vmatpush3.bf16.msra.mxu0 %v11667_v13 }
 0xe00   :  { %8997 = vmatprep.subr.bf16.mxu0 %v13216_v36 }
 0xe01   :  { %v9404_v10 = vpop.eup %9403 }
 0xe02   :  { %8262 = vmatmul.mubr.f32.vlgmr.msra.gmra.mrb[114].mxu0 %v3380_v42  ;;  %v3390_v54 = vmul.f32 %v9404_v10, %v11632_v60 }
 0xe03   :  { %8264 = vmatprep.mubr.msk.f32.mxu0 %vm9697_vm0, %v13217_v30 }
 0xe06   :  { %8265 = vmatmul.mubr.f32.gmra.mrb[116].mxu0 %v3382_v53 }
 0xe07   :  { %8267 = vmatprep.mubr.msk.f32.mxu0 %vm9697_vm0, %v13217_v30 }
 0xe0a   :  { %8268 = vmatmul.mubr.f32.gmra.mrb[118].mxu0 %v3384_v17 }
 0xe0b   :  { %8270 = vmatprep.mubr.msk.f32.mxu0 %vm9697_vm0, %v13217_v30 }
 0xe0e   :  { %8271 = vmatmul.mubr.f32.gmra.mrb[120].mxu0 %v3386_v59 }
 0xe0f   :  { %8273 = vmatprep.mubr.msk.f32.mxu0 %vm9697_vm0, %v13217_v30 }
 0xe12   :  { %8274 = vmatmul.mubr.f32.gmra.mrb[122].mxu0 %v3388_v18  ;;  %v7085_v18 = vld [vmem:[%s13073_s13] ss:$0 sm:$0xff] }
 0xe13   :  { %8276 = vmatprep.mubr.msk.f32.mxu0 %vm9697_vm0, %v13217_v30  ;;  %v3195_v10 = vadd.f32 %v7085_v18, %v11604_v12 }
 0xe16   :  { %8277 = vmatmul.mubr.f32.gmra.mrb[124].mxu0 %v3390_v54 }
 0xe17   :  { %8279 = vmatprep.mubr.msk.f32.mxu0 %vm9697_vm0, %v13217_v30 }
 0xe23   :  { %v3378_v41 = vpop.xlane.xlu1 %3377 }
 0xe24   :  { %9405 = vrcp.f32 %v3378_v41 }
 0xe2e   :  { %v9406_v63 = vpop.eup %9405 }
 0xe2f   :  { %v3392_v4 = vmul.f32 %v9406_v63, %v9392_v39 }
 0xe31   :  { %8280 = vmatmul.mubr.f32.gmra.mrb[126].mxu0 %v3392_v4  ;;  %v3196_v4 = vadd.f32 %v7085_v18, %v11606_v7  ;;  %v3198_v7 = vadd.f32 %v7085_v18, %v11616_v32  ;;  %v3200_v32 = vadd.f32 %v7085_v18, %v11648_v61 }
 0xe32   :  { %8315 = vmatprep.mubr.msk.f32.mxu0 %vm9697_vm0, %v13217_v30 }
 0xed5   :  { %v3507_v34 = vpop.f32.mrb[114].mxu0 }
 0xed6   :  { %v8263_v23 = vpop.f32.mrb[115].mxu0  ;;  %8287 = vmatmul.mubr.msk.f32.vlgmr.msra.gmra.mrb[116].mxu1 %vm1533_vm2, %v3507_v34 }
 0xed7   :  { %8289 = vmatprep.mubr.msk.f32.mxu1 %vm9697_vm0, %v13217_v30 }
 0xed9   :  { %v3512_v60 = vpop.f32.mrb[116].mxu0 }
 0xeda   :  { %v8266_v2 = vpop.f32.mrb[117].mxu0  ;;  %8290 = vmatmul.mubr.msk.f32.gmra.mrb[118].mxu1 %vm1533_vm2, %v3512_v60 }
 0xedb   :  { %8292 = vmatprep.mubr.msk.f32.mxu1 %vm9697_vm0, %v13217_v30 }
 0xedd   :  { %v3517_v58 = vpop.f32.mrb[118].mxu0 }
 0xede   :  { %v8269_v39 = vpop.f32.mrb[119].mxu0  ;;  %8293 = vmatmul.mubr.msk.f32.gmra.mrb[120].mxu1 %vm1533_vm2, %v3517_v58 }
 0xedf   :  { %8295 = vmatprep.mubr.msk.f32.mxu1 %vm9697_vm0, %v13217_v30  ;;  %v3197_v39 = vadd.f32 %v7085_v18, %v11611_v46  ;;  %v3199_v46 = vadd.f32 %v7085_v18, %v11621_v55 }
 0xee1   :  { %v3522_v42 = vpop.f32.mrb[120].mxu0 }
 0xee2   :  { %v8272_v21 = vpop.f32.mrb[121].mxu0  ;;  %8296 = vmatmul.mubr.msk.f32.gmra.mrb[122].mxu1 %vm1533_vm2, %v3522_v42 }
 0xee3   :  { %8298 = vmatprep.mubr.msk.f32.mxu1 %vm9697_vm0, %v13217_v30 }
 0xee5   :  { %v3527_v53 = vpop.f32.mrb[122].mxu0 }
 0xee6   :  { %v8275_v33 = vpop.f32.mrb[123].mxu0  ;;  %8299 = vmatmul.mubr.msk.f32.gmra.mrb[124].mxu1 %vm1533_vm2, %v3527_v53 }
 0xee7   :  { %8301 = vmatprep.mubr.msk.f32.mxu1 %vm9697_vm0, %v13217_v30 }
 0xee9   :  { %v3532_v17 = vpop.f32.mrb[124].mxu0 }
 0xeea   :  { %v8278_v38 = vpop.f32.mrb[125].mxu0  ;;  %8302 = vmatmul.mubr.msk.f32.gmra.mrb[126].mxu1 %vm1533_vm2, %v3532_v17 }
 0xeeb   :  { %8304 = vmatprep.mubr.msk.f32.mxu1 %vm9697_vm0, %v13217_v30 }
 0xf04   :  { %v3537_v59 = vpop.f32.mrb[126].mxu0 }
 0xf05   :  { %v8281_v57 = vpop.f32.mrb[127].mxu0  ;;  %8305 = vmatmul.mubr.msk.f32.gmra.mrb[128].mxu1 %vm1533_vm2, %v3537_v59 }
 0xf06   :  { %8344 = vmatprep.mubr.msk.f32.mxu1 %vm9697_vm0, %v13217_v30 }
 0xfa9   :  { %v3628_v54 = vpop.f32.mrb[116].mxu1 }
 0xfaa   :  { %v3662_v41 = vadd.f32 %v3628_v54, %v3195_v10  ;;  %v8288_v63 = vpop.f32.mrb[117].mxu1 }
 0xfac   :  { %v3669_v34 = vadd.f32 %v3662_v41, %v11213_v25 }
 0xfad   :  { %v3633_v23 = vpop.f32.mrb[118].mxu1 }
 0xfae   :  { %v3663_v60 = vadd.f32 %v3633_v23, %v3196_v4  ;;  %v8291_v2 = vpop.f32.mrb[119].mxu1  ;;  %v3676_v58 = vsel %vm323_vm1, %v3669_v34, 0.0 }
 0xfaf   :  { %3677 = vadd.xlane.f32.xlu0 %v3676_v58  ;;  %v3201_v58 = vadd.f32 %v7085_v18, %v11651_v49 }
 0xfb0   :  { %v3670_v42 = vadd.f32 %v3663_v60, %v11222_v28 }
 0xfb1   :  { %v3638_v21 = vpop.f32.mrb[120].mxu1 }
 0xfb2   :  { %v3664_v53 = vadd.f32 %v3638_v21, %v3197_v39  ;;  %v8294_v12 = vpop.f32.mrb[121].mxu1  ;;  %v3679_v33 = vsel %vm323_vm1, %v3670_v42, 0.0 }
 0xfb3   :  { %3680 = vadd.xlane.f32.xlu1 %v3679_v33 }
 0xfb4   :  { %v3671_v25 = vadd.f32 %v3664_v53, %v11231_v47 }
 0xfb5   :  { %v3643_v17 = vpop.f32.mrb[122].mxu1 }
 0xfb6   :  { %v3665_v38 = vadd.f32 %v3643_v17, %v3198_v7  ;;  %v8297_v59 = vpop.f32.mrb[123].mxu1  ;;  %v3682_v57 = vsel %vm323_vm1, %v3671_v25, 0.0 }
 0xfb7   :  { %3683 = vadd.xlane.f32.xlu1 %v3682_v57 }
 0xfb8   :  { %v3672_v28 = vadd.f32 %v3665_v38, %v11240_v3 }
 0xfb9   :  { %v3648_v10 = vpop.f32.mrb[124].mxu1 }
 0xfba   :  { %v3666_v54 = vadd.f32 %v3648_v10, %v3199_v46  ;;  %v8300_v41 = vpop.f32.mrb[125].mxu1  ;;  %v3685_v63 = vsel %vm323_vm1, %v3672_v28, 0.0 }
 0xfbb   :  { %3686 = vadd.xlane.f32.xlu1 %v3685_v63 }
 0xfbc   :  { %v3673_v47 = vadd.f32 %v3666_v54, %v11249_v45 }
 0xfbd   :  { %v3653_v4 = vpop.f32.mrb[126].mxu1 }
 0xfbe   :  { %v3667_v23 = vadd.f32 %v3653_v4, %v3200_v32  ;;  %v8303_v60 = vpop.f32.mrb[127].mxu1  ;;  %v3688_v2 = vsel %vm323_vm1, %v3673_v47, 0.0 }
 0xfbf   :  { %3689 = vadd.xlane.f32.xlu1 %v3688_v2 }
 0xfc0   :  { %v3674_v55 = vadd.f32 %v3667_v23, %v11258_v20 }
 0xfc2   :  { %v3691_v3 = vsel %vm323_vm1, %v3674_v55, 0.0 }
 0xfc3   :  { %3692 = vadd.xlane.f32.xlu0 %v3691_v3 }
 0xfd8   :  { %v3658_v39 = vpop.f32.mrb[128].mxu1 }
 0xfd9   :  { %v3668_v21 = vadd.f32 %v3658_v39, %v3201_v58  ;;  %v8306_v53 = vpop.f32.mrb[129].mxu1 }
 0xfdb   :  { %v3675_v61 = vadd.f32 %v3668_v21, %v11313_v15 }
 0xfdd   :  { %v3694_v45 = vsel %vm323_vm1, %v3675_v61, 0.0 }
 0xfde   :  { %3695 = vadd.xlane.f32.xlu1 %v3694_v45  ;;  %v158_v45 = vld [vmem:[%s13074_s14 + $0x8] sm:$0xff] }
0x103c   :  { %v3678_v12 = vpop.xlane.xlu0 %3677 }
0x103d   :  { %v3697_v33 = vmul.f32 0.03125, %v3678_v12 }
0x103f   :  { %v11736_v7 = vsub.f32 %v3669_v34, %v3697_v33  ;;  %v160_v33 = vld [vmem:[%s13074_s14 + $0x18] sm:$0xff] }
0x1040   :  { %v3681_v17 = vpop.xlane.xlu1 %3680 }
0x1041   :  { %v3698_v38 = vmul.f32 0.03125, %v3681_v17  ;;  %v3711_v20 = vmul.f32 %v11736_v7, %v11736_v7 }
0x1043   :  { %v11740_v59 = vsub.f32 %v3670_v42, %v3698_v38  ;;  %v3718_v49 = vsel %vm323_vm1, %v3711_v20, 0.0 }
0x1044   :  { %v3684_v18 = vpop.xlane.xlu1 %3683  ;;  %3719 = vadd.xlane.f32.xlu0 %v3718_v49 }
0x1045   :  { %v3699_v57 = vmul.f32 0.03125, %v3684_v18  ;;  %v3712_v15 = vmul.f32 %v11740_v59, %v11740_v59 }
0x1047   :  { %v11745_v46 = vsub.f32 %v3671_v25, %v3699_v57  ;;  %v3721_v34 = vsel %vm323_vm1, %v3712_v15, 0.0 }
0x1048   :  { %v3687_v10 = vpop.xlane.xlu1 %3686  ;;  %3722 = vadd.xlane.f32.xlu1 %v3721_v34 }
0x1049   :  { %v3700_v54 = vmul.f32 0.03125, %v3687_v10  ;;  %v3713_v41 = vmul.f32 %v11745_v46, %v11745_v46 }
0x104b   :  { %v11750_v42 = vsub.f32 %v3672_v28, %v3700_v54  ;;  %v3724_v63 = vsel %vm323_vm1, %v3713_v41, 0.0 }
0x104c   :  { %v3690_v32 = vpop.xlane.xlu1 %3689  ;;  %3725 = vadd.xlane.f32.xlu0 %v3724_v63 }
0x104d   :  { %v3701_v4 = vmul.f32 0.03125, %v3690_v32  ;;  %v3714_v23 = vmul.f32 %v11750_v42, %v11750_v42 }
0x104f   :  { %v11755_v25 = vsub.f32 %v3673_v47, %v3701_v4  ;;  %v3727_v60 = vsel %vm323_vm1, %v3714_v23, 0.0  ;;  %v157_v47 = vld [vmem:[%s13074_s14] sm:$0xff] }
0x1050   :  { %v3693_v2 = vpop.xlane.xlu0 %3692  ;;  %3728 = vadd.xlane.f32.xlu1 %v3727_v60  ;;  %v11772_v12 = vpack.c.bf16 %v158_v45, %v157_v47 }
0x1051   :  { %v3702_v3 = vmul.f32 0.03125, %v3693_v2  ;;  %v3715_v58 = vmul.f32 %v11755_v25, %v11755_v25  ;;  %v9666_v2 = vld [vmem:[%s13070_s24] sm:$0x7] }
0x1052   :  { %13281 = vst [vmem:[#allocation17_spill] sm:$0xff] %v11772_v12  ;;  %8999 = vmatpush3.bf16.msra.mxu0 %v11772_v12 }
0x1053   :  { %v11760_v28 = vsub.f32 %v3674_v55, %v3702_v3  ;;  %v3730_v39 = vsel %vm323_vm1, %v3715_v58, 0.0  ;;  %v159_v55 = vld [vmem:[%s13074_s14 + $0x10] sm:$0xff]  ;;  %9000 = vmatprep.subr.bf16.mxu0 %v13216_v36  ;;  %v11795_v3 = vrot.slane %v9666_v2, %v13250_v37 }
0x1054   :  { %3731 = vadd.xlane.f32.xlu0 %v3730_v39  ;;  %v11782_v38 = vpack.c.bf16 %v160_v33, %v159_v55 }
0x1055   :  { %v3716_v21 = vmul.f32 %v11760_v28, %v11760_v28  ;;  %13283 = vst [vmem:[#allocation19_spill] sm:$0xff] %v11795_v3 }
0x1056   :  { %13282 = vst [vmem:[#allocation20_spill] sm:$0xff] %v11782_v38  ;;  %9002 = vmatpush3.bf16.msra.mxu0 %v11782_v38 }
0x1057   :  { %v3733_v53 = vsel %vm323_vm1, %v3716_v21, 0.0  ;;  %9009 = vmatprep.subr.bf16.mxu0 %v13216_v36  ;;  %v9667_v21 = vld [vmem:[%s13071_s25] sm:$0x7] }
0x1058   :  { %3734 = vadd.xlane.f32.xlu1 %v3733_v53  ;;  %v11801_v53 = vrot.slane %v9667_v21, %v13250_v37  ;;  %v9668_v37 = vld [vmem:[%s13192_s27] sm:$0xff] }
0x105a   :  { %13284 = vst [vmem:[#allocation22_spill] sm:$0xff] %v11801_v53 }
0x106b   :  { %v3696_v17 = vpop.xlane.xlu1 %3695 }
0x106c   :  { %v3703_v20 = vmul.f32 0.03125, %v3696_v17 }
0x106e   :  { %v11784_v49 = vsub.f32 %v3675_v61, %v3703_v20 }
0x1070   :  { %v3717_v18 = vmul.f32 %v11784_v49, %v11784_v49 }
0x1072   :  { %v3736_v57 = vsel %vm323_vm1, %v3717_v18, 0.0 }
0x1073   :  { %3737 = vadd.xlane.f32.xlu0 %v3736_v57 }
0x10d1   :  { %v3720_v15 = vpop.xlane.xlu0 %3719 }
0x10d2   :  { %v3739_v34 = vmul.f32 0.03125, %v3720_v15 }
0x10d4   :  { %v3746_v10 = vadd.f32 1e-05, %v3739_v34 }
0x10d5   :  { %v3723_v54 = vpop.xlane.xlu1 %3722 }
0x10d6   :  { %9407 = vrsqrt.f32 %v3746_v10  ;;  %v3740_v41 = vmul.f32 0.03125, %v3723_v54 }
0x10d8   :  { %v3747_v63 = vadd.f32 1e-05, %v3740_v41 }
0x10d9   :  { %v3726_v32 = vpop.xlane.xlu0 %3725 }
0x10da   :  { %9409 = vrsqrt.f32 %v3747_v63  ;;  %v3741_v61 = vmul.f32 0.03125, %v3726_v32 }
0x10dc   :  { %v3748_v4 = vadd.f32 1e-05, %v3741_v61 }
0x10dd   :  { %v3729_v23 = vpop.xlane.xlu1 %3728 }
0x10de   :  { %9411 = vrsqrt.f32 %v3748_v4  ;;  %v3742_v60 = vmul.f32 0.03125, %v3729_v23 }
0x10e0   :  { %v9408_v58 = vpop.eup %9407  ;;  %v3749_v39 = vadd.f32 1e-05, %v3742_v60 }
0x10e1   :  { %v3760_v47 = vmul.f32 %v9408_v58, %v11736_v7  ;;  %v3732_v45 = vpop.xlane.xlu0 %3731 }
0x10e2   :  { %9413 = vrsqrt.f32 %v3749_v39  ;;  %v3743_v55 = vmul.f32 0.03125, %v3732_v45 }
0x10e3   :  { %v3767_v33 = vmul.f32 %v3760_v47, %v11795_v3 }
0x10e4   :  { %v9410_v17 = vpop.eup %9409  ;;  %v3750_v20 = vadd.f32 1e-05, %v3743_v55 }
0x10e5   :  { %v3774_v18 = vadd.f32 %v3767_v33, %v11801_v53  ;;  %v3735_v57 = vpop.xlane.xlu1 %3734  ;;  %v3761_v15 = vmul.f32 %v9410_v17, %v11740_v59  ;;  %v9669_v59 = vld [vmem:[%s13192_s27 + $0x8] sm:$0xff] }
0x10e6   :  { %9415 = vrsqrt.f32 %v3750_v20  ;;  %v3744_v34 = vmul.f32 0.03125, %v3735_v57 }
0x10e7   :  { %v3781_v10 = vadd.f32 %v9668_v37, %v3774_v18  ;;  %v3768_v7 = vmul.f32 %v3761_v15, %v11795_v3 }
0x10e8   :  { %v9412_v54 = vpop.eup %9411  ;;  %v3751_v41 = vadd.f32 1e-05, %v3744_v34 }
0x10e9   :  { %8316 = vmatmul.mubr.msk.f32.vlgmr.msra.gmra.mrb[128].mxu0 %vm323_vm1, %v3781_v10  ;;  %v3775_v63 = vadd.f32 %v3768_v7, %v11801_v53  ;;  %v3762_v32 = vmul.f32 %v9412_v54, %v11745_v46  ;;  %v9670_v46 = vld [vmem:[%s13192_s27 + $0x10] sm:$0xff] }
0x10ea   :  { %9417 = vrsqrt.f32 %v3751_v41  ;;  %8318 = vmatprep.mubr.msk.f32.mxu0 %vm9697_vm0, %v13217_v30 }
0x10eb   :  { %v3782_v61 = vadd.f32 %v9669_v59, %v3775_v63  ;;  %v3769_v4 = vmul.f32 %v3762_v32, %v11795_v3 }
0x10ec   :  { %v9414_v23 = vpop.eup %9413 }
0x10ed   :  { %8319 = vmatmul.mubr.msk.f32.gmra.mrb[130].mxu0 %vm323_vm1, %v3782_v61  ;;  %v3776_v60 = vadd.f32 %v3769_v4, %v11801_v53  ;;  %v3763_v2 = vmul.f32 %v9414_v23, %v11750_v42  ;;  %v9671_v42 = vld [vmem:[%s13192_s27 + $0x18] sm:$0xff]  ;;  %v9674_v61 = vld [vmem:[%s13192_s27 + $0x30] sm:$0xff]  ;;  %v9675_v23 = vld [vmem:[%s13201_s10] sm:$0x7] }
0x10ee   :  { %8321 = vmatprep.mubr.msk.f32.mxu0 %vm9697_vm0, %v13217_v30 }
0x10ef   :  { %v3783_v58 = vadd.f32 %v9670_v46, %v3776_v60  ;;  %v3770_v39 = vmul.f32 %v3763_v2, %v11795_v3 }
0x10f0   :  { %v9416_v21 = vpop.eup %9415 }
0x10f1   :  { %8322 = vmatmul.mubr.msk.f32.gmra.mrb[132].mxu0 %vm323_vm1, %v3783_v58  ;;  %v3777_v47 = vadd.f32 %v3770_v39, %v11801_v53  ;;  %v3764_v45 = vmul.f32 %v9416_v21, %v11755_v25  ;;  %v9672_v25 = vld [vmem:[%s13192_s27 + $0x20] sm:$0xff] }
0x10f2   :  { %8324 = vmatprep.mubr.msk.f32.mxu0 %vm9697_vm0, %v13217_v30 }
0x10f3   :  { %v3784_v55 = vadd.f32 %v9671_v42, %v3777_v47  ;;  %v3771_v33 = vmul.f32 %v3764_v45, %v11795_v3 }
0x10f4   :  { %v9418_v17 = vpop.eup %9417 }
0x10f5   :  { %8325 = vmatmul.mubr.msk.f32.gmra.mrb[134].mxu0 %vm323_vm1, %v3784_v55  ;;  %v3778_v20 = vadd.f32 %v3771_v33, %v11801_v53  ;;  %v3765_v18 = vmul.f32 %v9418_v17, %v11760_v28  ;;  %v9673_v28 = vld [vmem:[%s13192_s27 + $0x28] sm:$0xff] }
0x10f6   :  { %8327 = vmatprep.mubr.msk.f32.mxu0 %vm9697_vm0, %v13217_v30 }
0x10f7   :  { %v3785_v57 = vadd.f32 %v9672_v25, %v3778_v20  ;;  %v3772_v15 = vmul.f32 %v3765_v18, %v11795_v3 }
0x10f9   :  { %8328 = vmatmul.mubr.msk.f32.gmra.mrb[136].mxu0 %vm323_vm1, %v3785_v57  ;;  %v3779_v34 = vadd.f32 %v3772_v15, %v11801_v53 }
0x10fa   :  { %8330 = vmatprep.mubr.msk.f32.mxu0 %vm9697_vm0, %v13217_v30 }
0x10fb   :  { %v3786_v37 = vadd.f32 %v9673_v28, %v3779_v34 }
0x10fd   :  { %8331 = vmatmul.mubr.msk.f32.gmra.mrb[138].mxu0 %vm323_vm1, %v3786_v37 }
0x10fe   :  { %8333 = vmatprep.mubr.msk.f32.mxu0 %vm9697_vm0, %v13217_v30 }
0x1100   :  { %v3738_v10 = vpop.xlane.xlu0 %3737 }
0x1101   :  { %v3745_v7 = vmul.f32 0.03125, %v3738_v10 }
0x1103   :  { %v3752_v54 = vadd.f32 1e-05, %v3745_v7 }
0x1105   :  { %9419 = vrsqrt.f32 %v3752_v54 }
0x110f   :  { %v9420_v41 = vpop.eup %9419 }
0x1110   :  { %v3766_v63 = vmul.f32 %v9420_v41, %v11784_v49  ;;  %v11870_v49 = vrot.slane %v9675_v23, %v13267_v19 }
0x1112   :  { %v3773_v32 = vmul.f32 %v3766_v63, %v11795_v3  ;;  %13285 = vst [vmem:[#allocation21_spill] sm:$0xff] %v11870_v49 }
0x1114   :  { %v3780_v59 = vadd.f32 %v3773_v32, %v11801_v53 }
0x1116   :  { %v3787_v4 = vadd.f32 %v9674_v61, %v3780_v59 }
0x1118   :  { %8334 = vmatmul.mubr.msk.f32.gmra.mrb[140].mxu0 %vm323_vm1, %v3787_v4 }
0x1119   :  { %8381 = vmatprep.mubr.msk.f32.mxu0 %vm9697_vm0, %v13217_v30 }
0x11bc   :  { %v3875_v60 = vpop.f32.mrb[128].mxu0 }
0x11bd   :  { %v3876_v2 = vadd.f32 %v3875_v60, %v11870_v49  ;;  %v8317_v46 = vpop.f32.mrb[129].mxu0 }
0x11bf   :  { %v3909_v58 = vmul.f32 0.17677669, %v3876_v2 }
0x11c0   :  { %v3880_v39 = vpop.f32.mrb[130].mxu0 }
0x11c1   :  { %v3881_v21 = vadd.f32 %v3880_v39, %v11870_v49  ;;  %v8320_v47 = vpop.f32.mrb[131].mxu0  ;;  %v3916_v45 = vsel %vm323_vm1, %v3909_v58, -inf }
0x11c2   :  { %3917 = vmax.xlane.f32.xlu1 %v3916_v45 }
0x11c3   :  { %v3910_v42 = vmul.f32 0.17677669, %v3881_v21 }
0x11c4   :  { %v3885_v55 = vpop.f32.mrb[132].mxu0 }
0x11c5   :  { %v3886_v33 = vadd.f32 %v3885_v55, %v11870_v49  ;;  %v8323_v17 = vpop.f32.mrb[133].mxu0  ;;  %v3919_v19 = vsel %vm323_vm1, %v3910_v42, -inf }
0x11c6   :  { %3920 = vmax.xlane.f32.xlu0 %v3919_v19 }
0x11c7   :  { %v3911_v20 = vmul.f32 0.17677669, %v3886_v33 }
0x11c8   :  { %v3890_v18 = vpop.f32.mrb[134].mxu0 }
0x11c9   :  { %v3891_v25 = vadd.f32 %v3890_v18, %v11870_v49  ;;  %v8326_v57 = vpop.f32.mrb[135].mxu0  ;;  %v3922_v15 = vsel %vm323_vm1, %v3911_v20, -inf }
0x11ca   :  { %3923 = vmax.xlane.f32.xlu1 %v3922_v15 }
0x11cb   :  { %v3912_v34 = vmul.f32 0.17677669, %v3891_v25 }
0x11cc   :  { %v3895_v28 = vpop.f32.mrb[136].mxu0 }
0x11cd   :  { %v3896_v37 = vadd.f32 %v3895_v28, %v11870_v49  ;;  %v8329_v10 = vpop.f32.mrb[137].mxu0  ;;  %v3925_v7 = vsel %vm323_vm1, %v3912_v34, -inf }
0x11ce   :  { %3926 = vmax.xlane.f32.xlu0 %v3925_v7 }
0x11cf   :  { %v3913_v54 = vmul.f32 0.17677669, %v3896_v37 }
0x11d0   :  { %v3900_v41 = vpop.f32.mrb[138].mxu0 }
0x11d1   :  { %v3901_v63 = vadd.f32 %v3900_v41, %v11870_v49  ;;  %v8332_v32 = vpop.f32.mrb[139].mxu0  ;;  %v3928_v59 = vsel %vm323_vm1, %v3913_v54, -inf }
0x11d2   :  { %3929 = vmax.xlane.f32.xlu1 %v3928_v59 }
0x11d3   :  { %v3914_v61 = vmul.f32 0.17677669, %v3901_v63 }
0x11d5   :  { %v3931_v4 = vsel %vm323_vm1, %v3914_v61, -inf }
0x11d6   :  { %3932 = vmax.xlane.f32.xlu0 %v3931_v4 }
0x11eb   :  { %v3905_v23 = vpop.f32.mrb[140].mxu0 }
0x11ec   :  { %v3906_v60 = vadd.f32 %v3905_v23, %v11870_v49  ;;  %v8335_v2 = vpop.f32.mrb[141].mxu0 }
0x11ee   :  { %v3915_v46 = vmul.f32 0.17677669, %v3906_v60 }
0x11f0   :  { %v3934_v39 = vsel %vm323_vm1, %v3915_v46, -inf }
0x11f1   :  { %3935 = vmax.xlane.f32.xlu1 %v3934_v39 }
0x124f   :  { %v3918_v21 = vpop.xlane.xlu1 %3917 }
0x1250   :  { %v3937_v47 = vsub.f32 %v3909_v58, %v3918_v21 }
0x1252   :  { %v3944_v45 = vmul.f32 1.442695, %v3937_v47 }
0x1253   :  { %v3921_v55 = vpop.xlane.xlu0 %3920 }
0x1254   :  { %9421 = vpow2.f32 %v3944_v45  ;;  %v3938_v33 = vsub.f32 %v3910_v42, %v3921_v55 }
0x1256   :  { %v3946_v17 = vmul.f32 1.442695, %v3938_v33 }
0x1257   :  { %v3924_v19 = vpop.xlane.xlu1 %3923 }
0x1258   :  { %9423 = vpow2.f32 %v3946_v17  ;;  %v3939_v18 = vsub.f32 %v3911_v20, %v3924_v19  ;;  %v1320_v17 = vrot.slane %v10680_v26, 4 }
0x125a   :  { %v3948_v25 = vmul.f32 1.442695, %v3939_v18  ;;  %v1321_v19 = vadd.f32 %v1320_v17, %v10680_v26 }
0x125b   :  { %v3927_v57 = vpop.xlane.xlu0 %3926 }
0x125c   :  { %9425 = vpow2.f32 %v3948_v25  ;;  %v3940_v15 = vsub.f32 %v3912_v34, %v3927_v57  ;;  %v1322_v18 = vrot.slane %v1321_v19, 2 }
0x125e   :  { %v9422_v28 = vpop.eup %9421  ;;  %v3950_v37 = vmul.f32 1.442695, %v3940_v15  ;;  %v1323_v57 = vadd.f32 %v1322_v18, %v1321_v19 }
0x125f   :  { %v3930_v10 = vpop.xlane.xlu1 %3929  ;;  %v3958_v7 = vsel %vm323_vm1, %v9422_v28, 0.0 }
0x1260   :  { %9427 = vpow2.f32 %v3950_v37  ;;  %v3941_v41 = vsub.f32 %v3913_v54, %v3930_v10  ;;  %3959 = vadd.xlane.f32.xlu0 %v3958_v7  ;;  %v1324_v37 = vrot.slane %v1323_v57, 1 }
0x1262   :  { %v9424_v58 = vpop.eup %9423  ;;  %v3952_v63 = vmul.f32 1.442695, %v3941_v41  ;;  %v11895_v7 = vadd.f32 %v1324_v37, %v1323_v57 }
0x1263   :  { %v3933_v32 = vpop.xlane.xlu0 %3932  ;;  %v3961_v42 = vsel %vm323_vm1, %v9424_v58, 0.0 }
0x1264   :  { %9429 = vpow2.f32 %v3952_v63  ;;  %v3942_v59 = vsub.f32 %v3914_v61, %v3933_v32  ;;  %3962 = vadd.xlane.f32.xlu1 %v3961_v42  ;;  %13286 = vst [vmem:[#allocation23_spill] sm:$0xff] %v11895_v7 }
0x1266   :  { %v9426_v20 = vpop.eup %9425  ;;  %v3954_v4 = vmul.f32 1.442695, %v3942_v59 }
0x1267   :  { %v3964_v34 = vsel %vm323_vm1, %v9426_v20, 0.0 }
0x1268   :  { %9431 = vpow2.f32 %v3954_v4  ;;  %3965 = vadd.xlane.f32.xlu0 %v3964_v34 }
0x126a   :  { %v9428_v23 = vpop.eup %9427 }
0x126b   :  { %v3967_v60 = vsel %vm323_vm1, %v9428_v23, 0.0 }
0x126c   :  { %3968 = vadd.xlane.f32.xlu1 %v3967_v60 }
0x126e   :  { %v9430_v54 = vpop.eup %9429 }
0x126f   :  { %v3970_v2 = vsel %vm323_vm1, %v9430_v54, 0.0 }
0x1270   :  { %3971 = vadd.xlane.f32.xlu0 %v3970_v2 }
0x1272   :  { %v9432_v39 = vpop.eup %9431 }
0x1273   :  { %v3973_v21 = vsel %vm323_vm1, %v9432_v39, 0.0 }
0x1274   :  { %3974 = vadd.xlane.f32.xlu1 %v3973_v21 }
0x127e   :  { %v3936_v61 = vpop.xlane.xlu1 %3935 }
0x127f   :  { %v3943_v47 = vsub.f32 %v3915_v46, %v3936_v61 }
0x1281   :  { %v3956_v45 = vmul.f32 1.442695, %v3943_v47 }
0x1283   :  { %9433 = vpow2.f32 %v3956_v45 }
0x128d   :  { %v9434_v55 = vpop.eup %9433 }
0x128e   :  { %v3976_v33 = vsel %vm323_vm1, %v9434_v55, 0.0 }
0x128f   :  { %3977 = vadd.xlane.f32.xlu0 %v3976_v33 }
0x12ed   :  { %v3960_v25 = vpop.xlane.xlu0 %3959 }
0x12ee   :  { %9435 = vrcp.f32 %v3960_v25 }
0x12f1   :  { %v3963_v15 = vpop.xlane.xlu1 %3962 }
0x12f2   :  { %9437 = vrcp.f32 %v3963_v15 }
0x12f5   :  { %v3966_v10 = vpop.xlane.xlu0 %3965 }
0x12f6   :  { %9439 = vrcp.f32 %v3966_v10 }
0x12f8   :  { %v9436_v46 = vpop.eup %9435 }
0x12f9   :  { %v3969_v41 = vpop.xlane.xlu1 %3968  ;;  %v3980_v63 = vmul.f32 %v9436_v46, %v9422_v28 }
0x12fa   :  { %9441 = vrcp.f32 %v3969_v41 }
0x12fb   :  { %v3993_v32 = vmul.f32 %v3980_v63, %v11895_v7 }
0x12fc   :  { %v9438_v42 = vpop.eup %9437 }
0x12fd   :  { %v3972_v59 = vpop.xlane.xlu0 %3971  ;;  %v4000_v26 = vsel %vm323_vm1, %v3993_v32, 0.0  ;;  %v3982_v4 = vmul.f32 %v9438_v42, %v9424_v58 }
0x12fe   :  { %9443 = vrcp.f32 %v3972_v59  ;;  %4001 = vadd.xlane.f32.xlu1 %v4000_v26 }
0x12ff   :  { %v3994_v34 = vmul.f32 %v3982_v4, %v11895_v7 }
0x1300   :  { %v9440_v60 = vpop.eup %9439 }
0x1301   :  { %v3975_v2 = vpop.xlane.xlu1 %3974  ;;  %v4003_v21 = vsel %vm323_vm1, %v3994_v34, 0.0  ;;  %v3984_v61 = vmul.f32 %v9440_v60, %v9426_v20 }
0x1302   :  { %9445 = vrcp.f32 %v3975_v2  ;;  %4004 = vadd.xlane.f32.xlu0 %v4003_v21 }
0x1303   :  { %v3995_v28 = vmul.f32 %v3984_v61, %v11895_v7 }
0x1304   :  { %v9442_v47 = vpop.eup %9441 }
0x1305   :  { %v4006_v45 = vsel %vm323_vm1, %v3995_v28, 0.0  ;;  %v3986_v33 = vmul.f32 %v9442_v47, %v9428_v23 }
0x1306   :  { %4007 = vadd.xlane.f32.xlu1 %v4006_v45 }
0x1307   :  { %v3996_v58 = vmul.f32 %v3986_v33, %v11895_v7 }
0x1308   :  { %v9444_v17 = vpop.eup %9443 }
0x1309   :  { %v4009_v19 = vsel %vm323_vm1, %v3996_v58, 0.0  ;;  %v3988_v18 = vmul.f32 %v9444_v17, %v9430_v54 }
0x130a   :  { %4010 = vadd.xlane.f32.xlu0 %v4009_v19 }
0x130b   :  { %v3997_v25 = vmul.f32 %v3988_v18, %v11895_v7 }
0x130c   :  { %v9446_v57 = vpop.eup %9445 }
0x130d   :  { %v4012_v20 = vsel %vm323_vm1, %v3997_v25, 0.0  ;;  %v3990_v15 = vmul.f32 %v9446_v57, %v9432_v39 }
0x130e   :  { %4013 = vadd.xlane.f32.xlu1 %v4012_v20 }
0x130f   :  { %v3998_v37 = vmul.f32 %v3990_v15, %v11895_v7 }
0x1311   :  { %v4015_v10 = vsel %vm323_vm1, %v3998_v37, 0.0 }
0x1312   :  { %4016 = vadd.xlane.f32.xlu0 %v4015_v10 }
0x131c   :  { %v3978_v23 = vpop.xlane.xlu0 %3977 }
0x131d   :  { %9447 = vrcp.f32 %v3978_v23 }
0x1327   :  { %v9448_v46 = vpop.eup %9447 }
0x1328   :  { %v3992_v41 = vmul.f32 %v9448_v46, %v9434_v55 }
0x132a   :  { %v3999_v63 = vmul.f32 %v3992_v41, %v11895_v7 }
0x132c   :  { %v4018_v54 = vsel %vm323_vm1, %v3999_v63, 0.0 }
0x132d   :  { %4019 = vadd.xlane.f32.xlu1 %v4018_v54 }
0x138b   :  { %v4002_v42 = vpop.xlane.xlu1 %4001 }
0x138c   :  { %v4021_v59 = vmul.f32 0.03125, %v4002_v42 }
0x138e   :  { %v11911_v26 = vsub.f32 %v3993_v32, %v4021_v59 }
0x138f   :  { %v4005_v39 = vpop.xlane.xlu0 %4004 }
0x1390   :  { %v4022_v4 = vmul.f32 0.03125, %v4005_v39  ;;  %v4035_v60 = vmul.f32 %v11911_v26, %v11911_v26  ;;  %v173_v39 = vld [vmem:[%s13075_s20 + $0x8] sm:$0xff] }
0x1392   :  { %v11915_v2 = vsub.f32 %v3994_v34, %v4022_v4  ;;  %v4042_v21 = vsel %vm323_vm1, %v4035_v60, 0.0  ;;  %v175_v60 = vld [vmem:[%s13075_s20 + $0x18] sm:$0xff] }
0x1393   :  { %4043 = vadd.xlane.f32.xlu0 %v4042_v21  ;;  %v4008_v55 = vpop.xlane.xlu1 %4007 }
0x1394   :  { %v4023_v61 = vmul.f32 0.03125, %v4008_v55  ;;  %v4036_v47 = vmul.f32 %v11915_v2, %v11915_v2 }
0x1396   :  { %v11920_v45 = vsub.f32 %v3995_v28, %v4023_v61  ;;  %v4045_v32 = vsel %vm323_vm1, %v4036_v47, 0.0 }
0x1397   :  { %v4011_v33 = vpop.xlane.xlu0 %4010  ;;  %4046 = vadd.xlane.f32.xlu1 %v4045_v32 }
0x1398   :  { %v4024_v17 = vmul.f32 0.03125, %v4011_v33  ;;  %v4037_v19 = vmul.f32 %v11920_v45, %v11920_v45 }
0x139a   :  { %v11925_v34 = vsub.f32 %v3996_v58, %v4024_v17  ;;  %v4048_v18 = vsel %vm323_vm1, %v4037_v19, 0.0  ;;  %v177_v17 = vld [vmem:[%s13076_s22] sm:$0xff]  ;;  %v178_v19 = vld [vmem:[%s13076_s22 + $0x8] sm:$0xff] }
0x139b   :  { %4049 = vadd.xlane.f32.xlu0 %v4048_v18  ;;  %v4014_v57 = vpop.xlane.xlu1 %4013  ;;  %v179_v18 = vld [vmem:[%s13076_s22 + $0x10] sm:$0xff] }
0x139c   :  { %v4025_v20 = vmul.f32 0.03125, %v4014_v57  ;;  %v4038_v15 = vmul.f32 %v11925_v34, %v11925_v34  ;;  %v180_v57 = vld [vmem:[%s13076_s22 + $0x18] sm:$0xff] }
0x139e   :  { %v11930_v28 = vsub.f32 %v3997_v25, %v4025_v20  ;;  %v4051_v10 = vsel %vm323_vm1, %v4038_v15, 0.0  ;;  %v172_v25 = vld [vmem:[%s13075_s20] sm:$0xff]  ;;  %v9013_v20 = vpack.c.bf16 %v180_v57, %v179_v18 }
0x139f   :  { %v4017_v23 = vpop.xlane.xlu0 %4016  ;;  %4052 = vadd.xlane.f32.xlu1 %v4051_v10  ;;  %v9004_v4 = vpack.c.bf16 %v173_v39, %v172_v25  ;;  %v181_v15 = vld [vmem:[%s13076_s22 + $0x20] sm:$0xff]  ;;  %v182_v10 = vld [vmem:[%s13076_s22 + $0x28] sm:$0xff] }
0x13a0   :  { %v4026_v46 = vmul.f32 0.03125, %v4017_v23  ;;  %v4039_v41 = vmul.f32 %v11930_v28, %v11930_v28  ;;  %v9016_v23 = vpack.c.bf16 %v182_v10, %v181_v15  ;;  %v7087_v18 = vld [vmem:[%s13078_s19] ss:$0 sm:$0xff] }
0x13a1   :  { %9005 = vmatpush3.bf16.msra.mxu1 %v9004_v4 }
0x13a2   :  { %v11935_v58 = vsub.f32 %v3998_v37, %v4026_v46  ;;  %v4054_v54 = vsel %vm323_vm1, %v4039_v41, 0.0  ;;  %v174_v37 = vld [vmem:[%s13075_s20 + $0x10] sm:$0xff]  ;;  %9006 = vmatprep.subr.bf16.mxu1 %v13216_v36 }
0x13a3   :  { %4055 = vadd.xlane.f32.xlu0 %v4054_v54  ;;  %v9007_v21 = vpack.c.bf16 %v175_v60, %v174_v37 }
0x13a4   :  { %v4040_v42 = vmul.f32 %v11935_v58, %v11935_v58 }
0x13a5   :  { %9008 = vmatpush3.bf16.msra.mxu1 %v9007_v21 }
0x13a6   :  { %v4057_v59 = vsel %vm323_vm1, %v4040_v42, 0.0  ;;  %9021 = vmatprep.subr.bf16.mxu1 %v13216_v36 }
0x13a7   :  { %4058 = vadd.xlane.f32.xlu1 %v4057_v59 }
0x13ba   :  { %v4020_v55 = vpop.xlane.xlu1 %4019 }
0x13bb   :  { %v4027_v61 = vmul.f32 0.03125, %v4020_v55 }
0x13bd   :  { %v11955_v47 = vsub.f32 %v3999_v63, %v4027_v61  ;;  %v9010_v63 = vpack.c.bf16 %v178_v19, %v177_v17  ;;  %v11984_v61 = vld [vmem:[%s13077_s18] ss:$0 sm:$0xff] }
0x13bf   :  { %v4041_v32 = vmul.f32 %v11955_v47, %v11955_v47  ;;  %9011 = vmatpush3.bf16.msra.mxu0 %v9010_v63 }
0x13c0   :  { %9012 = vmatprep.subr.bf16.mxu0 %v13216_v36 }
0x13c1   :  { %v4060_v33 = vsel %vm323_vm1, %v4041_v32, 0.0 }
0x13c2   :  { %4061 = vadd.xlane.f32.xlu0 %v4060_v33 }
0x13c3   :  { %9014 = vmatpush3.bf16.msra.mxu0 %v9013_v20 }
0x13c4   :  { %9015 = vmatprep.subr.bf16.mxu0 %v13216_v36 }
0x13c7   :  { %9017 = vmatpush3.bf16.msra.mxu0 %v9016_v23 }
0x13c8   :  { %9018 = vmatprep.subr.bf16.mxu0 %v13216_v36 }
0x1420   :  { %v4044_v46 = vpop.xlane.xlu0 %4043 }
0x1421   :  { %v4063_v41 = vmul.f32 0.03125, %v4044_v46 }
0x1423   :  { %v4070_v54 = vadd.f32 1e-05, %v4063_v41 }
0x1424   :  { %v4047_v42 = vpop.xlane.xlu1 %4046 }
0x1425   :  { %9449 = vrsqrt.f32 %v4070_v54  ;;  %v4064_v59 = vmul.f32 0.03125, %v4047_v42  ;;  %v13287_v42 = vld [vmem:[#allocation2_spill] sm:$0xff] }
0x1427   :  { %v4071_v25 = vadd.f32 1e-05, %v4064_v59 }
0x1428   :  { %v4050_v39 = vpop.xlane.xlu0 %4049 }
0x1429   :  { %9451 = vrsqrt.f32 %v4071_v25  ;;  %v4065_v4 = vmul.f32 0.03125, %v4050_v39 }
0x142b   :  { %v4072_v37 = vadd.f32 1e-05, %v4065_v4  ;;  %v13288_v4 = vld [vmem:[#allocation3_spill] sm:$0xff] }
0x142c   :  { %v4053_v60 = vpop.xlane.xlu1 %4052 }
0x142d   :  { %9453 = vrsqrt.f32 %v4072_v37  ;;  %v4066_v21 = vmul.f32 0.03125, %v4053_v60 }
0x142f   :  { %v9450_v55 = vpop.eup %9449  ;;  %v4073_v32 = vadd.f32 1e-05, %v4066_v21 }
0x1430   :  { %v4084_v33 = vmul.f32 %v9450_v55, %v11911_v26  ;;  %v4056_v17 = vpop.xlane.xlu0 %4055 }
0x1431   :  { %9455 = vrsqrt.f32 %v4073_v32  ;;  %v4067_v19 = vmul.f32 0.03125, %v4056_v17 }
0x1432   :  { %v4091_v63 = vmul.f32 %v11984_v61, %v4084_v33 }
0x1433   :  { %v9452_v57 = vpop.eup %9451  ;;  %v4074_v20 = vadd.f32 1e-05, %v4067_v19 }
0x1434   :  { %v4059_v15 = vpop.xlane.xlu1 %4058  ;;  %v11991_v10 = vadd.f32 %v7087_v18, %v4091_v63  ;;  %v4085_v23 = vmul.f32 %v9452_v57, %v11915_v2 }
0x1435   :  { %9457 = vrsqrt.f32 %v4074_v20  ;;  %v4068_v46 = vmul.f32 0.03125, %v4059_v15 }
0x1436   :  { %8345 = vmatmul.mubr.msk.f32.vlgmr.msra.gmra.mrb[130].mxu1 %vm323_vm1, %v11991_v10  ;;  %4467 = vst.msk [vmem:[%s13079_s26] sm:$0xff] %vm323_vm1, %v11991_v10  ;;  %v4092_v26 = vmul.f32 %v11984_v61, %v4085_v23 }
0x1437   :  { %v9454_v41 = vpop.eup %9453  ;;  %v4075_v54 = vadd.f32 1e-05, %v4068_v46  ;;  %8347 = vmatprep.mubr.msk.f32.mxu1 %vm9697_vm0, %v13217_v30  ;;  %9023 = vmatpush3.bf16.msra.mxu1 %v13287_v42 }
0x1438   :  { %v12005_v2 = vadd.f32 %v7087_v18, %v4092_v26  ;;  %v4086_v59 = vmul.f32 %v9454_v41, %v11920_v45  ;;  %9024 = vmatprep.subr.bf16.mxu1 %v13216_v36  ;;  %v7088_v41 = vld [vmem:[%s13080_s21] ss:$0 sm:$0xff] }
0x1439   :  { %9459 = vrsqrt.f32 %v4075_v54 }
0x143a   :  { %8348 = vmatmul.mubr.msk.f32.gmra.mrb[132].mxu1 %vm323_vm1, %v12005_v2  ;;  %4468 = vst.msk [vmem:[%s13079_s26 + $0x8] sm:$0xff] %vm323_vm1, %v12005_v2  ;;  %v4093_v25 = vmul.f32 %v11984_v61, %v4086_v59 }
0x143b   :  { %v9456_v39 = vpop.eup %9455  ;;  %8350 = vmatprep.mubr.msk.f32.mxu1 %vm9697_vm0, %v13217_v30  ;;  %9026 = vmatpush3.bf16.msra.mxu1 %v13288_v4 }
0x143c   :  { %v12020_v45 = vadd.f32 %v7087_v18, %v4093_v25  ;;  %v4087_v37 = vmul.f32 %v9456_v39, %v11925_v34  ;;  %9030 = vmatprep.subr.bf16.mxu1 %v13216_v36 }
0x143e   :  { %8351 = vmatmul.mubr.msk.f32.gmra.mrb[134].mxu1 %vm323_vm1, %v12020_v45  ;;  %4469 = vst.msk [vmem:[%s13079_s26 + $0x10] sm:$0xff] %vm323_vm1, %v12020_v45  ;;  %v4094_v60 = vmul.f32 %v11984_v61, %v4087_v37 }
0x143f   :  { %v9458_v21 = vpop.eup %9457  ;;  %8353 = vmatprep.mubr.msk.f32.mxu1 %vm9697_vm0, %v13217_v30 }
0x1440   :  { %v12034_v55 = vadd.f32 %v7087_v18, %v4094_v60  ;;  %v4088_v34 = vmul.f32 %v9458_v21, %v11930_v28  ;;  %v13289_v60 = vld [vmem:[#allocation24_spill] sm:$0xff] }
0x1442   :  { %8354 = vmatmul.mubr.msk.f32.gmra.mrb[136].mxu1 %vm323_vm1, %v12034_v55  ;;  %4470 = vst.msk [vmem:[%s13079_s26 + $0x18] sm:$0xff] %vm323_vm1, %v12034_v55  ;;  %v4095_v32 = vmul.f32 %v11984_v61, %v4088_v34 }
0x1443   :  { %v9460_v33 = vpop.eup %9459  ;;  %8356 = vmatprep.mubr.msk.f32.mxu1 %vm9697_vm0, %v13217_v30 }
0x1444   :  { %v12047_v17 = vadd.f32 %v7087_v18, %v4095_v32  ;;  %v4089_v19 = vmul.f32 %v9460_v33, %v11935_v58 }
0x1446   :  { %8357 = vmatmul.mubr.msk.f32.gmra.mrb[138].mxu1 %vm323_vm1, %v12047_v17  ;;  %4471 = vst.msk [vmem:[%s13079_s26 + $0x20] sm:$0xff] %vm323_vm1, %v12047_v17  ;;  %v4096_v28 = vmul.f32 %v11984_v61, %v4089_v19 }
0x1447   :  { %8359 = vmatprep.mubr.msk.f32.mxu1 %vm9697_vm0, %v13217_v30 }
0x1448   :  { %v12060_v63 = vadd.f32 %v7087_v18, %v4096_v28 }
0x144a   :  { %8360 = vmatmul.mubr.msk.f32.gmra.mrb[140].mxu1 %vm323_vm1, %v12060_v63  ;;  %4472 = vst.msk [vmem:[%s13079_s26 + $0x28] sm:$0xff] %vm323_vm1, %v12060_v63 }
0x144b   :  { %8362 = vmatprep.mubr.msk.f32.mxu1 %vm9697_vm0, %v13217_v30 }
0x144f   :  { %v4062_v58 = vpop.xlane.xlu0 %4061 }
0x1450   :  { %v4069_v57 = vmul.f32 0.03125, %v4062_v58 }
0x1452   :  { %v4076_v20 = vadd.f32 1e-05, %v4069_v57 }
0x1454   :  { %9461 = vrsqrt.f32 %v4076_v20 }
0x145e   :  { %v9462_v15 = vpop.eup %9461 }
0x145f   :  { %v4090_v23 = vmul.f32 %v9462_v15, %v11955_v47  ;;  %v183_v47 = vld [vmem:[%s13076_s22 + $0x30] sm:$0xff] }
0x1461   :  { %v4097_v46 = vmul.f32 %v11984_v61, %v4090_v23  ;;  %v184_v61 = vld [vmem:[%s13076_s22 + $0x38] sm:$0xff] }
0x1463   :  { %v12073_v26 = vadd.f32 %v7087_v18, %v4097_v46  ;;  %v9019_v18 = vpack.c.bf16 %v184_v61, %v183_v47 }
0x1465   :  { %8363 = vmatmul.mubr.msk.f32.gmra.mrb[142].mxu1 %vm323_vm1, %v12073_v26  ;;  %4473 = vst.msk [vmem:[%s13079_s26 + $0x30] sm:$0xff] %vm323_vm1, %v12073_v26  ;;  %9020 = vmatpush3.bf16.msra.mxu0 %v9019_v18 }
0x1466   :  { %8410 = vmatprep.mubr.msk.f32.mxu1 %vm9697_vm0, %v13217_v30  ;;  %9027 = vmatprep.subr.bf16.mxu0 %v13216_v36 }
0x1509   :  { %v4192_v54 = vpop.f32.mrb[130].mxu1 }
0x150a   :  { %v4193_v42 = vadd.f32 %v7088_v41, %v4192_v54  ;;  %v8346_v59 = vpop.f32.mrb[131].mxu1 }
0x150c   :  { %v4226_v25 = vmax.f32 %v4193_v42, 0.0 }
0x150d   :  { %v4197_v39 = vpop.f32.mrb[132].mxu1 }
0x150e   :  { %v4198_v4 = vadd.f32 %v7088_v41, %v4197_v39  ;;  %v8349_v37 = vpop.f32.mrb[133].mxu1  ;;  %8382 = vmatmul.mubr.msk.f32.vlgmr.msra.gmra.mrb[142].mxu0 %vm4233_vm3, %v4226_v25 }
0x150f   :  { %9029 = vmatpush3.bf16.msra.mxu0 %v13289_v60  ;;  %8384 = vmatprep.mubr.msk.f32.mxu0 %vm9697_vm0, %v13217_v30  ;;  %v7089_v37 = vld [vmem:[%s13081_s23] ss:$0 sm:$0xff] }
0x1510   :  { %v4227_v21 = vmax.f32 %v4198_v4, 0.0  ;;  %9039 = vmatprep.subr.bf16.mxu0 %v13216_v36 }
0x1511   :  { %v4202_v34 = vpop.f32.mrb[134].mxu1 }
0x1512   :  { %v4203_v32 = vadd.f32 %v7088_v41, %v4202_v34  ;;  %v8352_v33 = vpop.f32.mrb[135].mxu1  ;;  %8385 = vmatmul.mubr.msk.f32.gmra.mrb[144].mxu0 %vm4233_vm3, %v4227_v21 }
0x1513   :  { %8387 = vmatprep.mubr.msk.f32.mxu0 %vm9697_vm0, %v13217_v30 }
0x1514   :  { %v4228_v19 = vmax.f32 %v4203_v32, 0.0 }
0x1515   :  { %v4207_v28 = vpop.f32.mrb[136].mxu1 }
0x1516   :  { %v4208_v58 = vadd.f32 %v7088_v41, %v4207_v28  ;;  %v8355_v57 = vpop.f32.mrb[137].mxu1  ;;  %8388 = vmatmul.mubr.msk.f32.gmra.mrb[146].mxu0 %vm4233_vm3, %v4228_v19 }
0x1517   :  { %8390 = vmatprep.mubr.msk.f32.mxu0 %vm9697_vm0, %v13217_v30 }
0x1518   :  { %v4229_v20 = vmax.f32 %v4208_v58, 0.0 }
0x1519   :  { %v4212_v15 = vpop.f32.mrb[138].mxu1 }
0x151a   :  { %v4213_v23 = vadd.f32 %v7088_v41, %v4212_v15  ;;  %v8358_v46 = vpop.f32.mrb[139].mxu1  ;;  %8391 = vmatmul.mubr.msk.f32.gmra.mrb[148].mxu0 %vm4233_vm3, %v4229_v20 }
0x151b   :  { %8393 = vmatprep.mubr.msk.f32.mxu0 %vm9697_vm0, %v13217_v30 }
0x151c   :  { %v4230_v47 = vmax.f32 %v4213_v23, 0.0 }
0x151d   :  { %v4217_v61 = vpop.f32.mrb[140].mxu1 }
0x151e   :  { %v4218_v18 = vadd.f32 %v7088_v41, %v4217_v61  ;;  %v8361_v54 = vpop.f32.mrb[141].mxu1  ;;  %8394 = vmatmul.mubr.msk.f32.gmra.mrb[150].mxu0 %vm4233_vm3, %v4230_v47 }
0x151f   :  { %8396 = vmatprep.mubr.msk.f32.mxu0 %vm9697_vm0, %v13217_v30 }
0x1520   :  { %v4231_v42 = vmax.f32 %v4218_v18, 0.0 }
0x1522   :  { %8397 = vmatmul.mubr.msk.f32.gmra.mrb[152].mxu0 %vm4233_vm3, %v4231_v42 }
0x1523   :  { %8399 = vmatprep.mubr.msk.f32.mxu0 %vm9697_vm0, %v13217_v30 }
0x1538   :  { %v4222_v59 = vpop.f32.mrb[142].mxu1 }
0x1539   :  { %v4223_v25 = vadd.f32 %v7088_v41, %v4222_v59  ;;  %v8364_v39 = vpop.f32.mrb[143].mxu1 }
0x153b   :  { %v4232_v4 = vmax.f32 %v4223_v25, 0.0 }
0x153d   :  { %8400 = vmatmul.mubr.msk.f32.gmra.mrb[154].mxu0 %vm4233_vm3, %v4232_v4 }
0x153e   :  { %8435 = vmatprep.mubr.msk.f32.mxu0 %vm9697_vm0, %v13217_v30 }
0x15e1   :  { %v4321_v60 = vpop.f32.mrb[142].mxu0 }
0x15e2   :  { %v4322_v21 = vadd.f32 %v7089_v37, %v4321_v60  ;;  %v8383_v34 = vpop.f32.mrb[143].mxu0 }
0x15e4   :  { %v4355_v32 = vadd.f32 %v4322_v21, %v11991_v10 }
0x15e5   :  { %v4326_v33 = vpop.f32.mrb[144].mxu0 }
0x15e6   :  { %v4327_v19 = vadd.f32 %v7089_v37, %v4326_v33  ;;  %v8386_v28 = vpop.f32.mrb[145].mxu0  ;;  %v4362_v41 = vsel %vm323_vm1, %v4355_v32, 0.0 }
0x15e7   :  { %4363 = vadd.xlane.f32.xlu1 %v4362_v41 }
0x15e8   :  { %v4356_v58 = vadd.f32 %v4327_v19, %v12005_v2 }
0x15e9   :  { %v4331_v57 = vpop.f32.mrb[146].mxu0 }
0x15ea   :  { %v4332_v20 = vadd.f32 %v7089_v37, %v4331_v57  ;;  %v8389_v15 = vpop.f32.mrb[147].mxu0  ;;  %v4365_v23 = vsel %vm323_vm1, %v4356_v58, 0.0 }
0x15eb   :  { %4366 = vadd.xlane.f32.xlu0 %v4365_v23 }
0x15ec   :  { %v4357_v46 = vadd.f32 %v4332_v20, %v12020_v45 }
0x15ed   :  { %v4336_v47 = vpop.f32.mrb[148].mxu0 }
0x15ee   :  { %v4337_v61 = vadd.f32 %v7089_v37, %v4336_v47  ;;  %v8392_v18 = vpop.f32.mrb[149].mxu0  ;;  %v4368_v10 = vsel %vm323_vm1, %v4357_v46, 0.0 }
0x15ef   :  { %4369 = vadd.xlane.f32.xlu1 %v4368_v10 }
0x15f0   :  { %v4358_v54 = vadd.f32 %v4337_v61, %v12034_v55 }
0x15f1   :  { %v4341_v42 = vpop.f32.mrb[150].mxu0 }
0x15f2   :  { %v4342_v59 = vadd.f32 %v7089_v37, %v4341_v42  ;;  %v8395_v25 = vpop.f32.mrb[151].mxu0  ;;  %v4371_v2 = vsel %vm323_vm1, %v4358_v54, 0.0 }
0x15f3   :  { %4372 = vadd.xlane.f32.xlu0 %v4371_v2 }
0x15f4   :  { %v4359_v39 = vadd.f32 %v4342_v59, %v12047_v17 }
0x15f5   :  { %v4346_v4 = vpop.f32.mrb[152].mxu0 }
0x15f6   :  { %v4347_v60 = vadd.f32 %v7089_v37, %v4346_v4  ;;  %v8398_v21 = vpop.f32.mrb[153].mxu0  ;;  %v4374_v45 = vsel %vm323_vm1, %v4359_v39, 0.0 }
0x15f7   :  { %4375 = vadd.xlane.f32.xlu1 %v4374_v45 }
0x15f8   :  { %v4360_v34 = vadd.f32 %v4347_v60, %v12060_v63 }
0x15fa   :  { %v4377_v33 = vsel %vm323_vm1, %v4360_v34, 0.0 }
0x15fb   :  { %4378 = vadd.xlane.f32.xlu0 %v4377_v33 }
0x1610   :  { %v4351_v55 = vpop.f32.mrb[154].mxu0 }
0x1611   :  { %v4352_v19 = vadd.f32 %v7089_v37, %v4351_v55  ;;  %v8401_v28 = vpop.f32.mrb[155].mxu0 }
0x1613   :  { %v4361_v41 = vadd.f32 %v4352_v19, %v12073_v26 }
0x1615   :  { %v4380_v57 = vsel %vm323_vm1, %v4361_v41, 0.0 }
0x1616   :  { %4381 = vadd.xlane.f32.xlu1 %v4380_v57 }
0x1674   :  { %v4364_v17 = vpop.xlane.xlu1 %4363 }
0x1675   :  { %v4383_v20 = vmul.f32 0.03125, %v4364_v17 }
0x1677   :  { %v4390_v15 = vsub.f32 %v4355_v32, %v4383_v20 }
0x1678   :  { %v4367_v23 = vpop.xlane.xlu0 %4366 }
0x1679   :  { %v4384_v47 = vmul.f32 0.03125, %v4367_v23  ;;  %v4397_v61 = vmul.f32 %v4390_v15, %v4390_v15 }
0x167b   :  { %v12134_v18 = vsub.f32 %v4356_v58, %v4384_v47  ;;  %v4404_v63 = vsel %vm323_vm1, %v4397_v61, 0.0 }
0x167c   :  { %4405 = vadd.xlane.f32.xlu0 %v4404_v63  ;;  %v4370_v10 = vpop.xlane.xlu1 %4369 }
0x167d   :  { %v4385_v42 = vmul.f32 0.03125, %v4370_v10  ;;  %v4398_v37 = vmul.f32 %v12134_v18, %v12134_v18 }
0x167f   :  { %v12139_v26 = vsub.f32 %v4357_v46, %v4385_v42  ;;  %v4407_v59 = vsel %vm323_vm1, %v4398_v37, 0.0 }
0x1680   :  { %v4373_v25 = vpop.xlane.xlu0 %4372  ;;  %4408 = vadd.xlane.f32.xlu1 %v4407_v59 }
0x1681   :  { %v4386_v32 = vmul.f32 0.03125, %v4373_v25  ;;  %v4399_v2 = vmul.f32 %v12139_v26, %v12139_v26 }
0x1683   :  { %v12144_v58 = vsub.f32 %v4358_v54, %v4386_v32  ;;  %v4410_v4 = vsel %vm323_vm1, %v4399_v2, 0.0 }
0x1684   :  { %4411 = vadd.xlane.f32.xlu0 %v4410_v4  ;;  %v4376_v60 = vpop.xlane.xlu1 %4375 }
0x1685   :  { %v4387_v21 = vmul.f32 0.03125, %v4376_v60  ;;  %v4400_v45 = vmul.f32 %v12144_v58, %v12144_v58 }
0x1687   :  { %v12149_v46 = vsub.f32 %v4359_v39, %v4387_v21  ;;  %v4413_v33 = vsel %vm323_vm1, %v4400_v45, 0.0  ;;  %v9676_v21 = vld [vmem:[%s13070_s24] sm:$0x7] }
0x1688   :  { %v4379_v55 = vpop.xlane.xlu0 %4378  ;;  %4414 = vadd.xlane.f32.xlu1 %v4413_v33  ;;  %v12169_v45 = vrot.slane %v9676_v21, %v10392_v0  ;;  %v9680_v21 = vld [vmem:[%s13192_s27 + $0x10] sm:$0xff] }
0x1689   :  { %v4388_v19 = vmul.f32 0.03125, %v4379_v55  ;;  %v4401_v28 = vmul.f32 %v12149_v46, %v12149_v46 }
0x168b   :  { %v12154_v54 = vsub.f32 %v4360_v34, %v4388_v19  ;;  %v4416_v57 = vsel %vm323_vm1, %v4401_v28, 0.0  ;;  %v9677_v19 = vld [vmem:[%s13071_s25] sm:$0x7] }
0x168c   :  { %4417 = vadd.xlane.f32.xlu0 %v4416_v57  ;;  %v12175_v28 = vrot.slane %v9677_v19, %v10392_v0  ;;  %v9678_v0 = vld [vmem:[%s13192_s27] sm:$0xff] }
0x168d   :  { %v4402_v17 = vmul.f32 %v12154_v54, %v12154_v54 }
0x168f   :  { %v4419_v20 = vsel %vm323_vm1, %v4402_v17, 0.0 }
0x1690   :  { %4420 = vadd.xlane.f32.xlu1 %v4419_v20 }
0x16a3   :  { %v4382_v39 = vpop.xlane.xlu1 %4381 }
0x16a4   :  { %v4389_v23 = vmul.f32 0.03125, %v4382_v39 }
0x16a6   :  { %v12160_v47 = vsub.f32 %v4361_v41, %v4389_v23 }
0x16a8   :  { %v4403_v61 = vmul.f32 %v12160_v47, %v12160_v47 }
0x16aa   :  { %v4422_v63 = vsel %vm323_vm1, %v4403_v61, 0.0 }
0x16ab   :  { %4423 = vadd.xlane.f32.xlu0 %v4422_v63 }
0x1709   :  { %v4406_v34 = vpop.xlane.xlu0 %4405 }
0x170a   :  { %v4425_v10 = vmul.f32 0.03125, %v4406_v34 }
0x170c   :  { %v4432_v42 = vadd.f32 1e-05, %v4425_v10 }
0x170d   :  { %v4409_v37 = vpop.xlane.xlu1 %4408 }
0x170e   :  { %9463 = vrsqrt.f32 %v4432_v42  ;;  %v4426_v59 = vmul.f32 0.03125, %v4409_v37 }
0x1710   :  { %v4433_v25 = vadd.f32 1e-05, %v4426_v59 }
0x1711   :  { %v4412_v32 = vpop.xlane.xlu0 %4411 }
0x1712   :  { %9465 = vrsqrt.f32 %v4433_v25  ;;  %v4427_v2 = vmul.f32 0.03125, %v4412_v32 }
0x1714   :  { %v4434_v4 = vadd.f32 1e-05, %v4427_v2 }
0x1715   :  { %v4415_v60 = vpop.xlane.xlu1 %4414 }
0x1716   :  { %9467 = vrsqrt.f32 %v4434_v4  ;;  %v4428_v41 = vmul.f32 0.03125, %v4415_v60 }
0x1718   :  { %v9464_v33 = vpop.eup %9463  ;;  %v4435_v55 = vadd.f32 1e-05, %v4428_v41 }
0x1719   :  { %v4446_v57 = vmul.f32 %v9464_v33, %v4390_v15  ;;  %v4418_v17 = vpop.xlane.xlu0 %4417 }
0x171a   :  { %9469 = vrsqrt.f32 %v4435_v55  ;;  %v4429_v20 = vmul.f32 0.03125, %v4418_v17 }
0x171b   :  { %v4453_v39 = vmul.f32 %v4446_v57, %v12169_v45  ;;  %v9681_v57 = vld [vmem:[%s13192_s27 + $0x18] sm:$0xff] }
0x171c   :  { %v9466_v23 = vpop.eup %9465  ;;  %v4436_v61 = vadd.f32 1e-05, %v4429_v20 }
0x171d   :  { %v12179_v63 = vadd.f32 %v4453_v39, %v12175_v28  ;;  %v4421_v34 = vpop.xlane.xlu1 %4420  ;;  %v4447_v10 = vmul.f32 %v9466_v23, %v12134_v18  ;;  %v9679_v18 = vld [vmem:[%s13192_s27 + $0x8] sm:$0xff]  ;;  %v9682_v23 = vld [vmem:[%s13192_s27 + $0x20] sm:$0xff] }
0x171e   :  { %9471 = vrsqrt.f32 %v4436_v61  ;;  %v4430_v42 = vmul.f32 0.03125, %v4421_v34 }
0x171f   :  { %v4474_v15 = vadd.f32 %v9678_v0, %v12179_v63  ;;  %v4454_v37 = vmul.f32 %v4447_v10, %v12169_v45 }
0x1720   :  { %v9468_v59 = vpop.eup %9467  ;;  %v4437_v25 = vadd.f32 1e-05, %v4430_v42 }
0x1721   :  { %8411 = vmatmul.mubr.msk.f32.vlgmr.msra.gmra.mrb[144].mxu1 %vm323_vm1, %v4474_v15  ;;  %v12189_v32 = vadd.f32 %v4454_v37, %v12175_v28  ;;  %v4448_v2 = vmul.f32 %v9468_v59, %v12139_v26 }
0x1722   :  { %9473 = vrsqrt.f32 %v4437_v25  ;;  %9032 = vmatpush3.bf16.msra.mxu1 %v10806_v40  ;;  %8413 = vmatprep.mubr.msk.f32.mxu1 %vm9697_vm0, %v13217_v30 }
0x1723   :  { %9033 = vmatprep.subr.bf16.mxu1 %v13216_v36  ;;  %v4475_v4 = vadd.f32 %v9679_v18, %v12189_v32  ;;  %v4455_v60 = vmul.f32 %v4448_v2, %v12169_v45  ;;  %v9684_v18 = vld [vmem:[%s13192_s27 + $0x30] sm:$0xff] }
0x1724   :  { %v9470_v41 = vpop.eup %9469 }
0x1725   :  { %8414 = vmatmul.mubr.msk.f32.gmra.mrb[146].mxu1 %vm323_vm1, %v4475_v4  ;;  %v12203_v26 = vadd.f32 %v4455_v60, %v12175_v28  ;;  %v4449_v40 = vmul.f32 %v9470_v41, %v12144_v58 }
0x1726   :  { %9035 = vmatpush3.bf16.msra.mxu1 %v10814_v24  ;;  %8416 = vmatprep.mubr.msk.f32.mxu1 %vm9697_vm0, %v13217_v30 }
0x1727   :  { %9036 = vmatprep.subr.bf16.mxu1 %v13216_v36  ;;  %v4476_v33 = vadd.f32 %v9680_v21, %v12203_v26  ;;  %v4456_v55 = vmul.f32 %v4449_v40, %v12169_v45 }
0x1728   :  { %v9472_v19 = vpop.eup %9471 }
0x1729   :  { %8417 = vmatmul.mubr.msk.f32.gmra.mrb[148].mxu1 %vm323_vm1, %v4476_v33  ;;  %v12217_v58 = vadd.f32 %v4456_v55, %v12175_v28  ;;  %v4450_v24 = vmul.f32 %v9472_v19, %v12149_v46 }
0x172a   :  { %9038 = vmatpush3.bf16.msra.mxu1 %v10856_v29  ;;  %8419 = vmatprep.mubr.msk.f32.mxu1 %vm9697_vm0, %v13217_v30 }
0x172b   :  { %8468 = vmatprep.subr.mxu1 %v13217_v30  ;;  %v4477_v17 = vadd.f32 %v9681_v57, %v12217_v58  ;;  %v4457_v20 = vmul.f32 %v4450_v24, %v12169_v45 }
0x172c   :  { %v9474_v39 = vpop.eup %9473 }
0x172d   :  { %8420 = vmatmul.mubr.msk.f32.gmra.mrb[150].mxu1 %vm323_vm1, %v4477_v17  ;;  %v12231_v46 = vadd.f32 %v4457_v20, %v12175_v28  ;;  %v4451_v29 = vmul.f32 %v9474_v39, %v12154_v54 }
0x172e   :  { %8469 = vmatpush3.msra.mxu1 %v10861_v44  ;;  %8422 = vmatprep.mubr.msk.f32.mxu1 %vm9697_vm0, %v13217_v30  ;;  %v9683_v44 = vld [vmem:[%s13192_s27 + $0x28] sm:$0xff] }
0x172f   :  { %v4478_v61 = vadd.f32 %v9682_v23, %v12231_v46  ;;  %v4458_v34 = vmul.f32 %v4451_v29, %v12169_v45  ;;  %9042 = vmatprep.subr.bf16.mxu1 %v13216_v36 }
0x1731   :  { %8423 = vmatmul.mubr.msk.f32.gmra.mrb[152].mxu1 %vm323_vm1, %v4478_v61  ;;  %v12245_v10 = vadd.f32 %v4458_v34, %v12175_v28 }
0x1732   :  { %8425 = vmatprep.mubr.msk.f32.mxu1 %vm9697_vm0, %v13217_v30 }
0x1733   :  { %v4479_v54 = vadd.f32 %v9683_v44, %v12245_v10 }
0x1735   :  { %8426 = vmatmul.mubr.msk.f32.gmra.mrb[154].mxu1 %vm323_vm1, %v4479_v54 }
0x1736   :  { %8428 = vmatprep.mubr.msk.f32.mxu1 %vm9697_vm0, %v13217_v30 }
0x1738   :  { %v4424_v42 = vpop.xlane.xlu0 %4423 }
0x1739   :  { %v4431_v0 = vmul.f32 0.03125, %v4424_v42 }
0x173b   :  { %v4438_v15 = vadd.f32 1e-05, %v4431_v0 }
0x173d   :  { %9475 = vrsqrt.f32 %v4438_v15 }
0x1747   :  { %v9476_v37 = vpop.eup %9475 }
0x1748   :  { %v4452_v59 = vmul.f32 %v9476_v37, %v12160_v47 }
0x174a   :  { %v4459_v25 = vmul.f32 %v4452_v59, %v12169_v45 }
0x174c   :  { %v12259_v2 = vadd.f32 %v4459_v25, %v12175_v28 }
0x174e   :  { %v4480_v4 = vadd.f32 %v9684_v18, %v12259_v2 }
0x1750   :  { %8429 = vmatmul.mubr.msk.f32.gmra.mrb[156].mxu1 %vm323_vm1, %v4480_v4  ;;  %v13290_v4 = vld [vmem:[#allocation6_spill] sm:$0xff] }
0x1751   :  { %8470 = vmatprep.mubr.msk.f32.mxu1 %vm9697_vm0, %v13217_v30 }
0x17f4   :  { %v4568_v60 = vpop.f32.mrb[144].mxu1 }
0x17f5   :  { %v4569_v41 = vadd.f32 %v4568_v60, %v10536_v16  ;;  %v8412_v47 = vpop.f32.mrb[145].mxu1 }
0x17f7   :  { %v12269_v40 = vmul.f32 0.25, %v4569_v41 }
0x17f8   :  { %v4573_v45 = vpop.f32.mrb[146].mxu1 }
0x17f9   :  { %v4574_v28 = vadd.f32 %v4573_v45, %v10536_v16  ;;  %v8415_v21 = vpop.f32.mrb[147].mxu1  ;;  %8436 = vmatmul.mubr.msk.f32.vlgmr.msra.gmra.mrb[156].mxu0 %vm1533_vm2, %v12269_v40 }
0x17fa   :  { %8438 = vmatprep.mubr.msk.f32.mxu0 %vm9697_vm0, %v13217_v30  ;;  %9041 = vmatpush3.bf16.msra.mxu0 %v10852_v5 }
0x17fb   :  { %v12277_v33 = vmul.f32 0.25, %v4574_v28  ;;  %9045 = vmatprep.subr.bf16.mxu0 %v13216_v36  ;;  %v13291_v28 = vld [vmem:[#allocation25_spill] sm:$0xff] }
0x17fc   :  { %v4578_v55 = vpop.f32.mrb[148].mxu1 }
0x17fd   :  { %v4579_v19 = vadd.f32 %v4578_v55, %v10536_v16  ;;  %v8418_v24 = vpop.f32.mrb[149].mxu1  ;;  %8439 = vmatmul.mubr.msk.f32.gmra.mrb[158].mxu0 %vm1533_vm2, %v12277_v33 }
0x17fe   :  { %8441 = vmatprep.mubr.msk.f32.mxu0 %vm9697_vm0, %v13217_v30  ;;  %v13292_v24 = vld [vmem:[#allocation26_spill] sm:$0xff] }
0x17ff   :  { %v12285_v57 = vmul.f32 0.25, %v4579_v19 }
0x1800   :  { %v4583_v17 = vpop.f32.mrb[150].mxu1 }
0x1801   :  { %v4584_v20 = vadd.f32 %v4583_v17, %v10536_v16  ;;  %v8421_v5 = vpop.f32.mrb[151].mxu1  ;;  %8442 = vmatmul.mubr.msk.f32.gmra.mrb[160].mxu0 %vm1533_vm2, %v12285_v57 }
0x1802   :  { %8444 = vmatprep.mubr.msk.f32.mxu0 %vm9697_vm0, %v13217_v30 }
0x1803   :  { %v12292_v39 = vmul.f32 0.25, %v4584_v20 }
0x1804   :  { %v4588_v29 = vpop.f32.mrb[152].mxu1 }
0x1805   :  { %v4589_v23 = vadd.f32 %v4588_v29, %v10536_v16  ;;  %v8424_v61 = vpop.f32.mrb[153].mxu1  ;;  %8445 = vmatmul.mubr.msk.f32.gmra.mrb[162].mxu0 %vm1533_vm2, %v12292_v39 }
0x1806   :  { %8447 = vmatprep.mubr.msk.f32.mxu0 %vm9697_vm0, %v13217_v30 }
0x1807   :  { %v12299_v34 = vmul.f32 0.25, %v4589_v23  ;;  %v13293_v23 = vld [vmem:[#allocation27_spill] sm:$0xff] }
0x1808   :  { %v4593_v44 = vpop.f32.mrb[154].mxu1 }
0x1809   :  { %v4594_v54 = vadd.f32 %v4593_v44, %v10536_v16  ;;  %v8427_v42 = vpop.f32.mrb[155].mxu1  ;;  %8448 = vmatmul.mubr.msk.f32.gmra.mrb[164].mxu0 %vm1533_vm2, %v12299_v34 }
0x180a   :  { %8450 = vmatprep.mubr.msk.f32.mxu0 %vm9697_vm0, %v13217_v30 }
0x180b   :  { %v12306_v0 = vmul.f32 0.25, %v4594_v54 }
0x180d   :  { %8451 = vmatmul.mubr.msk.f32.gmra.mrb[166].mxu0 %vm1533_vm2, %v12306_v0 }
0x180e   :  { %8453 = vmatprep.mubr.msk.f32.mxu0 %vm9697_vm0, %v13217_v30 }
0x1823   :  { %v4598_v15 = vpop.f32.mrb[156].mxu1 }
0x1824   :  { %v4599_v37 = vadd.f32 %v4598_v15, %v10536_v16  ;;  %v8430_v59 = vpop.f32.mrb[157].mxu1  ;;  %v13294_v15 = vld [vmem:[#allocation28_spill] sm:$0xff] }
0x1826   :  { %v12313_v25 = vmul.f32 0.25, %v4599_v37 }
0x1828   :  { %8454 = vmatmul.mubr.msk.f32.gmra.mrb[168].mxu0 %vm1533_vm2, %v12313_v25 }
0x1829   :  { %8495 = vmatprep.mubr.msk.f32.mxu0 %vm9697_vm0, %v13217_v30 }
0x18cc   :  { %v4696_v18 = vpop.f32.mrb[156].mxu0 }
0x18cd   :  { %v4697_v60 = vadd.f32 %v4696_v18, %v13290_v4  ;;  %v8437_v41 = vpop.f32.mrb[157].mxu0 }
0x18cf   :  { %v4730_v47 = vsel %vm1655_vm8, %v4697_v60, -inf }
0x18d0   :  { %4731 = vmax.xlane.f32.xlu1 %v4730_v47  ;;  %v4701_v45 = vpop.f32.mrb[158].mxu0  ;;  %v13295_v47 = vld [vmem:[#allocation29_spill] sm:$0xff] }
0x18d1   :  { %v4702_v21 = vadd.f32 %v4701_v45, %v13291_v28  ;;  %v8440_v16 = vpop.f32.mrb[159].mxu0 }
0x18d3   :  { %v4733_v55 = vsel %vm1655_vm8, %v4702_v21, -inf }
0x18d4   :  { %4734 = vmax.xlane.f32.xlu0 %v4733_v55  ;;  %v4706_v19 = vpop.f32.mrb[160].mxu0 }
0x18d5   :  { %v4707_v17 = vadd.f32 %v4706_v19, %v13292_v24  ;;  %v8443_v20 = vpop.f32.mrb[161].mxu0 }
0x18d6   :  { %v13296_v20 = vld [vmem:[#allocation30_spill] sm:$0xff] }
0x18d7   :  { %v4736_v5 = vsel %vm1655_vm8, %v4707_v17, -inf }
0x18d8   :  { %4737 = vmax.xlane.f32.xlu1 %v4736_v5  ;;  %v4711_v29 = vpop.f32.mrb[162].mxu0 }
0x18d9   :  { %v4712_v61 = vadd.f32 %v4711_v29, %v13293_v23  ;;  %v8446_v44 = vpop.f32.mrb[163].mxu0 }
0x18db   :  { %v4739_v54 = vsel %vm1655_vm8, %v4712_v61, -inf }
0x18dc   :  { %4740 = vmax.xlane.f32.xlu0 %v4739_v54  ;;  %v4716_v42 = vpop.f32.mrb[164].mxu0 }
0x18dd   :  { %v4717_v37 = vadd.f32 %v4716_v42, %v13294_v15  ;;  %v8449_v59 = vpop.f32.mrb[165].mxu0 }
0x18df   :  { %v4742_v18 = vsel %vm1655_vm8, %v4717_v37, -inf }
0x18e0   :  { %4743 = vmax.xlane.f32.xlu1 %v4742_v18  ;;  %v4721_v41 = vpop.f32.mrb[166].mxu0 }
0x18e1   :  { %v4722_v45 = vadd.f32 %v4721_v41, %v13295_v47  ;;  %v8452_v16 = vpop.f32.mrb[167].mxu0 }
0x18e3   :  { %v4745_v55 = vsel %vm1655_vm8, %v4722_v45, -inf }
0x18e4   :  { %4746 = vmax.xlane.f32.xlu0 %v4745_v55 }
0x18fb   :  { %v4726_v19 = vpop.f32.mrb[168].mxu0 }
0x18fc   :  { %v4727_v5 = vadd.f32 %v4726_v19, %v13296_v20  ;;  %v8455_v29 = vpop.f32.mrb[169].mxu0 }
0x18fe   :  { %v4748_v44 = vsel %vm1655_vm8, %v4727_v5, -inf }
0x18ff   :  { %4749 = vmax.xlane.f32.xlu1 %v4748_v44 }
0x195d   :  { %v4732_v54 = vpop.xlane.xlu1 %4731 }
0x195e   :  { %v4751_v42 = vsub.f32 %v4697_v60, %v4732_v54 }
0x1960   :  { %v4758_v59 = vmul.f32 1.442695, %v4751_v42 }
0x1961   :  { %v4735_v7 = vpop.xlane.xlu0 %4734 }
0x1962   :  { %9477 = vpow2.f32 %v4758_v59  ;;  %v4752_v18 = vsub.f32 %v4702_v21, %v4735_v7 }
0x1964   :  { %v4760_v49 = vmul.f32 1.442695, %v4752_v18 }
0x1965   :  { %v4738_v53 = vpop.xlane.xlu1 %4737 }
0x1966   :  { %9479 = vpow2.f32 %v4760_v49  ;;  %v4753_v41 = vsub.f32 %v4707_v17, %v4738_v53 }
0x1968   :  { %v4762_v16 = vmul.f32 1.442695, %v4753_v41 }
0x1969   :  { %v4741_v3 = vpop.xlane.xlu0 %4740 }
0x196a   :  { %9481 = vpow2.f32 %v4762_v16  ;;  %v4754_v55 = vsub.f32 %v4712_v61, %v4741_v3 }
0x196c   :  { %v9478_v38 = vpop.eup %9477  ;;  %v4764_v19 = vmul.f32 1.442695, %v4754_v55 }
0x196d   :  { %v4744_v29 = vpop.xlane.xlu1 %4743  ;;  %v4772_v12 = vsel %vm1655_vm8, %v9478_v38, 0.0 }
0x196e   :  { %9483 = vpow2.f32 %v4764_v19  ;;  %v4755_v44 = vsub.f32 %v4717_v37, %v4744_v29  ;;  %4773 = vadd.xlane.f32.xlu0 %v4772_v12 }
0x1970   :  { %v9480_v60 = vpop.eup %9479  ;;  %v4766_v54 = vmul.f32 1.442695, %v4755_v44 }
0x1971   :  { %v4747_v42 = vpop.xlane.xlu0 %4746  ;;  %v4775_v7 = vsel %vm1655_vm8, %v9480_v60, 0.0 }
0x1972   :  { %9485 = vpow2.f32 %v4766_v54  ;;  %v4756_v49 = vsub.f32 %v4722_v45, %v4747_v42  ;;  %4776 = vadd.xlane.f32.xlu1 %v4775_v7 }
0x1974   :  { %v9482_v53 = vpop.eup %9481  ;;  %v4768_v21 = vmul.f32 1.442695, %v4756_v49 }
0x1975   :  { %v4778_v3 = vsel %vm1655_vm8, %v9482_v53, 0.0 }
0x1976   :  { %9487 = vpow2.f32 %v4768_v21  ;;  %4779 = vadd.xlane.f32.xlu0 %v4778_v3 }
0x1978   :  { %v9484_v17 = vpop.eup %9483 }
0x1979   :  { %v4781_v61 = vsel %vm1655_vm8, %v9484_v17, 0.0 }
0x197a   :  { %4782 = vadd.xlane.f32.xlu1 %v4781_v61 }
0x197c   :  { %v9486_v37 = vpop.eup %9485 }
0x197d   :  { %v4784_v12 = vsel %vm1655_vm8, %v9486_v37, 0.0 }
0x197e   :  { %4785 = vadd.xlane.f32.xlu0 %v4784_v12 }
0x1980   :  { %v9488_v59 = vpop.eup %9487 }
0x1981   :  { %v4787_v18 = vsel %vm1655_vm8, %v9488_v59, 0.0 }
0x1982   :  { %4788 = vadd.xlane.f32.xlu1 %v4787_v18 }
0x198c   :  { %v4750_v45 = vpop.xlane.xlu1 %4749 }
0x198d   :  { %v4757_v41 = vsub.f32 %v4727_v5, %v4750_v45 }
0x198f   :  { %v4770_v16 = vmul.f32 1.442695, %v4757_v41 }
0x1991   :  { %9489 = vpow2.f32 %v4770_v16 }
0x1993   :  { %5056 = vrot.lane.b32.xlu1 %v12269_v40, %s9702_s3 }
0x1997   :  { %5060 = vrot.lane.b32.xlu1 %v12285_v57, %s9702_s3 }
0x199b   :  { %v9490_v55 = vpop.eup %9489  ;;  %5062 = vrot.lane.b32.xlu1 %v12292_v39, %s9702_s3 }
0x199c   :  { %v4790_v19 = vsel %vm1655_vm8, %v9490_v55, 0.0 }
0x199d   :  { %4791 = vadd.xlane.f32.xlu0 %v4790_v19 }
0x199f   :  { %5066 = vrot.lane.b32.xlu1 %v12306_v0, %s9702_s3 }
0x19b3   :  { %5058 = vrot.lane.b32.xlu0 %v12277_v33, %s9702_s3  ;;  %v13297_v33 = vld [vmem:[#allocation9_spill] sm:$0xff] }
0x19b7   :  { %5064 = vrot.lane.b32.xlu0 %v12299_v34, %s9702_s3 }
0x19bb   :  { %5068 = vrot.lane.b32.xlu0 %v12313_v25, %s9702_s3 }
0x19fb   :  { %v4774_v40 = vpop.xlane.xlu0 %4773 }
0x19fc   :  { %9491 = vrcp.f32 %v4774_v40 }
0x19ff   :  { %v4777_v57 = vpop.xlane.xlu1 %4776 }
0x1a00   :  { %9493 = vrcp.f32 %v4777_v57 }
0x1a03   :  { %v4780_v39 = vpop.xlane.xlu0 %4779 }
0x1a04   :  { %9495 = vrcp.f32 %v4780_v39  ;;  %v13299_v39 = vld [vmem:[#allocation31_spill] sm:$0xff] }
0x1a06   :  { %v9492_v5 = vpop.eup %9491 }
0x1a07   :  { %v4794_v29 = vmul.f32 %v9492_v5, %v9478_v38  ;;  %v4783_v44 = vpop.xlane.xlu1 %4782 }
0x1a08   :  { %9497 = vrcp.f32 %v4783_v44  ;;  %v13300_v44 = vld [vmem:[#allocation32_spill] sm:$0xff] }
0x1a09   :  { %8471 = vmatmul.mubr.msk.f32.vlgmr.msra.gmra.mrb[158].mxu1 %vm1655_vm8, %v4794_v29 }
0x1a0a   :  { %v9494_v0 = vpop.eup %9493  ;;  %9044 = vmatpush3.bf16.msra.mxu1 %v13297_v33  ;;  %8473 = vmatprep.mubr.msk.f32.mxu1 %vm9697_vm0, %v13217_v30 }
0x1a0b   :  { %v4786_v34 = vpop.xlane.xlu0 %4785  ;;  %v4796_v25 = vmul.f32 %v9494_v0, %v9480_v60  ;;  %9054 = vmatprep.subr.bf16.mxu1 %v13216_v36 }
0x1a0c   :  { %9499 = vrcp.f32 %v4786_v34  ;;  %v13301_v34 = vld [vmem:[#allocation34_spill] sm:$0xff] }
0x1a0d   :  { %8474 = vmatmul.mubr.msk.f32.gmra.mrb[160].mxu1 %vm1655_vm8, %v4796_v25 }
0x1a0e   :  { %v9496_v54 = vpop.eup %9495  ;;  %8476 = vmatprep.mubr.msk.f32.mxu1 %vm9697_vm0, %v13217_v30 }
0x1a0f   :  { %v4789_v38 = vpop.xlane.xlu1 %4788  ;;  %v4798_v42 = vmul.f32 %v9496_v54, %v9482_v53 }
0x1a10   :  { %9501 = vrcp.f32 %v4789_v38  ;;  %v13302_v38 = vld [vmem:[#allocation35_spill] sm:$0xff] }
0x1a11   :  { %8477 = vmatmul.mubr.msk.f32.gmra.mrb[162].mxu1 %vm1655_vm8, %v4798_v42 }
0x1a12   :  { %v9498_v7 = vpop.eup %9497  ;;  %8479 = vmatprep.mubr.msk.f32.mxu1 %vm9697_vm0, %v13217_v30 }
0x1a13   :  { %v4800_v49 = vmul.f32 %v9498_v7, %v9484_v17 }
0x1a15   :  { %8480 = vmatmul.mubr.msk.f32.gmra.mrb[164].mxu1 %vm1655_vm8, %v4800_v49 }
0x1a16   :  { %v9500_v60 = vpop.eup %9499  ;;  %8482 = vmatprep.mubr.msk.f32.mxu1 %vm9697_vm0, %v13217_v30 }
0x1a17   :  { %v4802_v21 = vmul.f32 %v9500_v60, %v9486_v37  ;;  %v5057_v37 = vpop.permute.xlu1 %5056 }
0x1a19   :  { %8483 = vmatmul.mubr.msk.f32.gmra.mrb[166].mxu1 %vm1655_vm8, %v4802_v21 }
0x1a1a   :  { %v9502_v3 = vpop.eup %9501  ;;  %8485 = vmatprep.mubr.msk.f32.mxu1 %vm9697_vm0, %v13217_v30 }
0x1a1b   :  { %v4804_v53 = vmul.f32 %v9502_v3, %v9488_v59  ;;  %v13298_v59 = vld [vmem:[#allocation33_spill] sm:$0xff]  ;;  %v5061_v45 = vpop.permute.xlu1 %5060 }
0x1a1d   :  { %8486 = vmatmul.mubr.msk.f32.gmra.mrb[168].mxu1 %vm1655_vm8, %v4804_v53 }
0x1a1e   :  { %8488 = vmatprep.mubr.msk.f32.mxu1 %vm9697_vm0, %v13217_v30 }
0x1a1f   :  { %v5063_v41 = vpop.permute.xlu1 %5062 }
0x1a2a   :  { %v4792_v17 = vpop.xlane.xlu0 %4791 }
0x1a2b   :  { %9503 = vrcp.f32 %v4792_v17 }
0x1a2e   :  { %v5059_v18 = vpop.permute.xlu0 %5058 }
0x1a32   :  { %v5065_v16 = vpop.permute.xlu0 %5064 }
0x1a35   :  { %v9504_v61 = vpop.eup %9503 }
0x1a36   :  { %v4806_v12 = vmul.f32 %v9504_v61, %v9490_v55  ;;  %v5067_v55 = vpop.permute.xlu1 %5066  ;;  %v5069_v19 = vpop.permute.xlu0 %5068 }
0x1a38   :  { %8489 = vmatmul.mubr.msk.f32.gmra.mrb[170].mxu1 %vm1655_vm8, %v4806_v12 }
0x1a39   :  { %8520 = vmatprep.mubr.msk.f32.mxu1 %vm9697_vm0, %v13217_v30 }
0x1a3c   :  { %8521 = vmatmul.mubr.msk.f32.vlgmr.msra.gmra.mrb[172].mxu1 %vm1533_vm2, %v5057_v37 }
0x1a3d   :  { %8523 = vmatprep.mubr.msk.f32.mxu1 %vm9697_vm0, %v13217_v30  ;;  %9056 = vmatpush3.bf16.msra.mxu1 %v13298_v59 }
0x1a3e   :  { %9063 = vmatprep.subr.bf16.mxu1 %v13216_v36 }
0x1a40   :  { %8524 = vmatmul.mubr.msk.f32.gmra.mrb[174].mxu1 %vm1533_vm2, %v5059_v18 }
0x1a41   :  { %8526 = vmatprep.mubr.msk.f32.mxu1 %vm9697_vm0, %v13217_v30 }
0x1a44   :  { %8527 = vmatmul.mubr.msk.f32.gmra.mrb[176].mxu1 %vm1533_vm2, %v5061_v45 }
0x1a45   :  { %8529 = vmatprep.mubr.msk.f32.mxu1 %vm9697_vm0, %v13217_v30 }
0x1a48   :  { %8530 = vmatmul.mubr.msk.f32.gmra.mrb[178].mxu1 %vm1533_vm2, %v5063_v41 }
0x1a49   :  { %8532 = vmatprep.mubr.msk.f32.mxu1 %vm9697_vm0, %v13217_v30 }
0x1a4c   :  { %8533 = vmatmul.mubr.msk.f32.gmra.mrb[180].mxu1 %vm1533_vm2, %v5065_v16 }
0x1a4d   :  { %8535 = vmatprep.mubr.msk.f32.mxu1 %vm9697_vm0, %v13217_v30 }
0x1a50   :  { %8536 = vmatmul.mubr.msk.f32.gmra.mrb[182].mxu1 %vm1533_vm2, %v5067_v55 }
0x1a51   :  { %8538 = vmatprep.mubr.msk.f32.mxu1 %vm9697_vm0, %v13217_v30 }
0x1a54   :  { %8539 = vmatmul.mubr.msk.f32.gmra.mrb[184].mxu1 %vm1533_vm2, %v5069_v19 }
0x1a55   :  { %8580 = vmatprep.mubr.msk.f32.mxu1 %vm9697_vm0, %v13217_v30 }
0x1adc   :  { %v4894_v40 = vpop.f32.mrb[158].mxu1 }
0x1add   :  { %v8472_v57 = vpop.f32.mrb[159].mxu1  ;;  %8496 = vmatmul.mubr.msk.f32.vlgmr.msra.gmra.mrb[170].mxu0 %vm1533_vm2, %v4894_v40 }
0x1ade   :  { %9047 = vmatpush3.bf16.msra.mxu0 %v13299_v39  ;;  %8498 = vmatprep.mubr.msk.f32.mxu0 %vm9697_vm0, %v13217_v30 }
0x1adf   :  { %9048 = vmatprep.subr.bf16.mxu0 %v13216_v36 }
0x1ae0   :  { %v4899_v5 = vpop.f32.mrb[160].mxu1 }
0x1ae1   :  { %v8475_v29 = vpop.f32.mrb[161].mxu1  ;;  %8499 = vmatmul.mubr.msk.f32.gmra.mrb[172].mxu0 %vm1533_vm2, %v4899_v5 }
0x1ae2   :  { %9050 = vmatpush3.bf16.msra.mxu0 %v13300_v44  ;;  %8501 = vmatprep.mubr.msk.f32.mxu0 %vm9697_vm0, %v13217_v30 }
0x1ae3   :  { %9051 = vmatprep.subr.bf16.mxu0 %v13216_v36 }
0x1ae4   :  { %v4904_v0 = vpop.f32.mrb[162].mxu1 }
0x1ae5   :  { %v8478_v33 = vpop.f32.mrb[163].mxu1  ;;  %8502 = vmatmul.mubr.msk.f32.gmra.mrb[174].mxu0 %vm1533_vm2, %v4904_v0 }
0x1ae6   :  { %9053 = vmatpush3.bf16.msra.mxu0 %v13301_v34  ;;  %8504 = vmatprep.mubr.msk.f32.mxu0 %vm9697_vm0, %v13217_v30 }
0x1ae7   :  { %8553 = vmatprep.subr.mxu0 %v13217_v30 }
0x1ae8   :  { %v4909_v25 = vpop.f32.mrb[164].mxu1 }
0x1ae9   :  { %v8481_v54 = vpop.f32.mrb[165].mxu1  ;;  %8505 = vmatmul.mubr.msk.f32.gmra.mrb[176].mxu0 %vm1533_vm2, %v4909_v25 }
0x1aea   :  { %8554 = vmatpush3.msra.mxu0 %v13302_v38  ;;  %8507 = vmatprep.mubr.msk.f32.mxu0 %vm9697_vm0, %v13217_v30 }
0x1aeb   :  { %9057 = vmatprep.subr.bf16.mxu0 %v13216_v36 }
0x1aec   :  { %v4914_v42 = vpop.f32.mrb[166].mxu1 }
0x1aed   :  { %v8484_v7 = vpop.f32.mrb[167].mxu1  ;;  %8508 = vmatmul.mubr.msk.f32.gmra.mrb[178].mxu0 %vm1533_vm2, %v4914_v42 }
0x1aee   :  { %8510 = vmatprep.mubr.msk.f32.mxu0 %vm9697_vm0, %v13217_v30 }
0x1af0   :  { %v4919_v49 = vpop.f32.mrb[168].mxu1 }
0x1af1   :  { %v8487_v60 = vpop.f32.mrb[169].mxu1  ;;  %8511 = vmatmul.mubr.msk.f32.gmra.mrb[180].mxu0 %vm1533_vm2, %v4919_v49 }
0x1af2   :  { %8513 = vmatprep.mubr.msk.f32.mxu0 %vm9697_vm0, %v13217_v30 }
0x1b0b   :  { %v4924_v21 = vpop.f32.mrb[170].mxu1 }
0x1b0c   :  { %v8490_v3 = vpop.f32.mrb[171].mxu1  ;;  %8514 = vmatmul.mubr.msk.f32.gmra.mrb[182].mxu0 %vm1533_vm2, %v4924_v21 }
0x1b0d   :  { %8555 = vmatprep.mubr.msk.f32.mxu0 %vm9697_vm0, %v13217_v30 }
0x1b0f   :  { %v5150_v53 = vpop.f32.mrb[172].mxu1 }
0x1b10   :  { %v5151_v17 = vadd.f32 %v5150_v53, %v13290_v4  ;;  %v8522_v61 = vpop.f32.mrb[173].mxu1 }
0x1b12   :  { %v5184_v12 = vsel %vm1655_vm8, %v5151_v17, -inf }
0x1b13   :  { %5185 = vmax.xlane.f32.xlu1 %v5184_v12  ;;  %v5155_v37 = vpop.f32.mrb[174].mxu1 }
0x1b14   :  { %v5156_v59 = vadd.f32 %v5155_v37, %v13291_v28  ;;  %v8525_v18 = vpop.f32.mrb[175].mxu1 }
0x1b16   :  { %v5187_v45 = vsel %vm1655_vm8, %v5156_v59, -inf }
0x1b17   :  { %5188 = vmax.xlane.f32.xlu0 %v5187_v45  ;;  %v5160_v41 = vpop.f32.mrb[176].mxu1 }
0x1b18   :  { %v5161_v16 = vadd.f32 %v5160_v41, %v13292_v24  ;;  %v8528_v55 = vpop.f32.mrb[177].mxu1 }
0x1b1a   :  { %v5190_v19 = vsel %vm1655_vm8, %v5161_v16, -inf }
0x1b1b   :  { %5191 = vmax.xlane.f32.xlu0 %v5190_v19  ;;  %v5165_v40 = vpop.f32.mrb[178].mxu1 }
0x1b1c   :  { %v5166_v4 = vadd.f32 %v5165_v40, %v13293_v23  ;;  %v8531_v57 = vpop.f32.mrb[179].mxu1 }
0x1b1e   :  { %v5193_v39 = vsel %vm1655_vm8, %v5166_v4, -inf }
0x1b1f   :  { %5194 = vmax.xlane.f32.xlu1 %v5193_v39  ;;  %v5170_v5 = vpop.f32.mrb[180].mxu1 }
0x1b20   :  { %v5171_v28 = vadd.f32 %v5170_v5, %v13294_v15  ;;  %v8534_v29 = vpop.f32.mrb[181].mxu1 }
0x1b22   :  { %v5196_v44 = vsel %vm1655_vm8, %v5171_v28, -inf }
0x1b23   :  { %5197 = vmax.xlane.f32.xlu0 %v5196_v44  ;;  %v5175_v0 = vpop.f32.mrb[182].mxu1 }
0x1b24   :  { %v5176_v24 = vadd.f32 %v5175_v0, %v13295_v47  ;;  %v8537_v33 = vpop.f32.mrb[183].mxu1 }
0x1b26   :  { %v5199_v34 = vsel %vm1655_vm8, %v5176_v24, -inf }
0x1b27   :  { %5200 = vmax.xlane.f32.xlu1 %v5199_v34  ;;  %v5180_v25 = vpop.f32.mrb[184].mxu1 }
0x1b28   :  { %v5181_v23 = vadd.f32 %v5180_v25, %v13296_v20  ;;  %v8540_v54 = vpop.f32.mrb[185].mxu1 }
0x1b2a   :  { %v5202_v38 = vsel %vm1655_vm8, %v5181_v23, -inf }
0x1b2b   :  { %5203 = vmax.xlane.f32.xlu0 %v5202_v38 }
0x1ba0   :  { %v5186_v42 = vpop.xlane.xlu1 %5185 }
0x1ba1   :  { %v5205_v15 = vsub.f32 %v5151_v17, %v5186_v42 }
0x1ba3   :  { %v5212_v7 = vmul.f32 1.442695, %v5205_v15 }
0x1ba4   :  { %v5189_v49 = vpop.xlane.xlu0 %5188 }
0x1ba5   :  { %9505 = vpow2.f32 %v5212_v7  ;;  %v5206_v60 = vsub.f32 %v5156_v59, %v5189_v49 }
0x1ba7   :  { %v5214_v21 = vmul.f32 1.442695, %v5206_v60 }
0x1ba8   :  { %v5192_v3 = vpop.xlane.xlu0 %5191 }
0x1ba9   :  { %9507 = vpow2.f32 %v5214_v21  ;;  %v5207_v47 = vsub.f32 %v5161_v16, %v5192_v3 }
0x1bab   :  { %v5216_v53 = vmul.f32 1.442695, %v5207_v47 }
0x1bac   :  { %v5195_v61 = vpop.xlane.xlu1 %5194 }
0x1bad   :  { %9509 = vpow2.f32 %v5216_v53  ;;  %v5208_v12 = vsub.f32 %v5166_v4, %v5195_v61 }
0x1baf   :  { %v9506_v37 = vpop.eup %9505  ;;  %v5218_v20 = vmul.f32 1.442695, %v5208_v12 }
0x1bb0   :  { %v12443_v18 = vpop.f32.mrb[170].mxu0  ;;  %v5198_v45 = vpop.xlane.xlu0 %5197  ;;  %v5226_v41 = vsel %vm1655_vm8, %v9506_v37, 0.0 }
0x1bb1   :  { %9511 = vpow2.f32 %v5218_v20  ;;  %v5209_v17 = vsub.f32 %v5171_v28, %v5198_v45  ;;  %v8497_v55 = vpop.f32.mrb[171].mxu0  ;;  %5227 = vadd.xlane.f32.xlu1 %v5226_v41 }
0x1bb3   :  { %v9508_v59 = vpop.eup %9507  ;;  %v5220_v19 = vmul.f32 1.442695, %v5209_v17 }
0x1bb4   :  { %v12446_v40 = vpop.f32.mrb[172].mxu0  ;;  %v5201_v16 = vpop.xlane.xlu1 %5200  ;;  %v5229_v57 = vsel %vm1655_vm8, %v9508_v59, 0.0 }
0x1bb5   :  { %9513 = vpow2.f32 %v5220_v19  ;;  %v5210_v4 = vsub.f32 %v5176_v24, %v5201_v16  ;;  %v8500_v39 = vpop.f32.mrb[173].mxu0  ;;  %5230 = vadd.xlane.f32.xlu0 %v5229_v57 }
0x1bb7   :  { %v9510_v5 = vpop.eup %9509  ;;  %v5222_v29 = vmul.f32 1.442695, %v5210_v4  ;;  %v13303_v4 = vld [vmem:[#allocation36_spill] sm:$0xff] }
0x1bb8   :  { %v12449_v44 = vpop.f32.mrb[174].mxu0  ;;  %v5204_v0 = vpop.xlane.xlu0 %5203  ;;  %v5232_v28 = vsel %vm1655_vm8, %v9510_v5, 0.0 }
0x1bb9   :  { %9515 = vpow2.f32 %v5222_v29  ;;  %v5211_v33 = vsub.f32 %v5181_v23, %v5204_v0  ;;  %v8503_v34 = vpop.f32.mrb[175].mxu0  ;;  %5233 = vadd.xlane.f32.xlu1 %v5232_v28 }
0x1bbb   :  { %v9512_v25 = vpop.eup %9511  ;;  %v5224_v54 = vmul.f32 1.442695, %v5211_v33 }
0x1bbc   :  { %v12452_v38 = vpop.f32.mrb[176].mxu0  ;;  %v5235_v42 = vsel %vm1655_vm8, %v9512_v25, 0.0 }
0x1bbd   :  { %9517 = vpow2.f32 %v5224_v54  ;;  %v8506_v24 = vpop.f32.mrb[177].mxu0  ;;  %5236 = vadd.xlane.f32.xlu0 %v5235_v42 }
0x1bbf   :  { %v9514_v15 = vpop.eup %9513 }
0x1bc0   :  { %v12455_v7 = vpop.f32.mrb[178].mxu0  ;;  %v5238_v49 = vsel %vm1655_vm8, %v9514_v15, 0.0 }
0x1bc1   :  { %v8509_v60 = vpop.f32.mrb[179].mxu0  ;;  %5239 = vadd.xlane.f32.xlu1 %v5238_v49 }
0x1bc3   :  { %v9516_v21 = vpop.eup %9515 }
0x1bc4   :  { %v12458_v23 = vpop.f32.mrb[180].mxu0  ;;  %v5241_v3 = vsel %vm1655_vm8, %v9516_v21, 0.0 }
0x1bc5   :  { %v8512_v47 = vpop.f32.mrb[181].mxu0  ;;  %5242 = vadd.xlane.f32.xlu0 %v5241_v3 }
0x1bc6   :  { %v13305_v47 = vld [vmem:[#allocation5_spill] sm:$0xff] }
0x1bc7   :  { %v9518_v53 = vpop.eup %9517 }
0x1bc8   :  { %v5244_v61 = vsel %vm1655_vm8, %v9518_v53, 0.0 }
0x1bc9   :  { %5245 = vadd.xlane.f32.xlu1 %v5244_v61 }
0x1bdf   :  { %v12462_v12 = vpop.f32.mrb[182].mxu0 }
0x1be0   :  { %v8515_v20 = vpop.f32.mrb[183].mxu0 }
0x1c3e   :  { %v5228_v45 = vpop.xlane.xlu1 %5227 }
0x1c3f   :  { %9519 = vrcp.f32 %v5228_v45 }
0x1c42   :  { %v5231_v41 = vpop.xlane.xlu0 %5230 }
0x1c43   :  { %9521 = vrcp.f32 %v5231_v41 }
0x1c46   :  { %v5234_v17 = vpop.xlane.xlu1 %5233 }
0x1c47   :  { %9523 = vrcp.f32 %v5234_v17 }
0x1c49   :  { %v9520_v55 = vpop.eup %9519 }
0x1c4a   :  { %v5248_v19 = vmul.f32 %v9520_v55, %v9506_v37  ;;  %v5237_v16 = vpop.xlane.xlu0 %5236  ;;  %v13304_v37 = vld [vmem:[#allocation37_spill] sm:$0xff] }
0x1c4b   :  { %9525 = vrcp.f32 %v5237_v16 }
0x1c4c   :  { %8556 = vmatmul.mubr.msk.f32.vlgmr.msra.gmra.mrb[184].mxu0 %vm1655_vm8, %v5248_v19 }
0x1c4d   :  { %v9522_v57 = vpop.eup %9521  ;;  %8558 = vmatprep.mubr.msk.f32.mxu0 %vm9697_vm0, %v13217_v30  ;;  %9059 = vmatpush3.bf16.msra.mxu0 %v13303_v4 }
0x1c4e   :  { %v5240_v39 = vpop.xlane.xlu1 %5239  ;;  %v5250_v29 = vmul.f32 %v9522_v57, %v9508_v59  ;;  %9060 = vmatprep.subr.bf16.mxu0 %v13216_v36 }
0x1c4f   :  { %9527 = vrcp.f32 %v5240_v39  ;;  %v9685_v39 = vld [vmem:[%s13067_s8] ss:$0 sm:$0xff] }
0x1c50   :  { %8559 = vmatmul.mubr.msk.f32.gmra.mrb[186].mxu0 %vm1655_vm8, %v5250_v29  ;;  %v5049_v29 = vadd.f32 %v9685_v39, %v12443_v18 }
0x1c51   :  { %v9524_v0 = vpop.eup %9523  ;;  %8561 = vmatprep.mubr.msk.f32.mxu0 %vm9697_vm0, %v13217_v30  ;;  %9062 = vmatpush3.bf16.msra.mxu0 %v13304_v37 }
0x1c52   :  { %v5243_v28 = vpop.xlane.xlu0 %5242  ;;  %v5252_v33 = vmul.f32 %v9524_v0, %v9510_v5  ;;  %9066 = vmatprep.subr.bf16.mxu0 %v13216_v36 }
0x1c53   :  { %9529 = vrcp.f32 %v5243_v28 }
0x1c54   :  { %8562 = vmatmul.mubr.msk.f32.gmra.mrb[188].mxu0 %vm1655_vm8, %v5252_v33  ;;  %v5050_v33 = vadd.f32 %v9685_v39, %v12446_v40  ;;  %v5052_v40 = vadd.f32 %v9685_v39, %v12452_v38  ;;  %v5054_v38 = vadd.f32 %v9685_v39, %v12458_v23 }
0x1c55   :  { %v9526_v34 = vpop.eup %9525  ;;  %8564 = vmatprep.mubr.msk.f32.mxu0 %vm9697_vm0, %v13217_v30 }
0x1c56   :  { %v5246_v59 = vpop.xlane.xlu1 %5245  ;;  %v5254_v54 = vmul.f32 %v9526_v34, %v9512_v25 }
0x1c57   :  { %9531 = vrcp.f32 %v5246_v59 }
0x1c58   :  { %8565 = vmatmul.mubr.msk.f32.gmra.mrb[190].mxu0 %vm1655_vm8, %v5254_v54 }
0x1c59   :  { %v9528_v42 = vpop.eup %9527  ;;  %8567 = vmatprep.mubr.msk.f32.mxu0 %vm9697_vm0, %v13217_v30 }
0x1c5a   :  { %v5256_v24 = vmul.f32 %v9528_v42, %v9514_v15 }
0x1c5c   :  { %8568 = vmatmul.mubr.msk.f32.gmra.mrb[192].mxu0 %vm1655_vm8, %v5256_v24 }
0x1c5d   :  { %v9530_v5 = vpop.eup %9529  ;;  %8570 = vmatprep.mubr.msk.f32.mxu0 %vm9697_vm0, %v13217_v30 }
0x1c5e   :  { %v5258_v49 = vmul.f32 %v9530_v5, %v9516_v21  ;;  %v5051_v5 = vadd.f32 %v9685_v39, %v12449_v44  ;;  %v5053_v44 = vadd.f32 %v9685_v39, %v12455_v7  ;;  %v5055_v7 = vadd.f32 %v9685_v39, %v12462_v12 }
0x1c60   :  { %8571 = vmatmul.mubr.msk.f32.gmra.mrb[194].mxu0 %vm1655_vm8, %v5258_v49 }
0x1c61   :  { %v9532_v60 = vpop.eup %9531  ;;  %8573 = vmatprep.mubr.msk.f32.mxu0 %vm9697_vm0, %v13217_v30 }
0x1c62   :  { %v5260_v25 = vmul.f32 %v9532_v60, %v9518_v53 }
0x1c64   :  { %8574 = vmatmul.mubr.msk.f32.gmra.mrb[196].mxu0 %vm1655_vm8, %v5260_v25 }
0x1c65   :  { %8609 = vmatprep.mubr.msk.f32.mxu0 %vm9697_vm0, %v13217_v30 }
0x1d1f   :  { %v5348_v15 = vpop.f32.mrb[184].mxu0 }
0x1d20   :  { %v8557_v3 = vpop.f32.mrb[185].mxu0  ;;  %8581 = vmatmul.mubr.msk.f32.vlgmr.msra.gmra.mrb[186].mxu1 %vm1533_vm2, %v5348_v15 }
0x1d21   :  { %9065 = vmatpush3.bf16.msra.mxu1 %v13305_v47  ;;  %8583 = vmatprep.mubr.msk.f32.mxu1 %vm9697_vm0, %v13217_v30 }
0x1d22   :  { %9090 = vmatprep.subr.bf16.mxu1 %v13216_v36 }
0x1d23   :  { %v5353_v21 = vpop.f32.mrb[186].mxu0 }
0x1d24   :  { %v8560_v61 = vpop.f32.mrb[187].mxu0  ;;  %8584 = vmatmul.mubr.msk.f32.gmra.mrb[188].mxu1 %vm1533_vm2, %v5353_v21 }
0x1d25   :  { %8586 = vmatprep.mubr.msk.f32.mxu1 %vm9697_vm0, %v13217_v30 }
0x1d27   :  { %v5358_v53 = vpop.f32.mrb[188].mxu0 }
0x1d28   :  { %v8563_v20 = vpop.f32.mrb[189].mxu0  ;;  %8587 = vmatmul.mubr.msk.f32.gmra.mrb[190].mxu1 %vm1533_vm2, %v5358_v53 }
0x1d29   :  { %8589 = vmatprep.mubr.msk.f32.mxu1 %vm9697_vm0, %v13217_v30 }
0x1d2b   :  { %v5363_v45 = vpop.f32.mrb[190].mxu0 }
0x1d2c   :  { %v8566_v41 = vpop.f32.mrb[191].mxu0  ;;  %8590 = vmatmul.mubr.msk.f32.gmra.mrb[192].mxu1 %vm1533_vm2, %v5363_v45 }
0x1d2d   :  { %8592 = vmatprep.mubr.msk.f32.mxu1 %vm9697_vm0, %v13217_v30 }
0x1d2f   :  { %v5368_v17 = vpop.f32.mrb[192].mxu0 }
0x1d30   :  { %v8569_v55 = vpop.f32.mrb[193].mxu0  ;;  %8593 = vmatmul.mubr.msk.f32.gmra.mrb[194].mxu1 %vm1533_vm2, %v5368_v17 }
0x1d31   :  { %8595 = vmatprep.mubr.msk.f32.mxu1 %vm9697_vm0, %v13217_v30 }
0x1d33   :  { %v5373_v19 = vpop.f32.mrb[194].mxu0 }
0x1d34   :  { %v8572_v16 = vpop.f32.mrb[195].mxu0  ;;  %8596 = vmatmul.mubr.msk.f32.gmra.mrb[196].mxu1 %vm1533_vm2, %v5373_v19 }
0x1d35   :  { %8598 = vmatprep.mubr.msk.f32.mxu1 %vm9697_vm0, %v13217_v30 }
0x1d37   :  { %v5378_v57 = vpop.f32.mrb[196].mxu0 }
0x1d38   :  { %v8575_v4 = vpop.f32.mrb[197].mxu0  ;;  %8599 = vmatmul.mubr.msk.f32.gmra.mrb[198].mxu1 %vm1533_vm2, %v5378_v57 }
0x1d39   :  { %8634 = vmatprep.mubr.msk.f32.mxu1 %vm9697_vm0, %v13217_v30 }
0x1df3   :  { %v5469_v0 = vpop.f32.mrb[186].mxu1 }
0x1df4   :  { %v5503_v37 = vadd.f32 %v5469_v0, %v5049_v29  ;;  %v8582_v28 = vpop.f32.mrb[187].mxu1 }
0x1df6   :  { %v5510_v34 = vadd.f32 %v5503_v37, %v12179_v63 }
0x1df7   :  { %v5474_v59 = vpop.f32.mrb[188].mxu1 }
0x1df8   :  { %v5504_v54 = vadd.f32 %v5474_v59, %v5050_v33  ;;  %v8585_v42 = vpop.f32.mrb[189].mxu1  ;;  %v5517_v24 = vsel %vm323_vm1, %v5510_v34, 0.0 }
0x1df9   :  { %5518 = vadd.xlane.f32.xlu0 %v5517_v24 }
0x1dfa   :  { %v5511_v49 = vadd.f32 %v5504_v54, %v12189_v32 }
0x1dfb   :  { %v5479_v60 = vpop.f32.mrb[190].mxu1 }
0x1dfc   :  { %v5505_v25 = vadd.f32 %v5479_v60, %v5051_v5  ;;  %v8588_v18 = vpop.f32.mrb[191].mxu1  ;;  %v5520_v15 = vsel %vm323_vm1, %v5511_v49, 0.0 }
0x1dfd   :  { %5521 = vadd.xlane.f32.xlu1 %v5520_v15 }
0x1dfe   :  { %v5512_v63 = vadd.f32 %v5505_v25, %v12203_v26 }
0x1dff   :  { %v5484_v3 = vpop.f32.mrb[192].mxu1 }
0x1e00   :  { %v5506_v47 = vadd.f32 %v5484_v3, %v5052_v40  ;;  %v8591_v21 = vpop.f32.mrb[193].mxu1  ;;  %v5523_v61 = vsel %vm323_vm1, %v5512_v63, 0.0 }
0x1e01   :  { %5524 = vadd.xlane.f32.xlu0 %v5523_v61 }
0x1e02   :  { %v5513_v32 = vadd.f32 %v5506_v47, %v12217_v58 }
0x1e03   :  { %v5489_v53 = vpop.f32.mrb[194].mxu1 }
0x1e04   :  { %v5507_v20 = vadd.f32 %v5489_v53, %v5053_v44  ;;  %v8594_v45 = vpop.f32.mrb[195].mxu1  ;;  %v5526_v41 = vsel %vm323_vm1, %v5513_v32, 0.0 }
0x1e05   :  { %5527 = vadd.xlane.f32.xlu1 %v5526_v41 }
0x1e06   :  { %v5514_v26 = vadd.f32 %v5507_v20, %v12231_v46 }
0x1e07   :  { %v5494_v17 = vpop.f32.mrb[196].mxu1 }
0x1e08   :  { %v5508_v55 = vadd.f32 %v5494_v17, %v5054_v38  ;;  %v8597_v19 = vpop.f32.mrb[197].mxu1  ;;  %v5529_v16 = vsel %vm323_vm1, %v5514_v26, 0.0 }
0x1e09   :  { %5530 = vadd.xlane.f32.xlu0 %v5529_v16 }
0x1e0a   :  { %v5515_v58 = vadd.f32 %v5508_v55, %v12245_v10 }
0x1e0b   :  { %v5499_v57 = vpop.f32.mrb[198].mxu1 }
0x1e0c   :  { %v5509_v4 = vadd.f32 %v5499_v57, %v5055_v7  ;;  %v8600_v29 = vpop.f32.mrb[199].mxu1  ;;  %v5532_v0 = vsel %vm323_vm1, %v5515_v58, 0.0 }
0x1e0d   :  { %5533 = vadd.xlane.f32.xlu1 %v5532_v0 }
0x1e0e   :  { %v5516_v23 = vadd.f32 %v5509_v4, %v12259_v2 }
0x1e10   :  { %v5535_v46 = vsel %vm323_vm1, %v5516_v23, 0.0 }
0x1e11   :  { %5536 = vadd.xlane.f32.xlu0 %v5535_v46 }
0x1e86   :  { %v5519_v37 = vpop.xlane.xlu0 %5518 }
0x1e87   :  { %v5538_v28 = vmul.f32 0.03125, %v5519_v37 }
0x1e89   :  { %v5545_v33 = vsub.f32 %v5510_v34, %v5538_v28 }
0x1e8a   :  { %v5522_v59 = vpop.xlane.xlu1 %5521 }
0x1e8b   :  { %v5539_v54 = vmul.f32 0.03125, %v5522_v59  ;;  %v5552_v42 = vmul.f32 %v5545_v33, %v5545_v33 }
0x1e8d   :  { %v5546_v12 = vsub.f32 %v5511_v49, %v5539_v54  ;;  %v5559_v10 = vsel %vm323_vm1, %v5552_v42, 0.0 }
0x1e8e   :  { %v5525_v39 = vpop.xlane.xlu0 %5524  ;;  %5560 = vadd.xlane.f32.xlu1 %v5559_v10 }
0x1e8f   :  { %v5540_v24 = vmul.f32 0.03125, %v5525_v39  ;;  %v5553_v5 = vmul.f32 %v5546_v12, %v5546_v12 }
0x1e91   :  { %v12537_v60 = vsub.f32 %v5512_v63, %v5540_v24  ;;  %v5562_v2 = vsel %vm323_vm1, %v5553_v5, 0.0  ;;  %v13306_v24 = vld [vmem:[#allocation4_spill] sm:$0xff] }
0x1e92   :  { %5563 = vadd.xlane.f32.xlu0 %v5562_v2  ;;  %v5528_v25 = vpop.xlane.xlu1 %5527 }
0x1e93   :  { %v5541_v18 = vmul.f32 0.03125, %v5528_v25  ;;  %v5554_v34 = vmul.f32 %v12537_v60, %v12537_v60 }
0x1e95   :  { %v12542_v15 = vsub.f32 %v5513_v32, %v5541_v18  ;;  %v5565_v49 = vsel %vm323_vm1, %v5554_v34, 0.0  ;;  %v13307_v18 = vld [vmem:[#allocation7_spill] sm:$0xff] }
0x1e96   :  { %v5531_v40 = vpop.xlane.xlu0 %5530  ;;  %5566 = vadd.xlane.f32.xlu1 %v5565_v49 }
0x1e97   :  { %v5542_v3 = vmul.f32 0.03125, %v5531_v40  ;;  %v5555_v47 = vmul.f32 %v12542_v15, %v12542_v15 }
0x1e99   :  { %v12547_v63 = vsub.f32 %v5514_v26, %v5542_v3  ;;  %v5568_v21 = vsel %vm323_vm1, %v5555_v47, 0.0 }
0x1e9a   :  { %5569 = vadd.xlane.f32.xlu0 %v5568_v21  ;;  %v5534_v61 = vpop.xlane.xlu1 %5533 }
0x1e9b   :  { %v5543_v44 = vmul.f32 0.03125, %v5534_v61  ;;  %v5556_v53 = vmul.f32 %v12547_v63, %v12547_v63  ;;  %v13308_v61 = vld [vmem:[#allocation10_spill] sm:$0xff] }
0x1e9d   :  { %v12552_v32 = vsub.f32 %v5515_v58, %v5543_v44  ;;  %v5571_v20 = vsel %vm323_vm1, %v5556_v53, 0.0 }
0x1e9e   :  { %5572 = vadd.xlane.f32.xlu1 %v5571_v20  ;;  %v5537_v45 = vpop.xlane.xlu0 %5536 }
0x1e9f   :  { %v5544_v41 = vmul.f32 0.03125, %v5537_v45  ;;  %v5557_v38 = vmul.f32 %v12552_v32, %v12552_v32 }
0x1ea1   :  { %v12557_v26 = vsub.f32 %v5516_v23, %v5544_v41  ;;  %v5574_v17 = vsel %vm323_vm1, %v5557_v38, 0.0 }
0x1ea2   :  { %5575 = vadd.xlane.f32.xlu0 %v5574_v17  ;;  %v13309_v17 = vld [vmem:[#allocation8_spill] sm:$0xff] }
0x1ea3   :  { %v5558_v55 = vmul.f32 %v12557_v26, %v12557_v26 }
0x1ea5   :  { %v5577_v19 = vsel %vm323_vm1, %v5558_v55, 0.0 }
0x1ea6   :  { %5578 = vadd.xlane.f32.xlu1 %v5577_v19 }
0x1f1b   :  { %v5561_v16 = vpop.xlane.xlu1 %5560 }
0x1f1c   :  { %v5580_v7 = vmul.f32 0.03125, %v5561_v16 }
0x1f1e   :  { %v5587_v58 = vadd.f32 1e-05, %v5580_v7  ;;  %v13310_v7 = vld [vmem:[#allocation12_spill] sm:$0xff] }
0x1f1f   :  { %v5564_v57 = vpop.xlane.xlu0 %5563 }
0x1f20   :  { %9533 = vrsqrt.f32 %v5587_v58  ;;  %v5581_v4 = vmul.f32 0.03125, %v5564_v57 }
0x1f22   :  { %v5588_v29 = vadd.f32 1e-05, %v5581_v4 }
0x1f23   :  { %v5567_v0 = vpop.xlane.xlu1 %5566 }
0x1f24   :  { %9535 = vrsqrt.f32 %v5588_v29  ;;  %v5582_v23 = vmul.f32 0.03125, %v5567_v0  ;;  %v13311_v29 = vld [vmem:[#allocation11_spill] sm:$0xff] }
0x1f26   :  { %v5589_v46 = vadd.f32 1e-05, %v5582_v23 }
0x1f27   :  { %v5570_v37 = vpop.xlane.xlu0 %5569 }
0x1f28   :  { %9537 = vrsqrt.f32 %v5589_v46  ;;  %v5583_v28 = vmul.f32 0.03125, %v5570_v37 }
0x1f2a   :  { %v9534_v59 = vpop.eup %9533  ;;  %v5590_v54 = vadd.f32 1e-05, %v5583_v28 }
0x1f2b   :  { %v5601_v42 = vmul.f32 %v9534_v59, %v5545_v33  ;;  %v5573_v10 = vpop.xlane.xlu1 %5572 }
0x1f2c   :  { %9539 = vrsqrt.f32 %v5590_v54  ;;  %v5584_v39 = vmul.f32 0.03125, %v5573_v10 }
0x1f2d   :  { %v5608_v5 = vmul.f32 %v5601_v42, %v13306_v24 }
0x1f2e   :  { %v9536_v2 = vpop.eup %9535  ;;  %v5591_v25 = vadd.f32 1e-05, %v5584_v39 }
0x1f2f   :  { %v12565_v34 = vadd.f32 %v5608_v5, %v13307_v18  ;;  %v5576_v49 = vpop.xlane.xlu0 %5575  ;;  %v5602_v40 = vmul.f32 %v9536_v2, %v5546_v12 }
0x1f30   :  { %9541 = vrsqrt.f32 %v5591_v25  ;;  %v5585_v3 = vmul.f32 0.03125, %v5576_v49 }
0x1f31   :  { %8610 = vmatmul.mubr.msk.f32.vlgmr.msra.gmra.mrb[198].mxu0 %vm323_vm1, %v12565_v34  ;;  %v5609_v47 = vmul.f32 %v5602_v40, %v13306_v24 }
0x1f32   :  { %v9538_v33 = vpop.eup %9537  ;;  %v5592_v21 = vadd.f32 1e-05, %v5585_v3  ;;  %9068 = vmatpush3.bf16.msra.mxu0 %v13308_v61  ;;  %8612 = vmatprep.mubr.msk.f32.mxu0 %vm9697_vm0, %v13217_v30 }
0x1f33   :  { %v5579_v44 = vpop.xlane.xlu1 %5578  ;;  %9069 = vmatprep.subr.bf16.mxu0 %v13216_v36  ;;  %v12575_v53 = vadd.f32 %v5609_v47, %v13307_v18  ;;  %v5603_v12 = vmul.f32 %v9538_v33, %v12537_v60 }
0x1f34   :  { %9543 = vrsqrt.f32 %v5592_v21  ;;  %v5586_v20 = vmul.f32 0.03125, %v5579_v44 }
0x1f35   :  { %8613 = vmatmul.mubr.msk.f32.gmra.mrb[200].mxu0 %vm323_vm1, %v12575_v53  ;;  %v5610_v45 = vmul.f32 %v5603_v12, %v13306_v24 }
0x1f36   :  { %v9540_v41 = vpop.eup %9539  ;;  %v5593_v38 = vadd.f32 1e-05, %v5586_v20  ;;  %9071 = vmatpush3.bf16.msra.mxu0 %v13309_v17  ;;  %8615 = vmatprep.mubr.msk.f32.mxu0 %vm9697_vm0, %v13217_v30 }
0x1f37   :  { %9072 = vmatprep.subr.bf16.mxu0 %v13216_v36  ;;  %v12586_v55 = vadd.f32 %v5610_v45, %v13307_v18  ;;  %v5604_v60 = vmul.f32 %v9540_v41, %v12542_v15 }
0x1f38   :  { %9545 = vrsqrt.f32 %v5593_v38 }
0x1f39   :  { %8616 = vmatmul.mubr.msk.f32.gmra.mrb[202].mxu0 %vm323_vm1, %v12586_v55  ;;  %v5611_v19 = vmul.f32 %v5604_v60, %v13306_v24 }
0x1f3a   :  { %v9542_v16 = vpop.eup %9541  ;;  %9074 = vmatpush3.bf16.msra.mxu0 %v13310_v7  ;;  %8618 = vmatprep.mubr.msk.f32.mxu0 %vm9697_vm0, %v13217_v30 }
0x1f3b   :  { %9075 = vmatprep.subr.bf16.mxu0 %v13216_v36  ;;  %v12597_v58 = vadd.f32 %v5611_v19, %v13307_v18  ;;  %v5605_v57 = vmul.f32 %v9542_v16, %v12547_v63 }
0x1f3d   :  { %8619 = vmatmul.mubr.msk.f32.gmra.mrb[204].mxu0 %vm323_vm1, %v12597_v58  ;;  %v5612_v15 = vmul.f32 %v5605_v57, %v13306_v24 }
0x1f3e   :  { %v9544_v4 = vpop.eup %9543  ;;  %9077 = vmatpush3.bf16.msra.mxu0 %v13311_v29  ;;  %8621 = vmatprep.mubr.msk.f32.mxu0 %vm9697_vm0, %v13217_v30 }
0x1f3f   :  { %9078 = vmatprep.subr.bf16.mxu0 %v13216_v36  ;;  %v12608_v0 = vadd.f32 %v5612_v15, %v13307_v18  ;;  %v5606_v23 = vmul.f32 %v9544_v4, %v12552_v32 }
0x1f41   :  { %8622 = vmatmul.mubr.msk.f32.gmra.mrb[206].mxu0 %vm323_vm1, %v12608_v0  ;;  %v5613_v63 = vmul.f32 %v5606_v23, %v13306_v24 }
0x1f42   :  { %v9546_v46 = vpop.eup %9545  ;;  %9080 = vmatpush3.bf16.msra.mxu0 %v11455_v48  ;;  %8624 = vmatprep.mubr.msk.f32.mxu0 %vm9697_vm0, %v13217_v30 }
0x1f43   :  { %9081 = vmatprep.subr.bf16.mxu0 %v13216_v36  ;;  %v12619_v37 = vadd.f32 %v5613_v63, %v13307_v18  ;;  %v5607_v28 = vmul.f32 %v9546_v46, %v12557_v26  ;;  %v13312_v26 = vld [vmem:[#allocation14_spill] sm:$0xff] }
0x1f45   :  { %8625 = vmatmul.mubr.msk.f32.gmra.mrb[208].mxu0 %vm323_vm1, %v12619_v37  ;;  %v5614_v32 = vmul.f32 %v5607_v28, %v13306_v24 }
0x1f46   :  { %9083 = vmatpush3.bf16.msra.mxu0 %v11459_v22  ;;  %8627 = vmatprep.mubr.msk.f32.mxu0 %vm9697_vm0, %v13217_v30 }
0x1f47   :  { %9084 = vmatprep.subr.bf16.mxu0 %v13216_v36  ;;  %v12630_v48 = vadd.f32 %v5614_v32, %v13307_v18 }
0x1f49   :  { %8628 = vmatmul.mubr.msk.f32.gmra.mrb[210].mxu0 %vm323_vm1, %v12630_v48 }
0x1f4a   :  { %9086 = vmatpush3.bf16.msra.mxu0 %v11499_v11  ;;  %8687 = vmatprep.mubr.msk.f32.mxu0 %vm9697_vm0, %v13217_v30 }
0x1f4b   :  { %9087 = vmatprep.subr.bf16.mxu0 %v13216_v36 }
0x1f4e   :  { %9089 = vmatpush3.bf16.msra.mxu0 %v11503_v50 }
0x1f4f   :  { %9093 = vmatprep.subr.bf16.mxu0 %v13216_v36 }
0x2004   :  { %v5709_v22 = vpop.f32.mrb[198].mxu0 }
0x2005   :  { %v5710_v59 = vadd.f32 %v5709_v22, %v13312_v26  ;;  %v8611_v54 = vpop.f32.mrb[199].mxu0 }
0x2007   :  { %v12641_v42 = vmul.f32 0.25, %v5710_v59 }
0x2008   :  { %v5714_v10 = vpop.f32.mrb[200].mxu0 }
0x2009   :  { %v5715_v39 = vadd.f32 %v5714_v10, %v13312_v26  ;;  %v8614_v24 = vpop.f32.mrb[201].mxu0  ;;  %8635 = vmatmul.mubr.msk.f32.vlgmr.msra.gmra.mrb[200].mxu1 %vm1533_vm2, %v12641_v42 }
0x200a   :  { %8637 = vmatprep.mubr.msk.f32.mxu1 %vm9697_vm0, %v13217_v30  ;;  %9092 = vmatpush3.bf16.msra.mxu1 %v11495_v43 }
0x200b   :  { %v12649_v11 = vmul.f32 0.25, %v5715_v39  ;;  %9096 = vmatprep.subr.bf16.mxu1 %v13216_v36 }
0x200c   :  { %v5719_v50 = vpop.f32.mrb[202].mxu0 }
0x200d   :  { %v5720_v5 = vadd.f32 %v5719_v50, %v13312_v26  ;;  %v8617_v2 = vpop.f32.mrb[203].mxu0  ;;  %8638 = vmatmul.mubr.msk.f32.gmra.mrb[202].mxu1 %vm1533_vm2, %v12649_v11 }
0x200e   :  { %8640 = vmatprep.mubr.msk.f32.mxu1 %vm9697_vm0, %v13217_v30 }
0x200f   :  { %v12657_v25 = vmul.f32 0.25, %v5720_v5 }
0x2010   :  { %v5724_v18 = vpop.f32.mrb[204].mxu0 }
0x2011   :  { %v5725_v49 = vadd.f32 %v5724_v18, %v13312_v26  ;;  %v8620_v43 = vpop.f32.mrb[205].mxu0  ;;  %8641 = vmatmul.mubr.msk.f32.gmra.mrb[204].mxu1 %vm1533_vm2, %v12657_v25 }
0x2012   :  { %8643 = vmatprep.mubr.msk.f32.mxu1 %vm9697_vm0, %v13217_v30 }
0x2013   :  { %v12664_v40 = vmul.f32 0.25, %v5725_v49 }
0x2014   :  { %v5729_v3 = vpop.f32.mrb[206].mxu0 }
0x2015   :  { %v5730_v47 = vadd.f32 %v5729_v3, %v13312_v26  ;;  %v8623_v33 = vpop.f32.mrb[207].mxu0  ;;  %8644 = vmatmul.mubr.msk.f32.gmra.mrb[206].mxu1 %vm1533_vm2, %v12664_v40 }
0x2016   :  { %8646 = vmatprep.mubr.msk.f32.mxu1 %vm9697_vm0, %v13217_v30 }
0x2017   :  { %v12671_v21 = vmul.f32 0.25, %v5730_v47 }
0x2018   :  { %v5734_v61 = vpop.f32.mrb[208].mxu0 }
0x2019   :  { %v5735_v44 = vadd.f32 %v5734_v61, %v13312_v26  ;;  %v8626_v12 = vpop.f32.mrb[209].mxu0  ;;  %8647 = vmatmul.mubr.msk.f32.gmra.mrb[208].mxu1 %vm1533_vm2, %v12671_v21 }
0x201a   :  { %8649 = vmatprep.mubr.msk.f32.mxu1 %vm9697_vm0, %v13217_v30 }
0x201b   :  { %v12678_v20 = vmul.f32 0.25, %v5735_v44 }
0x201c   :  { %v5739_v45 = vpop.f32.mrb[210].mxu0 }
0x201d   :  { %v5740_v41 = vadd.f32 %v5739_v45, %v13312_v26  ;;  %v8629_v38 = vpop.f32.mrb[211].mxu0  ;;  %8650 = vmatmul.mubr.msk.f32.gmra.mrb[210].mxu1 %vm1533_vm2, %v12678_v20 }
0x201e   :  { %8652 = vmatprep.mubr.msk.f32.mxu1 %vm9697_vm0, %v13217_v30 }
0x201f   :  { %v12685_v17 = vmul.f32 0.25, %v5740_v41 }
0x2021   :  { %8653 = vmatmul.mubr.msk.f32.gmra.mrb[212].mxu1 %vm1533_vm2, %v12685_v17 }
0x2022   :  { %8712 = vmatprep.mubr.msk.f32.mxu1 %vm9697_vm0, %v13217_v30 }
0x20dc   :  { %v5837_v60 = vpop.f32.mrb[200].mxu1 }
0x20dd   :  { %v5838_v19 = vadd.f32 %v5837_v60, %v11395_v56  ;;  %v8636_v16 = vpop.f32.mrb[201].mxu1 }
0x20df   :  { %5871 = vmax.xlane.f32.xlu0 %v5838_v19 }
0x20e0   :  { %v5842_v7 = vpop.f32.mrb[202].mxu1 }
0x20e1   :  { %v5843_v57 = vadd.f32 %v5842_v7, %v11401_v8  ;;  %v8639_v15 = vpop.f32.mrb[203].mxu1 }
0x20e3   :  { %5873 = vmax.xlane.f32.xlu1 %v5843_v57 }
0x20e4   :  { %v5847_v4 = vpop.f32.mrb[204].mxu1 }
0x20e5   :  { %v5848_v29 = vadd.f32 %v5847_v4, %v11407_v6  ;;  %v8642_v23 = vpop.f32.mrb[205].mxu1 }
0x20e7   :  { %5875 = vmax.xlane.f32.xlu0 %v5848_v29 }
0x20e8   :  { %v5852_v63 = vpop.f32.mrb[206].mxu1 }
0x20e9   :  { %v5853_v46 = vadd.f32 %v5852_v63, %v11413_v14  ;;  %v8645_v28 = vpop.f32.mrb[207].mxu1 }
0x20eb   :  { %5877 = vmax.xlane.f32.xlu1 %v5853_v46 }
0x20ec   :  { %v5857_v32 = vpop.f32.mrb[208].mxu1 }
0x20ed   :  { %v5858_v22 = vadd.f32 %v5857_v32, %v11419_v35  ;;  %v8648_v26 = vpop.f32.mrb[209].mxu1 }
0x20ef   :  { %5879 = vmax.xlane.f32.xlu0 %v5858_v22 }
0x20f0   :  { %v5862_v59 = vpop.f32.mrb[210].mxu1 }
0x20f1   :  { %v5863_v54 = vadd.f32 %v5862_v59, %v11425_v31  ;;  %v8651_v10 = vpop.f32.mrb[211].mxu1 }
0x20f3   :  { %5881 = vmax.xlane.f32.xlu1 %v5863_v54 }
0x20f4   :  { %v5867_v39 = vpop.f32.mrb[212].mxu1 }
0x20f5   :  { %v5868_v24 = vadd.f32 %v5867_v39, %v11431_v27  ;;  %v8654_v50 = vpop.f32.mrb[213].mxu1 }
0x20f7   :  { %5883 = vmax.xlane.f32.xlu0 %v5868_v24 }
0x216c   :  { %v5872_v5 = vpop.xlane.xlu0 %5871 }
0x216d   :  { %v5885_v2 = vsub.f32 %v5838_v19, %v5872_v5 }
0x216f   :  { %v5892_v18 = vmul.f32 1.442695, %v5885_v2 }
0x2170   :  { %v5874_v49 = vpop.xlane.xlu1 %5873 }
0x2171   :  { %9547 = vpow2.f32 %v5892_v18  ;;  %v5886_v43 = vsub.f32 %v5843_v57, %v5874_v49 }
0x2173   :  { %v5894_v3 = vmul.f32 1.442695, %v5886_v43 }
0x2174   :  { %v5876_v47 = vpop.xlane.xlu0 %5875 }
0x2175   :  { %9549 = vpow2.f32 %v5894_v3  ;;  %v5887_v33 = vsub.f32 %v5848_v29, %v5876_v47 }
0x2177   :  { %v5896_v61 = vmul.f32 1.442695, %v5887_v33 }
0x2178   :  { %v5878_v44 = vpop.xlane.xlu1 %5877 }
0x2179   :  { %9551 = vpow2.f32 %v5896_v61  ;;  %v5888_v12 = vsub.f32 %v5853_v46, %v5878_v44 }
0x217b   :  { %v9548_v45 = vpop.eup %9547  ;;  %v5898_v41 = vmul.f32 1.442695, %v5888_v12 }
0x217c   :  { %v5880_v38 = vpop.xlane.xlu0 %5879  ;;  %5906 = vadd.xlane.f32.xlu1 %v9548_v45 }
0x217d   :  { %9553 = vpow2.f32 %v5898_v41  ;;  %v5889_v60 = vsub.f32 %v5858_v22, %v5880_v38 }
0x217f   :  { %v9550_v16 = vpop.eup %9549  ;;  %v5900_v19 = vmul.f32 1.442695, %v5889_v60 }
0x2180   :  { %5908 = vadd.xlane.f32.xlu0 %v9550_v16  ;;  %v5882_v7 = vpop.xlane.xlu1 %5881 }
0x2181   :  { %9555 = vpow2.f32 %v5900_v19  ;;  %v5890_v57 = vsub.f32 %v5863_v54, %v5882_v7 }
0x2183   :  { %v9552_v15 = vpop.eup %9551  ;;  %v5902_v4 = vmul.f32 1.442695, %v5890_v57 }
0x2184   :  { %5910 = vadd.xlane.f32.xlu1 %v9552_v15  ;;  %v5884_v29 = vpop.xlane.xlu0 %5883 }
0x2185   :  { %9557 = vpow2.f32 %v5902_v4  ;;  %v5891_v23 = vsub.f32 %v5868_v24, %v5884_v29 }
0x2187   :  { %v9554_v63 = vpop.eup %9553  ;;  %v5904_v46 = vmul.f32 1.442695, %v5891_v23  ;;  %v13315_v23 = vld [vmem:[#allocation15_spill] sm:$0xff] }
0x2188   :  { %5912 = vadd.xlane.f32.xlu0 %v9554_v63 }
0x2189   :  { %9559 = vpow2.f32 %v5904_v46 }
0x218b   :  { %v9556_v28 = vpop.eup %9555 }
0x218c   :  { %5914 = vadd.xlane.f32.xlu1 %v9556_v28 }
0x218f   :  { %v9558_v32 = vpop.eup %9557 }
0x2190   :  { %5916 = vadd.xlane.f32.xlu0 %v9558_v32 }
0x2193   :  { %v9560_v22 = vpop.eup %9559 }
0x2194   :  { %5918 = vadd.xlane.f32.xlu1 %v9560_v22 }
0x21a5   :  { %6164 = vrot.lane.b32.xlu1 %v12649_v11, %s9702_s3 }
0x21a6   :  { %6162 = vrot.lane.b32.xlu0 %v12641_v42, %s9702_s3 }
0x21a9   :  { %6166 = vrot.lane.b32.xlu1 %v12657_v25, %s9702_s3 }
0x21aa   :  { %6168 = vrot.lane.b32.xlu0 %v12664_v40, %s9702_s3 }
0x21ad   :  { %6170 = vrot.lane.b32.xlu1 %v12671_v21, %s9702_s3 }
0x21ae   :  { %6172 = vrot.lane.b32.xlu0 %v12678_v20, %s9702_s3 }
0x21b1   :  { %6174 = vrot.lane.b32.xlu1 %v12685_v17, %s9702_s3 }
0x2209   :  { %v5907_v26 = vpop.xlane.xlu1 %5906 }
0x220a   :  { %9561 = vrcp.f32 %v5907_v26 }
0x220d   :  { %v5909_v11 = vpop.xlane.xlu0 %5908 }
0x220e   :  { %9563 = vrcp.f32 %v5909_v11 }
0x2211   :  { %v5911_v42 = vpop.xlane.xlu1 %5910 }
0x2212   :  { %9565 = vrcp.f32 %v5911_v42 }
0x2214   :  { %v9562_v59 = vpop.eup %9561 }
0x2215   :  { %v5921_v25 = vmul.f32 %v9562_v59, %v9548_v45  ;;  %v5913_v54 = vpop.xlane.xlu0 %5912 }
0x2216   :  { %9567 = vrcp.f32 %v5913_v54 }
0x2217   :  { %8688 = vmatmul.mubr.f32.vlgmr.msra.gmra.mrb[212].mxu0 %v5921_v25 }
0x2218   :  { %v9564_v40 = vpop.eup %9563  ;;  %9095 = vmatpush3.bf16.msra.mxu0 %v11510_v1  ;;  %8690 = vmatprep.mubr.msk.f32.mxu0 %vm9697_vm0, %v13217_v30 }
0x2219   :  { %v5915_v21 = vpop.xlane.xlu1 %5914  ;;  %v5923_v20 = vmul.f32 %v9564_v40, %v9550_v16  ;;  %9120 = vmatprep.subr.bf16.mxu0 %v13216_v36 }
0x221a   :  { %9569 = vrcp.f32 %v5915_v21 }
0x221b   :  { %8691 = vmatmul.mubr.f32.gmra.mrb[214].mxu0 %v5923_v20 }
0x221c   :  { %v9566_v17 = vpop.eup %9565  ;;  %8693 = vmatprep.mubr.msk.f32.mxu0 %vm9697_vm0, %v13217_v30 }
0x221d   :  { %v5917_v10 = vpop.xlane.xlu0 %5916  ;;  %v5925_v39 = vmul.f32 %v9566_v17, %v9552_v15 }
0x221e   :  { %9571 = vrcp.f32 %v5917_v10 }
0x221f   :  { %8694 = vmatmul.mubr.f32.gmra.mrb[216].mxu0 %v5925_v39 }
0x2220   :  { %v9568_v24 = vpop.eup %9567  ;;  %8696 = vmatprep.mubr.msk.f32.mxu0 %vm9697_vm0, %v13217_v30 }
0x2221   :  { %v5919_v1 = vpop.xlane.xlu1 %5918  ;;  %v5927_v50 = vmul.f32 %v9568_v24, %v9554_v63  ;;  %v6163_v47 = vpop.permute.xlu0 %6162 }
0x2222   :  { %9573 = vrcp.f32 %v5919_v1 }
0x2223   :  { %8697 = vmatmul.mubr.f32.gmra.mrb[218].mxu0 %v5927_v50 }
0x2224   :  { %v9570_v5 = vpop.eup %9569  ;;  %8699 = vmatprep.mubr.msk.f32.mxu0 %vm9697_vm0, %v13217_v30 }
0x2225   :  { %v5929_v2 = vmul.f32 %v9570_v5, %v9556_v28  ;;  %v6165_v33 = vpop.permute.xlu1 %6164  ;;  %v6169_v44 = vpop.permute.xlu0 %6168  ;;  %v13316_v28 = vld [vmem:[#allocation18_spill] sm:$0xff] }
0x2227   :  { %8700 = vmatmul.mubr.f32.gmra.mrb[220].mxu0 %v5929_v2 }
0x2228   :  { %v9572_v18 = vpop.eup %9571  ;;  %8702 = vmatprep.mubr.msk.f32.mxu0 %vm9697_vm0, %v13217_v30 }
0x2229   :  { %v5931_v49 = vmul.f32 %v9572_v18, %v9558_v32  ;;  %v6167_v61 = vpop.permute.xlu1 %6166 }
0x222b   :  { %8703 = vmatmul.mubr.f32.gmra.mrb[222].mxu0 %v5931_v49 }
0x222c   :  { %v9574_v43 = vpop.eup %9573  ;;  %8705 = vmatprep.mubr.msk.f32.mxu0 %vm9697_vm0, %v13217_v30 }
0x222d   :  { %v5933_v3 = vmul.f32 %v9574_v43, %v9560_v22  ;;  %v6171_v12 = vpop.permute.xlu1 %6170 }
0x222f   :  { %8706 = vmatmul.mubr.f32.gmra.mrb[224].mxu0 %v5933_v3 }
0x2230   :  { %8737 = vmatprep.mubr.msk.f32.mxu0 %vm9697_vm0, %v13217_v30 }
0x2231   :  { %v6175_v45 = vpop.permute.xlu1 %6174 }
0x2233   :  { %8738 = vmatmul.mubr.msk.f32.vlgmr.msra.gmra.mrb[226].mxu0 %vm1533_vm2, %v6163_v47 }
0x2234   :  { %8740 = vmatprep.mubr.msk.f32.mxu0 %vm9697_vm0, %v13217_v30  ;;  %9122 = vmatpush3.bf16.msra.mxu0 %v11659_v52  ;;  %v6173_v52 = vpop.permute.xlu0 %6172 }
0x2237   :  { %8741 = vmatmul.mubr.msk.f32.gmra.mrb[228].mxu0 %vm1533_vm2, %v6165_v33 }
0x2238   :  { %8743 = vmatprep.mubr.msk.f32.mxu0 %vm9697_vm0, %v13217_v30 }
0x223b   :  { %8744 = vmatmul.mubr.msk.f32.gmra.mrb[230].mxu0 %vm1533_vm2, %v6167_v61 }
0x223c   :  { %8746 = vmatprep.mubr.msk.f32.mxu0 %vm9697_vm0, %v13217_v30 }
0x223f   :  { %8747 = vmatmul.mubr.msk.f32.gmra.mrb[232].mxu0 %vm1533_vm2, %v6169_v44 }
0x2240   :  { %8749 = vmatprep.mubr.msk.f32.mxu0 %vm9697_vm0, %v13217_v30 }
0x2243   :  { %8750 = vmatmul.mubr.msk.f32.gmra.mrb[234].mxu0 %vm1533_vm2, %v6171_v12 }
0x2244   :  { %8752 = vmatprep.mubr.msk.f32.mxu0 %vm9697_vm0, %v13217_v30 }
0x2247   :  { %8753 = vmatmul.mubr.msk.f32.gmra.mrb[236].mxu0 %vm1533_vm2, %v6173_v52 }
0x2248   :  { %8755 = vmatprep.mubr.msk.f32.mxu0 %vm9697_vm0, %v13217_v30 }
0x224b   :  { %8756 = vmatmul.mubr.msk.f32.gmra.mrb[238].mxu0 %vm1533_vm2, %v6175_v45 }
0x224c   :  { %8815 = vmatprep.mubr.msk.f32.mxu0 %vm9697_vm0, %v13217_v30 }
0x22ea   :  { %v6000_v41 = vpop.f32.mrb[212].mxu0 }
0x22eb   :  { %v8689_v38 = vpop.f32.mrb[213].mxu0  ;;  %8713 = vmatmul.mubr.msk.f32.vlgmr.msra.gmra.mrb[214].mxu1 %vm1533_vm2, %v6000_v41 }
0x22ec   :  { %9098 = vmatpush3.bf16.msra.mxu1 %v11555_v62  ;;  %8715 = vmatprep.mubr.msk.f32.mxu1 %vm9697_vm0, %v13217_v30  ;;  %v13313_v62 = vld [vmem:[#allocation13_spill] sm:$0xff] }
0x22ed   :  { %9099 = vmatprep.subr.bf16.mxu1 %v13216_v36 }
0x22ee   :  { %v6005_v60 = vpop.f32.mrb[214].mxu0 }
0x22ef   :  { %v8692_v16 = vpop.f32.mrb[215].mxu0  ;;  %8716 = vmatmul.mubr.msk.f32.gmra.mrb[216].mxu1 %vm1533_vm2, %v6005_v60 }
0x22f0   :  { %9101 = vmatpush3.bf16.msra.mxu1 %v11562_v51  ;;  %8718 = vmatprep.mubr.msk.f32.mxu1 %vm9697_vm0, %v13217_v30  ;;  %v13314_v51 = vld [vmem:[#allocation16_spill] sm:$0xff] }
0x22f1   :  { %9102 = vmatprep.subr.bf16.mxu1 %v13216_v36 }
0x22f2   :  { %v6010_v19 = vpop.f32.mrb[216].mxu0 }
0x22f3   :  { %v8695_v7 = vpop.f32.mrb[217].mxu0  ;;  %8719 = vmatmul.mubr.msk.f32.gmra.mrb[218].mxu1 %vm1533_vm2, %v6010_v19 }
0x22f4   :  { %9104 = vmatpush3.bf16.msra.mxu1 %v13313_v62  ;;  %8721 = vmatprep.mubr.msk.f32.mxu1 %vm9697_vm0, %v13217_v30 }
0x22f5   :  { %9105 = vmatprep.subr.bf16.mxu1 %v13216_v36 }
0x22f6   :  { %v6015_v57 = vpop.f32.mrb[218].mxu0 }
0x22f7   :  { %v8698_v15 = vpop.f32.mrb[219].mxu0  ;;  %8722 = vmatmul.mubr.msk.f32.gmra.mrb[220].mxu1 %vm1533_vm2, %v6015_v57 }
0x22f8   :  { %9107 = vmatpush3.bf16.msra.mxu1 %v13314_v51  ;;  %8724 = vmatprep.mubr.msk.f32.mxu1 %vm9697_vm0, %v13217_v30 }
0x22f9   :  { %9108 = vmatprep.subr.bf16.mxu1 %v13216_v36 }
0x22fa   :  { %v6020_v4 = vpop.f32.mrb[220].mxu0 }
0x22fb   :  { %v8701_v29 = vpop.f32.mrb[221].mxu0  ;;  %8725 = vmatmul.mubr.msk.f32.gmra.mrb[222].mxu1 %vm1533_vm2, %v6020_v4 }
0x22fc   :  { %9110 = vmatpush3.bf16.msra.mxu1 %v13315_v23  ;;  %8727 = vmatprep.mubr.msk.f32.mxu1 %vm9697_vm0, %v13217_v30 }
0x22fd   :  { %9111 = vmatprep.subr.bf16.mxu1 %v13216_v36 }
0x22fe   :  { %v6025_v63 = vpop.f32.mrb[222].mxu0 }
0x22ff   :  { %v8704_v46 = vpop.f32.mrb[223].mxu0  ;;  %8728 = vmatmul.mubr.msk.f32.gmra.mrb[224].mxu1 %vm1533_vm2, %v6025_v63 }
0x2300   :  { %9113 = vmatpush3.bf16.msra.mxu1 %v13316_v28  ;;  %8730 = vmatprep.mubr.msk.f32.mxu1 %vm9697_vm0, %v13217_v30 }
0x2301   :  { %9114 = vmatprep.subr.bf16.mxu1 %v13216_v36 }
0x2302   :  { %v6030_v32 = vpop.f32.mrb[224].mxu0 }
0x2303   :  { %v8707_v22 = vpop.f32.mrb[225].mxu0  ;;  %8731 = vmatmul.mubr.msk.f32.gmra.mrb[226].mxu1 %vm1533_vm2, %v6030_v32 }
0x2304   :  { %9116 = vmatpush3.bf16.msra.mxu1 %v11663_v9  ;;  %8790 = vmatprep.mubr.msk.f32.mxu1 %vm9697_vm0, %v13217_v30 }
0x2305   :  { %9117 = vmatprep.subr.bf16.mxu1 %v13216_v36 }
0x2306   :  { %v6256_v26 = vpop.f32.mrb[226].mxu0 }
0x2307   :  { %v6257_v11 = vadd.f32 %v6256_v26, %v11395_v56  ;;  %v8739_v42 = vpop.f32.mrb[227].mxu0 }
0x2308   :  { %9119 = vmatpush3.bf16.msra.mxu1 %v11667_v13 }
0x2309   :  { %6290 = vmax.xlane.f32.xlu0 %v6257_v11  ;;  %9123 = vmatprep.subr.bf16.mxu1 %v13216_v36 }
0x230a   :  { %v6261_v59 = vpop.f32.mrb[228].mxu0 }
0x230b   :  { %v6262_v25 = vadd.f32 %v6261_v59, %v11401_v8  ;;  %v8742_v54 = vpop.f32.mrb[229].mxu0 }
0x230d   :  { %6292 = vmax.xlane.f32.xlu1 %v6262_v25 }
0x230e   :  { %v6266_v9 = vpop.f32.mrb[230].mxu0 }
0x230f   :  { %v6267_v40 = vadd.f32 %v6266_v9, %v11407_v6  ;;  %v8745_v21 = vpop.f32.mrb[231].mxu0 }
0x2311   :  { %6294 = vmax.xlane.f32.xlu0 %v6267_v40 }
0x2312   :  { %v6271_v20 = vpop.f32.mrb[232].mxu0 }
0x2313   :  { %v6272_v17 = vadd.f32 %v6271_v20, %v11413_v14  ;;  %v8748_v56 = vpop.f32.mrb[233].mxu0 }
0x2315   :  { %6296 = vmax.xlane.f32.xlu0 %v6272_v17 }
0x2316   :  { %v6276_v10 = vpop.f32.mrb[234].mxu0 }
0x2317   :  { %v6277_v13 = vadd.f32 %v6276_v10, %v11419_v35  ;;  %v8751_v39 = vpop.f32.mrb[235].mxu0 }
0x2319   :  { %6298 = vmax.xlane.f32.xlu1 %v6277_v13 }
0x231a   :  { %v6281_v24 = vpop.f32.mrb[236].mxu0 }
0x231b   :  { %v6282_v8 = vadd.f32 %v6281_v24, %v11425_v31  ;;  %v8754_v1 = vpop.f32.mrb[237].mxu0  ;;  %v13317_v24 = vld [vmem:[#allocation17_spill] sm:$0xff] }
0x231d   :  { %6300 = vmax.xlane.f32.xlu0 %v6282_v8 }
0x231e   :  { %v6286_v50 = vpop.f32.mrb[238].mxu0 }
0x231f   :  { %v6287_v6 = vadd.f32 %v6286_v50, %v11431_v27  ;;  %v8757_v5 = vpop.f32.mrb[239].mxu0 }
0x2321   :  { %6302 = vmax.xlane.f32.xlu1 %v6287_v6 }
0x2396   :  { %v6291_v2 = vpop.xlane.xlu0 %6290 }
0x2397   :  { %v6304_v18 = vsub.f32 %v6257_v11, %v6291_v2 }
0x2399   :  { %v6311_v14 = vmul.f32 1.442695, %v6304_v18 }
0x239a   :  { %v6293_v49 = vpop.xlane.xlu1 %6292 }
0x239b   :  { %9575 = vpow2.f32 %v6311_v14  ;;  %v6305_v43 = vsub.f32 %v6262_v25, %v6293_v49 }
0x239d   :  { %v6313_v3 = vmul.f32 1.442695, %v6305_v43 }
0x239e   :  { %v6295_v35 = vpop.xlane.xlu0 %6294 }
0x239f   :  { %9577 = vpow2.f32 %v6313_v3  ;;  %v6306_v47 = vsub.f32 %v6267_v40, %v6295_v35 }
0x23a1   :  { %v6315_v33 = vmul.f32 1.442695, %v6306_v47 }
0x23a2   :  { %v6297_v61 = vpop.xlane.xlu0 %6296 }
0x23a3   :  { %9579 = vpow2.f32 %v6315_v33  ;;  %v6307_v31 = vsub.f32 %v6272_v17, %v6297_v61 }
0x23a5   :  { %v9576_v44 = vpop.eup %9575  ;;  %v6317_v12 = vmul.f32 1.442695, %v6307_v31 }
0x23a6   :  { %6325 = vadd.xlane.f32.xlu0 %v9576_v44  ;;  %v6299_v27 = vpop.xlane.xlu1 %6298 }
0x23a7   :  { %9581 = vpow2.f32 %v6317_v12  ;;  %v6308_v52 = vsub.f32 %v6277_v13, %v6299_v27 }
0x23a9   :  { %v9578_v45 = vpop.eup %9577  ;;  %v6319_v41 = vmul.f32 1.442695, %v6308_v52 }
0x23aa   :  { %v6301_v38 = vpop.xlane.xlu0 %6300  ;;  %6327 = vadd.xlane.f32.xlu1 %v9578_v45 }
0x23ab   :  { %9583 = vpow2.f32 %v6319_v41  ;;  %v6309_v60 = vsub.f32 %v6282_v8, %v6301_v38 }
0x23ad   :  { %v9580_v16 = vpop.eup %9579  ;;  %v6321_v19 = vmul.f32 1.442695, %v6309_v60 }
0x23ae   :  { %6329 = vadd.xlane.f32.xlu0 %v9580_v16  ;;  %v6303_v7 = vpop.xlane.xlu1 %6302 }
0x23af   :  { %9585 = vpow2.f32 %v6321_v19  ;;  %v6310_v62 = vsub.f32 %v6287_v6, %v6303_v7  ;;  %v13318_v6 = vld [vmem:[#allocation20_spill] sm:$0xff] }
0x23b1   :  { %v9582_v57 = vpop.eup %9581  ;;  %v6323_v15 = vmul.f32 1.442695, %v6310_v62 }
0x23b2   :  { %6331 = vadd.xlane.f32.xlu1 %v9582_v57 }
0x23b3   :  { %9587 = vpow2.f32 %v6323_v15 }
0x23b5   :  { %v9584_v51 = vpop.eup %9583 }
0x23b6   :  { %6333 = vadd.xlane.f32.xlu0 %v9584_v51 }
0x23b9   :  { %v9586_v4 = vpop.eup %9585 }
0x23ba   :  { %6335 = vadd.xlane.f32.xlu1 %v9586_v4 }
0x23bd   :  { %v9588_v29 = vpop.eup %9587 }
0x23be   :  { %v12794_v23 = vpop.f32.mrb[214].mxu1  ;;  %6337 = vadd.xlane.f32.xlu0 %v9588_v29 }
0x23bf   :  { %v8714_v63 = vpop.f32.mrb[215].mxu1 }
0x23c2   :  { %v12796_v46 = vpop.f32.mrb[216].mxu1 }
0x23c3   :  { %v8717_v28 = vpop.f32.mrb[217].mxu1 }
0x23c6   :  { %v12798_v32 = vpop.f32.mrb[218].mxu1 }
0x23c7   :  { %v8720_v22 = vpop.f32.mrb[219].mxu1 }
0x23ca   :  { %v12800_v26 = vpop.f32.mrb[220].mxu1 }
0x23cb   :  { %v8723_v11 = vpop.f32.mrb[221].mxu1 }
0x23ce   :  { %v12802_v42 = vpop.f32.mrb[222].mxu1 }
0x23cf   :  { %v8726_v59 = vpop.f32.mrb[223].mxu1 }
0x23d2   :  { %v12804_v25 = vpop.f32.mrb[224].mxu1 }
0x23d3   :  { %v8729_v54 = vpop.f32.mrb[225].mxu1 }
0x23d6   :  { %v12806_v9 = vpop.f32.mrb[226].mxu1 }
0x23d7   :  { %v8732_v40 = vpop.f32.mrb[227].mxu1 }
0x2433   :  { %v6326_v21 = vpop.xlane.xlu0 %6325 }
0x2434   :  { %9589 = vrcp.f32 %v6326_v21 }
0x2437   :  { %v6328_v20 = vpop.xlane.xlu1 %6327 }
0x2438   :  { %9591 = vrcp.f32 %v6328_v20 }
0x243b   :  { %v6330_v17 = vpop.xlane.xlu0 %6329 }
0x243c   :  { %9593 = vrcp.f32 %v6330_v17 }
0x243e   :  { %v9590_v56 = vpop.eup %9589 }
0x243f   :  { %v6340_v10 = vmul.f32 %v9590_v56, %v9576_v44  ;;  %v6332_v13 = vpop.xlane.xlu1 %6331 }
0x2440   :  { %9595 = vrcp.f32 %v6332_v13 }
0x2441   :  { %8791 = vmatmul.mubr.f32.vlgmr.msra.gmra.mrb[228].mxu1 %v6340_v10 }
0x2442   :  { %v9592_v39 = vpop.eup %9591  ;;  %8793 = vmatprep.mubr.msk.f32.mxu1 %vm9697_vm0, %v13217_v30  ;;  %9125 = vmatpush3.bf16.msra.mxu1 %v13317_v24 }
0x2443   :  { %v6334_v8 = vpop.xlane.xlu0 %6333  ;;  %v6342_v1 = vmul.f32 %v9592_v39, %v9578_v45  ;;  %9126 = vmatprep.subr.bf16.mxu1 %v13216_v36 }
0x2444   :  { %9597 = vrcp.f32 %v6334_v8 }
0x2445   :  { %8794 = vmatmul.mubr.f32.gmra.mrb[230].mxu1 %v6342_v1 }
0x2446   :  { %v9594_v50 = vpop.eup %9593  ;;  %8796 = vmatprep.mubr.msk.f32.mxu1 %vm9697_vm0, %v13217_v30  ;;  %9128 = vmatpush3.bf16.msra.mxu1 %v13318_v6 }
0x2447   :  { %v6336_v5 = vpop.xlane.xlu1 %6335  ;;  %v6344_v2 = vmul.f32 %v9594_v50, %v9580_v16 }
0x2448   :  { %9599 = vrcp.f32 %v6336_v5 }
0x2449   :  { %8797 = vmatmul.mubr.f32.gmra.mrb[232].mxu1 %v6344_v2 }
0x244a   :  { %v9596_v18 = vpop.eup %9595  ;;  %8799 = vmatprep.mubr.msk.f32.mxu1 %vm9697_vm0, %v13217_v30 }
0x244b   :  { %v6338_v14 = vpop.xlane.xlu0 %6337  ;;  %v6346_v49 = vmul.f32 %v9596_v18, %v9582_v57  ;;  %v9686_v57 = vld [vmem:[%s13073_s13] ss:$0 sm:$0xff] }
0x244c   :  { %9601 = vrcp.f32 %v6338_v14  ;;  %v6155_v15 = vadd.f32 %v9686_v57, %v12794_v23  ;;  %v6156_v63 = vadd.f32 %v9686_v57, %v12796_v46  ;;  %v6157_v40 = vadd.f32 %v9686_v57, %v12798_v32 }
0x244d   :  { %8800 = vmatmul.mubr.f32.gmra.mrb[234].mxu1 %v6346_v49  ;;  %v6158_v46 = vadd.f32 %v9686_v57, %v12800_v26  ;;  %v6159_v32 = vadd.f32 %v9686_v57, %v12802_v42  ;;  %v6160_v26 = vadd.f32 %v9686_v57, %v12804_v25  ;;  %v6161_v42 = vadd.f32 %v9686_v57, %v12806_v9 }
0x244e   :  { %v9598_v36 = vpop.eup %9597  ;;  %8802 = vmatprep.mubr.msk.f32.mxu1 %vm9697_vm0, %v13217_v30 }
0x244f   :  { %v6348_v43 = vmul.f32 %v9598_v36, %v9584_v51 }
0x2451   :  { %8803 = vmatmul.mubr.f32.gmra.mrb[236].mxu1 %v6348_v43 }
0x2452   :  { %v9600_v3 = vpop.eup %9599  ;;  %8805 = vmatprep.mubr.msk.f32.mxu1 %vm9697_vm0, %v13217_v30 }
0x2453   :  { %v6350_v35 = vmul.f32 %v9600_v3, %v9586_v4 }
0x2455   :  { %8806 = vmatmul.mubr.f32.gmra.mrb[238].mxu1 %v6350_v35 }
0x2456   :  { %v9602_v47 = vpop.eup %9601  ;;  %8808 = vmatprep.mubr.msk.f32.mxu1 %vm9697_vm0, %v13217_v30 }
0x2457   :  { %v6352_v33 = vmul.f32 %v9602_v47, %v9588_v29 }
0x2459   :  { %8809 = vmatmul.mubr.f32.gmra.mrb[240].mxu1 %v6352_v33 }
0x245a   :  { %8844 = vmatprep.mubr.msk.f32.mxu1 %vm9697_vm0, %v13217_v30 }
0x2514   :  { %v6419_v61 = vpop.f32.mrb[228].mxu1 }
0x2515   :  { %v8792_v31 = vpop.f32.mrb[229].mxu1  ;;  %8816 = vmatmul.mubr.msk.f32.vlgmr.msra.gmra.mrb[240].mxu0 %vm1533_vm2, %v6419_v61 }
0x2516   :  { %8818 = vmatprep.mubr.msk.f32.mxu0 %vm9697_vm0, %v13217_v30 }
0x2518   :  { %v6424_v44 = vpop.f32.mrb[230].mxu1 }
0x2519   :  { %v8795_v12 = vpop.f32.mrb[231].mxu1  ;;  %8819 = vmatmul.mubr.msk.f32.gmra.mrb[242].mxu0 %vm1533_vm2, %v6424_v44 }
0x251a   :  { %8821 = vmatprep.mubr.msk.f32.mxu0 %vm9697_vm0, %v13217_v30 }
0x251c   :  { %v6429_v27 = vpop.f32.mrb[232].mxu1 }
0x251d   :  { %v8798_v52 = vpop.f32.mrb[233].mxu1  ;;  %8822 = vmatmul.mubr.msk.f32.gmra.mrb[244].mxu0 %vm1533_vm2, %v6429_v27 }
0x251e   :  { %8824 = vmatprep.mubr.msk.f32.mxu0 %vm9697_vm0, %v13217_v30 }
0x2520   :  { %v6434_v45 = vpop.f32.mrb[234].mxu1 }
0x2521   :  { %v8801_v41 = vpop.f32.mrb[235].mxu1  ;;  %8825 = vmatmul.mubr.msk.f32.gmra.mrb[246].mxu0 %vm1533_vm2, %v6434_v45 }
0x2522   :  { %8827 = vmatprep.mubr.msk.f32.mxu0 %vm9697_vm0, %v13217_v30 }
0x2524   :  { %v6439_v38 = vpop.f32.mrb[236].mxu1 }
0x2525   :  { %v8804_v60 = vpop.f32.mrb[237].mxu1  ;;  %8828 = vmatmul.mubr.msk.f32.gmra.mrb[248].mxu0 %vm1533_vm2, %v6439_v38 }
0x2526   :  { %8830 = vmatprep.mubr.msk.f32.mxu0 %vm9697_vm0, %v13217_v30 }
0x2528   :  { %v6444_v16 = vpop.f32.mrb[238].mxu1 }
0x2529   :  { %v8807_v19 = vpop.f32.mrb[239].mxu1  ;;  %8831 = vmatmul.mubr.msk.f32.gmra.mrb[250].mxu0 %vm1533_vm2, %v6444_v16 }
0x252a   :  { %8833 = vmatprep.mubr.msk.f32.mxu0 %vm9697_vm0, %v13217_v30 }
0x252c   :  { %v6449_v7 = vpop.f32.mrb[240].mxu1 }
0x252d   :  { %v8810_v62 = vpop.f32.mrb[241].mxu1  ;;  %8834 = vmatmul.mubr.msk.f32.gmra.mrb[252].mxu0 %vm1533_vm2, %v6449_v7 }
0x25e8   :  { %v6540_v51 = vpop.f32.mrb[240].mxu0 }
0x25e9   :  { %v6574_v4 = vadd.f32 %v6540_v51, %v6155_v15  ;;  %v8817_v29 = vpop.f32.mrb[241].mxu0 }
0x25eb   :  { %v6581_v28 = vadd.f32 %v6574_v4, %v12565_v34 }
0x25ec   :  { %v6545_v22 = vpop.f32.mrb[242].mxu0 }
0x25ed   :  { %v6575_v11 = vadd.f32 %v6545_v22, %v6156_v63  ;;  %v8820_v59 = vpop.f32.mrb[243].mxu0  ;;  %v6588_v54 = vsel %vm323_vm1, %v6581_v28, 0.0 }
0x25ee   :  { %6589 = vadd.xlane.f32.xlu1 %v6588_v54 }
0x25ef   :  { %v6582_v21 = vadd.f32 %v6575_v11, %v12575_v53 }
0x25f0   :  { %v6550_v20 = vpop.f32.mrb[244].mxu0 }
0x25f1   :  { %v6576_v17 = vadd.f32 %v6550_v20, %v6157_v40  ;;  %v8823_v23 = vpop.f32.mrb[245].mxu0  ;;  %v6591_v56 = vsel %vm323_vm1, %v6582_v21, 0.0 }
0x25f2   :  { %6592 = vadd.xlane.f32.xlu0 %v6591_v56 }
0x25f3   :  { %v6583_v34 = vadd.f32 %v6576_v17, %v12586_v55 }
0x25f4   :  { %v6555_v10 = vpop.f32.mrb[246].mxu0 }
0x25f5   :  { %v6577_v13 = vadd.f32 %v6555_v10, %v6158_v46  ;;  %v8826_v39 = vpop.f32.mrb[247].mxu0  ;;  %v6594_v24 = vsel %vm323_vm1, %v6583_v34, 0.0 }
0x25f6   :  { %6595 = vadd.xlane.f32.xlu1 %v6594_v24 }
0x25f7   :  { %v6584_v53 = vadd.f32 %v6577_v13, %v12597_v58 }
0x25f8   :  { %v6560_v8 = vpop.f32.mrb[248].mxu0 }
0x25f9   :  { %v6578_v1 = vadd.f32 %v6560_v8, %v6159_v32  ;;  %v8829_v50 = vpop.f32.mrb[249].mxu0  ;;  %v6597_v6 = vsel %vm323_vm1, %v6584_v53, 0.0 }
0x25fa   :  { %6598 = vadd.xlane.f32.xlu0 %v6597_v6 }
0x25fb   :  { %v6585_v55 = vadd.f32 %v6578_v1, %v12608_v0 }
0x25fc   :  { %v6565_v5 = vpop.f32.mrb[250].mxu0 }
0x25fd   :  { %v6579_v2 = vadd.f32 %v6565_v5, %v6160_v26  ;;  %v8832_v18 = vpop.f32.mrb[251].mxu0  ;;  %v6600_v14 = vsel %vm323_vm1, %v6585_v55, 0.0  ;;  %v13319_v5 = vld [vmem:[#allocation19_spill] sm:$0xff] }
0x25fe   :  { %6601 = vadd.xlane.f32.xlu1 %v6600_v14 }
0x25ff   :  { %v6586_v58 = vadd.f32 %v6579_v2, %v12619_v37 }
0x2600   :  { %v6570_v49 = vpop.f32.mrb[252].mxu0 }
0x2601   :  { %v6580_v36 = vadd.f32 %v6570_v49, %v6161_v42  ;;  %v8835_v43 = vpop.f32.mrb[253].mxu0  ;;  %v6603_v3 = vsel %vm323_vm1, %v6586_v58, 0.0  ;;  %v13320_v42 = vld [vmem:[#allocation22_spill] sm:$0xff] }
0x2602   :  { %6604 = vadd.xlane.f32.xlu0 %v6603_v3  ;;  %v9687_v3 = vld [vmem:[%s13192_s27] sm:$0xff] }
0x2603   :  { %v6587_v25 = vadd.f32 %v6580_v36, %v12630_v48 }
0x2605   :  { %v6606_v0 = vsel %vm323_vm1, %v6587_v25, 0.0 }
0x2606   :  { %6607 = vadd.xlane.f32.xlu1 %v6606_v0 }
0x267b   :  { %v6590_v35 = vpop.xlane.xlu1 %6589 }
0x267c   :  { %v6609_v47 = vmul.f32 0.03125, %v6590_v35 }
0x267e   :  { %v6616_v33 = vsub.f32 %v6581_v28, %v6609_v47 }
0x267f   :  { %v6593_v61 = vpop.xlane.xlu0 %6592 }
0x2680   :  { %v6610_v31 = vmul.f32 0.03125, %v6593_v61  ;;  %v6623_v44 = vmul.f32 %v6616_v33, %v6616_v33 }
0x2682   :  { %v6617_v9 = vsub.f32 %v6582_v21, %v6610_v31  ;;  %v6630_v37 = vsel %vm323_vm1, %v6623_v44, 0.0 }
0x2683   :  { %6631 = vadd.xlane.f32.xlu0 %v6630_v37  ;;  %v6596_v12 = vpop.xlane.xlu1 %6595 }
0x2684   :  { %v6611_v27 = vmul.f32 0.03125, %v6596_v12  ;;  %v6624_v52 = vmul.f32 %v6617_v9, %v6617_v9 }
0x2686   :  { %v12869_v45 = vsub.f32 %v6583_v34, %v6611_v27  ;;  %v6633_v48 = vsel %vm323_vm1, %v6624_v52, 0.0 }
0x2687   :  { %v6599_v41 = vpop.xlane.xlu0 %6598  ;;  %6634 = vadd.xlane.f32.xlu1 %v6633_v48 }
0x2688   :  { %v6612_v38 = vmul.f32 0.03125, %v6599_v41  ;;  %v6625_v60 = vmul.f32 %v12869_v45, %v12869_v45  ;;  %v9689_v41 = vld [vmem:[%s13192_s27 + $0x10] sm:$0xff] }
0x268a   :  { %v12874_v16 = vsub.f32 %v6584_v53, %v6612_v38  ;;  %v6636_v19 = vsel %vm323_vm1, %v6625_v60, 0.0 }
0x268b   :  { %6637 = vadd.xlane.f32.xlu0 %v6636_v19  ;;  %v6602_v7 = vpop.xlane.xlu1 %6601 }
0x268c   :  { %v6613_v62 = vmul.f32 0.03125, %v6602_v7  ;;  %v6626_v57 = vmul.f32 %v12874_v16, %v12874_v16 }
0x268e   :  { %v12879_v15 = vsub.f32 %v6585_v55, %v6613_v62  ;;  %v6639_v51 = vsel %vm323_vm1, %v6626_v57, 0.0  ;;  %v9690_v62 = vld [vmem:[%s13192_s27 + $0x18] sm:$0xff] }
0x268f   :  { %v6605_v4 = vpop.xlane.xlu0 %6604  ;;  %6640 = vadd.xlane.f32.xlu1 %v6639_v51 }
0x2690   :  { %v6614_v29 = vmul.f32 0.03125, %v6605_v4  ;;  %v6627_v63 = vmul.f32 %v12879_v15, %v12879_v15 }
0x2692   :  { %v12884_v28 = vsub.f32 %v6586_v58, %v6614_v29  ;;  %v6642_v22 = vsel %vm323_vm1, %v6627_v63, 0.0  ;;  %v9691_v63 = vld [vmem:[%s13192_s27 + $0x20] sm:$0xff] }
0x2693   :  { %6643 = vadd.xlane.f32.xlu0 %v6642_v22  ;;  %v6608_v11 = vpop.xlane.xlu1 %6607 }
0x2694   :  { %v6615_v59 = vmul.f32 0.03125, %v6608_v11  ;;  %v6628_v54 = vmul.f32 %v12884_v28, %v12884_v28 }
0x2696   :  { %v12889_v40 = vsub.f32 %v6587_v25, %v6615_v59  ;;  %v6645_v21 = vsel %vm323_vm1, %v6628_v54, 0.0 }
0x2697   :  { %6646 = vadd.xlane.f32.xlu1 %v6645_v21  ;;  %v9692_v21 = vld [vmem:[%s13192_s27 + $0x28] sm:$0xff] }
0x2698   :  { %v6629_v20 = vmul.f32 %v12889_v40, %v12889_v40 }
0x269a   :  { %v6648_v17 = vsel %vm323_vm1, %v6629_v20, 0.0 }
0x269b   :  { %6649 = vadd.xlane.f32.xlu0 %v6648_v17 }
0x2710   :  { %v6632_v23 = vpop.xlane.xlu0 %6631 }
0x2711   :  { %v6651_v56 = vmul.f32 0.03125, %v6632_v23 }
0x2713   :  { %v6658_v46 = vadd.f32 1e-05, %v6651_v56 }
0x2714   :  { %v6635_v34 = vpop.xlane.xlu1 %6634 }
0x2715   :  { %9603 = vrsqrt.f32 %v6658_v46  ;;  %v6652_v10 = vmul.f32 0.03125, %v6635_v34  ;;  %v13321_v34 = vld [vmem:[#allocation21_spill] sm:$0xff] }
0x2717   :  { %v6659_v13 = vadd.f32 1e-05, %v6652_v10 }
0x2718   :  { %v6638_v39 = vpop.xlane.xlu0 %6637 }
0x2719   :  { %9605 = vrsqrt.f32 %v6659_v13  ;;  %v6653_v24 = vmul.f32 0.03125, %v6638_v39 }
0x271b   :  { %v6660_v32 = vadd.f32 1e-05, %v6653_v24 }
0x271c   :  { %v6641_v53 = vpop.xlane.xlu1 %6640 }
0x271d   :  { %9607 = vrsqrt.f32 %v6660_v32  ;;  %v6654_v8 = vmul.f32 0.03125, %v6641_v53 }
0x271f   :  { %v9604_v1 = vpop.eup %9603  ;;  %v6661_v50 = vadd.f32 1e-05, %v6654_v8 }
0x2720   :  { %v6672_v6 = vmul.f32 %v9604_v1, %v6616_v33  ;;  %v6644_v26 = vpop.xlane.xlu0 %6643 }
0x2721   :  { %9609 = vrsqrt.f32 %v6661_v50  ;;  %v6655_v55 = vmul.f32 0.03125, %v6644_v26 }
0x2722   :  { %v6679_v2 = vmul.f32 %v6672_v6, %v13319_v5 }
0x2723   :  { %v9606_v18 = vpop.eup %9605  ;;  %v6662_v14 = vadd.f32 1e-05, %v6655_v55 }
0x2724   :  { %v6686_v58 = vadd.f32 %v6679_v2, %v13320_v42  ;;  %v6673_v49 = vmul.f32 %v9606_v18, %v6617_v9  ;;  %v6647_v36 = vpop.xlane.xlu1 %6646  ;;  %v9688_v9 = vld [vmem:[%s13192_s27 + $0x8] sm:$0xff] }
0x2725   :  { %9611 = vrsqrt.f32 %v6662_v14  ;;  %v6656_v43 = vmul.f32 0.03125, %v6647_v36 }
0x2726   :  { %v6693_v25 = vadd.f32 %v9687_v3, %v6686_v58  ;;  %v6680_v0 = vmul.f32 %v6673_v49, %v13319_v5 }
0x2727   :  { %v9608_v35 = vpop.eup %9607  ;;  %v6663_v47 = vadd.f32 1e-05, %v6656_v43 }
0x2728   :  { %v6674_v33 = vmul.f32 %v9608_v35, %v12869_v45  ;;  %8845 = vmatmul.mubr.msk.f32.vlgmr.msra.gmra.mrb[242].mxu1 %vm323_vm1, %v6693_v25  ;;  %v6650_v61 = vpop.xlane.xlu0 %6649  ;;  %v6687_v31 = vadd.f32 %v6680_v0, %v13320_v42 }
0x2729   :  { %9613 = vrsqrt.f32 %v6663_v47  ;;  %v6657_v44 = vmul.f32 0.03125, %v6650_v61  ;;  %8847 = vmatprep.mubr.msk.f32.mxu1 %vm9697_vm0, %v13217_v30 }
0x272a   :  { %v6694_v37 = vadd.f32 %v9688_v9, %v6687_v31  ;;  %v6681_v12 = vmul.f32 %v6674_v33, %v13319_v5 }
0x272b   :  { %v9610_v27 = vpop.eup %9609  ;;  %v6664_v52 = vadd.f32 1e-05, %v6657_v44 }
0x272c   :  { %v6675_v45 = vmul.f32 %v9610_v27, %v12874_v16  ;;  %8848 = vmatmul.mubr.msk.f32.gmra.mrb[244].mxu1 %vm323_vm1, %v6694_v37  ;;  %v6688_v48 = vadd.f32 %v6681_v12, %v13320_v42 }
0x272d   :  { %9615 = vrsqrt.f32 %v6664_v52  ;;  %8850 = vmatprep.mubr.msk.f32.mxu1 %vm9697_vm0, %v13217_v30 }
0x272e   :  { %v6695_v38 = vadd.f32 %v9689_v41, %v6688_v48  ;;  %v6682_v60 = vmul.f32 %v6675_v45, %v13319_v5 }
0x272f   :  { %v9612_v19 = vpop.eup %9611 }
0x2730   :  { %v6676_v7 = vmul.f32 %v9612_v19, %v12879_v15  ;;  %8851 = vmatmul.mubr.msk.f32.gmra.mrb[246].mxu1 %vm323_vm1, %v6695_v38  ;;  %v6689_v16 = vadd.f32 %v6682_v60, %v13320_v42 }
0x2731   :  { %8853 = vmatprep.mubr.msk.f32.mxu1 %vm9697_vm0, %v13217_v30 }
0x2732   :  { %v6696_v57 = vadd.f32 %v9690_v62, %v6689_v16  ;;  %v6683_v51 = vmul.f32 %v6676_v7, %v13319_v5 }
0x2733   :  { %v9614_v4 = vpop.eup %9613 }
0x2734   :  { %v6677_v29 = vmul.f32 %v9614_v4, %v12884_v28  ;;  %8854 = vmatmul.mubr.msk.f32.gmra.mrb[248].mxu1 %vm323_vm1, %v6696_v57  ;;  %v6690_v15 = vadd.f32 %v6683_v51, %v13320_v42 }
0x2735   :  { %8856 = vmatprep.mubr.msk.f32.mxu1 %vm9697_vm0, %v13217_v30 }
0x2736   :  { %v6697_v22 = vadd.f32 %v9691_v63, %v6690_v15  ;;  %v6684_v11 = vmul.f32 %v6677_v29, %v13319_v5 }
0x2737   :  { %v9616_v59 = vpop.eup %9615 }
0x2738   :  { %v6678_v54 = vmul.f32 %v9616_v59, %v12889_v40  ;;  %8857 = vmatmul.mubr.msk.f32.gmra.mrb[250].mxu1 %vm323_vm1, %v6697_v22  ;;  %v6691_v28 = vadd.f32 %v6684_v11, %v13320_v42  ;;  %v9693_v40 = vld [vmem:[%s13192_s27 + $0x30] sm:$0xff] }
0x2739   :  { %8859 = vmatprep.mubr.msk.f32.mxu1 %vm9697_vm0, %v13217_v30 }
0x273a   :  { %v6698_v20 = vadd.f32 %v9692_v21, %v6691_v28  ;;  %v6685_v17 = vmul.f32 %v6678_v54, %v13319_v5 }
0x273c   :  { %8860 = vmatmul.mubr.msk.f32.gmra.mrb[252].mxu1 %vm323_vm1, %v6698_v20  ;;  %v6692_v23 = vadd.f32 %v6685_v17, %v13320_v42 }
0x273d   :  { %8862 = vmatprep.mubr.msk.f32.mxu1 %vm9697_vm0, %v13217_v30 }
0x273e   :  { %v6699_v56 = vadd.f32 %v9693_v40, %v6692_v23 }
0x2740   :  { %8863 = vmatmul.mubr.msk.f32.gmra.mrb[254].mxu1 %vm323_vm1, %v6699_v56 }
0x27fb   :  { %v6787_v46 = vpop.f32.mrb[242].mxu1 }
0x27fc   :  { %v6788_v10 = vadd.f32 %v6787_v46, %v13321_v34  ;;  %v8846_v13 = vpop.f32.mrb[243].mxu1 }
0x27fe   :  { %v6821_v39 = vmul.f32 0.17677669, %v6788_v10 }
0x27ff   :  { %v6792_v24 = vpop.f32.mrb[244].mxu1 }
0x2800   :  { %v6793_v32 = vadd.f32 %v6792_v24, %v13321_v34  ;;  %v8849_v53 = vpop.f32.mrb[245].mxu1  ;;  %v6828_v8 = vsel %vm323_vm1, %v6821_v39, -inf }
0x2801   :  { %6829 = vmax.xlane.f32.xlu1 %v6828_v8 }
0x2802   :  { %v6822_v30 = vmul.f32 0.17677669, %v6793_v32 }
0x2803   :  { %v6797_v1 = vpop.f32.mrb[246].mxu1 }
0x2804   :  { %v6798_v50 = vadd.f32 %v6797_v1, %v13321_v34  ;;  %v8852_v6 = vpop.f32.mrb[247].mxu1  ;;  %v6831_v26 = vsel %vm323_vm1, %v6822_v30, -inf }
0x2805   :  { %6832 = vmax.xlane.f32.xlu0 %v6831_v26  ;;  %v13322_v26 = vld [vmem:[#allocation23_spill] sm:$0xff] }
0x2806   :  { %v6823_v55 = vmul.f32 0.17677669, %v6798_v50 }
0x2807   :  { %v6802_v5 = vpop.f32.mrb[248].mxu1 }
0x2808   :  { %v6803_v2 = vadd.f32 %v6802_v5, %v13321_v34  ;;  %v8855_v18 = vpop.f32.mrb[249].mxu1  ;;  %v6834_v14 = vsel %vm323_vm1, %v6823_v55, -inf }
0x2809   :  { %6835 = vmax.xlane.f32.xlu1 %v6834_v14 }
0x280a   :  { %v6824_v42 = vmul.f32 0.17677669, %v6803_v2 }
0x280b   :  { %v6807_v58 = vpop.f32.mrb[250].mxu1 }
0x280c   :  { %v6808_v49 = vadd.f32 %v6807_v58, %v13321_v34  ;;  %v8858_v36 = vpop.f32.mrb[251].mxu1  ;;  %v6837_v43 = vsel %vm323_vm1, %v6824_v42, -inf }
0x280d   :  { %6838 = vmax.xlane.f32.xlu0 %v6837_v43 }
0x280e   :  { %v6825_v3 = vmul.f32 0.17677669, %v6808_v49 }
0x280f   :  { %v6812_v25 = vpop.f32.mrb[252].mxu1 }
0x2810   :  { %v6813_v0 = vadd.f32 %v6812_v25, %v13321_v34  ;;  %v8861_v35 = vpop.f32.mrb[253].mxu1  ;;  %v6840_v47 = vsel %vm323_vm1, %v6825_v3, -inf }
0x2811   :  { %6841 = vmax.xlane.f32.xlu1 %v6840_v47 }
0x2812   :  { %v6826_v33 = vmul.f32 0.17677669, %v6813_v0 }
0x2813   :  { %v6817_v61 = vpop.f32.mrb[254].mxu1 }
0x2814   :  { %v6818_v31 = vadd.f32 %v6817_v61, %v13321_v34  ;;  %v8864_v44 = vpop.f32.mrb[255].mxu1  ;;  %v6843_v9 = vsel %vm323_vm1, %v6826_v33, -inf }
0x2815   :  { %6844 = vmax.xlane.f32.xlu0 %v6843_v9 }
0x2816   :  { %v6827_v37 = vmul.f32 0.17677669, %v6818_v31 }
0x2818   :  { %v6846_v12 = vsel %vm323_vm1, %v6827_v37, -inf }
0x2819   :  { %6847 = vmax.xlane.f32.xlu1 %v6846_v12 }
0x288e   :  { %v6830_v27 = vpop.xlane.xlu1 %6829 }
0x288f   :  { %v6849_v52 = vsub.f32 %v6821_v39, %v6830_v27 }
0x2891   :  { %v6856_v45 = vmul.f32 1.442695, %v6849_v52 }
0x2892   :  { %v6833_v48 = vpop.xlane.xlu0 %6832 }
0x2893   :  { %9617 = vpow2.f32 %v6856_v45  ;;  %v6850_v41 = vsub.f32 %v6822_v30, %v6833_v48 }
0x2895   :  { %v6858_v38 = vmul.f32 1.442695, %v6850_v41 }
0x2896   :  { %v6836_v60 = vpop.xlane.xlu1 %6835 }
0x2897   :  { %9619 = vpow2.f32 %v6858_v38  ;;  %v6851_v19 = vsub.f32 %v6823_v55, %v6836_v60 }
0x2899   :  { %v6860_v7 = vmul.f32 1.442695, %v6851_v19 }
0x289a   :  { %v6839_v16 = vpop.xlane.xlu0 %6838 }
0x289b   :  { %9621 = vpow2.f32 %v6860_v7  ;;  %v6852_v62 = vsub.f32 %v6824_v42, %v6839_v16 }
0x289d   :  { %v9618_v57 = vpop.eup %9617  ;;  %v6862_v51 = vmul.f32 1.442695, %v6852_v62 }
0x289e   :  { %v6842_v4 = vpop.xlane.xlu1 %6841  ;;  %v6870_v29 = vsel %vm323_vm1, %v9618_v57, 0.0 }
0x289f   :  { %9623 = vpow2.f32 %v6862_v51  ;;  %v6853_v15 = vsub.f32 %v6825_v3, %v6842_v4  ;;  %6871 = vadd.xlane.f32.xlu0 %v6870_v29 }
0x28a1   :  { %v9620_v63 = vpop.eup %9619  ;;  %v6864_v22 = vmul.f32 1.442695, %v6853_v15 }
0x28a2   :  { %v6845_v11 = vpop.xlane.xlu0 %6844  ;;  %v6873_v59 = vsel %vm323_vm1, %v9620_v63, 0.0 }
0x28a3   :  { %9625 = vpow2.f32 %v6864_v22  ;;  %v6854_v54 = vsub.f32 %v6826_v33, %v6845_v11  ;;  %6874 = vadd.xlane.f32.xlu1 %v6873_v59 }
0x28a5   :  { %v9622_v28 = vpop.eup %9621  ;;  %v6866_v21 = vmul.f32 1.442695, %v6854_v54 }
0x28a6   :  { %v6848_v20 = vpop.xlane.xlu1 %6847  ;;  %v6876_v17 = vsel %vm323_vm1, %v9622_v28, 0.0 }
0x28a7   :  { %9627 = vpow2.f32 %v6866_v21  ;;  %v6855_v23 = vsub.f32 %v6827_v37, %v6848_v20  ;;  %6877 = vadd.xlane.f32.xlu0 %v6876_v17 }
0x28a9   :  { %v9624_v40 = vpop.eup %9623  ;;  %v6868_v56 = vmul.f32 1.442695, %v6855_v23 }
0x28aa   :  { %v6879_v46 = vsel %vm323_vm1, %v9624_v40, 0.0 }
0x28ab   :  { %9629 = vpow2.f32 %v6868_v56  ;;  %6880 = vadd.xlane.f32.xlu1 %v6879_v46 }
0x28ad   :  { %v9626_v34 = vpop.eup %9625 }
0x28ae   :  { %v6882_v10 = vsel %vm323_vm1, %v9626_v34, 0.0 }
0x28af   :  { %6883 = vadd.xlane.f32.xlu0 %v6882_v10 }
0x28b1   :  { %v9628_v13 = vpop.eup %9627 }
0x28b2   :  { %v6885_v39 = vsel %vm323_vm1, %v9628_v13, 0.0 }
0x28b3   :  { %6886 = vadd.xlane.f32.xlu1 %v6885_v39 }
0x28b5   :  { %v9630_v24 = vpop.eup %9629 }
0x28b6   :  { %v6888_v32 = vsel %vm323_vm1, %v9630_v24, 0.0 }
0x28b7   :  { %6889 = vadd.xlane.f32.xlu0 %v6888_v32 }
0x292c   :  { %v6872_v53 = vpop.xlane.xlu0 %6871 }
0x292d   :  { %9631 = vrcp.f32 %v6872_v53 }
0x2930   :  { %v6875_v8 = vpop.xlane.xlu1 %6874 }
0x2931   :  { %9633 = vrcp.f32 %v6875_v8 }
0x2934   :  { %v6878_v30 = vpop.xlane.xlu0 %6877 }
0x2935   :  { %9635 = vrcp.f32 %v6878_v30 }
0x2937   :  { %v9632_v1 = vpop.eup %9631 }
0x2938   :  { %v6881_v50 = vpop.xlane.xlu1 %6880  ;;  %v6892_v6 = vmul.f32 %v9632_v1, %v9618_v57 }
0x2939   :  { %9637 = vrcp.f32 %v6881_v50 }
0x293a   :  { %v6905_v55 = vmul.f32 %v6892_v6, %v13322_v26 }
0x293b   :  { %v9634_v5 = vpop.eup %9633 }
0x293c   :  { %v6884_v2 = vpop.xlane.xlu0 %6883  ;;  %v6912_v18 = vsel %vm323_vm1, %v6905_v55, 0.0  ;;  %v6894_v14 = vmul.f32 %v9634_v5, %v9620_v63 }
0x293d   :  { %9639 = vrcp.f32 %v6884_v2  ;;  %6913 = vadd.xlane.f32.xlu1 %v6912_v18 }
0x293e   :  { %v6906_v42 = vmul.f32 %v6894_v14, %v13322_v26 }
0x293f   :  { %v9636_v58 = vpop.eup %9635 }
0x2940   :  { %v6887_v49 = vpop.xlane.xlu1 %6886  ;;  %v6915_v36 = vsel %vm323_vm1, %v6906_v42, 0.0  ;;  %v6896_v43 = vmul.f32 %v9636_v58, %v9622_v28 }
0x2941   :  { %9641 = vrcp.f32 %v6887_v49  ;;  %6916 = vadd.xlane.f32.xlu0 %v6915_v36 }
0x2942   :  { %v6907_v3 = vmul.f32 %v6896_v43, %v13322_v26 }
0x2943   :  { %v9638_v25 = vpop.eup %9637 }
0x2944   :  { %v6890_v0 = vpop.xlane.xlu0 %6889  ;;  %v6918_v35 = vsel %vm323_vm1, %v6907_v3, 0.0  ;;  %v6898_v47 = vmul.f32 %v9638_v25, %v9624_v40 }
0x2945   :  { %9643 = vrcp.f32 %v6890_v0  ;;  %6919 = vadd.xlane.f32.xlu1 %v6918_v35 }
0x2946   :  { %v6908_v33 = vmul.f32 %v6898_v47, %v13322_v26 }
0x2947   :  { %v9640_v61 = vpop.eup %9639 }
0x2948   :  { %v6921_v31 = vsel %vm323_vm1, %v6908_v33, 0.0  ;;  %v6900_v44 = vmul.f32 %v9640_v61, %v9626_v34  ;;  %v9694_v61 = vld [vmem:[%s13077_s18] ss:$0 sm:$0xff] }
0x2949   :  { %6922 = vadd.xlane.f32.xlu0 %v6921_v31 }
0x294a   :  { %v6909_v9 = vmul.f32 %v6900_v44, %v13322_v26 }
0x294b   :  { %v9642_v37 = vpop.eup %9641 }
0x294c   :  { %v6924_v12 = vsel %vm323_vm1, %v6909_v9, 0.0  ;;  %v6902_v27 = vmul.f32 %v9642_v37, %v9628_v13  ;;  %v9695_v37 = vld [vmem:[%s13078_s19] ss:$0 sm:$0xff] }
0x294d   :  { %6925 = vadd.xlane.f32.xlu1 %v6924_v12 }
0x294e   :  { %v6910_v52 = vmul.f32 %v6902_v27, %v13322_v26 }
0x294f   :  { %v9644_v45 = vpop.eup %9643 }
0x2950   :  { %v6927_v48 = vsel %vm323_vm1, %v6910_v52, 0.0  ;;  %v6904_v41 = vmul.f32 %v9644_v45, %v9630_v24 }
0x2951   :  { %6928 = vadd.xlane.f32.xlu0 %v6927_v48 }
0x2952   :  { %v6911_v38 = vmul.f32 %v6904_v41, %v13322_v26 }
0x2954   :  { %v6930_v60 = vsel %vm323_vm1, %v6911_v38, 0.0 }
0x2955   :  { %6931 = vadd.xlane.f32.xlu1 %v6930_v60 }
0x29ca   :  { %v6914_v19 = vpop.xlane.xlu1 %6913 }
0x29cb   :  { %v6933_v7 = vmul.f32 0.03125, %v6914_v19 }
0x29cd   :  { %v6940_v16 = vsub.f32 %v6905_v55, %v6933_v7 }
0x29ce   :  { %v6917_v62 = vpop.xlane.xlu0 %6916 }
0x29cf   :  { %v6934_v57 = vmul.f32 0.03125, %v6917_v62  ;;  %v6947_v51 = vmul.f32 %v6940_v16, %v6940_v16 }
0x29d1   :  { %v6941_v4 = vsub.f32 %v6906_v42, %v6934_v57  ;;  %v6954_v29 = vsel %vm323_vm1, %v6947_v51, 0.0 }
0x29d2   :  { %6955 = vadd.xlane.f32.xlu0 %v6954_v29  ;;  %v6920_v15 = vpop.xlane.xlu1 %6919 }
0x29d3   :  { %v6935_v63 = vmul.f32 0.03125, %v6920_v15  ;;  %v6948_v22 = vmul.f32 %v6941_v4, %v6941_v4 }
0x29d5   :  { %v12990_v11 = vsub.f32 %v6907_v3, %v6935_v63  ;;  %v6957_v59 = vsel %vm323_vm1, %v6948_v22, 0.0 }
0x29d6   :  { %6958 = vadd.xlane.f32.xlu1 %v6957_v59  ;;  %v6923_v54 = vpop.xlane.xlu0 %6922 }
0x29d7   :  { %v6936_v28 = vmul.f32 0.03125, %v6923_v54  ;;  %v6949_v21 = vmul.f32 %v12990_v11, %v12990_v11 }
0x29d9   :  { %v12995_v20 = vsub.f32 %v6908_v33, %v6936_v28  ;;  %v6960_v17 = vsel %vm323_vm1, %v6949_v21, 0.0 }
0x29da   :  { %6961 = vadd.xlane.f32.xlu0 %v6960_v17  ;;  %v6926_v23 = vpop.xlane.xlu1 %6925 }
0x29db   :  { %v6937_v40 = vmul.f32 0.03125, %v6926_v23  ;;  %v6950_v56 = vmul.f32 %v12995_v20, %v12995_v20 }
0x29dd   :  { %v13000_v46 = vsub.f32 %v6909_v9, %v6937_v40  ;;  %v6963_v34 = vsel %vm323_vm1, %v6950_v56, 0.0 }
0x29de   :  { %6964 = vadd.xlane.f32.xlu1 %v6963_v34  ;;  %v6929_v10 = vpop.xlane.xlu0 %6928 }
0x29df   :  { %v6938_v13 = vmul.f32 0.03125, %v6929_v10  ;;  %v6951_v39 = vmul.f32 %v13000_v46, %v13000_v46 }
0x29e1   :  { %v13005_v24 = vsub.f32 %v6910_v52, %v6938_v13  ;;  %v6966_v32 = vsel %vm323_vm1, %v6951_v39, 0.0 }
0x29e2   :  { %6967 = vadd.xlane.f32.xlu0 %v6966_v32  ;;  %v6932_v53 = vpop.xlane.xlu1 %6931 }
0x29e3   :  { %v6939_v8 = vmul.f32 0.03125, %v6932_v53  ;;  %v6952_v30 = vmul.f32 %v13005_v24, %v13005_v24 }
0x29e5   :  { %v13010_v1 = vsub.f32 %v6911_v38, %v6939_v8  ;;  %v6969_v50 = vsel %vm323_vm1, %v6952_v30, 0.0 }
0x29e6   :  { %6970 = vadd.xlane.f32.xlu1 %v6969_v50 }
0x29e7   :  { %v6953_v6 = vmul.f32 %v13010_v1, %v13010_v1 }
0x29e9   :  { %v6972_v26 = vsel %vm323_vm1, %v6953_v6, 0.0 }
0x29ea   :  { %6973 = vadd.xlane.f32.xlu0 %v6972_v26 }
0x2a5f   :  { %v6956_v55 = vpop.xlane.xlu0 %6955 }
0x2a60   :  { %v6975_v5 = vmul.f32 0.03125, %v6956_v55 }
0x2a62   :  { %v6982_v2 = vadd.f32 1e-05, %v6975_v5 }
0x2a63   :  { %v6959_v18 = vpop.xlane.xlu1 %6958 }
0x2a64   :  { %9645 = vrsqrt.f32 %v6982_v2  ;;  %v6976_v14 = vmul.f32 0.03125, %v6959_v18 }
0x2a66   :  { %v6983_v42 = vadd.f32 1e-05, %v6976_v14 }
0x2a67   :  { %v6962_v58 = vpop.xlane.xlu0 %6961 }
0x2a68   :  { %9647 = vrsqrt.f32 %v6983_v42  ;;  %v6977_v49 = vmul.f32 0.03125, %v6962_v58 }
0x2a6a   :  { %v6984_v36 = vadd.f32 1e-05, %v6977_v49 }
0x2a6b   :  { %v6965_v43 = vpop.xlane.xlu1 %6964 }
0x2a6c   :  { %9649 = vrsqrt.f32 %v6984_v36  ;;  %v6978_v3 = vmul.f32 0.03125, %v6965_v43 }
0x2a6e   :  { %v9646_v25 = vpop.eup %9645  ;;  %v6985_v0 = vadd.f32 1e-05, %v6978_v3 }
0x2a6f   :  { %v6996_v35 = vmul.f32 %v9646_v25, %v6940_v16  ;;  %v6968_v47 = vpop.xlane.xlu0 %6967 }
0x2a70   :  { %9651 = vrsqrt.f32 %v6985_v0  ;;  %v6979_v33 = vmul.f32 0.03125, %v6968_v47 }
0x2a71   :  { %v7003_v31 = vmul.f32 %v9694_v61, %v6996_v35 }
0x2a72   :  { %v9648_v44 = vpop.eup %9647  ;;  %v6986_v9 = vadd.f32 1e-05, %v6979_v33 }
0x2a73   :  { %v7010_v12 = vadd.f32 %v9695_v37, %v7003_v31  ;;  %v6997_v27 = vmul.f32 %v9648_v44, %v6941_v4  ;;  %v6971_v52 = vpop.xlane.xlu1 %6970 }
0x2a74   :  { %9653 = vrsqrt.f32 %v6986_v9  ;;  %v6980_v45 = vmul.f32 0.03125, %v6971_v52 }
0x2a75   :  { %7286 = vst.msk [vmem:[%s13079_s26 + $0x38] sm:$0xff] %vm323_vm1, %v7010_v12  ;;  %v7004_v48 = vmul.f32 %v9694_v61, %v6997_v27 }
0x2a76   :  { %v9650_v41 = vpop.eup %9649  ;;  %v6987_v38 = vadd.f32 1e-05, %v6980_v45 }
0x2a77   :  { %v7011_v60 = vadd.f32 %v9695_v37, %v7004_v48  ;;  %v6998_v19 = vmul.f32 %v9650_v41, %v12990_v11  ;;  %v6974_v7 = vpop.xlane.xlu0 %6973 }
0x2a78   :  { %9655 = vrsqrt.f32 %v6987_v38  ;;  %v6981_v16 = vmul.f32 0.03125, %v6974_v7 }
0x2a79   :  { %7287 = vst.msk [vmem:[%s13079_s26 + $0x40] sm:$0xff] %vm323_vm1, %v7011_v60  ;;  %v7005_v62 = vmul.f32 %v9694_v61, %v6998_v19 }
0x2a7a   :  { %v9652_v57 = vpop.eup %9651  ;;  %v6988_v51 = vadd.f32 1e-05, %v6981_v16 }
0x2a7b   :  { %v7012_v4 = vadd.f32 %v9695_v37, %v7005_v62  ;;  %v6999_v29 = vmul.f32 %v9652_v57, %v12995_v20 }
0x2a7c   :  { %9657 = vrsqrt.f32 %v6988_v51 }
0x2a7d   :  { %7288 = vst.msk [vmem:[%s13079_s26 + $0x48] sm:$0xff] %vm323_vm1, %v7012_v4  ;;  %v7006_v15 = vmul.f32 %v9694_v61, %v6999_v29 }
0x2a7e   :  { %v9654_v63 = vpop.eup %9653 }
0x2a7f   :  { %v7013_v22 = vadd.f32 %v9695_v37, %v7006_v15  ;;  %v7000_v11 = vmul.f32 %v9654_v63, %v13000_v46 }
0x2a81   :  { %7289 = vst.msk [vmem:[%s13079_s26 + $0x50] sm:$0xff] %vm323_vm1, %v7013_v22  ;;  %v7007_v59 = vmul.f32 %v9694_v61, %v7000_v11 }
0x2a82   :  { %v9656_v54 = vpop.eup %9655 }
0x2a83   :  { %v7014_v28 = vadd.f32 %v9695_v37, %v7007_v59  ;;  %v7001_v21 = vmul.f32 %v9656_v54, %v13005_v24 }
0x2a85   :  { %7290 = vst.msk [vmem:[%s13079_s26 + $0x58] sm:$0xff] %vm323_vm1, %v7014_v28  ;;  %v7008_v20 = vmul.f32 %v9694_v61, %v7001_v21 }
0x2a86   :  { %v9658_v17 = vpop.eup %9657 }
0x2a87   :  { %v7015_v23 = vadd.f32 %v9695_v37, %v7008_v20  ;;  %v7002_v40 = vmul.f32 %v9658_v17, %v13010_v1 }
0x2a89   :  { %7291 = vst.msk [vmem:[%s13079_s26 + $0x60] sm:$0xff] %vm323_vm1, %v7015_v23  ;;  %v7009_v56 = vmul.f32 %v9694_v61, %v7002_v40 }
0x2a8b   :  { %v7016_v46 = vadd.f32 %v9695_v37, %v7009_v56 }
0x2a8d   :  { %7292 = vst.msk [vmem:[%s13079_s26 + $0x68] sm:$0xff] %vm323_vm1, %v7016_v46 }

</bundles_post_ra>
